<compile_context>
chip_gen: v7x
topology: tpu7x:2x2x1
jax: 0.10.0
libtpu: 0.0.40
codegen_flags: <defaults>
</compile_context>

<pallas_src>
import jax
import jax.numpy as jnp
from jax.experimental import pallas as pl
from jax.experimental.pallas import tpu as pltpu

F32 = jnp.float32

# ----------------------------- config (small, shape-consistent) -----------------------------
B, S = 2, 8                  # batch, sequence length
D_MODEL = 32                 # dim_model
N_HEADS = 4                  # num_heads
DIM_K = DIM_V = D_MODEL // N_HEADS
HDK = N_HEADS * DIM_K        # 32
HDV = N_HEADS * DIM_V        # 32
D_FF = 64                    # dim_feedforward
N_ENC_LAYERS = 2
N_DEC_LAYERS = 2
LN_EPS = 1e-5
BS = B * S

_VMEM = pl.BlockSpec(memory_space=pltpu.MemorySpace.VMEM)


# ----------------------------- in-kernel building blocks (traced helpers) -----------------------------
def _linear(x, w, b, relu=False):
    y = jnp.dot(x, w, preferred_element_type=F32) + b
    if relu:
        y = jnp.maximum(y, 0.0)
    return y


def _add_layernorm(sub, res, gamma, beta):
    """Residual.forward: norm(residual + dropout(sub)); dropout == identity (eval)."""
    z = sub + res
    mean = jnp.mean(z, axis=-1, keepdims=True)
    c = z - mean
    var = jnp.mean(c * c, axis=-1, keepdims=True)          # biased variance (PyTorch LayerNorm)
    return c * jax.lax.rsqrt(var + LN_EPS) * gamma + beta


def _mha(q_in, k_in, v_in, wqkv, bqkv, wo, bo):
    """MultiHeadAttention on 2-D (B*S, D) slabs, fully in VMEM/vregs.

    wqkv: (D, 3*HDK) = [Wq | Wk | Wv]; bqkv: (1, 3*HDK); wo: (HDV, D); bo: (1, D).
    Heads live in the lane axis (static slices). The head-concat + output linear is fused
    as an accumulation of per-head (S, dv) @ (dv, D) matmuls — no concat, no transposes.
    """
    if (q_in is k_in) and (k_in is v_in):                     # self-attention: fused QKV matmul
        qkv = jnp.dot(q_in, wqkv, preferred_element_type=F32) + bqkv
        q = qkv[:, :HDK]
        k = qkv[:, HDK:2 * HDK]
        v = qkv[:, 2 * HDK:]
    elif q_in is k_in:                                        # cross-attention: fused QK matmul
        qk = jnp.dot(q_in, wqkv[:, :2 * HDK], preferred_element_type=F32) + bqkv[:, :2 * HDK]
        q = qk[:, :HDK]
        k = qk[:, HDK:]
        v = jnp.dot(v_in, wqkv[:, 2 * HDK:], preferred_element_type=F32) + bqkv[:, 2 * HDK:]
    else:                                                     # fully general (not hit by this model)
        q = jnp.dot(q_in, wqkv[:, :HDK], preferred_element_type=F32) + bqkv[:, :HDK]
        k = jnp.dot(k_in, wqkv[:, HDK:2 * HDK], preferred_element_type=F32) + bqkv[:, HDK:2 * HDK]
        v = jnp.dot(v_in, wqkv[:, 2 * HDK:], preferred_element_type=F32) + bqkv[:, 2 * HDK:]

    inv_scale = 1.0 / (float(DIM_K) ** 0.5)
    row_blocks = []
    for b in range(B):                                        # static unroll: all slices static
        r0, r1 = b * S, (b + 1) * S
        acc = None
        for h in range(N_HEADS):
            ck0, ck1 = h * DIM_K, (h + 1) * DIM_K
            cv0, cv1 = h * DIM_V, (h + 1) * DIM_V
            qh = q[r0:r1, ck0:ck1]                            # (S, dk)
            kh = k[r0:r1, ck0:ck1]                            # (S, dk)
            vh = v[r0:r1, cv0:cv1]                            # (S, dv)
            s = jax.lax.dot_general(qh, kh, (((1,), (1,)), ((), ())),
                                    preferred_element_type=F32) * inv_scale
            s = s - jnp.max(s, axis=-1, keepdims=True)
            p = jnp.exp(s)
            p = p * pl.reciprocal(jnp.sum(p, axis=-1, keepdims=True), approx=True)
            o = jnp.dot(p, vh, preferred_element_type=F32)    # (S, dv)
            # fused "concat heads -> output Linear": per-head contribution to (S, D)
            contrib = jnp.dot(o, wo[cv0:cv1, :], preferred_element_type=F32)
            acc = contrib if acc is None else acc + contrib
        row_blocks.append(acc + bo)
    return jnp.concatenate(row_blocks, axis=0)                # (B*S, D), tile-aligned sublane concat


# ----------------------------- the single fused kernel -----------------------------
def _transformer_kernel(*refs):
    (src_ref, tgt_ref, pe_ref,
     e_wqkv, e_bqkv, e_wo, e_bo, e_g1, e_b1,
     e_w1, e_c1, e_w2, e_c2, e_g2, e_b2,
     d_wqkv1, d_bqkv1, d_wo1, d_bo1, d_g1, d_b1,
     d_wqkv2, d_bqkv2, d_wo2, d_bo2, d_g2, d_b2,
     d_w1, d_c1, d_w2, d_c2, d_g3, d_b3,
     wf_ref, bf_ref, out_ref) = refs

    pe = pe_ref[...]                                          # (B*S, D) position encoding

    # -------- encoder --------
    x = src_ref[...] + pe
    for l in range(N_ENC_LAYERS):
        a = _mha(x, x, x, e_wqkv[l], e_bqkv[l], e_wo[l], e_bo[l])
        x = _add_layernorm(a, x, e_g1[l], e_b1[l])
        h = _linear(x, e_w1[l], e_c1[l], relu=True)
        ff = _linear(h, e_w2[l], e_c2[l])
        x = _add_layernorm(ff, x, e_g2[l], e_b2[l])
    memory = x

    # -------- decoder --------
    t = tgt_ref[...] + pe
    for l in range(N_DEC_LAYERS):
        a1 = _mha(t, t, t, d_wqkv1[l], d_bqkv1[l], d_wo1[l], d_bo1[l])
        t = _add_layernorm(a1, t, d_g1[l], d_b1[l])
        # Faithful to the reference module: attention_2(memory, memory, tgt)
        # -> query = key = memory, value = tgt, residual adds tgt.
        a2 = _mha(memory, memory, t, d_wqkv2[l], d_bqkv2[l], d_wo2[l], d_bo2[l])
        t = _add_layernorm(a2, t, d_g2[l], d_b2[l])
        h = _linear(t, d_w1[l], d_c1[l], relu=True)
        ff = _linear(h, d_w2[l], d_c2[l])
        t = _add_layernorm(ff, t, d_g3[l], d_b3[l])

    # final Linear + softmax (exact reciprocal to keep rows summing to 1 tightly)
    logits = _linear(t, wf_ref[...], bf_ref[...])
    z = logits - jnp.max(logits, axis=-1, keepdims=True)
    e = jnp.exp(z)
    out_ref[...] = e / jnp.sum(e, axis=-1, keepdims=True)


# ----------------------------- model glue (plain JAX, one pallas_call) -----------------------------
def position_encoding(seq_len, dim_model):
    # Faithful to the module's (buggy) formula: phase = (pos/1e4) ** floor(dim/dim_model)
    pos = jnp.arange(seq_len, dtype=F32).reshape(1, seq_len, 1)
    dim = jnp.arange(dim_model, dtype=F32).reshape(1, 1, dim_model)
    tpp = pos / 10000.0
    dml = (jnp.arange(dim_model).reshape(1, 1, dim_model) % 2) == 0
    phase = tpp ** jnp.floor(dim / float(dim_model))
    return jnp.where(dml, jnp.sin(phase), jnp.cos(phase))     # (1, S, D)


def _flatten_params(params):
    e = params["encoder"]
    d = params["decoder"]
    return (
        e["wqkv"], e["bqkv"], e["wo"], e["bo"], e["g1"], e["b1"],
        e["w1"], e["c1"], e["w2"], e["c2"], e["g2"], e["b2"],
        d["wqkv1"], d["bqkv1"], d["wo1"], d["bo1"], d["g1"], d["b1"],
        d["wqkv2"], d["bqkv2"], d["wo2"], d["bo2"], d["g2"], d["b2"],
        d["w1"], d["c1"], d["w2"], d["c2"], d["g3"], d["b3"],
        d["wf"], d["bf"],
    )


def transformer_forward(params, src, tgt):
    b, s, d = src.shape
    pe = position_encoding(s, d)                              # constant-folded under jit
    pe2d = jnp.broadcast_to(pe, (b, s, d)).reshape(b * s, d)
    flat = _flatten_params(params)
    out2d = pl.pallas_call(
        _transformer_kernel,
        out_shape=jax.ShapeDtypeStruct((b * s, d), F32),
        in_specs=[_VMEM] * (3 + len(flat)),
        out_specs=_VMEM,
    )(src.reshape(b * s, d), tgt.reshape(b * s, d), pe2d, *flat)
    return out2d.reshape(b, s, d)


# ----------------------------- deterministic parameter init (stacked per layer) -----------------------------
def init_params(key):
    keys = iter(jax.random.split(key, 32))

    def u(shape, fan_in):
        bound = 1.0 / (fan_in ** 0.5)
        return jax.random.uniform(next(keys), shape, F32, -bound, bound)

    def ones(L):
        return jnp.ones((L, 1, D_MODEL), F32)

    def zeros(L):
        return jnp.zeros((L, 1, D_MODEL), F32)

    Le, Ld = N_ENC_LAYERS, N_DEC_LAYERS
    enc = dict(
        wqkv=u((Le, D_MODEL, 3 * HDK), D_MODEL), bqkv=u((Le, 1, 3 * HDK), D_MODEL),
        wo=u((Le, HDV, D_MODEL), HDV), bo=u((Le, 1, D_MODEL), HDV),
        g1=ones(Le), b1=zeros(Le),
        w1=u((Le, D_MODEL, D_FF), D_MODEL), c1=u((Le, 1, D_FF), D_MODEL),
        w2=u((Le, D_FF, D_MODEL), D_FF), c2=u((Le, 1, D_MODEL), D_FF),
        g2=ones(Le), b2=zeros(Le),
    )
    dec = dict(
        wqkv1=u((Ld, D_MODEL, 3 * HDK), D_MODEL), bqkv1=u((Ld, 1, 3 * HDK), D_MODEL),
        wo1=u((Ld, HDV, D_MODEL), HDV), bo1=u((Ld, 1, D_MODEL), HDV),
        g1=ones(Ld), b1=zeros(Ld),
        wqkv2=u((Ld, D_MODEL, 3 * HDK), D_MODEL), bqkv2=u((Ld, 1, 3 * HDK), D_MODEL),
        wo2=u((Ld, HDV, D_MODEL), HDV), bo2=u((Ld, 1, D_MODEL), HDV),
        g2=ones(Ld), b2=zeros(Ld),
        w1=u((Ld, D_MODEL, D_FF), D_MODEL), c1=u((Ld, 1, D_FF), D_MODEL),
        w2=u((Ld, D_FF, D_MODEL), D_FF), c2=u((Ld, 1, D_MODEL), D_FF),
        g3=ones(Ld), b3=zeros(Ld),
        wf=u((D_MODEL, D_MODEL), D_MODEL), bf=u((1, D_MODEL), D_MODEL),
    )
    return dict(encoder=enc, decoder=dec)
# TODO(synk): nn.Dropout(p=0.1) is modeled as identity (eval mode); training-time RNG dropout not implemented.


if __name__ == "__main__":
    root = jax.random.PRNGKey(0)
    kp, ks, kt = jax.random.split(root, 3)
    params = init_params(kp)
    src = jax.random.normal(ks, (B, S, D_MODEL), F32)
    tgt = jax.random.normal(kt, (B, S, D_MODEL), F32)

    fwd = jax.jit(transformer_forward)
    out = jax.block_until_ready(fwd(params, src, tgt))

    assert out.shape == (B, S, D_MODEL)
    # decoder output is a softmax over the last dim -> rows sum to 1
    assert bool(jnp.allclose(jnp.sum(out, axis=-1), 1.0, atol=1e-4))
    assert bool(jnp.all(jnp.isfinite(out)))
    print("KERNEL_OK")
</pallas_src>

<mosaic_0001>
module attributes {stable_mosaic.version = 11 : i64} {
  func.func @_transformer_kernel(%arg0: memref<16x32xf32, #tpu.memory_space<vmem>>, %arg1: memref<16x32xf32, #tpu.memory_space<vmem>>, %arg2: memref<16x32xf32, #tpu.memory_space<vmem>>, %arg3: memref<2x32x96xf32, #tpu.memory_space<vmem>>, %arg4: memref<2x1x96xf32, #tpu.memory_space<vmem>>, %arg5: memref<2x32x32xf32, #tpu.memory_space<vmem>>, %arg6: memref<2x1x32xf32, #tpu.memory_space<vmem>>, %arg7: memref<2x1x32xf32, #tpu.memory_space<vmem>>, %arg8: memref<2x1x32xf32, #tpu.memory_space<vmem>>, %arg9: memref<2x32x64xf32, #tpu.memory_space<vmem>>, %arg10: memref<2x1x64xf32, #tpu.memory_space<vmem>>, %arg11: memref<2x64x32xf32, #tpu.memory_space<vmem>>, %arg12: memref<2x1x32xf32, #tpu.memory_space<vmem>>, %arg13: memref<2x1x32xf32, #tpu.memory_space<vmem>>, %arg14: memref<2x1x32xf32, #tpu.memory_space<vmem>>, %arg15: memref<2x32x96xf32, #tpu.memory_space<vmem>>, %arg16: memref<2x1x96xf32, #tpu.memory_space<vmem>>, %arg17: memref<2x32x32xf32, #tpu.memory_space<vmem>>, %arg18: memref<2x1x32xf32, #tpu.memory_space<vmem>>, %arg19: memref<2x1x32xf32, #tpu.memory_space<vmem>>, %arg20: memref<2x1x32xf32, #tpu.memory_space<vmem>>, %arg21: memref<2x32x96xf32, #tpu.memory_space<vmem>>, %arg22: memref<2x1x96xf32, #tpu.memory_space<vmem>>, %arg23: memref<2x32x32xf32, #tpu.memory_space<vmem>>, %arg24: memref<2x1x32xf32, #tpu.memory_space<vmem>>, %arg25: memref<2x1x32xf32, #tpu.memory_space<vmem>>, %arg26: memref<2x1x32xf32, #tpu.memory_space<vmem>>, %arg27: memref<2x32x64xf32, #tpu.memory_space<vmem>>, %arg28: memref<2x1x64xf32, #tpu.memory_space<vmem>>, %arg29: memref<2x64x32xf32, #tpu.memory_space<vmem>>, %arg30: memref<2x1x32xf32, #tpu.memory_space<vmem>>, %arg31: memref<2x1x32xf32, #tpu.memory_space<vmem>>, %arg32: memref<2x1x32xf32, #tpu.memory_space<vmem>>, %arg33: memref<32x32xf32, #tpu.memory_space<vmem>>, %arg34: memref<1x32xf32, #tpu.memory_space<vmem>>, %arg35: memref<16x32xf32, #tpu.memory_space<vmem>>) attributes {dimension_semantics = [], scalar_prefetch = 0 : i64, scratch_operands = 0 : i64, tpu.core_type = #tpu.core_type<tc>} {
    %c0 = arith.constant 0 : index
    %c0_0 = arith.constant 0 : index
    %0 = vector.load %arg2[%c0, %c0_0] : memref<16x32xf32, #tpu.memory_space<vmem>>, vector<16x32xf32>
    %c0_1 = arith.constant 0 : index
    %c0_2 = arith.constant 0 : index
    %1 = vector.load %arg0[%c0_1, %c0_2] : memref<16x32xf32, #tpu.memory_space<vmem>>, vector<16x32xf32>
    %2 = arith.addf %1, %0 : vector<16x32xf32>
    %c0_3 = arith.constant 0 : index
    %c0_4 = arith.constant 0 : index
    %c0_5 = arith.constant 0 : index
    %3 = vector.load %arg3[%c0_3, %c0_4, %c0_5] : memref<2x32x96xf32, #tpu.memory_space<vmem>>, vector<1x32x96xf32>
    %4 = vector.shape_cast %3 : vector<1x32x96xf32> to vector<32x96xf32>
    %c0_6 = arith.constant 0 : index
    %c0_7 = arith.constant 0 : index
    %c0_8 = arith.constant 0 : index
    %5 = vector.load %arg4[%c0_6, %c0_7, %c0_8] : memref<2x1x96xf32, #tpu.memory_space<vmem>>, vector<1x1x96xf32>
    %6 = vector.shape_cast %5 : vector<1x1x96xf32> to vector<1x96xf32>
    %c0_9 = arith.constant 0 : index
    %c0_10 = arith.constant 0 : index
    %c0_11 = arith.constant 0 : index
    %7 = vector.load %arg5[%c0_9, %c0_10, %c0_11] : memref<2x32x32xf32, #tpu.memory_space<vmem>>, vector<1x32x32xf32>
    %8 = vector.shape_cast %7 : vector<1x32x32xf32> to vector<32x32xf32>
    %c0_12 = arith.constant 0 : index
    %c0_13 = arith.constant 0 : index
    %c0_14 = arith.constant 0 : index
    %9 = vector.load %arg6[%c0_12, %c0_13, %c0_14] : memref<2x1x32xf32, #tpu.memory_space<vmem>>, vector<1x1x32xf32>
    %10 = vector.shape_cast %9 : vector<1x1x32xf32> to vector<1x32xf32>
    %cst = arith.constant dense<0.000000e+00> : vector<16x96xf32>
    %11 = tpu.matmul %2, %4, %cst {dimension_numbers = #tpu.dot_dimension_numbers<[1], [0], [0], [1], [0, 0, 1, 1], [], []>} : vector<16x32xf32>, vector<32x96xf32>, vector<16x96xf32> -> vector<16x96xf32>
    %12 = vector.broadcast %6 : vector<1x96xf32> to vector<16x96xf32>
    %13 = arith.addf %11, %12 : vector<16x96xf32>
    %14 = vector.extract_strided_slice %13 {offsets = [0, 0], sizes = [16, 32], strides = [1, 1]} : vector<16x96xf32> to vector<16x32xf32>
    %15 = vector.extract_strided_slice %13 {offsets = [0, 32], sizes = [16, 32], strides = [1, 1]} : vector<16x96xf32> to vector<16x32xf32>
    %16 = vector.extract_strided_slice %13 {offsets = [0, 64], sizes = [16, 32], strides = [1, 1]} : vector<16x96xf32> to vector<16x32xf32>
    %17 = vector.extract_strided_slice %14 {offsets = [0, 0], sizes = [8, 8], strides = [1, 1]} : vector<16x32xf32> to vector<8x8xf32>
    %18 = vector.extract_strided_slice %15 {offsets = [0, 0], sizes = [8, 8], strides = [1, 1]} : vector<16x32xf32> to vector<8x8xf32>
    %19 = vector.extract_strided_slice %16 {offsets = [0, 0], sizes = [8, 8], strides = [1, 1]} : vector<16x32xf32> to vector<8x8xf32>
    %cst_15 = arith.constant dense<0.000000e+00> : vector<8x8xf32>
    %20 = tpu.matmul %17, %18, %cst_15 {dimension_numbers = #tpu.dot_dimension_numbers<[1], [1], [0], [0], [0, 0, 1, 0], [], []>} : vector<8x8xf32>, vector<8x8xf32>, vector<8x8xf32> -> vector<8x8xf32>
    %cst_16 = arith.constant 0.353553385 : f32
    %21 = vector.broadcast %cst_16 : f32 to vector<8x8xf32>
    %22 = arith.mulf %20, %21 : vector<8x8xf32>
    %cst_17 = arith.constant dense<0xFF800000> : vector<8xf32>
    %23 = vector.multi_reduction <maximumf>, %22, %cst_17 [1] : vector<8x8xf32> to vector<8xf32>
    %24 = vector.shape_cast %23 : vector<8xf32> to vector<8x1xf32>
    %25 = vector.broadcast %24 : vector<8x1xf32> to vector<8x8xf32>
    %26 = arith.subf %22, %25 : vector<8x8xf32>
    %27 = math.exp %26 : vector<8x8xf32>
    %cst_18 = arith.constant dense<0.000000e+00> : vector<8xf32>
    %28 = vector.multi_reduction <add>, %27, %cst_18 [1] : vector<8x8xf32> to vector<8xf32>
    %29 = vector.shape_cast %28 : vector<8xf32> to vector<8x1xf32>
    %30 = tpu.reciprocal %29 {approx = true} : vector<8x1xf32> -> vector<8x1xf32>
    %31 = vector.broadcast %30 : vector<8x1xf32> to vector<8x8xf32>
    %32 = arith.mulf %27, %31 : vector<8x8xf32>
    %cst_19 = arith.constant dense<0.000000e+00> : vector<8x8xf32>
    %33 = tpu.matmul %32, %19, %cst_19 {dimension_numbers = #tpu.dot_dimension_numbers<[1], [0], [0], [1], [0, 0, 1, 1], [], []>} : vector<8x8xf32>, vector<8x8xf32>, vector<8x8xf32> -> vector<8x8xf32>
    %34 = vector.extract_strided_slice %8 {offsets = [0, 0], sizes = [8, 32], strides = [1, 1]} : vector<32x32xf32> to vector<8x32xf32>
    %cst_20 = arith.constant dense<0.000000e+00> : vector<8x32xf32>
    %35 = tpu.matmul %33, %34, %cst_20 {dimension_numbers = #tpu.dot_dimension_numbers<[1], [0], [0], [1], [0, 0, 1, 1], [], []>} : vector<8x8xf32>, vector<8x32xf32>, vector<8x32xf32> -> vector<8x32xf32>
    %36 = vector.extract_strided_slice %14 {offsets = [0, 8], sizes = [8, 8], strides = [1, 1]} : vector<16x32xf32> to vector<8x8xf32>
    %37 = vector.extract_strided_slice %15 {offsets = [0, 8], sizes = [8, 8], strides = [1, 1]} : vector<16x32xf32> to vector<8x8xf32>
    %38 = vector.extract_strided_slice %16 {offsets = [0, 8], sizes = [8, 8], strides = [1, 1]} : vector<16x32xf32> to vector<8x8xf32>
    %cst_21 = arith.constant dense<0.000000e+00> : vector<8x8xf32>
    %39 = tpu.matmul %36, %37, %cst_21 {dimension_numbers = #tpu.dot_dimension_numbers<[1], [1], [0], [0], [0, 0, 1, 0], [], []>} : vector<8x8xf32>, vector<8x8xf32>, vector<8x8xf32> -> vector<8x8xf32>
    %cst_22 = arith.constant 0.353553385 : f32
    %40 = vector.broadcast %cst_22 : f32 to vector<8x8xf32>
    %41 = arith.mulf %39, %40 : vector<8x8xf32>
    %cst_23 = arith.constant dense<0xFF800000> : vector<8xf32>
    %42 = vector.multi_reduction <maximumf>, %41, %cst_23 [1] : vector<8x8xf32> to vector<8xf32>
    %43 = vector.shape_cast %42 : vector<8xf32> to vector<8x1xf32>
    %44 = vector.broadcast %43 : vector<8x1xf32> to vector<8x8xf32>
    %45 = arith.subf %41, %44 : vector<8x8xf32>
    %46 = math.exp %45 : vector<8x8xf32>
    %cst_24 = arith.constant dense<0.000000e+00> : vector<8xf32>
    %47 = vector.multi_reduction <add>, %46, %cst_24 [1] : vector<8x8xf32> to vector<8xf32>
    %48 = vector.shape_cast %47 : vector<8xf32> to vector<8x1xf32>
    %49 = tpu.reciprocal %48 {approx = true} : vector<8x1xf32> -> vector<8x1xf32>
    %50 = vector.broadcast %49 : vector<8x1xf32> to vector<8x8xf32>
    %51 = arith.mulf %46, %50 : vector<8x8xf32>
    %cst_25 = arith.constant dense<0.000000e+00> : vector<8x8xf32>
    %52 = tpu.matmul %51, %38, %cst_25 {dimension_numbers = #tpu.dot_dimension_numbers<[1], [0], [0], [1], [0, 0, 1, 1], [], []>} : vector<8x8xf32>, vector<8x8xf32>, vector<8x8xf32> -> vector<8x8xf32>
    %53 = vector.extract_strided_slice %8 {offsets = [8, 0], sizes = [8, 32], strides = [1, 1]} : vector<32x32xf32> to vector<8x32xf32>
    %cst_26 = arith.constant dense<0.000000e+00> : vector<8x32xf32>
    %54 = tpu.matmul %52, %53, %cst_26 {dimension_numbers = #tpu.dot_dimension_numbers<[1], [0], [0], [1], [0, 0, 1, 1], [], []>} : vector<8x8xf32>, vector<8x32xf32>, vector<8x32xf32> -> vector<8x32xf32>
    %55 = arith.addf %35, %54 : vector<8x32xf32>
    %56 = vector.extract_strided_slice %14 {offsets = [0, 16], sizes = [8, 8], strides = [1, 1]} : vector<16x32xf32> to vector<8x8xf32>
    %57 = vector.extract_strided_slice %15 {offsets = [0, 16], sizes = [8, 8], strides = [1, 1]} : vector<16x32xf32> to vector<8x8xf32>
    %58 = vector.extract_strided_slice %16 {offsets = [0, 16], sizes = [8, 8], strides = [1, 1]} : vector<16x32xf32> to vector<8x8xf32>
    %cst_27 = arith.constant dense<0.000000e+00> : vector<8x8xf32>
    %59 = tpu.matmul %56, %57, %cst_27 {dimension_numbers = #tpu.dot_dimension_numbers<[1], [1], [0], [0], [0, 0, 1, 0], [], []>} : vector<8x8xf32>, vector<8x8xf32>, vector<8x8xf32> -> vector<8x8xf32>
    %cst_28 = arith.constant 0.353553385 : f32
    %60 = vector.broadcast %cst_28 : f32 to vector<8x8xf32>
    %61 = arith.mulf %59, %60 : vector<8x8xf32>
    %cst_29 = arith.constant dense<0xFF800000> : vector<8xf32>
    %62 = vector.multi_reduction <maximumf>, %61, %cst_29 [1] : vector<8x8xf32> to vector<8xf32>
    %63 = vector.shape_cast %62 : vector<8xf32> to vector<8x1xf32>
    %64 = vector.broadcast %63 : vector<8x1xf32> to vector<8x8xf32>
    %65 = arith.subf %61, %64 : vector<8x8xf32>
    %66 = math.exp %65 : vector<8x8xf32>
    %cst_30 = arith.constant dense<0.000000e+00> : vector<8xf32>
    %67 = vector.multi_reduction <add>, %66, %cst_30 [1] : vector<8x8xf32> to vector<8xf32>
    %68 = vector.shape_cast %67 : vector<8xf32> to vector<8x1xf32>
    %69 = tpu.reciprocal %68 {approx = true} : vector<8x1xf32> -> vector<8x1xf32>
    %70 = vector.broadcast %69 : vector<8x1xf32> to vector<8x8xf32>
    %71 = arith.mulf %66, %70 : vector<8x8xf32>
    %cst_31 = arith.constant dense<0.000000e+00> : vector<8x8xf32>
    %72 = tpu.matmul %71, %58, %cst_31 {dimension_numbers = #tpu.dot_dimension_numbers<[1], [0], [0], [1], [0, 0, 1, 1], [], []>} : vector<8x8xf32>, vector<8x8xf32>, vector<8x8xf32> -> vector<8x8xf32>
    %73 = vector.extract_strided_slice %8 {offsets = [16, 0], sizes = [8, 32], strides = [1, 1]} : vector<32x32xf32> to vector<8x32xf32>
    %cst_32 = arith.constant dense<0.000000e+00> : vector<8x32xf32>
    %74 = tpu.matmul %72, %73, %cst_32 {dimension_numbers = #tpu.dot_dimension_numbers<[1], [0], [0], [1], [0, 0, 1, 1], [], []>} : vector<8x8xf32>, vector<8x32xf32>, vector<8x32xf32> -> vector<8x32xf32>
    %75 = arith.addf %55, %74 : vector<8x32xf32>
    %76 = vector.extract_strided_slice %14 {offsets = [0, 24], sizes = [8, 8], strides = [1, 1]} : vector<16x32xf32> to vector<8x8xf32>
    %77 = vector.extract_strided_slice %15 {offsets = [0, 24], sizes = [8, 8], strides = [1, 1]} : vector<16x32xf32> to vector<8x8xf32>
    %78 = vector.extract_strided_slice %16 {offsets = [0, 24], sizes = [8, 8], strides = [1, 1]} : vector<16x32xf32> to vector<8x8xf32>
    %cst_33 = arith.constant dense<0.000000e+00> : vector<8x8xf32>
    %79 = tpu.matmul %76, %77, %cst_33 {dimension_numbers = #tpu.dot_dimension_numbers<[1], [1], [0], [0], [0, 0, 1, 0], [], []>} : vector<8x8xf32>, vector<8x8xf32>, vector<8x8xf32> -> vector<8x8xf32>
    %cst_34 = arith.constant 0.353553385 : f32
    %80 = vector.broadcast %cst_34 : f32 to vector<8x8xf32>
    %81 = arith.mulf %79, %80 : vector<8x8xf32>
    %cst_35 = arith.constant dense<0xFF800000> : vector<8xf32>
    %82 = vector.multi_reduction <maximumf>, %81, %cst_35 [1] : vector<8x8xf32> to vector<8xf32>
    %83 = vector.shape_cast %82 : vector<8xf32> to vector<8x1xf32>
    %84 = vector.broadcast %83 : vector<8x1xf32> to vector<8x8xf32>
    %85 = arith.subf %81, %84 : vector<8x8xf32>
    %86 = math.exp %85 : vector<8x8xf32>
    %cst_36 = arith.constant dense<0.000000e+00> : vector<8xf32>
    %87 = vector.multi_reduction <add>, %86, %cst_36 [1] : vector<8x8xf32> to vector<8xf32>
    %88 = vector.shape_cast %87 : vector<8xf32> to vector<8x1xf32>
    %89 = tpu.reciprocal %88 {approx = true} : vector<8x1xf32> -> vector<8x1xf32>
    %90 = vector.broadcast %89 : vector<8x1xf32> to vector<8x8xf32>
    %91 = arith.mulf %86, %90 : vector<8x8xf32>
    %cst_37 = arith.constant dense<0.000000e+00> : vector<8x8xf32>
    %92 = tpu.matmul %91, %78, %cst_37 {dimension_numbers = #tpu.dot_dimension_numbers<[1], [0], [0], [1], [0, 0, 1, 1], [], []>} : vector<8x8xf32>, vector<8x8xf32>, vector<8x8xf32> -> vector<8x8xf32>
    %93 = vector.extract_strided_slice %8 {offsets = [24, 0], sizes = [8, 32], strides = [1, 1]} : vector<32x32xf32> to vector<8x32xf32>
    %cst_38 = arith.constant dense<0.000000e+00> : vector<8x32xf32>
    %94 = tpu.matmul %92, %93, %cst_38 {dimension_numbers = #tpu.dot_dimension_numbers<[1], [0], [0], [1], [0, 0, 1, 1], [], []>} : vector<8x8xf32>, vector<8x32xf32>, vector<8x32xf32> -> vector<8x32xf32>
    %95 = arith.addf %75, %94 : vector<8x32xf32>
    %96 = vector.broadcast %10 : vector<1x32xf32> to vector<8x32xf32>
    %97 = arith.addf %95, %96 : vector<8x32xf32>
    %98 = vector.extract_strided_slice %14 {offsets = [8, 0], sizes = [8, 8], strides = [1, 1]} : vector<16x32xf32> to vector<8x8xf32>
    %99 = vector.extract_strided_slice %15 {offsets = [8, 0], sizes = [8, 8], strides = [1, 1]} : vector<16x32xf32> to vector<8x8xf32>
    %100 = vector.extract_strided_slice %16 {offsets = [8, 0], sizes = [8, 8], strides = [1, 1]} : vector<16x32xf32> to vector<8x8xf32>
    %cst_39 = arith.constant dense<0.000000e+00> : vector<8x8xf32>
    %101 = tpu.matmul %98, %99, %cst_39 {dimension_numbers = #tpu.dot_dimension_numbers<[1], [1], [0], [0], [0, 0, 1, 0], [], []>} : vector<8x8xf32>, vector<8x8xf32>, vector<8x8xf32> -> vector<8x8xf32>
    %cst_40 = arith.constant 0.353553385 : f32
    %102 = vector.broadcast %cst_40 : f32 to vector<8x8xf32>
    %103 = arith.mulf %101, %102 : vector<8x8xf32>
    %cst_41 = arith.constant dense<0xFF800000> : vector<8xf32>
    %104 = vector.multi_reduction <maximumf>, %103, %cst_41 [1] : vector<8x8xf32> to vector<8xf32>
    %105 = vector.shape_cast %104 : vector<8xf32> to vector<8x1xf32>
    %106 = vector.broadcast %105 : vector<8x1xf32> to vector<8x8xf32>
    %107 = arith.subf %103, %106 : vector<8x8xf32>
    %108 = math.exp %107 : vector<8x8xf32>
    %cst_42 = arith.constant dense<0.000000e+00> : vector<8xf32>
    %109 = vector.multi_reduction <add>, %108, %cst_42 [1] : vector<8x8xf32> to vector<8xf32>
    %110 = vector.shape_cast %109 : vector<8xf32> to vector<8x1xf32>
    %111 = tpu.reciprocal %110 {approx = true} : vector<8x1xf32> -> vector<8x1xf32>
    %112 = vector.broadcast %111 : vector<8x1xf32> to vector<8x8xf32>
    %113 = arith.mulf %108, %112 : vector<8x8xf32>
    %cst_43 = arith.constant dense<0.000000e+00> : vector<8x8xf32>
    %114 = tpu.matmul %113, %100, %cst_43 {dimension_numbers = #tpu.dot_dimension_numbers<[1], [0], [0], [1], [0, 0, 1, 1], [], []>} : vector<8x8xf32>, vector<8x8xf32>, vector<8x8xf32> -> vector<8x8xf32>
    %115 = vector.extract_strided_slice %8 {offsets = [0, 0], sizes = [8, 32], strides = [1, 1]} : vector<32x32xf32> to vector<8x32xf32>
    %cst_44 = arith.constant dense<0.000000e+00> : vector<8x32xf32>
    %116 = tpu.matmul %114, %115, %cst_44 {dimension_numbers = #tpu.dot_dimension_numbers<[1], [0], [0], [1], [0, 0, 1, 1], [], []>} : vector<8x8xf32>, vector<8x32xf32>, vector<8x32xf32> -> vector<8x32xf32>
    %117 = vector.extract_strided_slice %14 {offsets = [8, 8], sizes = [8, 8], strides = [1, 1]} : vector<16x32xf32> to vector<8x8xf32>
    %118 = vector.extract_strided_slice %15 {offsets = [8, 8], sizes = [8, 8], strides = [1, 1]} : vector<16x32xf32> to vector<8x8xf32>
    %119 = vector.extract_strided_slice %16 {offsets = [8, 8], sizes = [8, 8], strides = [1, 1]} : vector<16x32xf32> to vector<8x8xf32>
    %cst_45 = arith.constant dense<0.000000e+00> : vector<8x8xf32>
    %120 = tpu.matmul %117, %118, %cst_45 {dimension_numbers = #tpu.dot_dimension_numbers<[1], [1], [0], [0], [0, 0, 1, 0], [], []>} : vector<8x8xf32>, vector<8x8xf32>, vector<8x8xf32> -> vector<8x8xf32>
    %cst_46 = arith.constant 0.353553385 : f32
    %121 = vector.broadcast %cst_46 : f32 to vector<8x8xf32>
    %122 = arith.mulf %120, %121 : vector<8x8xf32>
    %cst_47 = arith.constant dense<0xFF800000> : vector<8xf32>
    %123 = vector.multi_reduction <maximumf>, %122, %cst_47 [1] : vector<8x8xf32> to vector<8xf32>
    %124 = vector.shape_cast %123 : vector<8xf32> to vector<8x1xf32>
    %125 = vector.broadcast %124 : vector<8x1xf32> to vector<8x8xf32>
    %126 = arith.subf %122, %125 : vector<8x8xf32>
    %127 = math.exp %126 : vector<8x8xf32>
    %cst_48 = arith.constant dense<0.000000e+00> : vector<8xf32>
    %128 = vector.multi_reduction <add>, %127, %cst_48 [1] : vector<8x8xf32> to vector<8xf32>
    %129 = vector.shape_cast %128 : vector<8xf32> to vector<8x1xf32>
    %130 = tpu.reciprocal %129 {approx = true} : vector<8x1xf32> -> vector<8x1xf32>
    %131 = vector.broadcast %130 : vector<8x1xf32> to vector<8x8xf32>
    %132 = arith.mulf %127, %131 : vector<8x8xf32>
    %cst_49 = arith.constant dense<0.000000e+00> : vector<8x8xf32>
    %133 = tpu.matmul %132, %119, %cst_49 {dimension_numbers = #tpu.dot_dimension_numbers<[1], [0], [0], [1], [0, 0, 1, 1], [], []>} : vector<8x8xf32>, vector<8x8xf32>, vector<8x8xf32> -> vector<8x8xf32>
    %134 = vector.extract_strided_slice %8 {offsets = [8, 0], sizes = [8, 32], strides = [1, 1]} : vector<32x32xf32> to vector<8x32xf32>
    %cst_50 = arith.constant dense<0.000000e+00> : vector<8x32xf32>
    %135 = tpu.matmul %133, %134, %cst_50 {dimension_numbers = #tpu.dot_dimension_numbers<[1], [0], [0], [1], [0, 0, 1, 1], [], []>} : vector<8x8xf32>, vector<8x32xf32>, vector<8x32xf32> -> vector<8x32xf32>
    %136 = arith.addf %116, %135 : vector<8x32xf32>
    %137 = vector.extract_strided_slice %14 {offsets = [8, 16], sizes = [8, 8], strides = [1, 1]} : vector<16x32xf32> to vector<8x8xf32>
    %138 = vector.extract_strided_slice %15 {offsets = [8, 16], sizes = [8, 8], strides = [1, 1]} : vector<16x32xf32> to vector<8x8xf32>
    %139 = vector.extract_strided_slice %16 {offsets = [8, 16], sizes = [8, 8], strides = [1, 1]} : vector<16x32xf32> to vector<8x8xf32>
    %cst_51 = arith.constant dense<0.000000e+00> : vector<8x8xf32>
    %140 = tpu.matmul %137, %138, %cst_51 {dimension_numbers = #tpu.dot_dimension_numbers<[1], [1], [0], [0], [0, 0, 1, 0], [], []>} : vector<8x8xf32>, vector<8x8xf32>, vector<8x8xf32> -> vector<8x8xf32>
    %cst_52 = arith.constant 0.353553385 : f32
    %141 = vector.broadcast %cst_52 : f32 to vector<8x8xf32>
    %142 = arith.mulf %140, %141 : vector<8x8xf32>
    %cst_53 = arith.constant dense<0xFF800000> : vector<8xf32>
    %143 = vector.multi_reduction <maximumf>, %142, %cst_53 [1] : vector<8x8xf32> to vector<8xf32>
    %144 = vector.shape_cast %143 : vector<8xf32> to vector<8x1xf32>
    %145 = vector.broadcast %144 : vector<8x1xf32> to vector<8x8xf32>
    %146 = arith.subf %142, %145 : vector<8x8xf32>
    %147 = math.exp %146 : vector<8x8xf32>
    %cst_54 = arith.constant dense<0.000000e+00> : vector<8xf32>
    %148 = vector.multi_reduction <add>, %147, %cst_54 [1] : vector<8x8xf32> to vector<8xf32>
    %149 = vector.shape_cast %148 : vector<8xf32> to vector<8x1xf32>
    %150 = tpu.reciprocal %149 {approx = true} : vector<8x1xf32> -> vector<8x1xf32>
    %151 = vector.broadcast %150 : vector<8x1xf32> to vector<8x8xf32>
    %152 = arith.mulf %147, %151 : vector<8x8xf32>
    %cst_55 = arith.constant dense<0.000000e+00> : vector<8x8xf32>
    %153 = tpu.matmul %152, %139, %cst_55 {dimension_numbers = #tpu.dot_dimension_numbers<[1], [0], [0], [1], [0, 0, 1, 1], [], []>} : vector<8x8xf32>, vector<8x8xf32>, vector<8x8xf32> -> vector<8x8xf32>
    %154 = vector.extract_strided_slice %8 {offsets = [16, 0], sizes = [8, 32], strides = [1, 1]} : vector<32x32xf32> to vector<8x32xf32>
    %cst_56 = arith.constant dense<0.000000e+00> : vector<8x32xf32>
    %155 = tpu.matmul %153, %154, %cst_56 {dimension_numbers = #tpu.dot_dimension_numbers<[1], [0], [0], [1], [0, 0, 1, 1], [], []>} : vector<8x8xf32>, vector<8x32xf32>, vector<8x32xf32> -> vector<8x32xf32>
    %156 = arith.addf %136, %155 : vector<8x32xf32>
    %157 = vector.extract_strided_slice %14 {offsets = [8, 24], sizes = [8, 8], strides = [1, 1]} : vector<16x32xf32> to vector<8x8xf32>
    %158 = vector.extract_strided_slice %15 {offsets = [8, 24], sizes = [8, 8], strides = [1, 1]} : vector<16x32xf32> to vector<8x8xf32>
    %159 = vector.extract_strided_slice %16 {offsets = [8, 24], sizes = [8, 8], strides = [1, 1]} : vector<16x32xf32> to vector<8x8xf32>
    %cst_57 = arith.constant dense<0.000000e+00> : vector<8x8xf32>
    %160 = tpu.matmul %157, %158, %cst_57 {dimension_numbers = #tpu.dot_dimension_numbers<[1], [1], [0], [0], [0, 0, 1, 0], [], []>} : vector<8x8xf32>, vector<8x8xf32>, vector<8x8xf32> -> vector<8x8xf32>
    %cst_58 = arith.constant 0.353553385 : f32
    %161 = vector.broadcast %cst_58 : f32 to vector<8x8xf32>
    %162 = arith.mulf %160, %161 : vector<8x8xf32>
    %cst_59 = arith.constant dense<0xFF800000> : vector<8xf32>
    %163 = vector.multi_reduction <maximumf>, %162, %cst_59 [1] : vector<8x8xf32> to vector<8xf32>
    %164 = vector.shape_cast %163 : vector<8xf32> to vector<8x1xf32>
    %165 = vector.broadcast %164 : vector<8x1xf32> to vector<8x8xf32>
    %166 = arith.subf %162, %165 : vector<8x8xf32>
    %167 = math.exp %166 : vector<8x8xf32>
    %cst_60 = arith.constant dense<0.000000e+00> : vector<8xf32>
    %168 = vector.multi_reduction <add>, %167, %cst_60 [1] : vector<8x8xf32> to vector<8xf32>
    %169 = vector.shape_cast %168 : vector<8xf32> to vector<8x1xf32>
    %170 = tpu.reciprocal %169 {approx = true} : vector<8x1xf32> -> vector<8x1xf32>
    %171 = vector.broadcast %170 : vector<8x1xf32> to vector<8x8xf32>
    %172 = arith.mulf %167, %171 : vector<8x8xf32>
    %cst_61 = arith.constant dense<0.000000e+00> : vector<8x8xf32>
    %173 = tpu.matmul %172, %159, %cst_61 {dimension_numbers = #tpu.dot_dimension_numbers<[1], [0], [0], [1], [0, 0, 1, 1], [], []>} : vector<8x8xf32>, vector<8x8xf32>, vector<8x8xf32> -> vector<8x8xf32>
    %174 = vector.extract_strided_slice %8 {offsets = [24, 0], sizes = [8, 32], strides = [1, 1]} : vector<32x32xf32> to vector<8x32xf32>
    %cst_62 = arith.constant dense<0.000000e+00> : vector<8x32xf32>
    %175 = tpu.matmul %173, %174, %cst_62 {dimension_numbers = #tpu.dot_dimension_numbers<[1], [0], [0], [1], [0, 0, 1, 1], [], []>} : vector<8x8xf32>, vector<8x32xf32>, vector<8x32xf32> -> vector<8x32xf32>
    %176 = arith.addf %156, %175 : vector<8x32xf32>
    %177 = vector.broadcast %10 : vector<1x32xf32> to vector<8x32xf32>
    %178 = arith.addf %176, %177 : vector<8x32xf32>
    %179 = tpu.concatenate %97, %178 in 0 : vector<8x32xf32>, vector<8x32xf32> -> vector<16x32xf32>
    %c0_63 = arith.constant 0 : index
    %c0_64 = arith.constant 0 : index
    %c0_65 = arith.constant 0 : index
    %180 = vector.load %arg7[%c0_63, %c0_64, %c0_65] : memref<2x1x32xf32, #tpu.memory_space<vmem>>, vector<1x1x32xf32>
    %181 = vector.shape_cast %180 : vector<1x1x32xf32> to vector<1x32xf32>
    %c0_66 = arith.constant 0 : index
    %c0_67 = arith.constant 0 : index
    %c0_68 = arith.constant 0 : index
    %182 = vector.load %arg8[%c0_66, %c0_67, %c0_68] : memref<2x1x32xf32, #tpu.memory_space<vmem>>, vector<1x1x32xf32>
    %183 = vector.shape_cast %182 : vector<1x1x32xf32> to vector<1x32xf32>
    %184 = arith.addf %179, %2 : vector<16x32xf32>
    %cst_69 = arith.constant dense<0.000000e+00> : vector<16xf32>
    %185 = vector.multi_reduction <add>, %184, %cst_69 [1] : vector<16x32xf32> to vector<16xf32>
    %186 = vector.shape_cast %185 : vector<16xf32> to vector<16x1xf32>
    %cst_70 = arith.constant 3.200000e+01 : f32
    %187 = vector.broadcast %cst_70 : f32 to vector<16x1xf32>
    %188 = arith.divf %186, %187 : vector<16x1xf32>
    %189 = vector.broadcast %188 : vector<16x1xf32> to vector<16x32xf32>
    %190 = arith.subf %184, %189 : vector<16x32xf32>
    %191 = arith.mulf %190, %190 : vector<16x32xf32>
    %cst_71 = arith.constant dense<0.000000e+00> : vector<16xf32>
    %192 = vector.multi_reduction <add>, %191, %cst_71 [1] : vector<16x32xf32> to vector<16xf32>
    %193 = vector.shape_cast %192 : vector<16xf32> to vector<16x1xf32>
    %cst_72 = arith.constant 3.200000e+01 : f32
    %194 = vector.broadcast %cst_72 : f32 to vector<16x1xf32>
    %195 = arith.divf %193, %194 : vector<16x1xf32>
    %cst_73 = arith.constant 9.99999974E-6 : f32
    %196 = vector.broadcast %cst_73 : f32 to vector<16x1xf32>
    %197 = arith.addf %195, %196 : vector<16x1xf32>
    %198 = math.rsqrt %197 : vector<16x1xf32>
    %199 = vector.broadcast %198 : vector<16x1xf32> to vector<16x32xf32>
    %200 = arith.mulf %190, %199 : vector<16x32xf32>
    %201 = vector.broadcast %181 : vector<1x32xf32> to vector<16x32xf32>
    %202 = arith.mulf %200, %201 : vector<16x32xf32>
    %203 = vector.broadcast %183 : vector<1x32xf32> to vector<16x32xf32>
    %204 = arith.addf %202, %203 : vector<16x32xf32>
    %c0_74 = arith.constant 0 : index
    %c0_75 = arith.constant 0 : index
    %c0_76 = arith.constant 0 : index
    %205 = vector.load %arg9[%c0_74, %c0_75, %c0_76] : memref<2x32x64xf32, #tpu.memory_space<vmem>>, vector<1x32x64xf32>
    %206 = vector.shape_cast %205 : vector<1x32x64xf32> to vector<32x64xf32>
    %c0_77 = arith.constant 0 : index
    %c0_78 = arith.constant 0 : index
    %c0_79 = arith.constant 0 : index
    %207 = vector.load %arg10[%c0_77, %c0_78, %c0_79] : memref<2x1x64xf32, #tpu.memory_space<vmem>>, vector<1x1x64xf32>
    %208 = vector.shape_cast %207 : vector<1x1x64xf32> to vector<1x64xf32>
    %cst_80 = arith.constant dense<0.000000e+00> : vector<16x64xf32>
    %209 = tpu.matmul %204, %206, %cst_80 {dimension_numbers = #tpu.dot_dimension_numbers<[1], [0], [0], [1], [0, 0, 1, 1], [], []>} : vector<16x32xf32>, vector<32x64xf32>, vector<16x64xf32> -> vector<16x64xf32>
    %210 = vector.broadcast %208 : vector<1x64xf32> to vector<16x64xf32>
    %211 = arith.addf %209, %210 : vector<16x64xf32>
    %cst_81 = arith.constant 0.000000e+00 : f32
    %212 = vector.broadcast %cst_81 : f32 to vector<16x64xf32>
    %213 = arith.maximumf %211, %212 : vector<16x64xf32>
    %c0_82 = arith.constant 0 : index
    %c0_83 = arith.constant 0 : index
    %c0_84 = arith.constant 0 : index
    %214 = vector.load %arg11[%c0_82, %c0_83, %c0_84] : memref<2x64x32xf32, #tpu.memory_space<vmem>>, vector<1x64x32xf32>
    %215 = vector.shape_cast %214 : vector<1x64x32xf32> to vector<64x32xf32>
    %c0_85 = arith.constant 0 : index
    %c0_86 = arith.constant 0 : index
    %c0_87 = arith.constant 0 : index
    %216 = vector.load %arg12[%c0_85, %c0_86, %c0_87] : memref<2x1x32xf32, #tpu.memory_space<vmem>>, vector<1x1x32xf32>
    %217 = vector.shape_cast %216 : vector<1x1x32xf32> to vector<1x32xf32>
    %cst_88 = arith.constant dense<0.000000e+00> : vector<16x32xf32>
    %218 = tpu.matmul %213, %215, %cst_88 {dimension_numbers = #tpu.dot_dimension_numbers<[1], [0], [0], [1], [0, 0, 1, 1], [], []>} : vector<16x64xf32>, vector<64x32xf32>, vector<16x32xf32> -> vector<16x32xf32>
    %219 = vector.broadcast %217 : vector<1x32xf32> to vector<16x32xf32>
    %220 = arith.addf %218, %219 : vector<16x32xf32>
    %c0_89 = arith.constant 0 : index
    %c0_90 = arith.constant 0 : index
    %c0_91 = arith.constant 0 : index
    %221 = vector.load %arg13[%c0_89, %c0_90, %c0_91] : memref<2x1x32xf32, #tpu.memory_space<vmem>>, vector<1x1x32xf32>
    %222 = vector.shape_cast %221 : vector<1x1x32xf32> to vector<1x32xf32>
    %c0_92 = arith.constant 0 : index
    %c0_93 = arith.constant 0 : index
    %c0_94 = arith.constant 0 : index
    %223 = vector.load %arg14[%c0_92, %c0_93, %c0_94] : memref<2x1x32xf32, #tpu.memory_space<vmem>>, vector<1x1x32xf32>
    %224 = vector.shape_cast %223 : vector<1x1x32xf32> to vector<1x32xf32>
    %225 = arith.addf %220, %204 : vector<16x32xf32>
    %cst_95 = arith.constant dense<0.000000e+00> : vector<16xf32>
    %226 = vector.multi_reduction <add>, %225, %cst_95 [1] : vector<16x32xf32> to vector<16xf32>
    %227 = vector.shape_cast %226 : vector<16xf32> to vector<16x1xf32>
    %cst_96 = arith.constant 3.200000e+01 : f32
    %228 = vector.broadcast %cst_96 : f32 to vector<16x1xf32>
    %229 = arith.divf %227, %228 : vector<16x1xf32>
    %230 = vector.broadcast %229 : vector<16x1xf32> to vector<16x32xf32>
    %231 = arith.subf %225, %230 : vector<16x32xf32>
    %232 = arith.mulf %231, %231 : vector<16x32xf32>
    %cst_97 = arith.constant dense<0.000000e+00> : vector<16xf32>
    %233 = vector.multi_reduction <add>, %232, %cst_97 [1] : vector<16x32xf32> to vector<16xf32>
    %234 = vector.shape_cast %233 : vector<16xf32> to vector<16x1xf32>
    %cst_98 = arith.constant 3.200000e+01 : f32
    %235 = vector.broadcast %cst_98 : f32 to vector<16x1xf32>
    %236 = arith.divf %234, %235 : vector<16x1xf32>
    %cst_99 = arith.constant 9.99999974E-6 : f32
    %237 = vector.broadcast %cst_99 : f32 to vector<16x1xf32>
    %238 = arith.addf %236, %237 : vector<16x1xf32>
    %239 = math.rsqrt %238 : vector<16x1xf32>
    %240 = vector.broadcast %239 : vector<16x1xf32> to vector<16x32xf32>
    %241 = arith.mulf %231, %240 : vector<16x32xf32>
    %242 = vector.broadcast %222 : vector<1x32xf32> to vector<16x32xf32>
    %243 = arith.mulf %241, %242 : vector<16x32xf32>
    %244 = vector.broadcast %224 : vector<1x32xf32> to vector<16x32xf32>
    %245 = arith.addf %243, %244 : vector<16x32xf32>
    %c1 = arith.constant 1 : index
    %c0_100 = arith.constant 0 : index
    %c0_101 = arith.constant 0 : index
    %246 = vector.load %arg3[%c1, %c0_100, %c0_101] : memref<2x32x96xf32, #tpu.memory_space<vmem>>, vector<1x32x96xf32>
    %247 = vector.shape_cast %246 : vector<1x32x96xf32> to vector<32x96xf32>
    %c1_102 = arith.constant 1 : index
    %c0_103 = arith.constant 0 : index
    %c0_104 = arith.constant 0 : index
    %248 = vector.load %arg4[%c1_102, %c0_103, %c0_104] : memref<2x1x96xf32, #tpu.memory_space<vmem>>, vector<1x1x96xf32>
    %249 = vector.shape_cast %248 : vector<1x1x96xf32> to vector<1x96xf32>
    %c1_105 = arith.constant 1 : index
    %c0_106 = arith.constant 0 : index
    %c0_107 = arith.constant 0 : index
    %250 = vector.load %arg5[%c1_105, %c0_106, %c0_107] : memref<2x32x32xf32, #tpu.memory_space<vmem>>, vector<1x32x32xf32>
    %251 = vector.shape_cast %250 : vector<1x32x32xf32> to vector<32x32xf32>
    %c1_108 = arith.constant 1 : index
    %c0_109 = arith.constant 0 : index
    %c0_110 = arith.constant 0 : index
    %252 = vector.load %arg6[%c1_108, %c0_109, %c0_110] : memref<2x1x32xf32, #tpu.memory_space<vmem>>, vector<1x1x32xf32>
    %253 = vector.shape_cast %252 : vector<1x1x32xf32> to vector<1x32xf32>
    %cst_111 = arith.constant dense<0.000000e+00> : vector<16x96xf32>
    %254 = tpu.matmul %245, %247, %cst_111 {dimension_numbers = #tpu.dot_dimension_numbers<[1], [0], [0], [1], [0, 0, 1, 1], [], []>} : vector<16x32xf32>, vector<32x96xf32>, vector<16x96xf32> -> vector<16x96xf32>
    %255 = vector.broadcast %249 : vector<1x96xf32> to vector<16x96xf32>
    %256 = arith.addf %254, %255 : vector<16x96xf32>
    %257 = vector.extract_strided_slice %256 {offsets = [0, 0], sizes = [16, 32], strides = [1, 1]} : vector<16x96xf32> to vector<16x32xf32>
    %258 = vector.extract_strided_slice %256 {offsets = [0, 32], sizes = [16, 32], strides = [1, 1]} : vector<16x96xf32> to vector<16x32xf32>
    %259 = vector.extract_strided_slice %256 {offsets = [0, 64], sizes = [16, 32], strides = [1, 1]} : vector<16x96xf32> to vector<16x32xf32>
    %260 = vector.extract_strided_slice %257 {offsets = [0, 0], sizes = [8, 8], strides = [1, 1]} : vector<16x32xf32> to vector<8x8xf32>
    %261 = vector.extract_strided_slice %258 {offsets = [0, 0], sizes = [8, 8], strides = [1, 1]} : vector<16x32xf32> to vector<8x8xf32>
    %262 = vector.extract_strided_slice %259 {offsets = [0, 0], sizes = [8, 8], strides = [1, 1]} : vector<16x32xf32> to vector<8x8xf32>
    %cst_112 = arith.constant dense<0.000000e+00> : vector<8x8xf32>
    %263 = tpu.matmul %260, %261, %cst_112 {dimension_numbers = #tpu.dot_dimension_numbers<[1], [1], [0], [0], [0, 0, 1, 0], [], []>} : vector<8x8xf32>, vector<8x8xf32>, vector<8x8xf32> -> vector<8x8xf32>
    %cst_113 = arith.constant 0.353553385 : f32
    %264 = vector.broadcast %cst_113 : f32 to vector<8x8xf32>
    %265 = arith.mulf %263, %264 : vector<8x8xf32>
    %cst_114 = arith.constant dense<0xFF800000> : vector<8xf32>
    %266 = vector.multi_reduction <maximumf>, %265, %cst_114 [1] : vector<8x8xf32> to vector<8xf32>
    %267 = vector.shape_cast %266 : vector<8xf32> to vector<8x1xf32>
    %268 = vector.broadcast %267 : vector<8x1xf32> to vector<8x8xf32>
    %269 = arith.subf %265, %268 : vector<8x8xf32>
    %270 = math.exp %269 : vector<8x8xf32>
    %cst_115 = arith.constant dense<0.000000e+00> : vector<8xf32>
    %271 = vector.multi_reduction <add>, %270, %cst_115 [1] : vector<8x8xf32> to vector<8xf32>
    %272 = vector.shape_cast %271 : vector<8xf32> to vector<8x1xf32>
    %273 = tpu.reciprocal %272 {approx = true} : vector<8x1xf32> -> vector<8x1xf32>
    %274 = vector.broadcast %273 : vector<8x1xf32> to vector<8x8xf32>
    %275 = arith.mulf %270, %274 : vector<8x8xf32>
    %cst_116 = arith.constant dense<0.000000e+00> : vector<8x8xf32>
    %276 = tpu.matmul %275, %262, %cst_116 {dimension_numbers = #tpu.dot_dimension_numbers<[1], [0], [0], [1], [0, 0, 1, 1], [], []>} : vector<8x8xf32>, vector<8x8xf32>, vector<8x8xf32> -> vector<8x8xf32>
    %277 = vector.extract_strided_slice %251 {offsets = [0, 0], sizes = [8, 32], strides = [1, 1]} : vector<32x32xf32> to vector<8x32xf32>
    %cst_117 = arith.constant dense<0.000000e+00> : vector<8x32xf32>
    %278 = tpu.matmul %276, %277, %cst_117 {dimension_numbers = #tpu.dot_dimension_numbers<[1], [0], [0], [1], [0, 0, 1, 1], [], []>} : vector<8x8xf32>, vector<8x32xf32>, vector<8x32xf32> -> vector<8x32xf32>
    %279 = vector.extract_strided_slice %257 {offsets = [0, 8], sizes = [8, 8], strides = [1, 1]} : vector<16x32xf32> to vector<8x8xf32>
    %280 = vector.extract_strided_slice %258 {offsets = [0, 8], sizes = [8, 8], strides = [1, 1]} : vector<16x32xf32> to vector<8x8xf32>
    %281 = vector.extract_strided_slice %259 {offsets = [0, 8], sizes = [8, 8], strides = [1, 1]} : vector<16x32xf32> to vector<8x8xf32>
    %cst_118 = arith.constant dense<0.000000e+00> : vector<8x8xf32>
    %282 = tpu.matmul %279, %280, %cst_118 {dimension_numbers = #tpu.dot_dimension_numbers<[1], [1], [0], [0], [0, 0, 1, 0], [], []>} : vector<8x8xf32>, vector<8x8xf32>, vector<8x8xf32> -> vector<8x8xf32>
    %cst_119 = arith.constant 0.353553385 : f32
    %283 = vector.broadcast %cst_119 : f32 to vector<8x8xf32>
    %284 = arith.mulf %282, %283 : vector<8x8xf32>
    %cst_120 = arith.constant dense<0xFF800000> : vector<8xf32>
    %285 = vector.multi_reduction <maximumf>, %284, %cst_120 [1] : vector<8x8xf32> to vector<8xf32>
    %286 = vector.shape_cast %285 : vector<8xf32> to vector<8x1xf32>
    %287 = vector.broadcast %286 : vector<8x1xf32> to vector<8x8xf32>
    %288 = arith.subf %284, %287 : vector<8x8xf32>
    %289 = math.exp %288 : vector<8x8xf32>
    %cst_121 = arith.constant dense<0.000000e+00> : vector<8xf32>
    %290 = vector.multi_reduction <add>, %289, %cst_121 [1] : vector<8x8xf32> to vector<8xf32>
    %291 = vector.shape_cast %290 : vector<8xf32> to vector<8x1xf32>
    %292 = tpu.reciprocal %291 {approx = true} : vector<8x1xf32> -> vector<8x1xf32>
    %293 = vector.broadcast %292 : vector<8x1xf32> to vector<8x8xf32>
    %294 = arith.mulf %289, %293 : vector<8x8xf32>
    %cst_122 = arith.constant dense<0.000000e+00> : vector<8x8xf32>
    %295 = tpu.matmul %294, %281, %cst_122 {dimension_numbers = #tpu.dot_dimension_numbers<[1], [0], [0], [1], [0, 0, 1, 1], [], []>} : vector<8x8xf32>, vector<8x8xf32>, vector<8x8xf32> -> vector<8x8xf32>
    %296 = vector.extract_strided_slice %251 {offsets = [8, 0], sizes = [8, 32], strides = [1, 1]} : vector<32x32xf32> to vector<8x32xf32>
    %cst_123 = arith.constant dense<0.000000e+00> : vector<8x32xf32>
    %297 = tpu.matmul %295, %296, %cst_123 {dimension_numbers = #tpu.dot_dimension_numbers<[1], [0], [0], [1], [0, 0, 1, 1], [], []>} : vector<8x8xf32>, vector<8x32xf32>, vector<8x32xf32> -> vector<8x32xf32>
    %298 = arith.addf %278, %297 : vector<8x32xf32>
    %299 = vector.extract_strided_slice %257 {offsets = [0, 16], sizes = [8, 8], strides = [1, 1]} : vector<16x32xf32> to vector<8x8xf32>
    %300 = vector.extract_strided_slice %258 {offsets = [0, 16], sizes = [8, 8], strides = [1, 1]} : vector<16x32xf32> to vector<8x8xf32>
    %301 = vector.extract_strided_slice %259 {offsets = [0, 16], sizes = [8, 8], strides = [1, 1]} : vector<16x32xf32> to vector<8x8xf32>
    %cst_124 = arith.constant dense<0.000000e+00> : vector<8x8xf32>
    %302 = tpu.matmul %299, %300, %cst_124 {dimension_numbers = #tpu.dot_dimension_numbers<[1], [1], [0], [0], [0, 0, 1, 0], [], []>} : vector<8x8xf32>, vector<8x8xf32>, vector<8x8xf32> -> vector<8x8xf32>
    %cst_125 = arith.constant 0.353553385 : f32
    %303 = vector.broadcast %cst_125 : f32 to vector<8x8xf32>
    %304 = arith.mulf %302, %303 : vector<8x8xf32>
    %cst_126 = arith.constant dense<0xFF800000> : vector<8xf32>
    %305 = vector.multi_reduction <maximumf>, %304, %cst_126 [1] : vector<8x8xf32> to vector<8xf32>
    %306 = vector.shape_cast %305 : vector<8xf32> to vector<8x1xf32>
    %307 = vector.broadcast %306 : vector<8x1xf32> to vector<8x8xf32>
    %308 = arith.subf %304, %307 : vector<8x8xf32>
    %309 = math.exp %308 : vector<8x8xf32>
    %cst_127 = arith.constant dense<0.000000e+00> : vector<8xf32>
    %310 = vector.multi_reduction <add>, %309, %cst_127 [1] : vector<8x8xf32> to vector<8xf32>
    %311 = vector.shape_cast %310 : vector<8xf32> to vector<8x1xf32>
    %312 = tpu.reciprocal %311 {approx = true} : vector<8x1xf32> -> vector<8x1xf32>
    %313 = vector.broadcast %312 : vector<8x1xf32> to vector<8x8xf32>
    %314 = arith.mulf %309, %313 : vector<8x8xf32>
    %cst_128 = arith.constant dense<0.000000e+00> : vector<8x8xf32>
    %315 = tpu.matmul %314, %301, %cst_128 {dimension_numbers = #tpu.dot_dimension_numbers<[1], [0], [0], [1], [0, 0, 1, 1], [], []>} : vector<8x8xf32>, vector<8x8xf32>, vector<8x8xf32> -> vector<8x8xf32>
    %316 = vector.extract_strided_slice %251 {offsets = [16, 0], sizes = [8, 32], strides = [1, 1]} : vector<32x32xf32> to vector<8x32xf32>
    %cst_129 = arith.constant dense<0.000000e+00> : vector<8x32xf32>
    %317 = tpu.matmul %315, %316, %cst_129 {dimension_numbers = #tpu.dot_dimension_numbers<[1], [0], [0], [1], [0, 0, 1, 1], [], []>} : vector<8x8xf32>, vector<8x32xf32>, vector<8x32xf32> -> vector<8x32xf32>
    %318 = arith.addf %298, %317 : vector<8x32xf32>
    %319 = vector.extract_strided_slice %257 {offsets = [0, 24], sizes = [8, 8], strides = [1, 1]} : vector<16x32xf32> to vector<8x8xf32>
    %320 = vector.extract_strided_slice %258 {offsets = [0, 24], sizes = [8, 8], strides = [1, 1]} : vector<16x32xf32> to vector<8x8xf32>
    %321 = vector.extract_strided_slice %259 {offsets = [0, 24], sizes = [8, 8], strides = [1, 1]} : vector<16x32xf32> to vector<8x8xf32>
    %cst_130 = arith.constant dense<0.000000e+00> : vector<8x8xf32>
    %322 = tpu.matmul %319, %320, %cst_130 {dimension_numbers = #tpu.dot_dimension_numbers<[1], [1], [0], [0], [0, 0, 1, 0], [], []>} : vector<8x8xf32>, vector<8x8xf32>, vector<8x8xf32> -> vector<8x8xf32>
    %cst_131 = arith.constant 0.353553385 : f32
    %323 = vector.broadcast %cst_131 : f32 to vector<8x8xf32>
    %324 = arith.mulf %322, %323 : vector<8x8xf32>
    %cst_132 = arith.constant dense<0xFF800000> : vector<8xf32>
    %325 = vector.multi_reduction <maximumf>, %324, %cst_132 [1] : vector<8x8xf32> to vector<8xf32>
    %326 = vector.shape_cast %325 : vector<8xf32> to vector<8x1xf32>
    %327 = vector.broadcast %326 : vector<8x1xf32> to vector<8x8xf32>
    %328 = arith.subf %324, %327 : vector<8x8xf32>
    %329 = math.exp %328 : vector<8x8xf32>
    %cst_133 = arith.constant dense<0.000000e+00> : vector<8xf32>
    %330 = vector.multi_reduction <add>, %329, %cst_133 [1] : vector<8x8xf32> to vector<8xf32>
    %331 = vector.shape_cast %330 : vector<8xf32> to vector<8x1xf32>
    %332 = tpu.reciprocal %331 {approx = true} : vector<8x1xf32> -> vector<8x1xf32>
    %333 = vector.broadcast %332 : vector<8x1xf32> to vector<8x8xf32>
    %334 = arith.mulf %329, %333 : vector<8x8xf32>
    %cst_134 = arith.constant dense<0.000000e+00> : vector<8x8xf32>
    %335 = tpu.matmul %334, %321, %cst_134 {dimension_numbers = #tpu.dot_dimension_numbers<[1], [0], [0], [1], [0, 0, 1, 1], [], []>} : vector<8x8xf32>, vector<8x8xf32>, vector<8x8xf32> -> vector<8x8xf32>
    %336 = vector.extract_strided_slice %251 {offsets = [24, 0], sizes = [8, 32], strides = [1, 1]} : vector<32x32xf32> to vector<8x32xf32>
    %cst_135 = arith.constant dense<0.000000e+00> : vector<8x32xf32>
    %337 = tpu.matmul %335, %336, %cst_135 {dimension_numbers = #tpu.dot_dimension_numbers<[1], [0], [0], [1], [0, 0, 1, 1], [], []>} : vector<8x8xf32>, vector<8x32xf32>, vector<8x32xf32> -> vector<8x32xf32>
    %338 = arith.addf %318, %337 : vector<8x32xf32>
    %339 = vector.broadcast %253 : vector<1x32xf32> to vector<8x32xf32>
    %340 = arith.addf %338, %339 : vector<8x32xf32>
    %341 = vector.extract_strided_slice %257 {offsets = [8, 0], sizes = [8, 8], strides = [1, 1]} : vector<16x32xf32> to vector<8x8xf32>
    %342 = vector.extract_strided_slice %258 {offsets = [8, 0], sizes = [8, 8], strides = [1, 1]} : vector<16x32xf32> to vector<8x8xf32>
    %343 = vector.extract_strided_slice %259 {offsets = [8, 0], sizes = [8, 8], strides = [1, 1]} : vector<16x32xf32> to vector<8x8xf32>
    %cst_136 = arith.constant dense<0.000000e+00> : vector<8x8xf32>
    %344 = tpu.matmul %341, %342, %cst_136 {dimension_numbers = #tpu.dot_dimension_numbers<[1], [1], [0], [0], [0, 0, 1, 0], [], []>} : vector<8x8xf32>, vector<8x8xf32>, vector<8x8xf32> -> vector<8x8xf32>
    %cst_137 = arith.constant 0.353553385 : f32
    %345 = vector.broadcast %cst_137 : f32 to vector<8x8xf32>
    %346 = arith.mulf %344, %345 : vector<8x8xf32>
    %cst_138 = arith.constant dense<0xFF800000> : vector<8xf32>
    %347 = vector.multi_reduction <maximumf>, %346, %cst_138 [1] : vector<8x8xf32> to vector<8xf32>
    %348 = vector.shape_cast %347 : vector<8xf32> to vector<8x1xf32>
    %349 = vector.broadcast %348 : vector<8x1xf32> to vector<8x8xf32>
    %350 = arith.subf %346, %349 : vector<8x8xf32>
    %351 = math.exp %350 : vector<8x8xf32>
    %cst_139 = arith.constant dense<0.000000e+00> : vector<8xf32>
    %352 = vector.multi_reduction <add>, %351, %cst_139 [1] : vector<8x8xf32> to vector<8xf32>
    %353 = vector.shape_cast %352 : vector<8xf32> to vector<8x1xf32>
    %354 = tpu.reciprocal %353 {approx = true} : vector<8x1xf32> -> vector<8x1xf32>
    %355 = vector.broadcast %354 : vector<8x1xf32> to vector<8x8xf32>
    %356 = arith.mulf %351, %355 : vector<8x8xf32>
    %cst_140 = arith.constant dense<0.000000e+00> : vector<8x8xf32>
    %357 = tpu.matmul %356, %343, %cst_140 {dimension_numbers = #tpu.dot_dimension_numbers<[1], [0], [0], [1], [0, 0, 1, 1], [], []>} : vector<8x8xf32>, vector<8x8xf32>, vector<8x8xf32> -> vector<8x8xf32>
    %358 = vector.extract_strided_slice %251 {offsets = [0, 0], sizes = [8, 32], strides = [1, 1]} : vector<32x32xf32> to vector<8x32xf32>
    %cst_141 = arith.constant dense<0.000000e+00> : vector<8x32xf32>
    %359 = tpu.matmul %357, %358, %cst_141 {dimension_numbers = #tpu.dot_dimension_numbers<[1], [0], [0], [1], [0, 0, 1, 1], [], []>} : vector<8x8xf32>, vector<8x32xf32>, vector<8x32xf32> -> vector<8x32xf32>
    %360 = vector.extract_strided_slice %257 {offsets = [8, 8], sizes = [8, 8], strides = [1, 1]} : vector<16x32xf32> to vector<8x8xf32>
    %361 = vector.extract_strided_slice %258 {offsets = [8, 8], sizes = [8, 8], strides = [1, 1]} : vector<16x32xf32> to vector<8x8xf32>
    %362 = vector.extract_strided_slice %259 {offsets = [8, 8], sizes = [8, 8], strides = [1, 1]} : vector<16x32xf32> to vector<8x8xf32>
    %cst_142 = arith.constant dense<0.000000e+00> : vector<8x8xf32>
    %363 = tpu.matmul %360, %361, %cst_142 {dimension_numbers = #tpu.dot_dimension_numbers<[1], [1], [0], [0], [0, 0, 1, 0], [], []>} : vector<8x8xf32>, vector<8x8xf32>, vector<8x8xf32> -> vector<8x8xf32>
    %cst_143 = arith.constant 0.353553385 : f32
    %364 = vector.broadcast %cst_143 : f32 to vector<8x8xf32>
    %365 = arith.mulf %363, %364 : vector<8x8xf32>
    %cst_144 = arith.constant dense<0xFF800000> : vector<8xf32>
    %366 = vector.multi_reduction <maximumf>, %365, %cst_144 [1] : vector<8x8xf32> to vector<8xf32>
    %367 = vector.shape_cast %366 : vector<8xf32> to vector<8x1xf32>
    %368 = vector.broadcast %367 : vector<8x1xf32> to vector<8x8xf32>
    %369 = arith.subf %365, %368 : vector<8x8xf32>
    %370 = math.exp %369 : vector<8x8xf32>
    %cst_145 = arith.constant dense<0.000000e+00> : vector<8xf32>
    %371 = vector.multi_reduction <add>, %370, %cst_145 [1] : vector<8x8xf32> to vector<8xf32>
    %372 = vector.shape_cast %371 : vector<8xf32> to vector<8x1xf32>
    %373 = tpu.reciprocal %372 {approx = true} : vector<8x1xf32> -> vector<8x1xf32>
    %374 = vector.broadcast %373 : vector<8x1xf32> to vector<8x8xf32>
    %375 = arith.mulf %370, %374 : vector<8x8xf32>
    %cst_146 = arith.constant dense<0.000000e+00> : vector<8x8xf32>
    %376 = tpu.matmul %375, %362, %cst_146 {dimension_numbers = #tpu.dot_dimension_numbers<[1], [0], [0], [1], [0, 0, 1, 1], [], []>} : vector<8x8xf32>, vector<8x8xf32>, vector<8x8xf32> -> vector<8x8xf32>
    %377 = vector.extract_strided_slice %251 {offsets = [8, 0], sizes = [8, 32], strides = [1, 1]} : vector<32x32xf32> to vector<8x32xf32>
    %cst_147 = arith.constant dense<0.000000e+00> : vector<8x32xf32>
    %378 = tpu.matmul %376, %377, %cst_147 {dimension_numbers = #tpu.dot_dimension_numbers<[1], [0], [0], [1], [0, 0, 1, 1], [], []>} : vector<8x8xf32>, vector<8x32xf32>, vector<8x32xf32> -> vector<8x32xf32>
    %379 = arith.addf %359, %378 : vector<8x32xf32>
    %380 = vector.extract_strided_slice %257 {offsets = [8, 16], sizes = [8, 8], strides = [1, 1]} : vector<16x32xf32> to vector<8x8xf32>
    %381 = vector.extract_strided_slice %258 {offsets = [8, 16], sizes = [8, 8], strides = [1, 1]} : vector<16x32xf32> to vector<8x8xf32>
    %382 = vector.extract_strided_slice %259 {offsets = [8, 16], sizes = [8, 8], strides = [1, 1]} : vector<16x32xf32> to vector<8x8xf32>
    %cst_148 = arith.constant dense<0.000000e+00> : vector<8x8xf32>
    %383 = tpu.matmul %380, %381, %cst_148 {dimension_numbers = #tpu.dot_dimension_numbers<[1], [1], [0], [0], [0, 0, 1, 0], [], []>} : vector<8x8xf32>, vector<8x8xf32>, vector<8x8xf32> -> vector<8x8xf32>
    %cst_149 = arith.constant 0.353553385 : f32
    %384 = vector.broadcast %cst_149 : f32 to vector<8x8xf32>
    %385 = arith.mulf %383, %384 : vector<8x8xf32>
    %cst_150 = arith.constant dense<0xFF800000> : vector<8xf32>
    %386 = vector.multi_reduction <maximumf>, %385, %cst_150 [1] : vector<8x8xf32> to vector<8xf32>
    %387 = vector.shape_cast %386 : vector<8xf32> to vector<8x1xf32>
    %388 = vector.broadcast %387 : vector<8x1xf32> to vector<8x8xf32>
    %389 = arith.subf %385, %388 : vector<8x8xf32>
    %390 = math.exp %389 : vector<8x8xf32>
    %cst_151 = arith.constant dense<0.000000e+00> : vector<8xf32>
    %391 = vector.multi_reduction <add>, %390, %cst_151 [1] : vector<8x8xf32> to vector<8xf32>
    %392 = vector.shape_cast %391 : vector<8xf32> to vector<8x1xf32>
    %393 = tpu.reciprocal %392 {approx = true} : vector<8x1xf32> -> vector<8x1xf32>
    %394 = vector.broadcast %393 : vector<8x1xf32> to vector<8x8xf32>
    %395 = arith.mulf %390, %394 : vector<8x8xf32>
    %cst_152 = arith.constant dense<0.000000e+00> : vector<8x8xf32>
    %396 = tpu.matmul %395, %382, %cst_152 {dimension_numbers = #tpu.dot_dimension_numbers<[1], [0], [0], [1], [0, 0, 1, 1], [], []>} : vector<8x8xf32>, vector<8x8xf32>, vector<8x8xf32> -> vector<8x8xf32>
    %397 = vector.extract_strided_slice %251 {offsets = [16, 0], sizes = [8, 32], strides = [1, 1]} : vector<32x32xf32> to vector<8x32xf32>
    %cst_153 = arith.constant dense<0.000000e+00> : vector<8x32xf32>
    %398 = tpu.matmul %396, %397, %cst_153 {dimension_numbers = #tpu.dot_dimension_numbers<[1], [0], [0], [1], [0, 0, 1, 1], [], []>} : vector<8x8xf32>, vector<8x32xf32>, vector<8x32xf32> -> vector<8x32xf32>
    %399 = arith.addf %379, %398 : vector<8x32xf32>
    %400 = vector.extract_strided_slice %257 {offsets = [8, 24], sizes = [8, 8], strides = [1, 1]} : vector<16x32xf32> to vector<8x8xf32>
    %401 = vector.extract_strided_slice %258 {offsets = [8, 24], sizes = [8, 8], strides = [1, 1]} : vector<16x32xf32> to vector<8x8xf32>
    %402 = vector.extract_strided_slice %259 {offsets = [8, 24], sizes = [8, 8], strides = [1, 1]} : vector<16x32xf32> to vector<8x8xf32>
    %cst_154 = arith.constant dense<0.000000e+00> : vector<8x8xf32>
    %403 = tpu.matmul %400, %401, %cst_154 {dimension_numbers = #tpu.dot_dimension_numbers<[1], [1], [0], [0], [0, 0, 1, 0], [], []>} : vector<8x8xf32>, vector<8x8xf32>, vector<8x8xf32> -> vector<8x8xf32>
    %cst_155 = arith.constant 0.353553385 : f32
    %404 = vector.broadcast %cst_155 : f32 to vector<8x8xf32>
    %405 = arith.mulf %403, %404 : vector<8x8xf32>
    %cst_156 = arith.constant dense<0xFF800000> : vector<8xf32>
    %406 = vector.multi_reduction <maximumf>, %405, %cst_156 [1] : vector<8x8xf32> to vector<8xf32>
    %407 = vector.shape_cast %406 : vector<8xf32> to vector<8x1xf32>
    %408 = vector.broadcast %407 : vector<8x1xf32> to vector<8x8xf32>
    %409 = arith.subf %405, %408 : vector<8x8xf32>
    %410 = math.exp %409 : vector<8x8xf32>
    %cst_157 = arith.constant dense<0.000000e+00> : vector<8xf32>
    %411 = vector.multi_reduction <add>, %410, %cst_157 [1] : vector<8x8xf32> to vector<8xf32>
    %412 = vector.shape_cast %411 : vector<8xf32> to vector<8x1xf32>
    %413 = tpu.reciprocal %412 {approx = true} : vector<8x1xf32> -> vector<8x1xf32>
    %414 = vector.broadcast %413 : vector<8x1xf32> to vector<8x8xf32>
    %415 = arith.mulf %410, %414 : vector<8x8xf32>
    %cst_158 = arith.constant dense<0.000000e+00> : vector<8x8xf32>
    %416 = tpu.matmul %415, %402, %cst_158 {dimension_numbers = #tpu.dot_dimension_numbers<[1], [0], [0], [1], [0, 0, 1, 1], [], []>} : vector<8x8xf32>, vector<8x8xf32>, vector<8x8xf32> -> vector<8x8xf32>
    %417 = vector.extract_strided_slice %251 {offsets = [24, 0], sizes = [8, 32], strides = [1, 1]} : vector<32x32xf32> to vector<8x32xf32>
    %cst_159 = arith.constant dense<0.000000e+00> : vector<8x32xf32>
    %418 = tpu.matmul %416, %417, %cst_159 {dimension_numbers = #tpu.dot_dimension_numbers<[1], [0], [0], [1], [0, 0, 1, 1], [], []>} : vector<8x8xf32>, vector<8x32xf32>, vector<8x32xf32> -> vector<8x32xf32>
    %419 = arith.addf %399, %418 : vector<8x32xf32>
    %420 = vector.broadcast %253 : vector<1x32xf32> to vector<8x32xf32>
    %421 = arith.addf %419, %420 : vector<8x32xf32>
    %422 = tpu.concatenate %340, %421 in 0 : vector<8x32xf32>, vector<8x32xf32> -> vector<16x32xf32>
    %c1_160 = arith.constant 1 : index
    %c0_161 = arith.constant 0 : index
    %c0_162 = arith.constant 0 : index
    %423 = vector.load %arg7[%c1_160, %c0_161, %c0_162] : memref<2x1x32xf32, #tpu.memory_space<vmem>>, vector<1x1x32xf32>
    %424 = vector.shape_cast %423 : vector<1x1x32xf32> to vector<1x32xf32>
    %c1_163 = arith.constant 1 : index
    %c0_164 = arith.constant 0 : index
    %c0_165 = arith.constant 0 : index
    %425 = vector.load %arg8[%c1_163, %c0_164, %c0_165] : memref<2x1x32xf32, #tpu.memory_space<vmem>>, vector<1x1x32xf32>
    %426 = vector.shape_cast %425 : vector<1x1x32xf32> to vector<1x32xf32>
    %427 = arith.addf %422, %245 : vector<16x32xf32>
    %cst_166 = arith.constant dense<0.000000e+00> : vector<16xf32>
    %428 = vector.multi_reduction <add>, %427, %cst_166 [1] : vector<16x32xf32> to vector<16xf32>
    %429 = vector.shape_cast %428 : vector<16xf32> to vector<16x1xf32>
    %cst_167 = arith.constant 3.200000e+01 : f32
    %430 = vector.broadcast %cst_167 : f32 to vector<16x1xf32>
    %431 = arith.divf %429, %430 : vector<16x1xf32>
    %432 = vector.broadcast %431 : vector<16x1xf32> to vector<16x32xf32>
    %433 = arith.subf %427, %432 : vector<16x32xf32>
    %434 = arith.mulf %433, %433 : vector<16x32xf32>
    %cst_168 = arith.constant dense<0.000000e+00> : vector<16xf32>
    %435 = vector.multi_reduction <add>, %434, %cst_168 [1] : vector<16x32xf32> to vector<16xf32>
    %436 = vector.shape_cast %435 : vector<16xf32> to vector<16x1xf32>
    %cst_169 = arith.constant 3.200000e+01 : f32
    %437 = vector.broadcast %cst_169 : f32 to vector<16x1xf32>
    %438 = arith.divf %436, %437 : vector<16x1xf32>
    %cst_170 = arith.constant 9.99999974E-6 : f32
    %439 = vector.broadcast %cst_170 : f32 to vector<16x1xf32>
    %440 = arith.addf %438, %439 : vector<16x1xf32>
    %441 = math.rsqrt %440 : vector<16x1xf32>
    %442 = vector.broadcast %441 : vector<16x1xf32> to vector<16x32xf32>
    %443 = arith.mulf %433, %442 : vector<16x32xf32>
    %444 = vector.broadcast %424 : vector<1x32xf32> to vector<16x32xf32>
    %445 = arith.mulf %443, %444 : vector<16x32xf32>
    %446 = vector.broadcast %426 : vector<1x32xf32> to vector<16x32xf32>
    %447 = arith.addf %445, %446 : vector<16x32xf32>
    %c1_171 = arith.constant 1 : index
    %c0_172 = arith.constant 0 : index
    %c0_173 = arith.constant 0 : index
    %448 = vector.load %arg9[%c1_171, %c0_172, %c0_173] : memref<2x32x64xf32, #tpu.memory_space<vmem>>, vector<1x32x64xf32>
    %449 = vector.shape_cast %448 : vector<1x32x64xf32> to vector<32x64xf32>
    %c1_174 = arith.constant 1 : index
    %c0_175 = arith.constant 0 : index
    %c0_176 = arith.constant 0 : index
    %450 = vector.load %arg10[%c1_174, %c0_175, %c0_176] : memref<2x1x64xf32, #tpu.memory_space<vmem>>, vector<1x1x64xf32>
    %451 = vector.shape_cast %450 : vector<1x1x64xf32> to vector<1x64xf32>
    %cst_177 = arith.constant dense<0.000000e+00> : vector<16x64xf32>
    %452 = tpu.matmul %447, %449, %cst_177 {dimension_numbers = #tpu.dot_dimension_numbers<[1], [0], [0], [1], [0, 0, 1, 1], [], []>} : vector<16x32xf32>, vector<32x64xf32>, vector<16x64xf32> -> vector<16x64xf32>
    %453 = vector.broadcast %451 : vector<1x64xf32> to vector<16x64xf32>
    %454 = arith.addf %452, %453 : vector<16x64xf32>
    %cst_178 = arith.constant 0.000000e+00 : f32
    %455 = vector.broadcast %cst_178 : f32 to vector<16x64xf32>
    %456 = arith.maximumf %454, %455 : vector<16x64xf32>
    %c1_179 = arith.constant 1 : index
    %c0_180 = arith.constant 0 : index
    %c0_181 = arith.constant 0 : index
    %457 = vector.load %arg11[%c1_179, %c0_180, %c0_181] : memref<2x64x32xf32, #tpu.memory_space<vmem>>, vector<1x64x32xf32>
    %458 = vector.shape_cast %457 : vector<1x64x32xf32> to vector<64x32xf32>
    %c1_182 = arith.constant 1 : index
    %c0_183 = arith.constant 0 : index
    %c0_184 = arith.constant 0 : index
    %459 = vector.load %arg12[%c1_182, %c0_183, %c0_184] : memref<2x1x32xf32, #tpu.memory_space<vmem>>, vector<1x1x32xf32>
    %460 = vector.shape_cast %459 : vector<1x1x32xf32> to vector<1x32xf32>
    %cst_185 = arith.constant dense<0.000000e+00> : vector<16x32xf32>
    %461 = tpu.matmul %456, %458, %cst_185 {dimension_numbers = #tpu.dot_dimension_numbers<[1], [0], [0], [1], [0, 0, 1, 1], [], []>} : vector<16x64xf32>, vector<64x32xf32>, vector<16x32xf32> -> vector<16x32xf32>
    %462 = vector.broadcast %460 : vector<1x32xf32> to vector<16x32xf32>
    %463 = arith.addf %461, %462 : vector<16x32xf32>
    %c1_186 = arith.constant 1 : index
    %c0_187 = arith.constant 0 : index
    %c0_188 = arith.constant 0 : index
    %464 = vector.load %arg13[%c1_186, %c0_187, %c0_188] : memref<2x1x32xf32, #tpu.memory_space<vmem>>, vector<1x1x32xf32>
    %465 = vector.shape_cast %464 : vector<1x1x32xf32> to vector<1x32xf32>
    %c1_189 = arith.constant 1 : index
    %c0_190 = arith.constant 0 : index
    %c0_191 = arith.constant 0 : index
    %466 = vector.load %arg14[%c1_189, %c0_190, %c0_191] : memref<2x1x32xf32, #tpu.memory_space<vmem>>, vector<1x1x32xf32>
    %467 = vector.shape_cast %466 : vector<1x1x32xf32> to vector<1x32xf32>
    %468 = arith.addf %463, %447 : vector<16x32xf32>
    %cst_192 = arith.constant dense<0.000000e+00> : vector<16xf32>
    %469 = vector.multi_reduction <add>, %468, %cst_192 [1] : vector<16x32xf32> to vector<16xf32>
    %470 = vector.shape_cast %469 : vector<16xf32> to vector<16x1xf32>
    %cst_193 = arith.constant 3.200000e+01 : f32
    %471 = vector.broadcast %cst_193 : f32 to vector<16x1xf32>
    %472 = arith.divf %470, %471 : vector<16x1xf32>
    %473 = vector.broadcast %472 : vector<16x1xf32> to vector<16x32xf32>
    %474 = arith.subf %468, %473 : vector<16x32xf32>
    %475 = arith.mulf %474, %474 : vector<16x32xf32>
    %cst_194 = arith.constant dense<0.000000e+00> : vector<16xf32>
    %476 = vector.multi_reduction <add>, %475, %cst_194 [1] : vector<16x32xf32> to vector<16xf32>
    %477 = vector.shape_cast %476 : vector<16xf32> to vector<16x1xf32>
    %cst_195 = arith.constant 3.200000e+01 : f32
    %478 = vector.broadcast %cst_195 : f32 to vector<16x1xf32>
    %479 = arith.divf %477, %478 : vector<16x1xf32>
    %cst_196 = arith.constant 9.99999974E-6 : f32
    %480 = vector.broadcast %cst_196 : f32 to vector<16x1xf32>
    %481 = arith.addf %479, %480 : vector<16x1xf32>
    %482 = math.rsqrt %481 : vector<16x1xf32>
    %483 = vector.broadcast %482 : vector<16x1xf32> to vector<16x32xf32>
    %484 = arith.mulf %474, %483 : vector<16x32xf32>
    %485 = vector.broadcast %465 : vector<1x32xf32> to vector<16x32xf32>
    %486 = arith.mulf %484, %485 : vector<16x32xf32>
    %487 = vector.broadcast %467 : vector<1x32xf32> to vector<16x32xf32>
    %488 = arith.addf %486, %487 : vector<16x32xf32>
    %c0_197 = arith.constant 0 : index
    %c0_198 = arith.constant 0 : index
    %489 = vector.load %arg1[%c0_197, %c0_198] : memref<16x32xf32, #tpu.memory_space<vmem>>, vector<16x32xf32>
    %490 = arith.addf %489, %0 : vector<16x32xf32>
    %c0_199 = arith.constant 0 : index
    %c0_200 = arith.constant 0 : index
    %c0_201 = arith.constant 0 : index
    %491 = vector.load %arg15[%c0_199, %c0_200, %c0_201] : memref<2x32x96xf32, #tpu.memory_space<vmem>>, vector<1x32x96xf32>
    %492 = vector.shape_cast %491 : vector<1x32x96xf32> to vector<32x96xf32>
    %c0_202 = arith.constant 0 : index
    %c0_203 = arith.constant 0 : index
    %c0_204 = arith.constant 0 : index
    %493 = vector.load %arg16[%c0_202, %c0_203, %c0_204] : memref<2x1x96xf32, #tpu.memory_space<vmem>>, vector<1x1x96xf32>
    %494 = vector.shape_cast %493 : vector<1x1x96xf32> to vector<1x96xf32>
    %c0_205 = arith.constant 0 : index
    %c0_206 = arith.constant 0 : index
    %c0_207 = arith.constant 0 : index
    %495 = vector.load %arg17[%c0_205, %c0_206, %c0_207] : memref<2x32x32xf32, #tpu.memory_space<vmem>>, vector<1x32x32xf32>
    %496 = vector.shape_cast %495 : vector<1x32x32xf32> to vector<32x32xf32>
    %c0_208 = arith.constant 0 : index
    %c0_209 = arith.constant 0 : index
    %c0_210 = arith.constant 0 : index
    %497 = vector.load %arg18[%c0_208, %c0_209, %c0_210] : memref<2x1x32xf32, #tpu.memory_space<vmem>>, vector<1x1x32xf32>
    %498 = vector.shape_cast %497 : vector<1x1x32xf32> to vector<1x32xf32>
    %cst_211 = arith.constant dense<0.000000e+00> : vector<16x96xf32>
    %499 = tpu.matmul %490, %492, %cst_211 {dimension_numbers = #tpu.dot_dimension_numbers<[1], [0], [0], [1], [0, 0, 1, 1], [], []>} : vector<16x32xf32>, vector<32x96xf32>, vector<16x96xf32> -> vector<16x96xf32>
    %500 = vector.broadcast %494 : vector<1x96xf32> to vector<16x96xf32>
    %501 = arith.addf %499, %500 : vector<16x96xf32>
    %502 = vector.extract_strided_slice %501 {offsets = [0, 0], sizes = [16, 32], strides = [1, 1]} : vector<16x96xf32> to vector<16x32xf32>
    %503 = vector.extract_strided_slice %501 {offsets = [0, 32], sizes = [16, 32], strides = [1, 1]} : vector<16x96xf32> to vector<16x32xf32>
    %504 = vector.extract_strided_slice %501 {offsets = [0, 64], sizes = [16, 32], strides = [1, 1]} : vector<16x96xf32> to vector<16x32xf32>
    %505 = vector.extract_strided_slice %502 {offsets = [0, 0], sizes = [8, 8], strides = [1, 1]} : vector<16x32xf32> to vector<8x8xf32>
    %506 = vector.extract_strided_slice %503 {offsets = [0, 0], sizes = [8, 8], strides = [1, 1]} : vector<16x32xf32> to vector<8x8xf32>
    %507 = vector.extract_strided_slice %504 {offsets = [0, 0], sizes = [8, 8], strides = [1, 1]} : vector<16x32xf32> to vector<8x8xf32>
    %cst_212 = arith.constant dense<0.000000e+00> : vector<8x8xf32>
    %508 = tpu.matmul %505, %506, %cst_212 {dimension_numbers = #tpu.dot_dimension_numbers<[1], [1], [0], [0], [0, 0, 1, 0], [], []>} : vector<8x8xf32>, vector<8x8xf32>, vector<8x8xf32> -> vector<8x8xf32>
    %cst_213 = arith.constant 0.353553385 : f32
    %509 = vector.broadcast %cst_213 : f32 to vector<8x8xf32>
    %510 = arith.mulf %508, %509 : vector<8x8xf32>
    %cst_214 = arith.constant dense<0xFF800000> : vector<8xf32>
    %511 = vector.multi_reduction <maximumf>, %510, %cst_214 [1] : vector<8x8xf32> to vector<8xf32>
    %512 = vector.shape_cast %511 : vector<8xf32> to vector<8x1xf32>
    %513 = vector.broadcast %512 : vector<8x1xf32> to vector<8x8xf32>
    %514 = arith.subf %510, %513 : vector<8x8xf32>
    %515 = math.exp %514 : vector<8x8xf32>
    %cst_215 = arith.constant dense<0.000000e+00> : vector<8xf32>
    %516 = vector.multi_reduction <add>, %515, %cst_215 [1] : vector<8x8xf32> to vector<8xf32>
    %517 = vector.shape_cast %516 : vector<8xf32> to vector<8x1xf32>
    %518 = tpu.reciprocal %517 {approx = true} : vector<8x1xf32> -> vector<8x1xf32>
    %519 = vector.broadcast %518 : vector<8x1xf32> to vector<8x8xf32>
    %520 = arith.mulf %515, %519 : vector<8x8xf32>
    %cst_216 = arith.constant dense<0.000000e+00> : vector<8x8xf32>
    %521 = tpu.matmul %520, %507, %cst_216 {dimension_numbers = #tpu.dot_dimension_numbers<[1], [0], [0], [1], [0, 0, 1, 1], [], []>} : vector<8x8xf32>, vector<8x8xf32>, vector<8x8xf32> -> vector<8x8xf32>
    %522 = vector.extract_strided_slice %496 {offsets = [0, 0], sizes = [8, 32], strides = [1, 1]} : vector<32x32xf32> to vector<8x32xf32>
    %cst_217 = arith.constant dense<0.000000e+00> : vector<8x32xf32>
    %523 = tpu.matmul %521, %522, %cst_217 {dimension_numbers = #tpu.dot_dimension_numbers<[1], [0], [0], [1], [0, 0, 1, 1], [], []>} : vector<8x8xf32>, vector<8x32xf32>, vector<8x32xf32> -> vector<8x32xf32>
    %524 = vector.extract_strided_slice %502 {offsets = [0, 8], sizes = [8, 8], strides = [1, 1]} : vector<16x32xf32> to vector<8x8xf32>
    %525 = vector.extract_strided_slice %503 {offsets = [0, 8], sizes = [8, 8], strides = [1, 1]} : vector<16x32xf32> to vector<8x8xf32>
    %526 = vector.extract_strided_slice %504 {offsets = [0, 8], sizes = [8, 8], strides = [1, 1]} : vector<16x32xf32> to vector<8x8xf32>
    %cst_218 = arith.constant dense<0.000000e+00> : vector<8x8xf32>
    %527 = tpu.matmul %524, %525, %cst_218 {dimension_numbers = #tpu.dot_dimension_numbers<[1], [1], [0], [0], [0, 0, 1, 0], [], []>} : vector<8x8xf32>, vector<8x8xf32>, vector<8x8xf32> -> vector<8x8xf32>
    %cst_219 = arith.constant 0.353553385 : f32
    %528 = vector.broadcast %cst_219 : f32 to vector<8x8xf32>
    %529 = arith.mulf %527, %528 : vector<8x8xf32>
    %cst_220 = arith.constant dense<0xFF800000> : vector<8xf32>
    %530 = vector.multi_reduction <maximumf>, %529, %cst_220 [1] : vector<8x8xf32> to vector<8xf32>
    %531 = vector.shape_cast %530 : vector<8xf32> to vector<8x1xf32>
    %532 = vector.broadcast %531 : vector<8x1xf32> to vector<8x8xf32>
    %533 = arith.subf %529, %532 : vector<8x8xf32>
    %534 = math.exp %533 : vector<8x8xf32>
    %cst_221 = arith.constant dense<0.000000e+00> : vector<8xf32>
    %535 = vector.multi_reduction <add>, %534, %cst_221 [1] : vector<8x8xf32> to vector<8xf32>
    %536 = vector.shape_cast %535 : vector<8xf32> to vector<8x1xf32>
    %537 = tpu.reciprocal %536 {approx = true} : vector<8x1xf32> -> vector<8x1xf32>
    %538 = vector.broadcast %537 : vector<8x1xf32> to vector<8x8xf32>
    %539 = arith.mulf %534, %538 : vector<8x8xf32>
    %cst_222 = arith.constant dense<0.000000e+00> : vector<8x8xf32>
    %540 = tpu.matmul %539, %526, %cst_222 {dimension_numbers = #tpu.dot_dimension_numbers<[1], [0], [0], [1], [0, 0, 1, 1], [], []>} : vector<8x8xf32>, vector<8x8xf32>, vector<8x8xf32> -> vector<8x8xf32>
    %541 = vector.extract_strided_slice %496 {offsets = [8, 0], sizes = [8, 32], strides = [1, 1]} : vector<32x32xf32> to vector<8x32xf32>
    %cst_223 = arith.constant dense<0.000000e+00> : vector<8x32xf32>
    %542 = tpu.matmul %540, %541, %cst_223 {dimension_numbers = #tpu.dot_dimension_numbers<[1], [0], [0], [1], [0, 0, 1, 1], [], []>} : vector<8x8xf32>, vector<8x32xf32>, vector<8x32xf32> -> vector<8x32xf32>
    %543 = arith.addf %523, %542 : vector<8x32xf32>
    %544 = vector.extract_strided_slice %502 {offsets = [0, 16], sizes = [8, 8], strides = [1, 1]} : vector<16x32xf32> to vector<8x8xf32>
    %545 = vector.extract_strided_slice %503 {offsets = [0, 16], sizes = [8, 8], strides = [1, 1]} : vector<16x32xf32> to vector<8x8xf32>
    %546 = vector.extract_strided_slice %504 {offsets = [0, 16], sizes = [8, 8], strides = [1, 1]} : vector<16x32xf32> to vector<8x8xf32>
    %cst_224 = arith.constant dense<0.000000e+00> : vector<8x8xf32>
    %547 = tpu.matmul %544, %545, %cst_224 {dimension_numbers = #tpu.dot_dimension_numbers<[1], [1], [0], [0], [0, 0, 1, 0], [], []>} : vector<8x8xf32>, vector<8x8xf32>, vector<8x8xf32> -> vector<8x8xf32>
    %cst_225 = arith.constant 0.353553385 : f32
    %548 = vector.broadcast %cst_225 : f32 to vector<8x8xf32>
    %549 = arith.mulf %547, %548 : vector<8x8xf32>
    %cst_226 = arith.constant dense<0xFF800000> : vector<8xf32>
    %550 = vector.multi_reduction <maximumf>, %549, %cst_226 [1] : vector<8x8xf32> to vector<8xf32>
    %551 = vector.shape_cast %550 : vector<8xf32> to vector<8x1xf32>
    %552 = vector.broadcast %551 : vector<8x1xf32> to vector<8x8xf32>
    %553 = arith.subf %549, %552 : vector<8x8xf32>
    %554 = math.exp %553 : vector<8x8xf32>
    %cst_227 = arith.constant dense<0.000000e+00> : vector<8xf32>
    %555 = vector.multi_reduction <add>, %554, %cst_227 [1] : vector<8x8xf32> to vector<8xf32>
    %556 = vector.shape_cast %555 : vector<8xf32> to vector<8x1xf32>
    %557 = tpu.reciprocal %556 {approx = true} : vector<8x1xf32> -> vector<8x1xf32>
    %558 = vector.broadcast %557 : vector<8x1xf32> to vector<8x8xf32>
    %559 = arith.mulf %554, %558 : vector<8x8xf32>
    %cst_228 = arith.constant dense<0.000000e+00> : vector<8x8xf32>
    %560 = tpu.matmul %559, %546, %cst_228 {dimension_numbers = #tpu.dot_dimension_numbers<[1], [0], [0], [1], [0, 0, 1, 1], [], []>} : vector<8x8xf32>, vector<8x8xf32>, vector<8x8xf32> -> vector<8x8xf32>
    %561 = vector.extract_strided_slice %496 {offsets = [16, 0], sizes = [8, 32], strides = [1, 1]} : vector<32x32xf32> to vector<8x32xf32>
    %cst_229 = arith.constant dense<0.000000e+00> : vector<8x32xf32>
    %562 = tpu.matmul %560, %561, %cst_229 {dimension_numbers = #tpu.dot_dimension_numbers<[1], [0], [0], [1], [0, 0, 1, 1], [], []>} : vector<8x8xf32>, vector<8x32xf32>, vector<8x32xf32> -> vector<8x32xf32>
    %563 = arith.addf %543, %562 : vector<8x32xf32>
    %564 = vector.extract_strided_slice %502 {offsets = [0, 24], sizes = [8, 8], strides = [1, 1]} : vector<16x32xf32> to vector<8x8xf32>
    %565 = vector.extract_strided_slice %503 {offsets = [0, 24], sizes = [8, 8], strides = [1, 1]} : vector<16x32xf32> to vector<8x8xf32>
    %566 = vector.extract_strided_slice %504 {offsets = [0, 24], sizes = [8, 8], strides = [1, 1]} : vector<16x32xf32> to vector<8x8xf32>
    %cst_230 = arith.constant dense<0.000000e+00> : vector<8x8xf32>
    %567 = tpu.matmul %564, %565, %cst_230 {dimension_numbers = #tpu.dot_dimension_numbers<[1], [1], [0], [0], [0, 0, 1, 0], [], []>} : vector<8x8xf32>, vector<8x8xf32>, vector<8x8xf32> -> vector<8x8xf32>
    %cst_231 = arith.constant 0.353553385 : f32
    %568 = vector.broadcast %cst_231 : f32 to vector<8x8xf32>
    %569 = arith.mulf %567, %568 : vector<8x8xf32>
    %cst_232 = arith.constant dense<0xFF800000> : vector<8xf32>
    %570 = vector.multi_reduction <maximumf>, %569, %cst_232 [1] : vector<8x8xf32> to vector<8xf32>
    %571 = vector.shape_cast %570 : vector<8xf32> to vector<8x1xf32>
    %572 = vector.broadcast %571 : vector<8x1xf32> to vector<8x8xf32>
    %573 = arith.subf %569, %572 : vector<8x8xf32>
    %574 = math.exp %573 : vector<8x8xf32>
    %cst_233 = arith.constant dense<0.000000e+00> : vector<8xf32>
    %575 = vector.multi_reduction <add>, %574, %cst_233 [1] : vector<8x8xf32> to vector<8xf32>
    %576 = vector.shape_cast %575 : vector<8xf32> to vector<8x1xf32>
    %577 = tpu.reciprocal %576 {approx = true} : vector<8x1xf32> -> vector<8x1xf32>
    %578 = vector.broadcast %577 : vector<8x1xf32> to vector<8x8xf32>
    %579 = arith.mulf %574, %578 : vector<8x8xf32>
    %cst_234 = arith.constant dense<0.000000e+00> : vector<8x8xf32>
    %580 = tpu.matmul %579, %566, %cst_234 {dimension_numbers = #tpu.dot_dimension_numbers<[1], [0], [0], [1], [0, 0, 1, 1], [], []>} : vector<8x8xf32>, vector<8x8xf32>, vector<8x8xf32> -> vector<8x8xf32>
    %581 = vector.extract_strided_slice %496 {offsets = [24, 0], sizes = [8, 32], strides = [1, 1]} : vector<32x32xf32> to vector<8x32xf32>
    %cst_235 = arith.constant dense<0.000000e+00> : vector<8x32xf32>
    %582 = tpu.matmul %580, %581, %cst_235 {dimension_numbers = #tpu.dot_dimension_numbers<[1], [0], [0], [1], [0, 0, 1, 1], [], []>} : vector<8x8xf32>, vector<8x32xf32>, vector<8x32xf32> -> vector<8x32xf32>
    %583 = arith.addf %563, %582 : vector<8x32xf32>
    %584 = vector.broadcast %498 : vector<1x32xf32> to vector<8x32xf32>
    %585 = arith.addf %583, %584 : vector<8x32xf32>
    %586 = vector.extract_strided_slice %502 {offsets = [8, 0], sizes = [8, 8], strides = [1, 1]} : vector<16x32xf32> to vector<8x8xf32>
    %587 = vector.extract_strided_slice %503 {offsets = [8, 0], sizes = [8, 8], strides = [1, 1]} : vector<16x32xf32> to vector<8x8xf32>
    %588 = vector.extract_strided_slice %504 {offsets = [8, 0], sizes = [8, 8], strides = [1, 1]} : vector<16x32xf32> to vector<8x8xf32>
    %cst_236 = arith.constant dense<0.000000e+00> : vector<8x8xf32>
    %589 = tpu.matmul %586, %587, %cst_236 {dimension_numbers = #tpu.dot_dimension_numbers<[1], [1], [0], [0], [0, 0, 1, 0], [], []>} : vector<8x8xf32>, vector<8x8xf32>, vector<8x8xf32> -> vector<8x8xf32>
    %cst_237 = arith.constant 0.353553385 : f32
    %590 = vector.broadcast %cst_237 : f32 to vector<8x8xf32>
    %591 = arith.mulf %589, %590 : vector<8x8xf32>
    %cst_238 = arith.constant dense<0xFF800000> : vector<8xf32>
    %592 = vector.multi_reduction <maximumf>, %591, %cst_238 [1] : vector<8x8xf32> to vector<8xf32>
    %593 = vector.shape_cast %592 : vector<8xf32> to vector<8x1xf32>
    %594 = vector.broadcast %593 : vector<8x1xf32> to vector<8x8xf32>
    %595 = arith.subf %591, %594 : vector<8x8xf32>
    %596 = math.exp %595 : vector<8x8xf32>
    %cst_239 = arith.constant dense<0.000000e+00> : vector<8xf32>
    %597 = vector.multi_reduction <add>, %596, %cst_239 [1] : vector<8x8xf32> to vector<8xf32>
    %598 = vector.shape_cast %597 : vector<8xf32> to vector<8x1xf32>
    %599 = tpu.reciprocal %598 {approx = true} : vector<8x1xf32> -> vector<8x1xf32>
    %600 = vector.broadcast %599 : vector<8x1xf32> to vector<8x8xf32>
    %601 = arith.mulf %596, %600 : vector<8x8xf32>
    %cst_240 = arith.constant dense<0.000000e+00> : vector<8x8xf32>
    %602 = tpu.matmul %601, %588, %cst_240 {dimension_numbers = #tpu.dot_dimension_numbers<[1], [0], [0], [1], [0, 0, 1, 1], [], []>} : vector<8x8xf32>, vector<8x8xf32>, vector<8x8xf32> -> vector<8x8xf32>
    %603 = vector.extract_strided_slice %496 {offsets = [0, 0], sizes = [8, 32], strides = [1, 1]} : vector<32x32xf32> to vector<8x32xf32>
    %cst_241 = arith.constant dense<0.000000e+00> : vector<8x32xf32>
    %604 = tpu.matmul %602, %603, %cst_241 {dimension_numbers = #tpu.dot_dimension_numbers<[1], [0], [0], [1], [0, 0, 1, 1], [], []>} : vector<8x8xf32>, vector<8x32xf32>, vector<8x32xf32> -> vector<8x32xf32>
    %605 = vector.extract_strided_slice %502 {offsets = [8, 8], sizes = [8, 8], strides = [1, 1]} : vector<16x32xf32> to vector<8x8xf32>
    %606 = vector.extract_strided_slice %503 {offsets = [8, 8], sizes = [8, 8], strides = [1, 1]} : vector<16x32xf32> to vector<8x8xf32>
    %607 = vector.extract_strided_slice %504 {offsets = [8, 8], sizes = [8, 8], strides = [1, 1]} : vector<16x32xf32> to vector<8x8xf32>
    %cst_242 = arith.constant dense<0.000000e+00> : vector<8x8xf32>
    %608 = tpu.matmul %605, %606, %cst_242 {dimension_numbers = #tpu.dot_dimension_numbers<[1], [1], [0], [0], [0, 0, 1, 0], [], []>} : vector<8x8xf32>, vector<8x8xf32>, vector<8x8xf32> -> vector<8x8xf32>
    %cst_243 = arith.constant 0.353553385 : f32
    %609 = vector.broadcast %cst_243 : f32 to vector<8x8xf32>
    %610 = arith.mulf %608, %609 : vector<8x8xf32>
    %cst_244 = arith.constant dense<0xFF800000> : vector<8xf32>
    %611 = vector.multi_reduction <maximumf>, %610, %cst_244 [1] : vector<8x8xf32> to vector<8xf32>
    %612 = vector.shape_cast %611 : vector<8xf32> to vector<8x1xf32>
    %613 = vector.broadcast %612 : vector<8x1xf32> to vector<8x8xf32>
    %614 = arith.subf %610, %613 : vector<8x8xf32>
    %615 = math.exp %614 : vector<8x8xf32>
    %cst_245 = arith.constant dense<0.000000e+00> : vector<8xf32>
    %616 = vector.multi_reduction <add>, %615, %cst_245 [1] : vector<8x8xf32> to vector<8xf32>
    %617 = vector.shape_cast %616 : vector<8xf32> to vector<8x1xf32>
    %618 = tpu.reciprocal %617 {approx = true} : vector<8x1xf32> -> vector<8x1xf32>
    %619 = vector.broadcast %618 : vector<8x1xf32> to vector<8x8xf32>
    %620 = arith.mulf %615, %619 : vector<8x8xf32>
    %cst_246 = arith.constant dense<0.000000e+00> : vector<8x8xf32>
    %621 = tpu.matmul %620, %607, %cst_246 {dimension_numbers = #tpu.dot_dimension_numbers<[1], [0], [0], [1], [0, 0, 1, 1], [], []>} : vector<8x8xf32>, vector<8x8xf32>, vector<8x8xf32> -> vector<8x8xf32>
    %622 = vector.extract_strided_slice %496 {offsets = [8, 0], sizes = [8, 32], strides = [1, 1]} : vector<32x32xf32> to vector<8x32xf32>
    %cst_247 = arith.constant dense<0.000000e+00> : vector<8x32xf32>
    %623 = tpu.matmul %621, %622, %cst_247 {dimension_numbers = #tpu.dot_dimension_numbers<[1], [0], [0], [1], [0, 0, 1, 1], [], []>} : vector<8x8xf32>, vector<8x32xf32>, vector<8x32xf32> -> vector<8x32xf32>
    %624 = arith.addf %604, %623 : vector<8x32xf32>
    %625 = vector.extract_strided_slice %502 {offsets = [8, 16], sizes = [8, 8], strides = [1, 1]} : vector<16x32xf32> to vector<8x8xf32>
    %626 = vector.extract_strided_slice %503 {offsets = [8, 16], sizes = [8, 8], strides = [1, 1]} : vector<16x32xf32> to vector<8x8xf32>
    %627 = vector.extract_strided_slice %504 {offsets = [8, 16], sizes = [8, 8], strides = [1, 1]} : vector<16x32xf32> to vector<8x8xf32>
    %cst_248 = arith.constant dense<0.000000e+00> : vector<8x8xf32>
    %628 = tpu.matmul %625, %626, %cst_248 {dimension_numbers = #tpu.dot_dimension_numbers<[1], [1], [0], [0], [0, 0, 1, 0], [], []>} : vector<8x8xf32>, vector<8x8xf32>, vector<8x8xf32> -> vector<8x8xf32>
    %cst_249 = arith.constant 0.353553385 : f32
    %629 = vector.broadcast %cst_249 : f32 to vector<8x8xf32>
    %630 = arith.mulf %628, %629 : vector<8x8xf32>
    %cst_250 = arith.constant dense<0xFF800000> : vector<8xf32>
    %631 = vector.multi_reduction <maximumf>, %630, %cst_250 [1] : vector<8x8xf32> to vector<8xf32>
    %632 = vector.shape_cast %631 : vector<8xf32> to vector<8x1xf32>
    %633 = vector.broadcast %632 : vector<8x1xf32> to vector<8x8xf32>
    %634 = arith.subf %630, %633 : vector<8x8xf32>
    %635 = math.exp %634 : vector<8x8xf32>
    %cst_251 = arith.constant dense<0.000000e+00> : vector<8xf32>
    %636 = vector.multi_reduction <add>, %635, %cst_251 [1] : vector<8x8xf32> to vector<8xf32>
    %637 = vector.shape_cast %636 : vector<8xf32> to vector<8x1xf32>
    %638 = tpu.reciprocal %637 {approx = true} : vector<8x1xf32> -> vector<8x1xf32>
    %639 = vector.broadcast %638 : vector<8x1xf32> to vector<8x8xf32>
    %640 = arith.mulf %635, %639 : vector<8x8xf32>
    %cst_252 = arith.constant dense<0.000000e+00> : vector<8x8xf32>
    %641 = tpu.matmul %640, %627, %cst_252 {dimension_numbers = #tpu.dot_dimension_numbers<[1], [0], [0], [1], [0, 0, 1, 1], [], []>} : vector<8x8xf32>, vector<8x8xf32>, vector<8x8xf32> -> vector<8x8xf32>
    %642 = vector.extract_strided_slice %496 {offsets = [16, 0], sizes = [8, 32], strides = [1, 1]} : vector<32x32xf32> to vector<8x32xf32>
    %cst_253 = arith.constant dense<0.000000e+00> : vector<8x32xf32>
    %643 = tpu.matmul %641, %642, %cst_253 {dimension_numbers = #tpu.dot_dimension_numbers<[1], [0], [0], [1], [0, 0, 1, 1], [], []>} : vector<8x8xf32>, vector<8x32xf32>, vector<8x32xf32> -> vector<8x32xf32>
    %644 = arith.addf %624, %643 : vector<8x32xf32>
    %645 = vector.extract_strided_slice %502 {offsets = [8, 24], sizes = [8, 8], strides = [1, 1]} : vector<16x32xf32> to vector<8x8xf32>
    %646 = vector.extract_strided_slice %503 {offsets = [8, 24], sizes = [8, 8], strides = [1, 1]} : vector<16x32xf32> to vector<8x8xf32>
    %647 = vector.extract_strided_slice %504 {offsets = [8, 24], sizes = [8, 8], strides = [1, 1]} : vector<16x32xf32> to vector<8x8xf32>
    %cst_254 = arith.constant dense<0.000000e+00> : vector<8x8xf32>
    %648 = tpu.matmul %645, %646, %cst_254 {dimension_numbers = #tpu.dot_dimension_numbers<[1], [1], [0], [0], [0, 0, 1, 0], [], []>} : vector<8x8xf32>, vector<8x8xf32>, vector<8x8xf32> -> vector<8x8xf32>
    %cst_255 = arith.constant 0.353553385 : f32
    %649 = vector.broadcast %cst_255 : f32 to vector<8x8xf32>
    %650 = arith.mulf %648, %649 : vector<8x8xf32>
    %cst_256 = arith.constant dense<0xFF800000> : vector<8xf32>
    %651 = vector.multi_reduction <maximumf>, %650, %cst_256 [1] : vector<8x8xf32> to vector<8xf32>
    %652 = vector.shape_cast %651 : vector<8xf32> to vector<8x1xf32>
    %653 = vector.broadcast %652 : vector<8x1xf32> to vector<8x8xf32>
    %654 = arith.subf %650, %653 : vector<8x8xf32>
    %655 = math.exp %654 : vector<8x8xf32>
    %cst_257 = arith.constant dense<0.000000e+00> : vector<8xf32>
    %656 = vector.multi_reduction <add>, %655, %cst_257 [1] : vector<8x8xf32> to vector<8xf32>
    %657 = vector.shape_cast %656 : vector<8xf32> to vector<8x1xf32>
    %658 = tpu.reciprocal %657 {approx = true} : vector<8x1xf32> -> vector<8x1xf32>
    %659 = vector.broadcast %658 : vector<8x1xf32> to vector<8x8xf32>
    %660 = arith.mulf %655, %659 : vector<8x8xf32>
    %cst_258 = arith.constant dense<0.000000e+00> : vector<8x8xf32>
    %661 = tpu.matmul %660, %647, %cst_258 {dimension_numbers = #tpu.dot_dimension_numbers<[1], [0], [0], [1], [0, 0, 1, 1], [], []>} : vector<8x8xf32>, vector<8x8xf32>, vector<8x8xf32> -> vector<8x8xf32>
    %662 = vector.extract_strided_slice %496 {offsets = [24, 0], sizes = [8, 32], strides = [1, 1]} : vector<32x32xf32> to vector<8x32xf32>
    %cst_259 = arith.constant dense<0.000000e+00> : vector<8x32xf32>
    %663 = tpu.matmul %661, %662, %cst_259 {dimension_numbers = #tpu.dot_dimension_numbers<[1], [0], [0], [1], [0, 0, 1, 1], [], []>} : vector<8x8xf32>, vector<8x32xf32>, vector<8x32xf32> -> vector<8x32xf32>
    %664 = arith.addf %644, %663 : vector<8x32xf32>
    %665 = vector.broadcast %498 : vector<1x32xf32> to vector<8x32xf32>
    %666 = arith.addf %664, %665 : vector<8x32xf32>
    %667 = tpu.concatenate %585, %666 in 0 : vector<8x32xf32>, vector<8x32xf32> -> vector<16x32xf32>
    %c0_260 = arith.constant 0 : index
    %c0_261 = arith.constant 0 : index
    %c0_262 = arith.constant 0 : index
    %668 = vector.load %arg19[%c0_260, %c0_261, %c0_262] : memref<2x1x32xf32, #tpu.memory_space<vmem>>, vector<1x1x32xf32>
    %669 = vector.shape_cast %668 : vector<1x1x32xf32> to vector<1x32xf32>
    %c0_263 = arith.constant 0 : index
    %c0_264 = arith.constant 0 : index
    %c0_265 = arith.constant 0 : index
    %670 = vector.load %arg20[%c0_263, %c0_264, %c0_265] : memref<2x1x32xf32, #tpu.memory_space<vmem>>, vector<1x1x32xf32>
    %671 = vector.shape_cast %670 : vector<1x1x32xf32> to vector<1x32xf32>
    %672 = arith.addf %667, %490 : vector<16x32xf32>
    %cst_266 = arith.constant dense<0.000000e+00> : vector<16xf32>
    %673 = vector.multi_reduction <add>, %672, %cst_266 [1] : vector<16x32xf32> to vector<16xf32>
    %674 = vector.shape_cast %673 : vector<16xf32> to vector<16x1xf32>
    %cst_267 = arith.constant 3.200000e+01 : f32
    %675 = vector.broadcast %cst_267 : f32 to vector<16x1xf32>
    %676 = arith.divf %674, %675 : vector<16x1xf32>
    %677 = vector.broadcast %676 : vector<16x1xf32> to vector<16x32xf32>
    %678 = arith.subf %672, %677 : vector<16x32xf32>
    %679 = arith.mulf %678, %678 : vector<16x32xf32>
    %cst_268 = arith.constant dense<0.000000e+00> : vector<16xf32>
    %680 = vector.multi_reduction <add>, %679, %cst_268 [1] : vector<16x32xf32> to vector<16xf32>
    %681 = vector.shape_cast %680 : vector<16xf32> to vector<16x1xf32>
    %cst_269 = arith.constant 3.200000e+01 : f32
    %682 = vector.broadcast %cst_269 : f32 to vector<16x1xf32>
    %683 = arith.divf %681, %682 : vector<16x1xf32>
    %cst_270 = arith.constant 9.99999974E-6 : f32
    %684 = vector.broadcast %cst_270 : f32 to vector<16x1xf32>
    %685 = arith.addf %683, %684 : vector<16x1xf32>
    %686 = math.rsqrt %685 : vector<16x1xf32>
    %687 = vector.broadcast %686 : vector<16x1xf32> to vector<16x32xf32>
    %688 = arith.mulf %678, %687 : vector<16x32xf32>
    %689 = vector.broadcast %669 : vector<1x32xf32> to vector<16x32xf32>
    %690 = arith.mulf %688, %689 : vector<16x32xf32>
    %691 = vector.broadcast %671 : vector<1x32xf32> to vector<16x32xf32>
    %692 = arith.addf %690, %691 : vector<16x32xf32>
    %c0_271 = arith.constant 0 : index
    %c0_272 = arith.constant 0 : index
    %c0_273 = arith.constant 0 : index
    %693 = vector.load %arg21[%c0_271, %c0_272, %c0_273] : memref<2x32x96xf32, #tpu.memory_space<vmem>>, vector<1x32x96xf32>
    %694 = vector.shape_cast %693 : vector<1x32x96xf32> to vector<32x96xf32>
    %c0_274 = arith.constant 0 : index
    %c0_275 = arith.constant 0 : index
    %c0_276 = arith.constant 0 : index
    %695 = vector.load %arg22[%c0_274, %c0_275, %c0_276] : memref<2x1x96xf32, #tpu.memory_space<vmem>>, vector<1x1x96xf32>
    %696 = vector.shape_cast %695 : vector<1x1x96xf32> to vector<1x96xf32>
    %c0_277 = arith.constant 0 : index
    %c0_278 = arith.constant 0 : index
    %c0_279 = arith.constant 0 : index
    %697 = vector.load %arg23[%c0_277, %c0_278, %c0_279] : memref<2x32x32xf32, #tpu.memory_space<vmem>>, vector<1x32x32xf32>
    %698 = vector.shape_cast %697 : vector<1x32x32xf32> to vector<32x32xf32>
    %c0_280 = arith.constant 0 : index
    %c0_281 = arith.constant 0 : index
    %c0_282 = arith.constant 0 : index
    %699 = vector.load %arg24[%c0_280, %c0_281, %c0_282] : memref<2x1x32xf32, #tpu.memory_space<vmem>>, vector<1x1x32xf32>
    %700 = vector.shape_cast %699 : vector<1x1x32xf32> to vector<1x32xf32>
    %701 = vector.extract_strided_slice %694 {offsets = [0, 0], sizes = [32, 64], strides = [1, 1]} : vector<32x96xf32> to vector<32x64xf32>
    %cst_283 = arith.constant dense<0.000000e+00> : vector<16x64xf32>
    %702 = tpu.matmul %488, %701, %cst_283 {dimension_numbers = #tpu.dot_dimension_numbers<[1], [0], [0], [1], [0, 0, 1, 1], [], []>} : vector<16x32xf32>, vector<32x64xf32>, vector<16x64xf32> -> vector<16x64xf32>
    %703 = vector.extract_strided_slice %696 {offsets = [0, 0], sizes = [1, 64], strides = [1, 1]} : vector<1x96xf32> to vector<1x64xf32>
    %704 = vector.broadcast %703 : vector<1x64xf32> to vector<16x64xf32>
    %705 = arith.addf %702, %704 : vector<16x64xf32>
    %706 = vector.extract_strided_slice %705 {offsets = [0, 0], sizes = [16, 32], strides = [1, 1]} : vector<16x64xf32> to vector<16x32xf32>
    %707 = vector.extract_strided_slice %705 {offsets = [0, 32], sizes = [16, 32], strides = [1, 1]} : vector<16x64xf32> to vector<16x32xf32>
    %708 = vector.extract_strided_slice %694 {offsets = [0, 64], sizes = [32, 32], strides = [1, 1]} : vector<32x96xf32> to vector<32x32xf32>
    %cst_284 = arith.constant dense<0.000000e+00> : vector<16x32xf32>
    %709 = tpu.matmul %692, %708, %cst_284 {dimension_numbers = #tpu.dot_dimension_numbers<[1], [0], [0], [1], [0, 0, 1, 1], [], []>} : vector<16x32xf32>, vector<32x32xf32>, vector<16x32xf32> -> vector<16x32xf32>
    %710 = vector.extract_strided_slice %696 {offsets = [0, 64], sizes = [1, 32], strides = [1, 1]} : vector<1x96xf32> to vector<1x32xf32>
    %711 = vector.broadcast %710 : vector<1x32xf32> to vector<16x32xf32>
    %712 = arith.addf %709, %711 : vector<16x32xf32>
    %713 = vector.extract_strided_slice %706 {offsets = [0, 0], sizes = [8, 8], strides = [1, 1]} : vector<16x32xf32> to vector<8x8xf32>
    %714 = vector.extract_strided_slice %707 {offsets = [0, 0], sizes = [8, 8], strides = [1, 1]} : vector<16x32xf32> to vector<8x8xf32>
    %715 = vector.extract_strided_slice %712 {offsets = [0, 0], sizes = [8, 8], strides = [1, 1]} : vector<16x32xf32> to vector<8x8xf32>
    %cst_285 = arith.constant dense<0.000000e+00> : vector<8x8xf32>
    %716 = tpu.matmul %713, %714, %cst_285 {dimension_numbers = #tpu.dot_dimension_numbers<[1], [1], [0], [0], [0, 0, 1, 0], [], []>} : vector<8x8xf32>, vector<8x8xf32>, vector<8x8xf32> -> vector<8x8xf32>
    %cst_286 = arith.constant 0.353553385 : f32
    %717 = vector.broadcast %cst_286 : f32 to vector<8x8xf32>
    %718 = arith.mulf %716, %717 : vector<8x8xf32>
    %cst_287 = arith.constant dense<0xFF800000> : vector<8xf32>
    %719 = vector.multi_reduction <maximumf>, %718, %cst_287 [1] : vector<8x8xf32> to vector<8xf32>
    %720 = vector.shape_cast %719 : vector<8xf32> to vector<8x1xf32>
    %721 = vector.broadcast %720 : vector<8x1xf32> to vector<8x8xf32>
    %722 = arith.subf %718, %721 : vector<8x8xf32>
    %723 = math.exp %722 : vector<8x8xf32>
    %cst_288 = arith.constant dense<0.000000e+00> : vector<8xf32>
    %724 = vector.multi_reduction <add>, %723, %cst_288 [1] : vector<8x8xf32> to vector<8xf32>
    %725 = vector.shape_cast %724 : vector<8xf32> to vector<8x1xf32>
    %726 = tpu.reciprocal %725 {approx = true} : vector<8x1xf32> -> vector<8x1xf32>
    %727 = vector.broadcast %726 : vector<8x1xf32> to vector<8x8xf32>
    %728 = arith.mulf %723, %727 : vector<8x8xf32>
    %cst_289 = arith.constant dense<0.000000e+00> : vector<8x8xf32>
    %729 = tpu.matmul %728, %715, %cst_289 {dimension_numbers = #tpu.dot_dimension_numbers<[1], [0], [0], [1], [0, 0, 1, 1], [], []>} : vector<8x8xf32>, vector<8x8xf32>, vector<8x8xf32> -> vector<8x8xf32>
    %730 = vector.extract_strided_slice %698 {offsets = [0, 0], sizes = [8, 32], strides = [1, 1]} : vector<32x32xf32> to vector<8x32xf32>
    %cst_290 = arith.constant dense<0.000000e+00> : vector<8x32xf32>
    %731 = tpu.matmul %729, %730, %cst_290 {dimension_numbers = #tpu.dot_dimension_numbers<[1], [0], [0], [1], [0, 0, 1, 1], [], []>} : vector<8x8xf32>, vector<8x32xf32>, vector<8x32xf32> -> vector<8x32xf32>
    %732 = vector.extract_strided_slice %706 {offsets = [0, 8], sizes = [8, 8], strides = [1, 1]} : vector<16x32xf32> to vector<8x8xf32>
    %733 = vector.extract_strided_slice %707 {offsets = [0, 8], sizes = [8, 8], strides = [1, 1]} : vector<16x32xf32> to vector<8x8xf32>
    %734 = vector.extract_strided_slice %712 {offsets = [0, 8], sizes = [8, 8], strides = [1, 1]} : vector<16x32xf32> to vector<8x8xf32>
    %cst_291 = arith.constant dense<0.000000e+00> : vector<8x8xf32>
    %735 = tpu.matmul %732, %733, %cst_291 {dimension_numbers = #tpu.dot_dimension_numbers<[1], [1], [0], [0], [0, 0, 1, 0], [], []>} : vector<8x8xf32>, vector<8x8xf32>, vector<8x8xf32> -> vector<8x8xf32>
    %cst_292 = arith.constant 0.353553385 : f32
    %736 = vector.broadcast %cst_292 : f32 to vector<8x8xf32>
    %737 = arith.mulf %735, %736 : vector<8x8xf32>
    %cst_293 = arith.constant dense<0xFF800000> : vector<8xf32>
    %738 = vector.multi_reduction <maximumf>, %737, %cst_293 [1] : vector<8x8xf32> to vector<8xf32>
    %739 = vector.shape_cast %738 : vector<8xf32> to vector<8x1xf32>
    %740 = vector.broadcast %739 : vector<8x1xf32> to vector<8x8xf32>
    %741 = arith.subf %737, %740 : vector<8x8xf32>
    %742 = math.exp %741 : vector<8x8xf32>
    %cst_294 = arith.constant dense<0.000000e+00> : vector<8xf32>
    %743 = vector.multi_reduction <add>, %742, %cst_294 [1] : vector<8x8xf32> to vector<8xf32>
    %744 = vector.shape_cast %743 : vector<8xf32> to vector<8x1xf32>
    %745 = tpu.reciprocal %744 {approx = true} : vector<8x1xf32> -> vector<8x1xf32>
    %746 = vector.broadcast %745 : vector<8x1xf32> to vector<8x8xf32>
    %747 = arith.mulf %742, %746 : vector<8x8xf32>
    %cst_295 = arith.constant dense<0.000000e+00> : vector<8x8xf32>
    %748 = tpu.matmul %747, %734, %cst_295 {dimension_numbers = #tpu.dot_dimension_numbers<[1], [0], [0], [1], [0, 0, 1, 1], [], []>} : vector<8x8xf32>, vector<8x8xf32>, vector<8x8xf32> -> vector<8x8xf32>
    %749 = vector.extract_strided_slice %698 {offsets = [8, 0], sizes = [8, 32], strides = [1, 1]} : vector<32x32xf32> to vector<8x32xf32>
    %cst_296 = arith.constant dense<0.000000e+00> : vector<8x32xf32>
    %750 = tpu.matmul %748, %749, %cst_296 {dimension_numbers = #tpu.dot_dimension_numbers<[1], [0], [0], [1], [0, 0, 1, 1], [], []>} : vector<8x8xf32>, vector<8x32xf32>, vector<8x32xf32> -> vector<8x32xf32>
    %751 = arith.addf %731, %750 : vector<8x32xf32>
    %752 = vector.extract_strided_slice %706 {offsets = [0, 16], sizes = [8, 8], strides = [1, 1]} : vector<16x32xf32> to vector<8x8xf32>
    %753 = vector.extract_strided_slice %707 {offsets = [0, 16], sizes = [8, 8], strides = [1, 1]} : vector<16x32xf32> to vector<8x8xf32>
    %754 = vector.extract_strided_slice %712 {offsets = [0, 16], sizes = [8, 8], strides = [1, 1]} : vector<16x32xf32> to vector<8x8xf32>
    %cst_297 = arith.constant dense<0.000000e+00> : vector<8x8xf32>
    %755 = tpu.matmul %752, %753, %cst_297 {dimension_numbers = #tpu.dot_dimension_numbers<[1], [1], [0], [0], [0, 0, 1, 0], [], []>} : vector<8x8xf32>, vector<8x8xf32>, vector<8x8xf32> -> vector<8x8xf32>
    %cst_298 = arith.constant 0.353553385 : f32
    %756 = vector.broadcast %cst_298 : f32 to vector<8x8xf32>
    %757 = arith.mulf %755, %756 : vector<8x8xf32>
    %cst_299 = arith.constant dense<0xFF800000> : vector<8xf32>
    %758 = vector.multi_reduction <maximumf>, %757, %cst_299 [1] : vector<8x8xf32> to vector<8xf32>
    %759 = vector.shape_cast %758 : vector<8xf32> to vector<8x1xf32>
    %760 = vector.broadcast %759 : vector<8x1xf32> to vector<8x8xf32>
    %761 = arith.subf %757, %760 : vector<8x8xf32>
    %762 = math.exp %761 : vector<8x8xf32>
    %cst_300 = arith.constant dense<0.000000e+00> : vector<8xf32>
    %763 = vector.multi_reduction <add>, %762, %cst_300 [1] : vector<8x8xf32> to vector<8xf32>
    %764 = vector.shape_cast %763 : vector<8xf32> to vector<8x1xf32>
    %765 = tpu.reciprocal %764 {approx = true} : vector<8x1xf32> -> vector<8x1xf32>
    %766 = vector.broadcast %765 : vector<8x1xf32> to vector<8x8xf32>
    %767 = arith.mulf %762, %766 : vector<8x8xf32>
    %cst_301 = arith.constant dense<0.000000e+00> : vector<8x8xf32>
    %768 = tpu.matmul %767, %754, %cst_301 {dimension_numbers = #tpu.dot_dimension_numbers<[1], [0], [0], [1], [0, 0, 1, 1], [], []>} : vector<8x8xf32>, vector<8x8xf32>, vector<8x8xf32> -> vector<8x8xf32>
    %769 = vector.extract_strided_slice %698 {offsets = [16, 0], sizes = [8, 32], strides = [1, 1]} : vector<32x32xf32> to vector<8x32xf32>
    %cst_302 = arith.constant dense<0.000000e+00> : vector<8x32xf32>
    %770 = tpu.matmul %768, %769, %cst_302 {dimension_numbers = #tpu.dot_dimension_numbers<[1], [0], [0], [1], [0, 0, 1, 1], [], []>} : vector<8x8xf32>, vector<8x32xf32>, vector<8x32xf32> -> vector<8x32xf32>
    %771 = arith.addf %751, %770 : vector<8x32xf32>
    %772 = vector.extract_strided_slice %706 {offsets = [0, 24], sizes = [8, 8], strides = [1, 1]} : vector<16x32xf32> to vector<8x8xf32>
    %773 = vector.extract_strided_slice %707 {offsets = [0, 24], sizes = [8, 8], strides = [1, 1]} : vector<16x32xf32> to vector<8x8xf32>
    %774 = vector.extract_strided_slice %712 {offsets = [0, 24], sizes = [8, 8], strides = [1, 1]} : vector<16x32xf32> to vector<8x8xf32>
    %cst_303 = arith.constant dense<0.000000e+00> : vector<8x8xf32>
    %775 = tpu.matmul %772, %773, %cst_303 {dimension_numbers = #tpu.dot_dimension_numbers<[1], [1], [0], [0], [0, 0, 1, 0], [], []>} : vector<8x8xf32>, vector<8x8xf32>, vector<8x8xf32> -> vector<8x8xf32>
    %cst_304 = arith.constant 0.353553385 : f32
    %776 = vector.broadcast %cst_304 : f32 to vector<8x8xf32>
    %777 = arith.mulf %775, %776 : vector<8x8xf32>
    %cst_305 = arith.constant dense<0xFF800000> : vector<8xf32>
    %778 = vector.multi_reduction <maximumf>, %777, %cst_305 [1] : vector<8x8xf32> to vector<8xf32>
    %779 = vector.shape_cast %778 : vector<8xf32> to vector<8x1xf32>
    %780 = vector.broadcast %779 : vector<8x1xf32> to vector<8x8xf32>
    %781 = arith.subf %777, %780 : vector<8x8xf32>
    %782 = math.exp %781 : vector<8x8xf32>
    %cst_306 = arith.constant dense<0.000000e+00> : vector<8xf32>
    %783 = vector.multi_reduction <add>, %782, %cst_306 [1] : vector<8x8xf32> to vector<8xf32>
    %784 = vector.shape_cast %783 : vector<8xf32> to vector<8x1xf32>
    %785 = tpu.reciprocal %784 {approx = true} : vector<8x1xf32> -> vector<8x1xf32>
    %786 = vector.broadcast %785 : vector<8x1xf32> to vector<8x8xf32>
    %787 = arith.mulf %782, %786 : vector<8x8xf32>
    %cst_307 = arith.constant dense<0.000000e+00> : vector<8x8xf32>
    %788 = tpu.matmul %787, %774, %cst_307 {dimension_numbers = #tpu.dot_dimension_numbers<[1], [0], [0], [1], [0, 0, 1, 1], [], []>} : vector<8x8xf32>, vector<8x8xf32>, vector<8x8xf32> -> vector<8x8xf32>
    %789 = vector.extract_strided_slice %698 {offsets = [24, 0], sizes = [8, 32], strides = [1, 1]} : vector<32x32xf32> to vector<8x32xf32>
    %cst_308 = arith.constant dense<0.000000e+00> : vector<8x32xf32>
    %790 = tpu.matmul %788, %789, %cst_308 {dimension_numbers = #tpu.dot_dimension_numbers<[1], [0], [0], [1], [0, 0, 1, 1], [], []>} : vector<8x8xf32>, vector<8x32xf32>, vector<8x32xf32> -> vector<8x32xf32>
    %791 = arith.addf %771, %790 : vector<8x32xf32>
    %792 = vector.broadcast %700 : vector<1x32xf32> to vector<8x32xf32>
    %793 = arith.addf %791, %792 : vector<8x32xf32>
    %794 = vector.extract_strided_slice %706 {offsets = [8, 0], sizes = [8, 8], strides = [1, 1]} : vector<16x32xf32> to vector<8x8xf32>
    %795 = vector.extract_strided_slice %707 {offsets = [8, 0], sizes = [8, 8], strides = [1, 1]} : vector<16x32xf32> to vector<8x8xf32>
    %796 = vector.extract_strided_slice %712 {offsets = [8, 0], sizes = [8, 8], strides = [1, 1]} : vector<16x32xf32> to vector<8x8xf32>
    %cst_309 = arith.constant dense<0.000000e+00> : vector<8x8xf32>
    %797 = tpu.matmul %794, %795, %cst_309 {dimension_numbers = #tpu.dot_dimension_numbers<[1], [1], [0], [0], [0, 0, 1, 0], [], []>} : vector<8x8xf32>, vector<8x8xf32>, vector<8x8xf32> -> vector<8x8xf32>
    %cst_310 = arith.constant 0.353553385 : f32
    %798 = vector.broadcast %cst_310 : f32 to vector<8x8xf32>
    %799 = arith.mulf %797, %798 : vector<8x8xf32>
    %cst_311 = arith.constant dense<0xFF800000> : vector<8xf32>
    %800 = vector.multi_reduction <maximumf>, %799, %cst_311 [1] : vector<8x8xf32> to vector<8xf32>
    %801 = vector.shape_cast %800 : vector<8xf32> to vector<8x1xf32>
    %802 = vector.broadcast %801 : vector<8x1xf32> to vector<8x8xf32>
    %803 = arith.subf %799, %802 : vector<8x8xf32>
    %804 = math.exp %803 : vector<8x8xf32>
    %cst_312 = arith.constant dense<0.000000e+00> : vector<8xf32>
    %805 = vector.multi_reduction <add>, %804, %cst_312 [1] : vector<8x8xf32> to vector<8xf32>
    %806 = vector.shape_cast %805 : vector<8xf32> to vector<8x1xf32>
    %807 = tpu.reciprocal %806 {approx = true} : vector<8x1xf32> -> vector<8x1xf32>
    %808 = vector.broadcast %807 : vector<8x1xf32> to vector<8x8xf32>
    %809 = arith.mulf %804, %808 : vector<8x8xf32>
    %cst_313 = arith.constant dense<0.000000e+00> : vector<8x8xf32>
    %810 = tpu.matmul %809, %796, %cst_313 {dimension_numbers = #tpu.dot_dimension_numbers<[1], [0], [0], [1], [0, 0, 1, 1], [], []>} : vector<8x8xf32>, vector<8x8xf32>, vector<8x8xf32> -> vector<8x8xf32>
    %811 = vector.extract_strided_slice %698 {offsets = [0, 0], sizes = [8, 32], strides = [1, 1]} : vector<32x32xf32> to vector<8x32xf32>
    %cst_314 = arith.constant dense<0.000000e+00> : vector<8x32xf32>
    %812 = tpu.matmul %810, %811, %cst_314 {dimension_numbers = #tpu.dot_dimension_numbers<[1], [0], [0], [1], [0, 0, 1, 1], [], []>} : vector<8x8xf32>, vector<8x32xf32>, vector<8x32xf32> -> vector<8x32xf32>
    %813 = vector.extract_strided_slice %706 {offsets = [8, 8], sizes = [8, 8], strides = [1, 1]} : vector<16x32xf32> to vector<8x8xf32>
    %814 = vector.extract_strided_slice %707 {offsets = [8, 8], sizes = [8, 8], strides = [1, 1]} : vector<16x32xf32> to vector<8x8xf32>
    %815 = vector.extract_strided_slice %712 {offsets = [8, 8], sizes = [8, 8], strides = [1, 1]} : vector<16x32xf32> to vector<8x8xf32>
    %cst_315 = arith.constant dense<0.000000e+00> : vector<8x8xf32>
    %816 = tpu.matmul %813, %814, %cst_315 {dimension_numbers = #tpu.dot_dimension_numbers<[1], [1], [0], [0], [0, 0, 1, 0], [], []>} : vector<8x8xf32>, vector<8x8xf32>, vector<8x8xf32> -> vector<8x8xf32>
    %cst_316 = arith.constant 0.353553385 : f32
    %817 = vector.broadcast %cst_316 : f32 to vector<8x8xf32>
    %818 = arith.mulf %816, %817 : vector<8x8xf32>
    %cst_317 = arith.constant dense<0xFF800000> : vector<8xf32>
    %819 = vector.multi_reduction <maximumf>, %818, %cst_317 [1] : vector<8x8xf32> to vector<8xf32>
    %820 = vector.shape_cast %819 : vector<8xf32> to vector<8x1xf32>
    %821 = vector.broadcast %820 : vector<8x1xf32> to vector<8x8xf32>
    %822 = arith.subf %818, %821 : vector<8x8xf32>
    %823 = math.exp %822 : vector<8x8xf32>
    %cst_318 = arith.constant dense<0.000000e+00> : vector<8xf32>
    %824 = vector.multi_reduction <add>, %823, %cst_318 [1] : vector<8x8xf32> to vector<8xf32>
    %825 = vector.shape_cast %824 : vector<8xf32> to vector<8x1xf32>
    %826 = tpu.reciprocal %825 {approx = true} : vector<8x1xf32> -> vector<8x1xf32>
    %827 = vector.broadcast %826 : vector<8x1xf32> to vector<8x8xf32>
    %828 = arith.mulf %823, %827 : vector<8x8xf32>
    %cst_319 = arith.constant dense<0.000000e+00> : vector<8x8xf32>
    %829 = tpu.matmul %828, %815, %cst_319 {dimension_numbers = #tpu.dot_dimension_numbers<[1], [0], [0], [1], [0, 0, 1, 1], [], []>} : vector<8x8xf32>, vector<8x8xf32>, vector<8x8xf32> -> vector<8x8xf32>
    %830 = vector.extract_strided_slice %698 {offsets = [8, 0], sizes = [8, 32], strides = [1, 1]} : vector<32x32xf32> to vector<8x32xf32>
    %cst_320 = arith.constant dense<0.000000e+00> : vector<8x32xf32>
    %831 = tpu.matmul %829, %830, %cst_320 {dimension_numbers = #tpu.dot_dimension_numbers<[1], [0], [0], [1], [0, 0, 1, 1], [], []>} : vector<8x8xf32>, vector<8x32xf32>, vector<8x32xf32> -> vector<8x32xf32>
    %832 = arith.addf %812, %831 : vector<8x32xf32>
    %833 = vector.extract_strided_slice %706 {offsets = [8, 16], sizes = [8, 8], strides = [1, 1]} : vector<16x32xf32> to vector<8x8xf32>
    %834 = vector.extract_strided_slice %707 {offsets = [8, 16], sizes = [8, 8], strides = [1, 1]} : vector<16x32xf32> to vector<8x8xf32>
    %835 = vector.extract_strided_slice %712 {offsets = [8, 16], sizes = [8, 8], strides = [1, 1]} : vector<16x32xf32> to vector<8x8xf32>
    %cst_321 = arith.constant dense<0.000000e+00> : vector<8x8xf32>
    %836 = tpu.matmul %833, %834, %cst_321 {dimension_numbers = #tpu.dot_dimension_numbers<[1], [1], [0], [0], [0, 0, 1, 0], [], []>} : vector<8x8xf32>, vector<8x8xf32>, vector<8x8xf32> -> vector<8x8xf32>
    %cst_322 = arith.constant 0.353553385 : f32
    %837 = vector.broadcast %cst_322 : f32 to vector<8x8xf32>
    %838 = arith.mulf %836, %837 : vector<8x8xf32>
    %cst_323 = arith.constant dense<0xFF800000> : vector<8xf32>
    %839 = vector.multi_reduction <maximumf>, %838, %cst_323 [1] : vector<8x8xf32> to vector<8xf32>
    %840 = vector.shape_cast %839 : vector<8xf32> to vector<8x1xf32>
    %841 = vector.broadcast %840 : vector<8x1xf32> to vector<8x8xf32>
    %842 = arith.subf %838, %841 : vector<8x8xf32>
    %843 = math.exp %842 : vector<8x8xf32>
    %cst_324 = arith.constant dense<0.000000e+00> : vector<8xf32>
    %844 = vector.multi_reduction <add>, %843, %cst_324 [1] : vector<8x8xf32> to vector<8xf32>
    %845 = vector.shape_cast %844 : vector<8xf32> to vector<8x1xf32>
    %846 = tpu.reciprocal %845 {approx = true} : vector<8x1xf32> -> vector<8x1xf32>
    %847 = vector.broadcast %846 : vector<8x1xf32> to vector<8x8xf32>
    %848 = arith.mulf %843, %847 : vector<8x8xf32>
    %cst_325 = arith.constant dense<0.000000e+00> : vector<8x8xf32>
    %849 = tpu.matmul %848, %835, %cst_325 {dimension_numbers = #tpu.dot_dimension_numbers<[1], [0], [0], [1], [0, 0, 1, 1], [], []>} : vector<8x8xf32>, vector<8x8xf32>, vector<8x8xf32> -> vector<8x8xf32>
    %850 = vector.extract_strided_slice %698 {offsets = [16, 0], sizes = [8, 32], strides = [1, 1]} : vector<32x32xf32> to vector<8x32xf32>
    %cst_326 = arith.constant dense<0.000000e+00> : vector<8x32xf32>
    %851 = tpu.matmul %849, %850, %cst_326 {dimension_numbers = #tpu.dot_dimension_numbers<[1], [0], [0], [1], [0, 0, 1, 1], [], []>} : vector<8x8xf32>, vector<8x32xf32>, vector<8x32xf32> -> vector<8x32xf32>
    %852 = arith.addf %832, %851 : vector<8x32xf32>
    %853 = vector.extract_strided_slice %706 {offsets = [8, 24], sizes = [8, 8], strides = [1, 1]} : vector<16x32xf32> to vector<8x8xf32>
    %854 = vector.extract_strided_slice %707 {offsets = [8, 24], sizes = [8, 8], strides = [1, 1]} : vector<16x32xf32> to vector<8x8xf32>
    %855 = vector.extract_strided_slice %712 {offsets = [8, 24], sizes = [8, 8], strides = [1, 1]} : vector<16x32xf32> to vector<8x8xf32>
    %cst_327 = arith.constant dense<0.000000e+00> : vector<8x8xf32>
    %856 = tpu.matmul %853, %854, %cst_327 {dimension_numbers = #tpu.dot_dimension_numbers<[1], [1], [0], [0], [0, 0, 1, 0], [], []>} : vector<8x8xf32>, vector<8x8xf32>, vector<8x8xf32> -> vector<8x8xf32>
    %cst_328 = arith.constant 0.353553385 : f32
    %857 = vector.broadcast %cst_328 : f32 to vector<8x8xf32>
    %858 = arith.mulf %856, %857 : vector<8x8xf32>
    %cst_329 = arith.constant dense<0xFF800000> : vector<8xf32>
    %859 = vector.multi_reduction <maximumf>, %858, %cst_329 [1] : vector<8x8xf32> to vector<8xf32>
    %860 = vector.shape_cast %859 : vector<8xf32> to vector<8x1xf32>
    %861 = vector.broadcast %860 : vector<8x1xf32> to vector<8x8xf32>
    %862 = arith.subf %858, %861 : vector<8x8xf32>
    %863 = math.exp %862 : vector<8x8xf32>
    %cst_330 = arith.constant dense<0.000000e+00> : vector<8xf32>
    %864 = vector.multi_reduction <add>, %863, %cst_330 [1] : vector<8x8xf32> to vector<8xf32>
    %865 = vector.shape_cast %864 : vector<8xf32> to vector<8x1xf32>
    %866 = tpu.reciprocal %865 {approx = true} : vector<8x1xf32> -> vector<8x1xf32>
    %867 = vector.broadcast %866 : vector<8x1xf32> to vector<8x8xf32>
    %868 = arith.mulf %863, %867 : vector<8x8xf32>
    %cst_331 = arith.constant dense<0.000000e+00> : vector<8x8xf32>
    %869 = tpu.matmul %868, %855, %cst_331 {dimension_numbers = #tpu.dot_dimension_numbers<[1], [0], [0], [1], [0, 0, 1, 1], [], []>} : vector<8x8xf32>, vector<8x8xf32>, vector<8x8xf32> -> vector<8x8xf32>
    %870 = vector.extract_strided_slice %698 {offsets = [24, 0], sizes = [8, 32], strides = [1, 1]} : vector<32x32xf32> to vector<8x32xf32>
    %cst_332 = arith.constant dense<0.000000e+00> : vector<8x32xf32>
    %871 = tpu.matmul %869, %870, %cst_332 {dimension_numbers = #tpu.dot_dimension_numbers<[1], [0], [0], [1], [0, 0, 1, 1], [], []>} : vector<8x8xf32>, vector<8x32xf32>, vector<8x32xf32> -> vector<8x32xf32>
    %872 = arith.addf %852, %871 : vector<8x32xf32>
    %873 = vector.broadcast %700 : vector<1x32xf32> to vector<8x32xf32>
    %874 = arith.addf %872, %873 : vector<8x32xf32>
    %875 = tpu.concatenate %793, %874 in 0 : vector<8x32xf32>, vector<8x32xf32> -> vector<16x32xf32>
    %c0_333 = arith.constant 0 : index
    %c0_334 = arith.constant 0 : index
    %c0_335 = arith.constant 0 : index
    %876 = vector.load %arg25[%c0_333, %c0_334, %c0_335] : memref<2x1x32xf32, #tpu.memory_space<vmem>>, vector<1x1x32xf32>
    %877 = vector.shape_cast %876 : vector<1x1x32xf32> to vector<1x32xf32>
    %c0_336 = arith.constant 0 : index
    %c0_337 = arith.constant 0 : index
    %c0_338 = arith.constant 0 : index
    %878 = vector.load %arg26[%c0_336, %c0_337, %c0_338] : memref<2x1x32xf32, #tpu.memory_space<vmem>>, vector<1x1x32xf32>
    %879 = vector.shape_cast %878 : vector<1x1x32xf32> to vector<1x32xf32>
    %880 = arith.addf %875, %692 : vector<16x32xf32>
    %cst_339 = arith.constant dense<0.000000e+00> : vector<16xf32>
    %881 = vector.multi_reduction <add>, %880, %cst_339 [1] : vector<16x32xf32> to vector<16xf32>
    %882 = vector.shape_cast %881 : vector<16xf32> to vector<16x1xf32>
    %cst_340 = arith.constant 3.200000e+01 : f32
    %883 = vector.broadcast %cst_340 : f32 to vector<16x1xf32>
    %884 = arith.divf %882, %883 : vector<16x1xf32>
    %885 = vector.broadcast %884 : vector<16x1xf32> to vector<16x32xf32>
    %886 = arith.subf %880, %885 : vector<16x32xf32>
    %887 = arith.mulf %886, %886 : vector<16x32xf32>
    %cst_341 = arith.constant dense<0.000000e+00> : vector<16xf32>
    %888 = vector.multi_reduction <add>, %887, %cst_341 [1] : vector<16x32xf32> to vector<16xf32>
    %889 = vector.shape_cast %888 : vector<16xf32> to vector<16x1xf32>
    %cst_342 = arith.constant 3.200000e+01 : f32
    %890 = vector.broadcast %cst_342 : f32 to vector<16x1xf32>
    %891 = arith.divf %889, %890 : vector<16x1xf32>
    %cst_343 = arith.constant 9.99999974E-6 : f32
    %892 = vector.broadcast %cst_343 : f32 to vector<16x1xf32>
    %893 = arith.addf %891, %892 : vector<16x1xf32>
    %894 = math.rsqrt %893 : vector<16x1xf32>
    %895 = vector.broadcast %894 : vector<16x1xf32> to vector<16x32xf32>
    %896 = arith.mulf %886, %895 : vector<16x32xf32>
    %897 = vector.broadcast %877 : vector<1x32xf32> to vector<16x32xf32>
    %898 = arith.mulf %896, %897 : vector<16x32xf32>
    %899 = vector.broadcast %879 : vector<1x32xf32> to vector<16x32xf32>
    %900 = arith.addf %898, %899 : vector<16x32xf32>
    %c0_344 = arith.constant 0 : index
    %c0_345 = arith.constant 0 : index
    %c0_346 = arith.constant 0 : index
    %901 = vector.load %arg27[%c0_344, %c0_345, %c0_346] : memref<2x32x64xf32, #tpu.memory_space<vmem>>, vector<1x32x64xf32>
    %902 = vector.shape_cast %901 : vector<1x32x64xf32> to vector<32x64xf32>
    %c0_347 = arith.constant 0 : index
    %c0_348 = arith.constant 0 : index
    %c0_349 = arith.constant 0 : index
    %903 = vector.load %arg28[%c0_347, %c0_348, %c0_349] : memref<2x1x64xf32, #tpu.memory_space<vmem>>, vector<1x1x64xf32>
    %904 = vector.shape_cast %903 : vector<1x1x64xf32> to vector<1x64xf32>
    %cst_350 = arith.constant dense<0.000000e+00> : vector<16x64xf32>
    %905 = tpu.matmul %900, %902, %cst_350 {dimension_numbers = #tpu.dot_dimension_numbers<[1], [0], [0], [1], [0, 0, 1, 1], [], []>} : vector<16x32xf32>, vector<32x64xf32>, vector<16x64xf32> -> vector<16x64xf32>
    %906 = vector.broadcast %904 : vector<1x64xf32> to vector<16x64xf32>
    %907 = arith.addf %905, %906 : vector<16x64xf32>
    %cst_351 = arith.constant 0.000000e+00 : f32
    %908 = vector.broadcast %cst_351 : f32 to vector<16x64xf32>
    %909 = arith.maximumf %907, %908 : vector<16x64xf32>
    %c0_352 = arith.constant 0 : index
    %c0_353 = arith.constant 0 : index
    %c0_354 = arith.constant 0 : index
    %910 = vector.load %arg29[%c0_352, %c0_353, %c0_354] : memref<2x64x32xf32, #tpu.memory_space<vmem>>, vector<1x64x32xf32>
    %911 = vector.shape_cast %910 : vector<1x64x32xf32> to vector<64x32xf32>
    %c0_355 = arith.constant 0 : index
    %c0_356 = arith.constant 0 : index
    %c0_357 = arith.constant 0 : index
    %912 = vector.load %arg30[%c0_355, %c0_356, %c0_357] : memref<2x1x32xf32, #tpu.memory_space<vmem>>, vector<1x1x32xf32>
    %913 = vector.shape_cast %912 : vector<1x1x32xf32> to vector<1x32xf32>
    %cst_358 = arith.constant dense<0.000000e+00> : vector<16x32xf32>
    %914 = tpu.matmul %909, %911, %cst_358 {dimension_numbers = #tpu.dot_dimension_numbers<[1], [0], [0], [1], [0, 0, 1, 1], [], []>} : vector<16x64xf32>, vector<64x32xf32>, vector<16x32xf32> -> vector<16x32xf32>
    %915 = vector.broadcast %913 : vector<1x32xf32> to vector<16x32xf32>
    %916 = arith.addf %914, %915 : vector<16x32xf32>
    %c0_359 = arith.constant 0 : index
    %c0_360 = arith.constant 0 : index
    %c0_361 = arith.constant 0 : index
    %917 = vector.load %arg31[%c0_359, %c0_360, %c0_361] : memref<2x1x32xf32, #tpu.memory_space<vmem>>, vector<1x1x32xf32>
    %918 = vector.shape_cast %917 : vector<1x1x32xf32> to vector<1x32xf32>
    %c0_362 = arith.constant 0 : index
    %c0_363 = arith.constant 0 : index
    %c0_364 = arith.constant 0 : index
    %919 = vector.load %arg32[%c0_362, %c0_363, %c0_364] : memref<2x1x32xf32, #tpu.memory_space<vmem>>, vector<1x1x32xf32>
    %920 = vector.shape_cast %919 : vector<1x1x32xf32> to vector<1x32xf32>
    %921 = arith.addf %916, %900 : vector<16x32xf32>
    %cst_365 = arith.constant dense<0.000000e+00> : vector<16xf32>
    %922 = vector.multi_reduction <add>, %921, %cst_365 [1] : vector<16x32xf32> to vector<16xf32>
    %923 = vector.shape_cast %922 : vector<16xf32> to vector<16x1xf32>
    %cst_366 = arith.constant 3.200000e+01 : f32
    %924 = vector.broadcast %cst_366 : f32 to vector<16x1xf32>
    %925 = arith.divf %923, %924 : vector<16x1xf32>
    %926 = vector.broadcast %925 : vector<16x1xf32> to vector<16x32xf32>
    %927 = arith.subf %921, %926 : vector<16x32xf32>
    %928 = arith.mulf %927, %927 : vector<16x32xf32>
    %cst_367 = arith.constant dense<0.000000e+00> : vector<16xf32>
    %929 = vector.multi_reduction <add>, %928, %cst_367 [1] : vector<16x32xf32> to vector<16xf32>
    %930 = vector.shape_cast %929 : vector<16xf32> to vector<16x1xf32>
    %cst_368 = arith.constant 3.200000e+01 : f32
    %931 = vector.broadcast %cst_368 : f32 to vector<16x1xf32>
    %932 = arith.divf %930, %931 : vector<16x1xf32>
    %cst_369 = arith.constant 9.99999974E-6 : f32
    %933 = vector.broadcast %cst_369 : f32 to vector<16x1xf32>
    %934 = arith.addf %932, %933 : vector<16x1xf32>
    %935 = math.rsqrt %934 : vector<16x1xf32>
    %936 = vector.broadcast %935 : vector<16x1xf32> to vector<16x32xf32>
    %937 = arith.mulf %927, %936 : vector<16x32xf32>
    %938 = vector.broadcast %918 : vector<1x32xf32> to vector<16x32xf32>
    %939 = arith.mulf %937, %938 : vector<16x32xf32>
    %940 = vector.broadcast %920 : vector<1x32xf32> to vector<16x32xf32>
    %941 = arith.addf %939, %940 : vector<16x32xf32>
    %c1_370 = arith.constant 1 : index
    %c0_371 = arith.constant 0 : index
    %c0_372 = arith.constant 0 : index
    %942 = vector.load %arg15[%c1_370, %c0_371, %c0_372] : memref<2x32x96xf32, #tpu.memory_space<vmem>>, vector<1x32x96xf32>
    %943 = vector.shape_cast %942 : vector<1x32x96xf32> to vector<32x96xf32>
    %c1_373 = arith.constant 1 : index
    %c0_374 = arith.constant 0 : index
    %c0_375 = arith.constant 0 : index
    %944 = vector.load %arg16[%c1_373, %c0_374, %c0_375] : memref<2x1x96xf32, #tpu.memory_space<vmem>>, vector<1x1x96xf32>
    %945 = vector.shape_cast %944 : vector<1x1x96xf32> to vector<1x96xf32>
    %c1_376 = arith.constant 1 : index
    %c0_377 = arith.constant 0 : index
    %c0_378 = arith.constant 0 : index
    %946 = vector.load %arg17[%c1_376, %c0_377, %c0_378] : memref<2x32x32xf32, #tpu.memory_space<vmem>>, vector<1x32x32xf32>
    %947 = vector.shape_cast %946 : vector<1x32x32xf32> to vector<32x32xf32>
    %c1_379 = arith.constant 1 : index
    %c0_380 = arith.constant 0 : index
    %c0_381 = arith.constant 0 : index
    %948 = vector.load %arg18[%c1_379, %c0_380, %c0_381] : memref<2x1x32xf32, #tpu.memory_space<vmem>>, vector<1x1x32xf32>
    %949 = vector.shape_cast %948 : vector<1x1x32xf32> to vector<1x32xf32>
    %cst_382 = arith.constant dense<0.000000e+00> : vector<16x96xf32>
    %950 = tpu.matmul %941, %943, %cst_382 {dimension_numbers = #tpu.dot_dimension_numbers<[1], [0], [0], [1], [0, 0, 1, 1], [], []>} : vector<16x32xf32>, vector<32x96xf32>, vector<16x96xf32> -> vector<16x96xf32>
    %951 = vector.broadcast %945 : vector<1x96xf32> to vector<16x96xf32>
    %952 = arith.addf %950, %951 : vector<16x96xf32>
    %953 = vector.extract_strided_slice %952 {offsets = [0, 0], sizes = [16, 32], strides = [1, 1]} : vector<16x96xf32> to vector<16x32xf32>
    %954 = vector.extract_strided_slice %952 {offsets = [0, 32], sizes = [16, 32], strides = [1, 1]} : vector<16x96xf32> to vector<16x32xf32>
    %955 = vector.extract_strided_slice %952 {offsets = [0, 64], sizes = [16, 32], strides = [1, 1]} : vector<16x96xf32> to vector<16x32xf32>
    %956 = vector.extract_strided_slice %953 {offsets = [0, 0], sizes = [8, 8], strides = [1, 1]} : vector<16x32xf32> to vector<8x8xf32>
    %957 = vector.extract_strided_slice %954 {offsets = [0, 0], sizes = [8, 8], strides = [1, 1]} : vector<16x32xf32> to vector<8x8xf32>
    %958 = vector.extract_strided_slice %955 {offsets = [0, 0], sizes = [8, 8], strides = [1, 1]} : vector<16x32xf32> to vector<8x8xf32>
    %cst_383 = arith.constant dense<0.000000e+00> : vector<8x8xf32>
    %959 = tpu.matmul %956, %957, %cst_383 {dimension_numbers = #tpu.dot_dimension_numbers<[1], [1], [0], [0], [0, 0, 1, 0], [], []>} : vector<8x8xf32>, vector<8x8xf32>, vector<8x8xf32> -> vector<8x8xf32>
    %cst_384 = arith.constant 0.353553385 : f32
    %960 = vector.broadcast %cst_384 : f32 to vector<8x8xf32>
    %961 = arith.mulf %959, %960 : vector<8x8xf32>
    %cst_385 = arith.constant dense<0xFF800000> : vector<8xf32>
    %962 = vector.multi_reduction <maximumf>, %961, %cst_385 [1] : vector<8x8xf32> to vector<8xf32>
    %963 = vector.shape_cast %962 : vector<8xf32> to vector<8x1xf32>
    %964 = vector.broadcast %963 : vector<8x1xf32> to vector<8x8xf32>
    %965 = arith.subf %961, %964 : vector<8x8xf32>
    %966 = math.exp %965 : vector<8x8xf32>
    %cst_386 = arith.constant dense<0.000000e+00> : vector<8xf32>
    %967 = vector.multi_reduction <add>, %966, %cst_386 [1] : vector<8x8xf32> to vector<8xf32>
    %968 = vector.shape_cast %967 : vector<8xf32> to vector<8x1xf32>
    %969 = tpu.reciprocal %968 {approx = true} : vector<8x1xf32> -> vector<8x1xf32>
    %970 = vector.broadcast %969 : vector<8x1xf32> to vector<8x8xf32>
    %971 = arith.mulf %966, %970 : vector<8x8xf32>
    %cst_387 = arith.constant dense<0.000000e+00> : vector<8x8xf32>
    %972 = tpu.matmul %971, %958, %cst_387 {dimension_numbers = #tpu.dot_dimension_numbers<[1], [0], [0], [1], [0, 0, 1, 1], [], []>} : vector<8x8xf32>, vector<8x8xf32>, vector<8x8xf32> -> vector<8x8xf32>
    %973 = vector.extract_strided_slice %947 {offsets = [0, 0], sizes = [8, 32], strides = [1, 1]} : vector<32x32xf32> to vector<8x32xf32>
    %cst_388 = arith.constant dense<0.000000e+00> : vector<8x32xf32>
    %974 = tpu.matmul %972, %973, %cst_388 {dimension_numbers = #tpu.dot_dimension_numbers<[1], [0], [0], [1], [0, 0, 1, 1], [], []>} : vector<8x8xf32>, vector<8x32xf32>, vector<8x32xf32> -> vector<8x32xf32>
    %975 = vector.extract_strided_slice %953 {offsets = [0, 8], sizes = [8, 8], strides = [1, 1]} : vector<16x32xf32> to vector<8x8xf32>
    %976 = vector.extract_strided_slice %954 {offsets = [0, 8], sizes = [8, 8], strides = [1, 1]} : vector<16x32xf32> to vector<8x8xf32>
    %977 = vector.extract_strided_slice %955 {offsets = [0, 8], sizes = [8, 8], strides = [1, 1]} : vector<16x32xf32> to vector<8x8xf32>
    %cst_389 = arith.constant dense<0.000000e+00> : vector<8x8xf32>
    %978 = tpu.matmul %975, %976, %cst_389 {dimension_numbers = #tpu.dot_dimension_numbers<[1], [1], [0], [0], [0, 0, 1, 0], [], []>} : vector<8x8xf32>, vector<8x8xf32>, vector<8x8xf32> -> vector<8x8xf32>
    %cst_390 = arith.constant 0.353553385 : f32
    %979 = vector.broadcast %cst_390 : f32 to vector<8x8xf32>
    %980 = arith.mulf %978, %979 : vector<8x8xf32>
    %cst_391 = arith.constant dense<0xFF800000> : vector<8xf32>
    %981 = vector.multi_reduction <maximumf>, %980, %cst_391 [1] : vector<8x8xf32> to vector<8xf32>
    %982 = vector.shape_cast %981 : vector<8xf32> to vector<8x1xf32>
    %983 = vector.broadcast %982 : vector<8x1xf32> to vector<8x8xf32>
    %984 = arith.subf %980, %983 : vector<8x8xf32>
    %985 = math.exp %984 : vector<8x8xf32>
    %cst_392 = arith.constant dense<0.000000e+00> : vector<8xf32>
    %986 = vector.multi_reduction <add>, %985, %cst_392 [1] : vector<8x8xf32> to vector<8xf32>
    %987 = vector.shape_cast %986 : vector<8xf32> to vector<8x1xf32>
    %988 = tpu.reciprocal %987 {approx = true} : vector<8x1xf32> -> vector<8x1xf32>
    %989 = vector.broadcast %988 : vector<8x1xf32> to vector<8x8xf32>
    %990 = arith.mulf %985, %989 : vector<8x8xf32>
    %cst_393 = arith.constant dense<0.000000e+00> : vector<8x8xf32>
    %991 = tpu.matmul %990, %977, %cst_393 {dimension_numbers = #tpu.dot_dimension_numbers<[1], [0], [0], [1], [0, 0, 1, 1], [], []>} : vector<8x8xf32>, vector<8x8xf32>, vector<8x8xf32> -> vector<8x8xf32>
    %992 = vector.extract_strided_slice %947 {offsets = [8, 0], sizes = [8, 32], strides = [1, 1]} : vector<32x32xf32> to vector<8x32xf32>
    %cst_394 = arith.constant dense<0.000000e+00> : vector<8x32xf32>
    %993 = tpu.matmul %991, %992, %cst_394 {dimension_numbers = #tpu.dot_dimension_numbers<[1], [0], [0], [1], [0, 0, 1, 1], [], []>} : vector<8x8xf32>, vector<8x32xf32>, vector<8x32xf32> -> vector<8x32xf32>
    %994 = arith.addf %974, %993 : vector<8x32xf32>
    %995 = vector.extract_strided_slice %953 {offsets = [0, 16], sizes = [8, 8], strides = [1, 1]} : vector<16x32xf32> to vector<8x8xf32>
    %996 = vector.extract_strided_slice %954 {offsets = [0, 16], sizes = [8, 8], strides = [1, 1]} : vector<16x32xf32> to vector<8x8xf32>
    %997 = vector.extract_strided_slice %955 {offsets = [0, 16], sizes = [8, 8], strides = [1, 1]} : vector<16x32xf32> to vector<8x8xf32>
    %cst_395 = arith.constant dense<0.000000e+00> : vector<8x8xf32>
    %998 = tpu.matmul %995, %996, %cst_395 {dimension_numbers = #tpu.dot_dimension_numbers<[1], [1], [0], [0], [0, 0, 1, 0], [], []>} : vector<8x8xf32>, vector<8x8xf32>, vector<8x8xf32> -> vector<8x8xf32>
    %cst_396 = arith.constant 0.353553385 : f32
    %999 = vector.broadcast %cst_396 : f32 to vector<8x8xf32>
    %1000 = arith.mulf %998, %999 : vector<8x8xf32>
    %cst_397 = arith.constant dense<0xFF800000> : vector<8xf32>
    %1001 = vector.multi_reduction <maximumf>, %1000, %cst_397 [1] : vector<8x8xf32> to vector<8xf32>
    %1002 = vector.shape_cast %1001 : vector<8xf32> to vector<8x1xf32>
    %1003 = vector.broadcast %1002 : vector<8x1xf32> to vector<8x8xf32>
    %1004 = arith.subf %1000, %1003 : vector<8x8xf32>
    %1005 = math.exp %1004 : vector<8x8xf32>
    %cst_398 = arith.constant dense<0.000000e+00> : vector<8xf32>
    %1006 = vector.multi_reduction <add>, %1005, %cst_398 [1] : vector<8x8xf32> to vector<8xf32>
    %1007 = vector.shape_cast %1006 : vector<8xf32> to vector<8x1xf32>
    %1008 = tpu.reciprocal %1007 {approx = true} : vector<8x1xf32> -> vector<8x1xf32>
    %1009 = vector.broadcast %1008 : vector<8x1xf32> to vector<8x8xf32>
    %1010 = arith.mulf %1005, %1009 : vector<8x8xf32>
    %cst_399 = arith.constant dense<0.000000e+00> : vector<8x8xf32>
    %1011 = tpu.matmul %1010, %997, %cst_399 {dimension_numbers = #tpu.dot_dimension_numbers<[1], [0], [0], [1], [0, 0, 1, 1], [], []>} : vector<8x8xf32>, vector<8x8xf32>, vector<8x8xf32> -> vector<8x8xf32>
    %1012 = vector.extract_strided_slice %947 {offsets = [16, 0], sizes = [8, 32], strides = [1, 1]} : vector<32x32xf32> to vector<8x32xf32>
    %cst_400 = arith.constant dense<0.000000e+00> : vector<8x32xf32>
    %1013 = tpu.matmul %1011, %1012, %cst_400 {dimension_numbers = #tpu.dot_dimension_numbers<[1], [0], [0], [1], [0, 0, 1, 1], [], []>} : vector<8x8xf32>, vector<8x32xf32>, vector<8x32xf32> -> vector<8x32xf32>
    %1014 = arith.addf %994, %1013 : vector<8x32xf32>
    %1015 = vector.extract_strided_slice %953 {offsets = [0, 24], sizes = [8, 8], strides = [1, 1]} : vector<16x32xf32> to vector<8x8xf32>
    %1016 = vector.extract_strided_slice %954 {offsets = [0, 24], sizes = [8, 8], strides = [1, 1]} : vector<16x32xf32> to vector<8x8xf32>
    %1017 = vector.extract_strided_slice %955 {offsets = [0, 24], sizes = [8, 8], strides = [1, 1]} : vector<16x32xf32> to vector<8x8xf32>
    %cst_401 = arith.constant dense<0.000000e+00> : vector<8x8xf32>
    %1018 = tpu.matmul %1015, %1016, %cst_401 {dimension_numbers = #tpu.dot_dimension_numbers<[1], [1], [0], [0], [0, 0, 1, 0], [], []>} : vector<8x8xf32>, vector<8x8xf32>, vector<8x8xf32> -> vector<8x8xf32>
    %cst_402 = arith.constant 0.353553385 : f32
    %1019 = vector.broadcast %cst_402 : f32 to vector<8x8xf32>
    %1020 = arith.mulf %1018, %1019 : vector<8x8xf32>
    %cst_403 = arith.constant dense<0xFF800000> : vector<8xf32>
    %1021 = vector.multi_reduction <maximumf>, %1020, %cst_403 [1] : vector<8x8xf32> to vector<8xf32>
    %1022 = vector.shape_cast %1021 : vector<8xf32> to vector<8x1xf32>
    %1023 = vector.broadcast %1022 : vector<8x1xf32> to vector<8x8xf32>
    %1024 = arith.subf %1020, %1023 : vector<8x8xf32>
    %1025 = math.exp %1024 : vector<8x8xf32>
    %cst_404 = arith.constant dense<0.000000e+00> : vector<8xf32>
    %1026 = vector.multi_reduction <add>, %1025, %cst_404 [1] : vector<8x8xf32> to vector<8xf32>
    %1027 = vector.shape_cast %1026 : vector<8xf32> to vector<8x1xf32>
    %1028 = tpu.reciprocal %1027 {approx = true} : vector<8x1xf32> -> vector<8x1xf32>
    %1029 = vector.broadcast %1028 : vector<8x1xf32> to vector<8x8xf32>
    %1030 = arith.mulf %1025, %1029 : vector<8x8xf32>
    %cst_405 = arith.constant dense<0.000000e+00> : vector<8x8xf32>
    %1031 = tpu.matmul %1030, %1017, %cst_405 {dimension_numbers = #tpu.dot_dimension_numbers<[1], [0], [0], [1], [0, 0, 1, 1], [], []>} : vector<8x8xf32>, vector<8x8xf32>, vector<8x8xf32> -> vector<8x8xf32>
    %1032 = vector.extract_strided_slice %947 {offsets = [24, 0], sizes = [8, 32], strides = [1, 1]} : vector<32x32xf32> to vector<8x32xf32>
    %cst_406 = arith.constant dense<0.000000e+00> : vector<8x32xf32>
    %1033 = tpu.matmul %1031, %1032, %cst_406 {dimension_numbers = #tpu.dot_dimension_numbers<[1], [0], [0], [1], [0, 0, 1, 1], [], []>} : vector<8x8xf32>, vector<8x32xf32>, vector<8x32xf32> -> vector<8x32xf32>
    %1034 = arith.addf %1014, %1033 : vector<8x32xf32>
    %1035 = vector.broadcast %949 : vector<1x32xf32> to vector<8x32xf32>
    %1036 = arith.addf %1034, %1035 : vector<8x32xf32>
    %1037 = vector.extract_strided_slice %953 {offsets = [8, 0], sizes = [8, 8], strides = [1, 1]} : vector<16x32xf32> to vector<8x8xf32>
    %1038 = vector.extract_strided_slice %954 {offsets = [8, 0], sizes = [8, 8], strides = [1, 1]} : vector<16x32xf32> to vector<8x8xf32>
    %1039 = vector.extract_strided_slice %955 {offsets = [8, 0], sizes = [8, 8], strides = [1, 1]} : vector<16x32xf32> to vector<8x8xf32>
    %cst_407 = arith.constant dense<0.000000e+00> : vector<8x8xf32>
    %1040 = tpu.matmul %1037, %1038, %cst_407 {dimension_numbers = #tpu.dot_dimension_numbers<[1], [1], [0], [0], [0, 0, 1, 0], [], []>} : vector<8x8xf32>, vector<8x8xf32>, vector<8x8xf32> -> vector<8x8xf32>
    %cst_408 = arith.constant 0.353553385 : f32
    %1041 = vector.broadcast %cst_408 : f32 to vector<8x8xf32>
    %1042 = arith.mulf %1040, %1041 : vector<8x8xf32>
    %cst_409 = arith.constant dense<0xFF800000> : vector<8xf32>
    %1043 = vector.multi_reduction <maximumf>, %1042, %cst_409 [1] : vector<8x8xf32> to vector<8xf32>
    %1044 = vector.shape_cast %1043 : vector<8xf32> to vector<8x1xf32>
    %1045 = vector.broadcast %1044 : vector<8x1xf32> to vector<8x8xf32>
    %1046 = arith.subf %1042, %1045 : vector<8x8xf32>
    %1047 = math.exp %1046 : vector<8x8xf32>
    %cst_410 = arith.constant dense<0.000000e+00> : vector<8xf32>
    %1048 = vector.multi_reduction <add>, %1047, %cst_410 [1] : vector<8x8xf32> to vector<8xf32>
    %1049 = vector.shape_cast %1048 : vector<8xf32> to vector<8x1xf32>
    %1050 = tpu.reciprocal %1049 {approx = true} : vector<8x1xf32> -> vector<8x1xf32>
    %1051 = vector.broadcast %1050 : vector<8x1xf32> to vector<8x8xf32>
    %1052 = arith.mulf %1047, %1051 : vector<8x8xf32>
    %cst_411 = arith.constant dense<0.000000e+00> : vector<8x8xf32>
    %1053 = tpu.matmul %1052, %1039, %cst_411 {dimension_numbers = #tpu.dot_dimension_numbers<[1], [0], [0], [1], [0, 0, 1, 1], [], []>} : vector<8x8xf32>, vector<8x8xf32>, vector<8x8xf32> -> vector<8x8xf32>
    %1054 = vector.extract_strided_slice %947 {offsets = [0, 0], sizes = [8, 32], strides = [1, 1]} : vector<32x32xf32> to vector<8x32xf32>
    %cst_412 = arith.constant dense<0.000000e+00> : vector<8x32xf32>
    %1055 = tpu.matmul %1053, %1054, %cst_412 {dimension_numbers = #tpu.dot_dimension_numbers<[1], [0], [0], [1], [0, 0, 1, 1], [], []>} : vector<8x8xf32>, vector<8x32xf32>, vector<8x32xf32> -> vector<8x32xf32>
    %1056 = vector.extract_strided_slice %953 {offsets = [8, 8], sizes = [8, 8], strides = [1, 1]} : vector<16x32xf32> to vector<8x8xf32>
    %1057 = vector.extract_strided_slice %954 {offsets = [8, 8], sizes = [8, 8], strides = [1, 1]} : vector<16x32xf32> to vector<8x8xf32>
    %1058 = vector.extract_strided_slice %955 {offsets = [8, 8], sizes = [8, 8], strides = [1, 1]} : vector<16x32xf32> to vector<8x8xf32>
    %cst_413 = arith.constant dense<0.000000e+00> : vector<8x8xf32>
    %1059 = tpu.matmul %1056, %1057, %cst_413 {dimension_numbers = #tpu.dot_dimension_numbers<[1], [1], [0], [0], [0, 0, 1, 0], [], []>} : vector<8x8xf32>, vector<8x8xf32>, vector<8x8xf32> -> vector<8x8xf32>
    %cst_414 = arith.constant 0.353553385 : f32
    %1060 = vector.broadcast %cst_414 : f32 to vector<8x8xf32>
    %1061 = arith.mulf %1059, %1060 : vector<8x8xf32>
    %cst_415 = arith.constant dense<0xFF800000> : vector<8xf32>
    %1062 = vector.multi_reduction <maximumf>, %1061, %cst_415 [1] : vector<8x8xf32> to vector<8xf32>
    %1063 = vector.shape_cast %1062 : vector<8xf32> to vector<8x1xf32>
    %1064 = vector.broadcast %1063 : vector<8x1xf32> to vector<8x8xf32>
    %1065 = arith.subf %1061, %1064 : vector<8x8xf32>
    %1066 = math.exp %1065 : vector<8x8xf32>
    %cst_416 = arith.constant dense<0.000000e+00> : vector<8xf32>
    %1067 = vector.multi_reduction <add>, %1066, %cst_416 [1] : vector<8x8xf32> to vector<8xf32>
    %1068 = vector.shape_cast %1067 : vector<8xf32> to vector<8x1xf32>
    %1069 = tpu.reciprocal %1068 {approx = true} : vector<8x1xf32> -> vector<8x1xf32>
    %1070 = vector.broadcast %1069 : vector<8x1xf32> to vector<8x8xf32>
    %1071 = arith.mulf %1066, %1070 : vector<8x8xf32>
    %cst_417 = arith.constant dense<0.000000e+00> : vector<8x8xf32>
    %1072 = tpu.matmul %1071, %1058, %cst_417 {dimension_numbers = #tpu.dot_dimension_numbers<[1], [0], [0], [1], [0, 0, 1, 1], [], []>} : vector<8x8xf32>, vector<8x8xf32>, vector<8x8xf32> -> vector<8x8xf32>
    %1073 = vector.extract_strided_slice %947 {offsets = [8, 0], sizes = [8, 32], strides = [1, 1]} : vector<32x32xf32> to vector<8x32xf32>
    %cst_418 = arith.constant dense<0.000000e+00> : vector<8x32xf32>
    %1074 = tpu.matmul %1072, %1073, %cst_418 {dimension_numbers = #tpu.dot_dimension_numbers<[1], [0], [0], [1], [0, 0, 1, 1], [], []>} : vector<8x8xf32>, vector<8x32xf32>, vector<8x32xf32> -> vector<8x32xf32>
    %1075 = arith.addf %1055, %1074 : vector<8x32xf32>
    %1076 = vector.extract_strided_slice %953 {offsets = [8, 16], sizes = [8, 8], strides = [1, 1]} : vector<16x32xf32> to vector<8x8xf32>
    %1077 = vector.extract_strided_slice %954 {offsets = [8, 16], sizes = [8, 8], strides = [1, 1]} : vector<16x32xf32> to vector<8x8xf32>
    %1078 = vector.extract_strided_slice %955 {offsets = [8, 16], sizes = [8, 8], strides = [1, 1]} : vector<16x32xf32> to vector<8x8xf32>
    %cst_419 = arith.constant dense<0.000000e+00> : vector<8x8xf32>
    %1079 = tpu.matmul %1076, %1077, %cst_419 {dimension_numbers = #tpu.dot_dimension_numbers<[1], [1], [0], [0], [0, 0, 1, 0], [], []>} : vector<8x8xf32>, vector<8x8xf32>, vector<8x8xf32> -> vector<8x8xf32>
    %cst_420 = arith.constant 0.353553385 : f32
    %1080 = vector.broadcast %cst_420 : f32 to vector<8x8xf32>
    %1081 = arith.mulf %1079, %1080 : vector<8x8xf32>
    %cst_421 = arith.constant dense<0xFF800000> : vector<8xf32>
    %1082 = vector.multi_reduction <maximumf>, %1081, %cst_421 [1] : vector<8x8xf32> to vector<8xf32>
    %1083 = vector.shape_cast %1082 : vector<8xf32> to vector<8x1xf32>
    %1084 = vector.broadcast %1083 : vector<8x1xf32> to vector<8x8xf32>
    %1085 = arith.subf %1081, %1084 : vector<8x8xf32>
    %1086 = math.exp %1085 : vector<8x8xf32>
    %cst_422 = arith.constant dense<0.000000e+00> : vector<8xf32>
    %1087 = vector.multi_reduction <add>, %1086, %cst_422 [1] : vector<8x8xf32> to vector<8xf32>
    %1088 = vector.shape_cast %1087 : vector<8xf32> to vector<8x1xf32>
    %1089 = tpu.reciprocal %1088 {approx = true} : vector<8x1xf32> -> vector<8x1xf32>
    %1090 = vector.broadcast %1089 : vector<8x1xf32> to vector<8x8xf32>
    %1091 = arith.mulf %1086, %1090 : vector<8x8xf32>
    %cst_423 = arith.constant dense<0.000000e+00> : vector<8x8xf32>
    %1092 = tpu.matmul %1091, %1078, %cst_423 {dimension_numbers = #tpu.dot_dimension_numbers<[1], [0], [0], [1], [0, 0, 1, 1], [], []>} : vector<8x8xf32>, vector<8x8xf32>, vector<8x8xf32> -> vector<8x8xf32>
    %1093 = vector.extract_strided_slice %947 {offsets = [16, 0], sizes = [8, 32], strides = [1, 1]} : vector<32x32xf32> to vector<8x32xf32>
    %cst_424 = arith.constant dense<0.000000e+00> : vector<8x32xf32>
    %1094 = tpu.matmul %1092, %1093, %cst_424 {dimension_numbers = #tpu.dot_dimension_numbers<[1], [0], [0], [1], [0, 0, 1, 1], [], []>} : vector<8x8xf32>, vector<8x32xf32>, vector<8x32xf32> -> vector<8x32xf32>
    %1095 = arith.addf %1075, %1094 : vector<8x32xf32>
    %1096 = vector.extract_strided_slice %953 {offsets = [8, 24], sizes = [8, 8], strides = [1, 1]} : vector<16x32xf32> to vector<8x8xf32>
    %1097 = vector.extract_strided_slice %954 {offsets = [8, 24], sizes = [8, 8], strides = [1, 1]} : vector<16x32xf32> to vector<8x8xf32>
    %1098 = vector.extract_strided_slice %955 {offsets = [8, 24], sizes = [8, 8], strides = [1, 1]} : vector<16x32xf32> to vector<8x8xf32>
    %cst_425 = arith.constant dense<0.000000e+00> : vector<8x8xf32>
    %1099 = tpu.matmul %1096, %1097, %cst_425 {dimension_numbers = #tpu.dot_dimension_numbers<[1], [1], [0], [0], [0, 0, 1, 0], [], []>} : vector<8x8xf32>, vector<8x8xf32>, vector<8x8xf32> -> vector<8x8xf32>
    %cst_426 = arith.constant 0.353553385 : f32
    %1100 = vector.broadcast %cst_426 : f32 to vector<8x8xf32>
    %1101 = arith.mulf %1099, %1100 : vector<8x8xf32>
    %cst_427 = arith.constant dense<0xFF800000> : vector<8xf32>
    %1102 = vector.multi_reduction <maximumf>, %1101, %cst_427 [1] : vector<8x8xf32> to vector<8xf32>
    %1103 = vector.shape_cast %1102 : vector<8xf32> to vector<8x1xf32>
    %1104 = vector.broadcast %1103 : vector<8x1xf32> to vector<8x8xf32>
    %1105 = arith.subf %1101, %1104 : vector<8x8xf32>
    %1106 = math.exp %1105 : vector<8x8xf32>
    %cst_428 = arith.constant dense<0.000000e+00> : vector<8xf32>
    %1107 = vector.multi_reduction <add>, %1106, %cst_428 [1] : vector<8x8xf32> to vector<8xf32>
    %1108 = vector.shape_cast %1107 : vector<8xf32> to vector<8x1xf32>
    %1109 = tpu.reciprocal %1108 {approx = true} : vector<8x1xf32> -> vector<8x1xf32>
    %1110 = vector.broadcast %1109 : vector<8x1xf32> to vector<8x8xf32>
    %1111 = arith.mulf %1106, %1110 : vector<8x8xf32>
    %cst_429 = arith.constant dense<0.000000e+00> : vector<8x8xf32>
    %1112 = tpu.matmul %1111, %1098, %cst_429 {dimension_numbers = #tpu.dot_dimension_numbers<[1], [0], [0], [1], [0, 0, 1, 1], [], []>} : vector<8x8xf32>, vector<8x8xf32>, vector<8x8xf32> -> vector<8x8xf32>
    %1113 = vector.extract_strided_slice %947 {offsets = [24, 0], sizes = [8, 32], strides = [1, 1]} : vector<32x32xf32> to vector<8x32xf32>
    %cst_430 = arith.constant dense<0.000000e+00> : vector<8x32xf32>
    %1114 = tpu.matmul %1112, %1113, %cst_430 {dimension_numbers = #tpu.dot_dimension_numbers<[1], [0], [0], [1], [0, 0, 1, 1], [], []>} : vector<8x8xf32>, vector<8x32xf32>, vector<8x32xf32> -> vector<8x32xf32>
    %1115 = arith.addf %1095, %1114 : vector<8x32xf32>
    %1116 = vector.broadcast %949 : vector<1x32xf32> to vector<8x32xf32>
    %1117 = arith.addf %1115, %1116 : vector<8x32xf32>
    %1118 = tpu.concatenate %1036, %1117 in 0 : vector<8x32xf32>, vector<8x32xf32> -> vector<16x32xf32>
    %c1_431 = arith.constant 1 : index
    %c0_432 = arith.constant 0 : index
    %c0_433 = arith.constant 0 : index
    %1119 = vector.load %arg19[%c1_431, %c0_432, %c0_433] : memref<2x1x32xf32, #tpu.memory_space<vmem>>, vector<1x1x32xf32>
    %1120 = vector.shape_cast %1119 : vector<1x1x32xf32> to vector<1x32xf32>
    %c1_434 = arith.constant 1 : index
    %c0_435 = arith.constant 0 : index
    %c0_436 = arith.constant 0 : index
    %1121 = vector.load %arg20[%c1_434, %c0_435, %c0_436] : memref<2x1x32xf32, #tpu.memory_space<vmem>>, vector<1x1x32xf32>
    %1122 = vector.shape_cast %1121 : vector<1x1x32xf32> to vector<1x32xf32>
    %1123 = arith.addf %1118, %941 : vector<16x32xf32>
    %cst_437 = arith.constant dense<0.000000e+00> : vector<16xf32>
    %1124 = vector.multi_reduction <add>, %1123, %cst_437 [1] : vector<16x32xf32> to vector<16xf32>
    %1125 = vector.shape_cast %1124 : vector<16xf32> to vector<16x1xf32>
    %cst_438 = arith.constant 3.200000e+01 : f32
    %1126 = vector.broadcast %cst_438 : f32 to vector<16x1xf32>
    %1127 = arith.divf %1125, %1126 : vector<16x1xf32>
    %1128 = vector.broadcast %1127 : vector<16x1xf32> to vector<16x32xf32>
    %1129 = arith.subf %1123, %1128 : vector<16x32xf32>
    %1130 = arith.mulf %1129, %1129 : vector<16x32xf32>
    %cst_439 = arith.constant dense<0.000000e+00> : vector<16xf32>
    %1131 = vector.multi_reduction <add>, %1130, %cst_439 [1] : vector<16x32xf32> to vector<16xf32>
    %1132 = vector.shape_cast %1131 : vector<16xf32> to vector<16x1xf32>
    %cst_440 = arith.constant 3.200000e+01 : f32
    %1133 = vector.broadcast %cst_440 : f32 to vector<16x1xf32>
    %1134 = arith.divf %1132, %1133 : vector<16x1xf32>
    %cst_441 = arith.constant 9.99999974E-6 : f32
    %1135 = vector.broadcast %cst_441 : f32 to vector<16x1xf32>
    %1136 = arith.addf %1134, %1135 : vector<16x1xf32>
    %1137 = math.rsqrt %1136 : vector<16x1xf32>
    %1138 = vector.broadcast %1137 : vector<16x1xf32> to vector<16x32xf32>
    %1139 = arith.mulf %1129, %1138 : vector<16x32xf32>
    %1140 = vector.broadcast %1120 : vector<1x32xf32> to vector<16x32xf32>
    %1141 = arith.mulf %1139, %1140 : vector<16x32xf32>
    %1142 = vector.broadcast %1122 : vector<1x32xf32> to vector<16x32xf32>
    %1143 = arith.addf %1141, %1142 : vector<16x32xf32>
    %c1_442 = arith.constant 1 : index
    %c0_443 = arith.constant 0 : index
    %c0_444 = arith.constant 0 : index
    %1144 = vector.load %arg21[%c1_442, %c0_443, %c0_444] : memref<2x32x96xf32, #tpu.memory_space<vmem>>, vector<1x32x96xf32>
    %1145 = vector.shape_cast %1144 : vector<1x32x96xf32> to vector<32x96xf32>
    %c1_445 = arith.constant 1 : index
    %c0_446 = arith.constant 0 : index
    %c0_447 = arith.constant 0 : index
    %1146 = vector.load %arg22[%c1_445, %c0_446, %c0_447] : memref<2x1x96xf32, #tpu.memory_space<vmem>>, vector<1x1x96xf32>
    %1147 = vector.shape_cast %1146 : vector<1x1x96xf32> to vector<1x96xf32>
    %c1_448 = arith.constant 1 : index
    %c0_449 = arith.constant 0 : index
    %c0_450 = arith.constant 0 : index
    %1148 = vector.load %arg23[%c1_448, %c0_449, %c0_450] : memref<2x32x32xf32, #tpu.memory_space<vmem>>, vector<1x32x32xf32>
    %1149 = vector.shape_cast %1148 : vector<1x32x32xf32> to vector<32x32xf32>
    %c1_451 = arith.constant 1 : index
    %c0_452 = arith.constant 0 : index
    %c0_453 = arith.constant 0 : index
    %1150 = vector.load %arg24[%c1_451, %c0_452, %c0_453] : memref<2x1x32xf32, #tpu.memory_space<vmem>>, vector<1x1x32xf32>
    %1151 = vector.shape_cast %1150 : vector<1x1x32xf32> to vector<1x32xf32>
    %1152 = vector.extract_strided_slice %1145 {offsets = [0, 0], sizes = [32, 64], strides = [1, 1]} : vector<32x96xf32> to vector<32x64xf32>
    %cst_454 = arith.constant dense<0.000000e+00> : vector<16x64xf32>
    %1153 = tpu.matmul %488, %1152, %cst_454 {dimension_numbers = #tpu.dot_dimension_numbers<[1], [0], [0], [1], [0, 0, 1, 1], [], []>} : vector<16x32xf32>, vector<32x64xf32>, vector<16x64xf32> -> vector<16x64xf32>
    %1154 = vector.extract_strided_slice %1147 {offsets = [0, 0], sizes = [1, 64], strides = [1, 1]} : vector<1x96xf32> to vector<1x64xf32>
    %1155 = vector.broadcast %1154 : vector<1x64xf32> to vector<16x64xf32>
    %1156 = arith.addf %1153, %1155 : vector<16x64xf32>
    %1157 = vector.extract_strided_slice %1156 {offsets = [0, 0], sizes = [16, 32], strides = [1, 1]} : vector<16x64xf32> to vector<16x32xf32>
    %1158 = vector.extract_strided_slice %1156 {offsets = [0, 32], sizes = [16, 32], strides = [1, 1]} : vector<16x64xf32> to vector<16x32xf32>
    %1159 = vector.extract_strided_slice %1145 {offsets = [0, 64], sizes = [32, 32], strides = [1, 1]} : vector<32x96xf32> to vector<32x32xf32>
    %cst_455 = arith.constant dense<0.000000e+00> : vector<16x32xf32>
    %1160 = tpu.matmul %1143, %1159, %cst_455 {dimension_numbers = #tpu.dot_dimension_numbers<[1], [0], [0], [1], [0, 0, 1, 1], [], []>} : vector<16x32xf32>, vector<32x32xf32>, vector<16x32xf32> -> vector<16x32xf32>
    %1161 = vector.extract_strided_slice %1147 {offsets = [0, 64], sizes = [1, 32], strides = [1, 1]} : vector<1x96xf32> to vector<1x32xf32>
    %1162 = vector.broadcast %1161 : vector<1x32xf32> to vector<16x32xf32>
    %1163 = arith.addf %1160, %1162 : vector<16x32xf32>
    %1164 = vector.extract_strided_slice %1157 {offsets = [0, 0], sizes = [8, 8], strides = [1, 1]} : vector<16x32xf32> to vector<8x8xf32>
    %1165 = vector.extract_strided_slice %1158 {offsets = [0, 0], sizes = [8, 8], strides = [1, 1]} : vector<16x32xf32> to vector<8x8xf32>
    %1166 = vector.extract_strided_slice %1163 {offsets = [0, 0], sizes = [8, 8], strides = [1, 1]} : vector<16x32xf32> to vector<8x8xf32>
    %cst_456 = arith.constant dense<0.000000e+00> : vector<8x8xf32>
    %1167 = tpu.matmul %1164, %1165, %cst_456 {dimension_numbers = #tpu.dot_dimension_numbers<[1], [1], [0], [0], [0, 0, 1, 0], [], []>} : vector<8x8xf32>, vector<8x8xf32>, vector<8x8xf32> -> vector<8x8xf32>
    %cst_457 = arith.constant 0.353553385 : f32
    %1168 = vector.broadcast %cst_457 : f32 to vector<8x8xf32>
    %1169 = arith.mulf %1167, %1168 : vector<8x8xf32>
    %cst_458 = arith.constant dense<0xFF800000> : vector<8xf32>
    %1170 = vector.multi_reduction <maximumf>, %1169, %cst_458 [1] : vector<8x8xf32> to vector<8xf32>
    %1171 = vector.shape_cast %1170 : vector<8xf32> to vector<8x1xf32>
    %1172 = vector.broadcast %1171 : vector<8x1xf32> to vector<8x8xf32>
    %1173 = arith.subf %1169, %1172 : vector<8x8xf32>
    %1174 = math.exp %1173 : vector<8x8xf32>
    %cst_459 = arith.constant dense<0.000000e+00> : vector<8xf32>
    %1175 = vector.multi_reduction <add>, %1174, %cst_459 [1] : vector<8x8xf32> to vector<8xf32>
    %1176 = vector.shape_cast %1175 : vector<8xf32> to vector<8x1xf32>
    %1177 = tpu.reciprocal %1176 {approx = true} : vector<8x1xf32> -> vector<8x1xf32>
    %1178 = vector.broadcast %1177 : vector<8x1xf32> to vector<8x8xf32>
    %1179 = arith.mulf %1174, %1178 : vector<8x8xf32>
    %cst_460 = arith.constant dense<0.000000e+00> : vector<8x8xf32>
    %1180 = tpu.matmul %1179, %1166, %cst_460 {dimension_numbers = #tpu.dot_dimension_numbers<[1], [0], [0], [1], [0, 0, 1, 1], [], []>} : vector<8x8xf32>, vector<8x8xf32>, vector<8x8xf32> -> vector<8x8xf32>
    %1181 = vector.extract_strided_slice %1149 {offsets = [0, 0], sizes = [8, 32], strides = [1, 1]} : vector<32x32xf32> to vector<8x32xf32>
    %cst_461 = arith.constant dense<0.000000e+00> : vector<8x32xf32>
    %1182 = tpu.matmul %1180, %1181, %cst_461 {dimension_numbers = #tpu.dot_dimension_numbers<[1], [0], [0], [1], [0, 0, 1, 1], [], []>} : vector<8x8xf32>, vector<8x32xf32>, vector<8x32xf32> -> vector<8x32xf32>
    %1183 = vector.extract_strided_slice %1157 {offsets = [0, 8], sizes = [8, 8], strides = [1, 1]} : vector<16x32xf32> to vector<8x8xf32>
    %1184 = vector.extract_strided_slice %1158 {offsets = [0, 8], sizes = [8, 8], strides = [1, 1]} : vector<16x32xf32> to vector<8x8xf32>
    %1185 = vector.extract_strided_slice %1163 {offsets = [0, 8], sizes = [8, 8], strides = [1, 1]} : vector<16x32xf32> to vector<8x8xf32>
    %cst_462 = arith.constant dense<0.000000e+00> : vector<8x8xf32>
    %1186 = tpu.matmul %1183, %1184, %cst_462 {dimension_numbers = #tpu.dot_dimension_numbers<[1], [1], [0], [0], [0, 0, 1, 0], [], []>} : vector<8x8xf32>, vector<8x8xf32>, vector<8x8xf32> -> vector<8x8xf32>
    %cst_463 = arith.constant 0.353553385 : f32
    %1187 = vector.broadcast %cst_463 : f32 to vector<8x8xf32>
    %1188 = arith.mulf %1186, %1187 : vector<8x8xf32>
    %cst_464 = arith.constant dense<0xFF800000> : vector<8xf32>
    %1189 = vector.multi_reduction <maximumf>, %1188, %cst_464 [1] : vector<8x8xf32> to vector<8xf32>
    %1190 = vector.shape_cast %1189 : vector<8xf32> to vector<8x1xf32>
    %1191 = vector.broadcast %1190 : vector<8x1xf32> to vector<8x8xf32>
    %1192 = arith.subf %1188, %1191 : vector<8x8xf32>
    %1193 = math.exp %1192 : vector<8x8xf32>
    %cst_465 = arith.constant dense<0.000000e+00> : vector<8xf32>
    %1194 = vector.multi_reduction <add>, %1193, %cst_465 [1] : vector<8x8xf32> to vector<8xf32>
    %1195 = vector.shape_cast %1194 : vector<8xf32> to vector<8x1xf32>
    %1196 = tpu.reciprocal %1195 {approx = true} : vector<8x1xf32> -> vector<8x1xf32>
    %1197 = vector.broadcast %1196 : vector<8x1xf32> to vector<8x8xf32>
    %1198 = arith.mulf %1193, %1197 : vector<8x8xf32>
    %cst_466 = arith.constant dense<0.000000e+00> : vector<8x8xf32>
    %1199 = tpu.matmul %1198, %1185, %cst_466 {dimension_numbers = #tpu.dot_dimension_numbers<[1], [0], [0], [1], [0, 0, 1, 1], [], []>} : vector<8x8xf32>, vector<8x8xf32>, vector<8x8xf32> -> vector<8x8xf32>
    %1200 = vector.extract_strided_slice %1149 {offsets = [8, 0], sizes = [8, 32], strides = [1, 1]} : vector<32x32xf32> to vector<8x32xf32>
    %cst_467 = arith.constant dense<0.000000e+00> : vector<8x32xf32>
    %1201 = tpu.matmul %1199, %1200, %cst_467 {dimension_numbers = #tpu.dot_dimension_numbers<[1], [0], [0], [1], [0, 0, 1, 1], [], []>} : vector<8x8xf32>, vector<8x32xf32>, vector<8x32xf32> -> vector<8x32xf32>
    %1202 = arith.addf %1182, %1201 : vector<8x32xf32>
    %1203 = vector.extract_strided_slice %1157 {offsets = [0, 16], sizes = [8, 8], strides = [1, 1]} : vector<16x32xf32> to vector<8x8xf32>
    %1204 = vector.extract_strided_slice %1158 {offsets = [0, 16], sizes = [8, 8], strides = [1, 1]} : vector<16x32xf32> to vector<8x8xf32>
    %1205 = vector.extract_strided_slice %1163 {offsets = [0, 16], sizes = [8, 8], strides = [1, 1]} : vector<16x32xf32> to vector<8x8xf32>
    %cst_468 = arith.constant dense<0.000000e+00> : vector<8x8xf32>
    %1206 = tpu.matmul %1203, %1204, %cst_468 {dimension_numbers = #tpu.dot_dimension_numbers<[1], [1], [0], [0], [0, 0, 1, 0], [], []>} : vector<8x8xf32>, vector<8x8xf32>, vector<8x8xf32> -> vector<8x8xf32>
    %cst_469 = arith.constant 0.353553385 : f32
    %1207 = vector.broadcast %cst_469 : f32 to vector<8x8xf32>
    %1208 = arith.mulf %1206, %1207 : vector<8x8xf32>
    %cst_470 = arith.constant dense<0xFF800000> : vector<8xf32>
    %1209 = vector.multi_reduction <maximumf>, %1208, %cst_470 [1] : vector<8x8xf32> to vector<8xf32>
    %1210 = vector.shape_cast %1209 : vector<8xf32> to vector<8x1xf32>
    %1211 = vector.broadcast %1210 : vector<8x1xf32> to vector<8x8xf32>
    %1212 = arith.subf %1208, %1211 : vector<8x8xf32>
    %1213 = math.exp %1212 : vector<8x8xf32>
    %cst_471 = arith.constant dense<0.000000e+00> : vector<8xf32>
    %1214 = vector.multi_reduction <add>, %1213, %cst_471 [1] : vector<8x8xf32> to vector<8xf32>
    %1215 = vector.shape_cast %1214 : vector<8xf32> to vector<8x1xf32>
    %1216 = tpu.reciprocal %1215 {approx = true} : vector<8x1xf32> -> vector<8x1xf32>
    %1217 = vector.broadcast %1216 : vector<8x1xf32> to vector<8x8xf32>
    %1218 = arith.mulf %1213, %1217 : vector<8x8xf32>
    %cst_472 = arith.constant dense<0.000000e+00> : vector<8x8xf32>
    %1219 = tpu.matmul %1218, %1205, %cst_472 {dimension_numbers = #tpu.dot_dimension_numbers<[1], [0], [0], [1], [0, 0, 1, 1], [], []>} : vector<8x8xf32>, vector<8x8xf32>, vector<8x8xf32> -> vector<8x8xf32>
    %1220 = vector.extract_strided_slice %1149 {offsets = [16, 0], sizes = [8, 32], strides = [1, 1]} : vector<32x32xf32> to vector<8x32xf32>
    %cst_473 = arith.constant dense<0.000000e+00> : vector<8x32xf32>
    %1221 = tpu.matmul %1219, %1220, %cst_473 {dimension_numbers = #tpu.dot_dimension_numbers<[1], [0], [0], [1], [0, 0, 1, 1], [], []>} : vector<8x8xf32>, vector<8x32xf32>, vector<8x32xf32> -> vector<8x32xf32>
    %1222 = arith.addf %1202, %1221 : vector<8x32xf32>
    %1223 = vector.extract_strided_slice %1157 {offsets = [0, 24], sizes = [8, 8], strides = [1, 1]} : vector<16x32xf32> to vector<8x8xf32>
    %1224 = vector.extract_strided_slice %1158 {offsets = [0, 24], sizes = [8, 8], strides = [1, 1]} : vector<16x32xf32> to vector<8x8xf32>
    %1225 = vector.extract_strided_slice %1163 {offsets = [0, 24], sizes = [8, 8], strides = [1, 1]} : vector<16x32xf32> to vector<8x8xf32>
    %cst_474 = arith.constant dense<0.000000e+00> : vector<8x8xf32>
    %1226 = tpu.matmul %1223, %1224, %cst_474 {dimension_numbers = #tpu.dot_dimension_numbers<[1], [1], [0], [0], [0, 0, 1, 0], [], []>} : vector<8x8xf32>, vector<8x8xf32>, vector<8x8xf32> -> vector<8x8xf32>
    %cst_475 = arith.constant 0.353553385 : f32
    %1227 = vector.broadcast %cst_475 : f32 to vector<8x8xf32>
    %1228 = arith.mulf %1226, %1227 : vector<8x8xf32>
    %cst_476 = arith.constant dense<0xFF800000> : vector<8xf32>
    %1229 = vector.multi_reduction <maximumf>, %1228, %cst_476 [1] : vector<8x8xf32> to vector<8xf32>
    %1230 = vector.shape_cast %1229 : vector<8xf32> to vector<8x1xf32>
    %1231 = vector.broadcast %1230 : vector<8x1xf32> to vector<8x8xf32>
    %1232 = arith.subf %1228, %1231 : vector<8x8xf32>
    %1233 = math.exp %1232 : vector<8x8xf32>
    %cst_477 = arith.constant dense<0.000000e+00> : vector<8xf32>
    %1234 = vector.multi_reduction <add>, %1233, %cst_477 [1] : vector<8x8xf32> to vector<8xf32>
    %1235 = vector.shape_cast %1234 : vector<8xf32> to vector<8x1xf32>
    %1236 = tpu.reciprocal %1235 {approx = true} : vector<8x1xf32> -> vector<8x1xf32>
    %1237 = vector.broadcast %1236 : vector<8x1xf32> to vector<8x8xf32>
    %1238 = arith.mulf %1233, %1237 : vector<8x8xf32>
    %cst_478 = arith.constant dense<0.000000e+00> : vector<8x8xf32>
    %1239 = tpu.matmul %1238, %1225, %cst_478 {dimension_numbers = #tpu.dot_dimension_numbers<[1], [0], [0], [1], [0, 0, 1, 1], [], []>} : vector<8x8xf32>, vector<8x8xf32>, vector<8x8xf32> -> vector<8x8xf32>
    %1240 = vector.extract_strided_slice %1149 {offsets = [24, 0], sizes = [8, 32], strides = [1, 1]} : vector<32x32xf32> to vector<8x32xf32>
    %cst_479 = arith.constant dense<0.000000e+00> : vector<8x32xf32>
    %1241 = tpu.matmul %1239, %1240, %cst_479 {dimension_numbers = #tpu.dot_dimension_numbers<[1], [0], [0], [1], [0, 0, 1, 1], [], []>} : vector<8x8xf32>, vector<8x32xf32>, vector<8x32xf32> -> vector<8x32xf32>
    %1242 = arith.addf %1222, %1241 : vector<8x32xf32>
    %1243 = vector.broadcast %1151 : vector<1x32xf32> to vector<8x32xf32>
    %1244 = arith.addf %1242, %1243 : vector<8x32xf32>
    %1245 = vector.extract_strided_slice %1157 {offsets = [8, 0], sizes = [8, 8], strides = [1, 1]} : vector<16x32xf32> to vector<8x8xf32>
    %1246 = vector.extract_strided_slice %1158 {offsets = [8, 0], sizes = [8, 8], strides = [1, 1]} : vector<16x32xf32> to vector<8x8xf32>
    %1247 = vector.extract_strided_slice %1163 {offsets = [8, 0], sizes = [8, 8], strides = [1, 1]} : vector<16x32xf32> to vector<8x8xf32>
    %cst_480 = arith.constant dense<0.000000e+00> : vector<8x8xf32>
    %1248 = tpu.matmul %1245, %1246, %cst_480 {dimension_numbers = #tpu.dot_dimension_numbers<[1], [1], [0], [0], [0, 0, 1, 0], [], []>} : vector<8x8xf32>, vector<8x8xf32>, vector<8x8xf32> -> vector<8x8xf32>
    %cst_481 = arith.constant 0.353553385 : f32
    %1249 = vector.broadcast %cst_481 : f32 to vector<8x8xf32>
    %1250 = arith.mulf %1248, %1249 : vector<8x8xf32>
    %cst_482 = arith.constant dense<0xFF800000> : vector<8xf32>
    %1251 = vector.multi_reduction <maximumf>, %1250, %cst_482 [1] : vector<8x8xf32> to vector<8xf32>
    %1252 = vector.shape_cast %1251 : vector<8xf32> to vector<8x1xf32>
    %1253 = vector.broadcast %1252 : vector<8x1xf32> to vector<8x8xf32>
    %1254 = arith.subf %1250, %1253 : vector<8x8xf32>
    %1255 = math.exp %1254 : vector<8x8xf32>
    %cst_483 = arith.constant dense<0.000000e+00> : vector<8xf32>
    %1256 = vector.multi_reduction <add>, %1255, %cst_483 [1] : vector<8x8xf32> to vector<8xf32>
    %1257 = vector.shape_cast %1256 : vector<8xf32> to vector<8x1xf32>
    %1258 = tpu.reciprocal %1257 {approx = true} : vector<8x1xf32> -> vector<8x1xf32>
    %1259 = vector.broadcast %1258 : vector<8x1xf32> to vector<8x8xf32>
    %1260 = arith.mulf %1255, %1259 : vector<8x8xf32>
    %cst_484 = arith.constant dense<0.000000e+00> : vector<8x8xf32>
    %1261 = tpu.matmul %1260, %1247, %cst_484 {dimension_numbers = #tpu.dot_dimension_numbers<[1], [0], [0], [1], [0, 0, 1, 1], [], []>} : vector<8x8xf32>, vector<8x8xf32>, vector<8x8xf32> -> vector<8x8xf32>
    %1262 = vector.extract_strided_slice %1149 {offsets = [0, 0], sizes = [8, 32], strides = [1, 1]} : vector<32x32xf32> to vector<8x32xf32>
    %cst_485 = arith.constant dense<0.000000e+00> : vector<8x32xf32>
    %1263 = tpu.matmul %1261, %1262, %cst_485 {dimension_numbers = #tpu.dot_dimension_numbers<[1], [0], [0], [1], [0, 0, 1, 1], [], []>} : vector<8x8xf32>, vector<8x32xf32>, vector<8x32xf32> -> vector<8x32xf32>
    %1264 = vector.extract_strided_slice %1157 {offsets = [8, 8], sizes = [8, 8], strides = [1, 1]} : vector<16x32xf32> to vector<8x8xf32>
    %1265 = vector.extract_strided_slice %1158 {offsets = [8, 8], sizes = [8, 8], strides = [1, 1]} : vector<16x32xf32> to vector<8x8xf32>
    %1266 = vector.extract_strided_slice %1163 {offsets = [8, 8], sizes = [8, 8], strides = [1, 1]} : vector<16x32xf32> to vector<8x8xf32>
    %cst_486 = arith.constant dense<0.000000e+00> : vector<8x8xf32>
    %1267 = tpu.matmul %1264, %1265, %cst_486 {dimension_numbers = #tpu.dot_dimension_numbers<[1], [1], [0], [0], [0, 0, 1, 0], [], []>} : vector<8x8xf32>, vector<8x8xf32>, vector<8x8xf32> -> vector<8x8xf32>
    %cst_487 = arith.constant 0.353553385 : f32
    %1268 = vector.broadcast %cst_487 : f32 to vector<8x8xf32>
    %1269 = arith.mulf %1267, %1268 : vector<8x8xf32>
    %cst_488 = arith.constant dense<0xFF800000> : vector<8xf32>
    %1270 = vector.multi_reduction <maximumf>, %1269, %cst_488 [1] : vector<8x8xf32> to vector<8xf32>
    %1271 = vector.shape_cast %1270 : vector<8xf32> to vector<8x1xf32>
    %1272 = vector.broadcast %1271 : vector<8x1xf32> to vector<8x8xf32>
    %1273 = arith.subf %1269, %1272 : vector<8x8xf32>
    %1274 = math.exp %1273 : vector<8x8xf32>
    %cst_489 = arith.constant dense<0.000000e+00> : vector<8xf32>
    %1275 = vector.multi_reduction <add>, %1274, %cst_489 [1] : vector<8x8xf32> to vector<8xf32>
    %1276 = vector.shape_cast %1275 : vector<8xf32> to vector<8x1xf32>
    %1277 = tpu.reciprocal %1276 {approx = true} : vector<8x1xf32> -> vector<8x1xf32>
    %1278 = vector.broadcast %1277 : vector<8x1xf32> to vector<8x8xf32>
    %1279 = arith.mulf %1274, %1278 : vector<8x8xf32>
    %cst_490 = arith.constant dense<0.000000e+00> : vector<8x8xf32>
    %1280 = tpu.matmul %1279, %1266, %cst_490 {dimension_numbers = #tpu.dot_dimension_numbers<[1], [0], [0], [1], [0, 0, 1, 1], [], []>} : vector<8x8xf32>, vector<8x8xf32>, vector<8x8xf32> -> vector<8x8xf32>
    %1281 = vector.extract_strided_slice %1149 {offsets = [8, 0], sizes = [8, 32], strides = [1, 1]} : vector<32x32xf32> to vector<8x32xf32>
    %cst_491 = arith.constant dense<0.000000e+00> : vector<8x32xf32>
    %1282 = tpu.matmul %1280, %1281, %cst_491 {dimension_numbers = #tpu.dot_dimension_numbers<[1], [0], [0], [1], [0, 0, 1, 1], [], []>} : vector<8x8xf32>, vector<8x32xf32>, vector<8x32xf32> -> vector<8x32xf32>
    %1283 = arith.addf %1263, %1282 : vector<8x32xf32>
    %1284 = vector.extract_strided_slice %1157 {offsets = [8, 16], sizes = [8, 8], strides = [1, 1]} : vector<16x32xf32> to vector<8x8xf32>
    %1285 = vector.extract_strided_slice %1158 {offsets = [8, 16], sizes = [8, 8], strides = [1, 1]} : vector<16x32xf32> to vector<8x8xf32>
    %1286 = vector.extract_strided_slice %1163 {offsets = [8, 16], sizes = [8, 8], strides = [1, 1]} : vector<16x32xf32> to vector<8x8xf32>
    %cst_492 = arith.constant dense<0.000000e+00> : vector<8x8xf32>
    %1287 = tpu.matmul %1284, %1285, %cst_492 {dimension_numbers = #tpu.dot_dimension_numbers<[1], [1], [0], [0], [0, 0, 1, 0], [], []>} : vector<8x8xf32>, vector<8x8xf32>, vector<8x8xf32> -> vector<8x8xf32>
    %cst_493 = arith.constant 0.353553385 : f32
    %1288 = vector.broadcast %cst_493 : f32 to vector<8x8xf32>
    %1289 = arith.mulf %1287, %1288 : vector<8x8xf32>
    %cst_494 = arith.constant dense<0xFF800000> : vector<8xf32>
    %1290 = vector.multi_reduction <maximumf>, %1289, %cst_494 [1] : vector<8x8xf32> to vector<8xf32>
    %1291 = vector.shape_cast %1290 : vector<8xf32> to vector<8x1xf32>
    %1292 = vector.broadcast %1291 : vector<8x1xf32> to vector<8x8xf32>
    %1293 = arith.subf %1289, %1292 : vector<8x8xf32>
    %1294 = math.exp %1293 : vector<8x8xf32>
    %cst_495 = arith.constant dense<0.000000e+00> : vector<8xf32>
    %1295 = vector.multi_reduction <add>, %1294, %cst_495 [1] : vector<8x8xf32> to vector<8xf32>
    %1296 = vector.shape_cast %1295 : vector<8xf32> to vector<8x1xf32>
    %1297 = tpu.reciprocal %1296 {approx = true} : vector<8x1xf32> -> vector<8x1xf32>
    %1298 = vector.broadcast %1297 : vector<8x1xf32> to vector<8x8xf32>
    %1299 = arith.mulf %1294, %1298 : vector<8x8xf32>
    %cst_496 = arith.constant dense<0.000000e+00> : vector<8x8xf32>
    %1300 = tpu.matmul %1299, %1286, %cst_496 {dimension_numbers = #tpu.dot_dimension_numbers<[1], [0], [0], [1], [0, 0, 1, 1], [], []>} : vector<8x8xf32>, vector<8x8xf32>, vector<8x8xf32> -> vector<8x8xf32>
    %1301 = vector.extract_strided_slice %1149 {offsets = [16, 0], sizes = [8, 32], strides = [1, 1]} : vector<32x32xf32> to vector<8x32xf32>
    %cst_497 = arith.constant dense<0.000000e+00> : vector<8x32xf32>
    %1302 = tpu.matmul %1300, %1301, %cst_497 {dimension_numbers = #tpu.dot_dimension_numbers<[1], [0], [0], [1], [0, 0, 1, 1], [], []>} : vector<8x8xf32>, vector<8x32xf32>, vector<8x32xf32> -> vector<8x32xf32>
    %1303 = arith.addf %1283, %1302 : vector<8x32xf32>
    %1304 = vector.extract_strided_slice %1157 {offsets = [8, 24], sizes = [8, 8], strides = [1, 1]} : vector<16x32xf32> to vector<8x8xf32>
    %1305 = vector.extract_strided_slice %1158 {offsets = [8, 24], sizes = [8, 8], strides = [1, 1]} : vector<16x32xf32> to vector<8x8xf32>
    %1306 = vector.extract_strided_slice %1163 {offsets = [8, 24], sizes = [8, 8], strides = [1, 1]} : vector<16x32xf32> to vector<8x8xf32>
    %cst_498 = arith.constant dense<0.000000e+00> : vector<8x8xf32>
    %1307 = tpu.matmul %1304, %1305, %cst_498 {dimension_numbers = #tpu.dot_dimension_numbers<[1], [1], [0], [0], [0, 0, 1, 0], [], []>} : vector<8x8xf32>, vector<8x8xf32>, vector<8x8xf32> -> vector<8x8xf32>
    %cst_499 = arith.constant 0.353553385 : f32
    %1308 = vector.broadcast %cst_499 : f32 to vector<8x8xf32>
    %1309 = arith.mulf %1307, %1308 : vector<8x8xf32>
    %cst_500 = arith.constant dense<0xFF800000> : vector<8xf32>
    %1310 = vector.multi_reduction <maximumf>, %1309, %cst_500 [1] : vector<8x8xf32> to vector<8xf32>
    %1311 = vector.shape_cast %1310 : vector<8xf32> to vector<8x1xf32>
    %1312 = vector.broadcast %1311 : vector<8x1xf32> to vector<8x8xf32>
    %1313 = arith.subf %1309, %1312 : vector<8x8xf32>
    %1314 = math.exp %1313 : vector<8x8xf32>
    %cst_501 = arith.constant dense<0.000000e+00> : vector<8xf32>
    %1315 = vector.multi_reduction <add>, %1314, %cst_501 [1] : vector<8x8xf32> to vector<8xf32>
    %1316 = vector.shape_cast %1315 : vector<8xf32> to vector<8x1xf32>
    %1317 = tpu.reciprocal %1316 {approx = true} : vector<8x1xf32> -> vector<8x1xf32>
    %1318 = vector.broadcast %1317 : vector<8x1xf32> to vector<8x8xf32>
    %1319 = arith.mulf %1314, %1318 : vector<8x8xf32>
    %cst_502 = arith.constant dense<0.000000e+00> : vector<8x8xf32>
    %1320 = tpu.matmul %1319, %1306, %cst_502 {dimension_numbers = #tpu.dot_dimension_numbers<[1], [0], [0], [1], [0, 0, 1, 1], [], []>} : vector<8x8xf32>, vector<8x8xf32>, vector<8x8xf32> -> vector<8x8xf32>
    %1321 = vector.extract_strided_slice %1149 {offsets = [24, 0], sizes = [8, 32], strides = [1, 1]} : vector<32x32xf32> to vector<8x32xf32>
    %cst_503 = arith.constant dense<0.000000e+00> : vector<8x32xf32>
    %1322 = tpu.matmul %1320, %1321, %cst_503 {dimension_numbers = #tpu.dot_dimension_numbers<[1], [0], [0], [1], [0, 0, 1, 1], [], []>} : vector<8x8xf32>, vector<8x32xf32>, vector<8x32xf32> -> vector<8x32xf32>
    %1323 = arith.addf %1303, %1322 : vector<8x32xf32>
    %1324 = vector.broadcast %1151 : vector<1x32xf32> to vector<8x32xf32>
    %1325 = arith.addf %1323, %1324 : vector<8x32xf32>
    %1326 = tpu.concatenate %1244, %1325 in 0 : vector<8x32xf32>, vector<8x32xf32> -> vector<16x32xf32>
    %c1_504 = arith.constant 1 : index
    %c0_505 = arith.constant 0 : index
    %c0_506 = arith.constant 0 : index
    %1327 = vector.load %arg25[%c1_504, %c0_505, %c0_506] : memref<2x1x32xf32, #tpu.memory_space<vmem>>, vector<1x1x32xf32>
    %1328 = vector.shape_cast %1327 : vector<1x1x32xf32> to vector<1x32xf32>
    %c1_507 = arith.constant 1 : index
    %c0_508 = arith.constant 0 : index
    %c0_509 = arith.constant 0 : index
    %1329 = vector.load %arg26[%c1_507, %c0_508, %c0_509] : memref<2x1x32xf32, #tpu.memory_space<vmem>>, vector<1x1x32xf32>
    %1330 = vector.shape_cast %1329 : vector<1x1x32xf32> to vector<1x32xf32>
    %1331 = arith.addf %1326, %1143 : vector<16x32xf32>
    %cst_510 = arith.constant dense<0.000000e+00> : vector<16xf32>
    %1332 = vector.multi_reduction <add>, %1331, %cst_510 [1] : vector<16x32xf32> to vector<16xf32>
    %1333 = vector.shape_cast %1332 : vector<16xf32> to vector<16x1xf32>
    %cst_511 = arith.constant 3.200000e+01 : f32
    %1334 = vector.broadcast %cst_511 : f32 to vector<16x1xf32>
    %1335 = arith.divf %1333, %1334 : vector<16x1xf32>
    %1336 = vector.broadcast %1335 : vector<16x1xf32> to vector<16x32xf32>
    %1337 = arith.subf %1331, %1336 : vector<16x32xf32>
    %1338 = arith.mulf %1337, %1337 : vector<16x32xf32>
    %cst_512 = arith.constant dense<0.000000e+00> : vector<16xf32>
    %1339 = vector.multi_reduction <add>, %1338, %cst_512 [1] : vector<16x32xf32> to vector<16xf32>
    %1340 = vector.shape_cast %1339 : vector<16xf32> to vector<16x1xf32>
    %cst_513 = arith.constant 3.200000e+01 : f32
    %1341 = vector.broadcast %cst_513 : f32 to vector<16x1xf32>
    %1342 = arith.divf %1340, %1341 : vector<16x1xf32>
    %cst_514 = arith.constant 9.99999974E-6 : f32
    %1343 = vector.broadcast %cst_514 : f32 to vector<16x1xf32>
    %1344 = arith.addf %1342, %1343 : vector<16x1xf32>
    %1345 = math.rsqrt %1344 : vector<16x1xf32>
    %1346 = vector.broadcast %1345 : vector<16x1xf32> to vector<16x32xf32>
    %1347 = arith.mulf %1337, %1346 : vector<16x32xf32>
    %1348 = vector.broadcast %1328 : vector<1x32xf32> to vector<16x32xf32>
    %1349 = arith.mulf %1347, %1348 : vector<16x32xf32>
    %1350 = vector.broadcast %1330 : vector<1x32xf32> to vector<16x32xf32>
    %1351 = arith.addf %1349, %1350 : vector<16x32xf32>
    %c1_515 = arith.constant 1 : index
    %c0_516 = arith.constant 0 : index
    %c0_517 = arith.constant 0 : index
    %1352 = vector.load %arg27[%c1_515, %c0_516, %c0_517] : memref<2x32x64xf32, #tpu.memory_space<vmem>>, vector<1x32x64xf32>
    %1353 = vector.shape_cast %1352 : vector<1x32x64xf32> to vector<32x64xf32>
    %c1_518 = arith.constant 1 : index
    %c0_519 = arith.constant 0 : index
    %c0_520 = arith.constant 0 : index
    %1354 = vector.load %arg28[%c1_518, %c0_519, %c0_520] : memref<2x1x64xf32, #tpu.memory_space<vmem>>, vector<1x1x64xf32>
    %1355 = vector.shape_cast %1354 : vector<1x1x64xf32> to vector<1x64xf32>
    %cst_521 = arith.constant dense<0.000000e+00> : vector<16x64xf32>
    %1356 = tpu.matmul %1351, %1353, %cst_521 {dimension_numbers = #tpu.dot_dimension_numbers<[1], [0], [0], [1], [0, 0, 1, 1], [], []>} : vector<16x32xf32>, vector<32x64xf32>, vector<16x64xf32> -> vector<16x64xf32>
    %1357 = vector.broadcast %1355 : vector<1x64xf32> to vector<16x64xf32>
    %1358 = arith.addf %1356, %1357 : vector<16x64xf32>
    %cst_522 = arith.constant 0.000000e+00 : f32
    %1359 = vector.broadcast %cst_522 : f32 to vector<16x64xf32>
    %1360 = arith.maximumf %1358, %1359 : vector<16x64xf32>
    %c1_523 = arith.constant 1 : index
    %c0_524 = arith.constant 0 : index
    %c0_525 = arith.constant 0 : index
    %1361 = vector.load %arg29[%c1_523, %c0_524, %c0_525] : memref<2x64x32xf32, #tpu.memory_space<vmem>>, vector<1x64x32xf32>
    %1362 = vector.shape_cast %1361 : vector<1x64x32xf32> to vector<64x32xf32>
    %c1_526 = arith.constant 1 : index
    %c0_527 = arith.constant 0 : index
    %c0_528 = arith.constant 0 : index
    %1363 = vector.load %arg30[%c1_526, %c0_527, %c0_528] : memref<2x1x32xf32, #tpu.memory_space<vmem>>, vector<1x1x32xf32>
    %1364 = vector.shape_cast %1363 : vector<1x1x32xf32> to vector<1x32xf32>
    %cst_529 = arith.constant dense<0.000000e+00> : vector<16x32xf32>
    %1365 = tpu.matmul %1360, %1362, %cst_529 {dimension_numbers = #tpu.dot_dimension_numbers<[1], [0], [0], [1], [0, 0, 1, 1], [], []>} : vector<16x64xf32>, vector<64x32xf32>, vector<16x32xf32> -> vector<16x32xf32>
    %1366 = vector.broadcast %1364 : vector<1x32xf32> to vector<16x32xf32>
    %1367 = arith.addf %1365, %1366 : vector<16x32xf32>
    %c1_530 = arith.constant 1 : index
    %c0_531 = arith.constant 0 : index
    %c0_532 = arith.constant 0 : index
    %1368 = vector.load %arg31[%c1_530, %c0_531, %c0_532] : memref<2x1x32xf32, #tpu.memory_space<vmem>>, vector<1x1x32xf32>
    %1369 = vector.shape_cast %1368 : vector<1x1x32xf32> to vector<1x32xf32>
    %c1_533 = arith.constant 1 : index
    %c0_534 = arith.constant 0 : index
    %c0_535 = arith.constant 0 : index
    %1370 = vector.load %arg32[%c1_533, %c0_534, %c0_535] : memref<2x1x32xf32, #tpu.memory_space<vmem>>, vector<1x1x32xf32>
    %1371 = vector.shape_cast %1370 : vector<1x1x32xf32> to vector<1x32xf32>
    %1372 = arith.addf %1367, %1351 : vector<16x32xf32>
    %cst_536 = arith.constant dense<0.000000e+00> : vector<16xf32>
    %1373 = vector.multi_reduction <add>, %1372, %cst_536 [1] : vector<16x32xf32> to vector<16xf32>
    %1374 = vector.shape_cast %1373 : vector<16xf32> to vector<16x1xf32>
    %cst_537 = arith.constant 3.200000e+01 : f32
    %1375 = vector.broadcast %cst_537 : f32 to vector<16x1xf32>
    %1376 = arith.divf %1374, %1375 : vector<16x1xf32>
    %1377 = vector.broadcast %1376 : vector<16x1xf32> to vector<16x32xf32>
    %1378 = arith.subf %1372, %1377 : vector<16x32xf32>
    %1379 = arith.mulf %1378, %1378 : vector<16x32xf32>
    %cst_538 = arith.constant dense<0.000000e+00> : vector<16xf32>
    %1380 = vector.multi_reduction <add>, %1379, %cst_538 [1] : vector<16x32xf32> to vector<16xf32>
    %1381 = vector.shape_cast %1380 : vector<16xf32> to vector<16x1xf32>
    %cst_539 = arith.constant 3.200000e+01 : f32
    %1382 = vector.broadcast %cst_539 : f32 to vector<16x1xf32>
    %1383 = arith.divf %1381, %1382 : vector<16x1xf32>
    %cst_540 = arith.constant 9.99999974E-6 : f32
    %1384 = vector.broadcast %cst_540 : f32 to vector<16x1xf32>
    %1385 = arith.addf %1383, %1384 : vector<16x1xf32>
    %1386 = math.rsqrt %1385 : vector<16x1xf32>
    %1387 = vector.broadcast %1386 : vector<16x1xf32> to vector<16x32xf32>
    %1388 = arith.mulf %1378, %1387 : vector<16x32xf32>
    %1389 = vector.broadcast %1369 : vector<1x32xf32> to vector<16x32xf32>
    %1390 = arith.mulf %1388, %1389 : vector<16x32xf32>
    %1391 = vector.broadcast %1371 : vector<1x32xf32> to vector<16x32xf32>
    %1392 = arith.addf %1390, %1391 : vector<16x32xf32>
    %c0_541 = arith.constant 0 : index
    %c0_542 = arith.constant 0 : index
    %1393 = vector.load %arg33[%c0_541, %c0_542] : memref<32x32xf32, #tpu.memory_space<vmem>>, vector<32x32xf32>
    %c0_543 = arith.constant 0 : index
    %c0_544 = arith.constant 0 : index
    %1394 = vector.load %arg34[%c0_543, %c0_544] : memref<1x32xf32, #tpu.memory_space<vmem>>, vector<1x32xf32>
    %cst_545 = arith.constant dense<0.000000e+00> : vector<16x32xf32>
    %1395 = tpu.matmul %1392, %1393, %cst_545 {dimension_numbers = #tpu.dot_dimension_numbers<[1], [0], [0], [1], [0, 0, 1, 1], [], []>} : vector<16x32xf32>, vector<32x32xf32>, vector<16x32xf32> -> vector<16x32xf32>
    %1396 = vector.broadcast %1394 : vector<1x32xf32> to vector<16x32xf32>
    %1397 = arith.addf %1395, %1396 : vector<16x32xf32>
    %cst_546 = arith.constant dense<0xFF800000> : vector<16xf32>
    %1398 = vector.multi_reduction <maximumf>, %1397, %cst_546 [1] : vector<16x32xf32> to vector<16xf32>
    %1399 = vector.shape_cast %1398 : vector<16xf32> to vector<16x1xf32>
    %1400 = vector.broadcast %1399 : vector<16x1xf32> to vector<16x32xf32>
    %1401 = arith.subf %1397, %1400 : vector<16x32xf32>
    %1402 = math.exp %1401 : vector<16x32xf32>
    %cst_547 = arith.constant dense<0.000000e+00> : vector<16xf32>
    %1403 = vector.multi_reduction <add>, %1402, %cst_547 [1] : vector<16x32xf32> to vector<16xf32>
    %1404 = vector.shape_cast %1403 : vector<16xf32> to vector<16x1xf32>
    %1405 = vector.broadcast %1404 : vector<16x1xf32> to vector<16x32xf32>
    %1406 = arith.divf %1402, %1405 : vector<16x32xf32>
    %c0_548 = arith.constant 0 : index
    %c0_549 = arith.constant 0 : index
    %1407 = vector.load %arg35[%c0_548, %c0_549] : memref<16x32xf32, #tpu.memory_space<vmem>>, vector<16x32xf32>
    tpu.vector_store %arg35[%c0_548, %c0_549], %1406 {strides = array<i32>} : memref<16x32xf32, #tpu.memory_space<vmem>>, vector<16x32xf32>,
    return
  }
}

</mosaic_0001>

<bundles_post_ra>
// kernel: transformer_forward.1
= control target key start
LH: loop header
LB: loop body
LE: loop exit
PB: predicated region body
PF: predicated region fallthrough
CT: control target
= control target key end

     0   :  { %s16687_s6 = smov 1   ;;  %s16688_s10 = smov 2   ;;  %s18590_s0 = inlined_call_operand.smem [shape: u32[36], index: -1, kind: input, shape index: {}] }
   0x1   :  { %s16765_s5 = sld [smem:[%s18590_s0]]   ;;  %s16689_s14 = smov 3  }
   0x2   :  { %s16770_s9 = sld [smem:[%s18590_s0 + %s16687_s6]]   ;;  %s16690_s18 = smov 4  }
   0x3   :  { %s16775_s13 = sld [smem:[%s18590_s0 + %s16688_s10]]   ;;  %s16691_s22 = smov 5  }
   0x4   :  { %s16780_s17 = sld [smem:[%s18590_s0 + %s16689_s14]]   ;;  %s16692_s26 = smov 6  }
   0x5   :  { %s16785_s21 = sld [smem:[%s18590_s0 + %s16690_s18]]   ;;  %s16693_s30 = smov 7  }
   0x6   :  { %s16790_s25 = sld [smem:[%s18590_s0 + %s16691_s22]]   ;;  %s16694_s4 = smov 8  }
   0x7   :  { %18609 = sst [smem:[#allocation40_spill]] %s16765_s5  ;;  %s16695_s10 = smov 9  }
   0x8   :  { %18610 = sst [smem:[#allocation41_spill]] %s16770_s9  ;;  %s16696_s15 = smov 10  }
   0x9   :  { %18611 = sst [smem:[#allocation42_spill]] %s16775_s13  ;;  %s16697_s20 = smov 11  }
   0xa   :  { %18612 = sst [smem:[#allocation43_spill]] %s16780_s17  ;;  %s16699_s1 = smov 13  }
   0xb   :  { %18613 = sst [smem:[#allocation44_spill]] %s16785_s21  ;;  %s16700_s7 = smov 14  }
   0xc   :  { %18614 = sst [smem:[#allocation45_spill]] %s16790_s25  ;;  %s16702_s22 = smov 16  }
   0xd   :  { %s16795_s29 = sld [smem:[%s18590_s0 + %s16692_s26]]   ;;  %s16698_s26 = smov 12  }
   0xe   :  { %s16800_s3 = sld [smem:[%s18590_s0 + %s16693_s30]]   ;;  %s16703_s28 = smov 17  }
   0xf   :  { %s16805_s8 = sld [smem:[%s18590_s0 + %s16694_s4]]  }
  0x10   :  { %s16810_s14 = sld [smem:[%s18590_s0 + %s16695_s10]]  }
  0x11   :  { %s16815_s19 = sld [smem:[%s18590_s0 + %s16696_s15]]   ;;  %s16701_s15 = smov 15  }
  0x12   :  { %s16820_s24 = sld [smem:[%s18590_s0 + %s16697_s20]]  }
  0x13   :  { %18615 = sst [smem:[#allocation46_spill]] %s16795_s29 }
  0x14   :  { %18616 = sst [smem:[#allocation47_spill]] %s16800_s3 }
  0x15   :  { %s16825_s30 = sld [smem:[%s18590_s0 + %s16698_s26]]  }
  0x16   :  { %18617 = sst [smem:[#allocation48_spill]] %s16810_s14 }
  0x17   :  { %18618 = sst [smem:[#allocation49_spill]] %s16815_s19 }
  0x18   :  { %18619 = sst [smem:[#allocation50_spill]] %s16820_s24 }
  0x19   :  { %s16830_s6 = sld [smem:[%s18590_s0 + %s16699_s1]]  }
  0x1a   :  { %s16835_s12 = sld [smem:[%s18590_s0 + %s16700_s7]]   ;;  %s16704_s7 = smov 18  }
  0x1b   :  { %18620 = sst [smem:[#allocation51_spill]] %s16825_s30 }
  0x1c   :  { %s16840_s20 = sld [smem:[%s18590_s0 + %s16701_s15]]   ;;  %s16705_s15 = smov 19  }
  0x1d   :  { %s16845_s27 = sld [smem:[%s18590_s0 + %s16702_s22]]   ;;  %s16706_s22 = smov 20  }
  0x1e   :  { %s16850_s4 = sld [smem:[%s18590_s0 + %s16703_s28]]   ;;  %s16707_s28 = smov 21  }
  0x1f   :  { %18621 = sst [smem:[#allocation52_spill]] %s16830_s6 }
  0x20   :  { %s16855_s9 = sld [smem:[%s18590_s0 + %s16704_s7]]   ;;  %s16708_s7 = smov 22  }
  0x21   :  { %s16865_s6 = sld [smem:[%s18590_s0 + %s16706_s22]]   ;;  %s16710_s22 = smov 24  }
  0x22   :  { %18622 = sst [smem:[#allocation53_spill]] %s16840_s20 }
  0x23   :  { %s16860_s20 = sld [smem:[%s18590_s0 + %s16705_s15]]   ;;  %s16709_s15 = smov 23  }
  0x24   :  { %18623 = sst [smem:[#allocation54_spill]] %s16850_s4 }
  0x25   :  { %s16870_s4 = sld [smem:[%s18590_s0 + %s16707_s28]]   ;;  %s16711_s28 = smov 25  }
  0x26   :  { %s16875_s30 = sld [smem:[%s18590_s0 + %s16708_s7]]   ;;  %s16712_s7 = smov 26  }
  0x27   :  { %s16880_s19 = sld [smem:[%s18590_s0 + %s16709_s15]]   ;;  %s16713_s15 = smov 27  }
  0x28   :  { %s16885_s24 = sld [smem:[%s18590_s0 + %s16710_s22]]   ;;  %s16714_s22 = smov 28  }
  0x29   :  { %s16890_s14 = sld [smem:[%s18590_s0 + %s16711_s28]]   ;;  %s16715_s28 = smov 29  }
  0x2a   :  { %s16895_s3 = sld [smem:[%s18590_s0 + %s16712_s7]]   ;;  %s16716_s7 = smov 30  }
  0x2b   :  { %s16900_s29 = sld [smem:[%s18590_s0 + %s16713_s15]]   ;;  %s16717_s15 = smov 31  }
  0x2c   :  { %s16905_s25 = sld [smem:[%s18590_s0 + %s16714_s22]]   ;;  %s16718_s22 = smov 32  }
  0x2d   :  { %s16910_s21 = sld [smem:[%s18590_s0 + %s16715_s28]]   ;;  %s16719_s28 = smov 33  }
  0x2e   :  { %s16915_s5 = sld [smem:[%s18590_s0 + %s16716_s7]]   ;;  %s16720_s7 = smov 34  }
  0x2f   :  { %s16920_s13 = sld [smem:[%s18590_s0 + %s16717_s15]]   ;;  %s16721_s15 = smov 35  }
  0x30   :  { %s16925_s17 = sld [smem:[%s18590_s0 + %s16718_s22]]  }
  0x31   :  { %18624 = sst [smem:[#allocation55_spill]] %s16900_s29 }
  0x32   :  { %s16940_s29 = sld [smem:[%s18590_s0 + %s16721_s15]]  }
  0x33   :  { %18625 = sst [smem:[#allocation56_spill]] %s16910_s21 }
  0x34   :  { %18626 = sst [smem:[#allocation57_spill]] %s16915_s5 }
  0x35   :  { %s16930_s21 = sld [smem:[%s18590_s0 + %s16719_s28]]  }
  0x36   :  { %s16935_s5 = sld [smem:[%s18590_s0 + %s16720_s7]]  }
  0x37   :  { %76 = vsyncpa [#allocation3], 0 }
  0x38   :  { %77 = vsyncpa [#allocation6], 0 }
  0x39   :  { %78 = vsyncpa [#allocation9], 0 }
  0x3a   :  { %79 = vsyncpa [#allocation12], 0 }
  0x3b   :  { %80 = vsyncpa [#allocation15], 0 }
  0x3c   :  { %81 = vsyncpa [#allocation18], 0 }
  0x3d   :  { %82 = vsyncpa [#allocation21], 0 }
  0x3e   :  { %83 = vsyncpa [#allocation24], 0 }
  0x3f   :  { %84 = vsyncpa [#allocation27], 0 }
  0x40   :  { %85 = vsyncpa [#allocation4], 0  ;;  %s16722_s22 = smov [#allocation5]   ;;  %s16723_s26 = smov [#allocation8]  }
  0x41   :  { %s129_s23 = sshll.u32 %s16722_s22, 4  ;;  %s157_s28 = sshll.u32 %s16723_s26, 4  ;;  %s130_s23 = int_to_ptr.vmem [resolvable:$true] %s129_s23  ;;  %s16942_s28 = int_to_ptr.vmem [resolvable:$true] %s157_s28 }
  0x42   :  { %s16271_s0 = scalar_lea.hbm %s16835_s12, 32 }
  0x43   :  { %p16272_p0 = scmp.ne.s32.totalorder %s16835_s12, %s16271_s0  ;;  %p16275_p1 = scmp.lt.u32.totalorder %s16271_s0, %s16835_s12 }
  0x45   :  { %p16277_p2 = pnand %p16275_p1, %p16272_p0 }
  0x47   :  { %16280 = shalt.err (!%p16277_p2)
}
  0x48   :  { %s16281_s1 = scalar_lea.vmem %s130_s23, 32  ;;  %p16286_p4 = scmp.lt.s32.totalorder %s130_s23, %s130_s23 }
  0x49   :  { %p16282_p3 = scmp.ne.s32.totalorder %s130_s23, %s16281_s1  ;;  %p16287_p5 = scmp.lt.s32.totalorder %s16281_s1, %s16281_s1 }
  0x4b   :  { %p16288_p6 = por %p16287_p5, %p16286_p4 }
  0x4d   :  { %p16289_p7 = pnand %p16288_p6, %p16282_p3 }
  0x4f   :  { %16292 = shalt.err (!%p16289_p7)
}
  0x50   :  { %s16724_s2 = smov 16   ;;  %s16725_s7 = smov 1  }
  0x51   :  { %135 = dma.hbm_to_vmem [thread:$0]  %s16835_s12, 32, %s130_s23, [#allocation6], %s16724_s2, %s16724_s2, %s16725_s7  }
  0x52   :  { %s16293_s10 = scalar_lea.hbm %s16855_s9, 32 }
  0x53   :  { %p16294_p8 = scmp.ne.s32.totalorder %s16855_s9, %s16293_s10  ;;  %p16297_p9 = scmp.lt.u32.totalorder %s16293_s10, %s16855_s9 }
  0x55   :  { %p16299_p10 = pnand %p16297_p9, %p16294_p8 }
  0x57   :  { %16302 = shalt.err (!%p16299_p10)
}
  0x58   :  { %s16303_s11 = scalar_lea.vmem %s16942_s28, 32  ;;  %p16308_p12 = scmp.lt.s32.totalorder %s16942_s28, %s16942_s28 }
  0x59   :  { %p16304_p11 = scmp.ne.s32.totalorder %s16942_s28, %s16303_s11  ;;  %p16309_p13 = scmp.lt.s32.totalorder %s16303_s11, %s16303_s11 }
  0x5b   :  { %p16310_p0 = por %p16309_p13, %p16308_p12 }
  0x5d   :  { %p16311_p1 = pnand %p16310_p0, %p16304_p11 }
  0x5f   :  { %16314 = shalt.err (!%p16311_p1)
}
  0x60   :  { %163 = dma.hbm_to_vmem [thread:$0]  %s16855_s9, 32, %s16942_s28, [#allocation9], %s16724_s2, %s16724_s2, %s16725_s7  }
  0x61   :  { %s16726_s12 = smov [#allocation11]   ;;  %s16727_s16 = smov [#allocation14]  }
  0x62   :  { %s181_s15 = sshll.u32 %s16726_s12, 4  ;;  %s205_s18 = sshll.u32 %s16727_s16, 4  ;;  %s182_s15 = int_to_ptr.vmem [resolvable:$true] %s181_s15  ;;  %s16963_s18 = int_to_ptr.vmem [resolvable:$true] %s205_s18 }
  0x63   :  { %s16315_s22 = scalar_lea.hbm %s16865_s6, 32 }
  0x64   :  { %p16316_p2 = scmp.ne.s32.totalorder %s16865_s6, %s16315_s22  ;;  %p16319_p3 = scmp.lt.u32.totalorder %s16315_s22, %s16865_s6 }
  0x66   :  { %p16321_p4 = pnand %p16319_p3, %p16316_p2 }
  0x68   :  { %16324 = shalt.err (!%p16321_p4)
}
  0x69   :  { %s16325_s23 = scalar_lea.vmem %s182_s15, 32  ;;  %p16330_p6 = scmp.lt.s32.totalorder %s182_s15, %s182_s15 }
  0x6a   :  { %p16326_p5 = scmp.ne.s32.totalorder %s182_s15, %s16325_s23  ;;  %p16331_p7 = scmp.lt.s32.totalorder %s16325_s23, %s16325_s23 }
  0x6c   :  { %p16332_p8 = por %p16331_p7, %p16330_p6 }
  0x6e   :  { %p16333_p9 = pnand %p16332_p8, %p16326_p5 }
  0x70   :  { %16336 = shalt.err (!%p16333_p9)
}
  0x71   :  { %187 = dma.hbm_to_vmem [thread:$0]  %s16865_s6, 32, %s182_s15, [#allocation12], %s16724_s2, %s16724_s2, %s16725_s7  }
  0x72   :  { %s16337_s9 = scalar_lea.hbm %s16875_s30, 32 }
  0x73   :  { %p16338_p10 = scmp.ne.s32.totalorder %s16875_s30, %s16337_s9  ;;  %p16341_p11 = scmp.lt.u32.totalorder %s16337_s9, %s16875_s30 }
  0x75   :  { %p16343_p12 = pnand %p16341_p11, %p16338_p10 }
  0x77   :  { %16346 = shalt.err (!%p16343_p12)
}
  0x78   :  { %s16347_s26 = scalar_lea.vmem %s16963_s18, 32  ;;  %p16352_p0 = scmp.lt.s32.totalorder %s16963_s18, %s16963_s18 }
  0x79   :  { %p16348_p13 = scmp.ne.s32.totalorder %s16963_s18, %s16347_s26  ;;  %p16353_p1 = scmp.lt.s32.totalorder %s16347_s26, %s16347_s26 }
  0x7b   :  { %p16354_p2 = por %p16353_p1, %p16352_p0 }
  0x7d   :  { %p16355_p3 = pnand %p16354_p2, %p16348_p13 }
  0x7f   :  { %16358 = shalt.err (!%p16355_p3)
}
  0x80   :  { %211 = dma.hbm_to_vmem [thread:$0]  %s16875_s30, 32, %s16963_s18, [#allocation15], %s16724_s2, %s16724_s2, %s16725_s7  }
  0x81   :  { %s16728_s6 = smov [#allocation17]   ;;  %s16729_s0 = smov [#allocation20]  }
  0x82   :  { %s229_s28 = sshll.u32 %s16728_s6, 4  ;;  %s253_s1 = sshll.u32 %s16729_s0, 4  ;;  %s230_s28 = int_to_ptr.vmem [resolvable:$true] %s229_s28  ;;  %s16984_s1 = int_to_ptr.vmem [resolvable:$true] %s253_s1 }
  0x83   :  { %s16359_s10 = scalar_lea.hbm %s16885_s24, 32 }
  0x84   :  { %p16360_p4 = scmp.ne.s32.totalorder %s16885_s24, %s16359_s10  ;;  %p16363_p5 = scmp.lt.u32.totalorder %s16359_s10, %s16885_s24 }
  0x86   :  { %p16365_p6 = pnand %p16363_p5, %p16360_p4 }
  0x88   :  { %16368 = shalt.err (!%p16365_p6)
}
  0x89   :  { %s16369_s11 = scalar_lea.vmem %s230_s28, 32  ;;  %p16374_p8 = scmp.lt.s32.totalorder %s230_s28, %s230_s28 }
  0x8a   :  { %p16370_p7 = scmp.ne.s32.totalorder %s230_s28, %s16369_s11  ;;  %p16375_p9 = scmp.lt.s32.totalorder %s16369_s11, %s16369_s11 }
  0x8c   :  { %p16376_p10 = por %p16375_p9, %p16374_p8 }
  0x8e   :  { %p16377_p11 = pnand %p16376_p10, %p16370_p7 }
  0x90   :  { %16380 = shalt.err (!%p16377_p11)
}
  0x91   :  { %235 = dma.hbm_to_vmem [thread:$0]  %s16885_s24, 32, %s230_s28, [#allocation18], %s16724_s2, %s16724_s2, %s16725_s7  }
  0x92   :  { %s16381_s30 = scalar_lea.hbm %s16895_s3, 32 }
  0x93   :  { %p16382_p12 = scmp.ne.s32.totalorder %s16895_s3, %s16381_s30  ;;  %p16385_p13 = scmp.lt.u32.totalorder %s16381_s30, %s16895_s3 }
  0x95   :  { %p16387_p0 = pnand %p16385_p13, %p16382_p12 }
  0x97   :  { %16390 = shalt.err (!%p16387_p0)
}
  0x98   :  { %s16391_s12 = scalar_lea.vmem %s16984_s1, 32  ;;  %p16396_p2 = scmp.lt.s32.totalorder %s16984_s1, %s16984_s1 }
  0x99   :  { %p16392_p1 = scmp.ne.s32.totalorder %s16984_s1, %s16391_s12  ;;  %p16397_p3 = scmp.lt.s32.totalorder %s16391_s12, %s16391_s12 }
  0x9b   :  { %p16398_p4 = por %p16397_p3, %p16396_p2 }
  0x9d   :  { %p16399_p5 = pnand %p16398_p4, %p16392_p1 }
  0x9f   :  { %16402 = shalt.err (!%p16399_p5)
}
  0xa0   :  { %259 = dma.hbm_to_vmem [thread:$0]  %s16895_s3, 32, %s16984_s1, [#allocation21], %s16724_s2, %s16724_s2, %s16725_s7  }
  0xa1   :  { %s16730_s24 = smov [#allocation23]   ;;  %s16731_s16 = smov [#allocation26]  }
  0xa2   :  { %s277_s15 = sshll.u32 %s16730_s24, 4  ;;  %s303_s18 = sshll.u32 %s16731_s16, 4  ;;  %s278_s15 = int_to_ptr.vmem [resolvable:$true] %s277_s15  ;;  %s17005_s18 = int_to_ptr.vmem [resolvable:$true] %s303_s18 }
  0xa3   :  { %s16403_s22 = scalar_lea.hbm %s16905_s25, 32 }
  0xa4   :  { %p16404_p6 = scmp.ne.s32.totalorder %s16905_s25, %s16403_s22  ;;  %p16407_p7 = scmp.lt.u32.totalorder %s16403_s22, %s16905_s25 }
  0xa6   :  { %p16409_p8 = pnand %p16407_p7, %p16404_p6 }
  0xa8   :  { %16412 = shalt.err (!%p16409_p8)
}
  0xa9   :  { %s16413_s23 = scalar_lea.vmem %s278_s15, 32  ;;  %p16418_p10 = scmp.lt.s32.totalorder %s278_s15, %s278_s15 }
  0xaa   :  { %p16414_p9 = scmp.ne.s32.totalorder %s278_s15, %s16413_s23  ;;  %p16419_p11 = scmp.lt.s32.totalorder %s16413_s23, %s16413_s23 }
  0xac   :  { %p16420_p12 = por %p16419_p11, %p16418_p10 }
  0xae   :  { %p16421_p13 = pnand %p16420_p12, %p16414_p9 }
  0xb0   :  { %16424 = shalt.err (!%p16421_p13)
}
  0xb1   :  { %283 = dma.hbm_to_vmem [thread:$0]  %s16905_s25, 32, %s278_s15, [#allocation24], %s16724_s2, %s16724_s2, %s16725_s7  }
  0xb2   :  { %s16425_s3 = scalar_lea.hbm %s16920_s13, 32 }
  0xb3   :  { %p16426_p0 = scmp.ne.s32.totalorder %s16920_s13, %s16425_s3  ;;  %p16429_p1 = scmp.lt.u32.totalorder %s16425_s3, %s16920_s13 }
  0xb5   :  { %p16431_p2 = pnand %p16429_p1, %p16426_p0 }
  0xb7   :  { %16434 = shalt.err (!%p16431_p2)
}
  0xb8   :  { %s16435_s9 = scalar_lea.vmem %s17005_s18, 32  ;;  %p16440_p4 = scmp.lt.s32.totalorder %s17005_s18, %s17005_s18 }
  0xb9   :  { %p16436_p3 = scmp.ne.s32.totalorder %s17005_s18, %s16435_s9  ;;  %p16441_p5 = scmp.lt.s32.totalorder %s16435_s9, %s16435_s9 }
  0xbb   :  { %p16442_p6 = por %p16441_p5, %p16440_p4 }
  0xbd   :  { %p16443_p7 = pnand %p16442_p6, %p16436_p3 }
  0xbf   :  { %16446 = shalt.err (!%p16443_p7)
}
  0xc0   :  { %309 = dma.hbm_to_vmem [thread:$0]  %s16920_s13, 32, %s17005_s18, [#allocation27], %s16724_s2, %s16724_s2, %s16725_s7  }
  0xc1   :  { %s16732_s25 = smov [#allocation2]   ;;  %s16733_s6 = smov [#allocation7]  }
  0xc2   :  { %s107_s26 = sshll.u32 %s16732_s25, 4  ;;  %s143_s28 = sshll.u32 %s16733_s6, 4  ;;  %s108_s26 = int_to_ptr.vmem [resolvable:$true] %s107_s26  ;;  %s17026_s28 = int_to_ptr.vmem [resolvable:$true] %s143_s28 }
  0xc3   :  { %s16447_s0 = scalar_lea.hbm %s16805_s8, 32 }
  0xc4   :  { %p16448_p8 = scmp.ne.s32.totalorder %s16805_s8, %s16447_s0  ;;  %p16451_p9 = scmp.lt.u32.totalorder %s16447_s0, %s16805_s8 }
  0xc6   :  { %p16453_p10 = pnand %p16451_p9, %p16448_p8 }
  0xc8   :  { %16456 = shalt.err (!%p16453_p10)
}
  0xc9   :  { %s16457_s1 = scalar_lea.vmem %s108_s26, 32  ;;  %p16462_p12 = scmp.lt.s32.totalorder %s108_s26, %s108_s26 }
  0xca   :  { %p16458_p11 = scmp.ne.s32.totalorder %s108_s26, %s16457_s1  ;;  %p16463_p13 = scmp.lt.s32.totalorder %s16457_s1, %s16457_s1 }
  0xcc   :  { %p16464_p0 = por %p16463_p13, %p16462_p12 }
  0xce   :  { %p16465_p1 = pnand %p16464_p0, %p16458_p11 }
  0xd0   :  { %16468 = shalt.err (!%p16465_p1)
}
  0xd1   :  { %113 = dma.hbm_to_vmem [thread:$0]  %s16805_s8, 32, %s108_s26, [#allocation3], %s16724_s2, %s16724_s2, %s16725_s7  }
  0xd2   :  { %s16469_s13 = scalar_lea.hbm %s16845_s27, 32 }
  0xd3   :  { %p16470_p2 = scmp.ne.s32.totalorder %s16845_s27, %s16469_s13  ;;  %p16473_p3 = scmp.lt.u32.totalorder %s16469_s13, %s16845_s27 }
  0xd5   :  { %p16475_p4 = pnand %p16473_p3, %p16470_p2 }
  0xd7   :  { %16478 = shalt.err (!%p16475_p4)
}
  0xd8   :  { %s16479_s10 = scalar_lea.vmem %s17026_s28, 32  ;;  %p16484_p6 = scmp.lt.s32.totalorder %s17026_s28, %s17026_s28 }
  0xd9   :  { %p16480_p5 = scmp.ne.s32.totalorder %s17026_s28, %s16479_s10  ;;  %p16485_p7 = scmp.lt.s32.totalorder %s16479_s10, %s16479_s10 }
  0xdb   :  { %p16486_p8 = por %p16485_p7, %p16484_p6 }
  0xdd   :  { %p16487_p9 = pnand %p16486_p8, %p16480_p5 }
  0xdf   :  { %16490 = shalt.err (!%p16487_p9)
}
  0xe0   :  { %149 = dma.hbm_to_vmem [thread:$0]  %s16845_s27, 32, %s17026_s28, [#allocation6], %s16724_s2, %s16724_s2, %s16725_s7  }
  0xe1   :  { %s16734_s8 = smov [#allocation10]   ;;  %s16735_s30 = smov [#allocation13]  }
  0xe2   :  { %s169_s11 = sshll.u32 %s16734_s8, 4  ;;  %s193_s12 = sshll.u32 %s16735_s30, 4  ;;  %s170_s11 = int_to_ptr.vmem [resolvable:$true] %s169_s11  ;;  %s17047_s12 = int_to_ptr.vmem [resolvable:$true] %s193_s12 }
  0xe3   :  { %s16491_s24 = scalar_lea.hbm %s16860_s20, 32 }
  0xe4   :  { %p16492_p10 = scmp.ne.s32.totalorder %s16860_s20, %s16491_s24  ;;  %p16495_p11 = scmp.lt.u32.totalorder %s16491_s24, %s16860_s20 }
  0xe6   :  { %p16497_p12 = pnand %p16495_p11, %p16492_p10 }
  0xe8   :  { %16500 = shalt.err (!%p16497_p12)
}
  0xe9   :  { %s16501_s15 = scalar_lea.vmem %s170_s11, 32  ;;  %p16506_p0 = scmp.lt.s32.totalorder %s170_s11, %s170_s11 }
  0xea   :  { %p16502_p13 = scmp.ne.s32.totalorder %s170_s11, %s16501_s15  ;;  %p16507_p1 = scmp.lt.s32.totalorder %s16501_s15, %s16501_s15 }
  0xec   :  { %p16508_p2 = por %p16507_p1, %p16506_p0 }
  0xee   :  { %p16509_p3 = pnand %p16508_p2, %p16502_p13 }
  0xf0   :  { %16512 = shalt.err (!%p16509_p3)
}
  0xf1   :  { %175 = dma.hbm_to_vmem [thread:$0]  %s16860_s20, 32, %s170_s11, [#allocation9], %s16724_s2, %s16724_s2, %s16725_s7  }
  0xf2   :  { %s16513_s27 = scalar_lea.hbm %s16870_s4, 1024 }
  0xf3   :  { %p16514_p4 = scmp.ne.s32.totalorder %s16870_s4, %s16513_s27  ;;  %p16517_p5 = scmp.lt.u32.totalorder %s16513_s27, %s16870_s4 }
  0xf5   :  { %p16519_p6 = pnand %p16517_p5, %p16514_p4 }
  0xf7   :  { %16522 = shalt.err (!%p16519_p6)
}
  0xf8   :  { %s16523_s16 = scalar_lea.vmem %s17047_s12, 1024  ;;  %p16528_p8 = scmp.lt.s32.totalorder %s17047_s12, %s17047_s12 }
  0xf9   :  { %p16524_p7 = scmp.ne.s32.totalorder %s17047_s12, %s16523_s16  ;;  %p16529_p9 = scmp.lt.s32.totalorder %s16523_s16, %s16523_s16 }
  0xfb   :  { %p16530_p10 = por %p16529_p9, %p16528_p8 }
  0xfd   :  { %p16531_p11 = pnand %p16530_p10, %p16524_p7 }
  0xff   :  { %16534 = shalt.err (!%p16531_p11)
}
 0x100   :  { %s16736_s18 = smov 128   ;;  %s16737_s20 = smov 8  }
 0x101   :  { %199 = dma.hbm_to_vmem [thread:$0]  %s16870_s4, 1024, %s17047_s12, [#allocation12], %s16736_s18, %s16736_s18, %s16737_s20  }
 0x102   :  { %s16738_s22 = smov [#allocation16]   ;;  %s16739_s3 = smov [#allocation19]  }
 0x103   :  { %s217_s23 = sshll.u32 %s16738_s22, 4  ;;  %s241_s9 = sshll.u32 %s16739_s3, 4  ;;  %s218_s23 = int_to_ptr.vmem [resolvable:$true] %s217_s23  ;;  %s17068_s9 = int_to_ptr.vmem [resolvable:$true] %s241_s9 }
 0x104   :  { %s16535_s25 = scalar_lea.hbm %s16880_s19, 1024 }
 0x105   :  { %p16536_p12 = scmp.ne.s32.totalorder %s16880_s19, %s16535_s25  ;;  %p16539_p13 = scmp.lt.u32.totalorder %s16535_s25, %s16880_s19 }
 0x107   :  { %p16541_p0 = pnand %p16539_p13, %p16536_p12 }
 0x109   :  { %16544 = shalt.err (!%p16541_p0)
}
 0x10a   :  { %s16545_s26 = scalar_lea.vmem %s218_s23, 1024  ;;  %p16550_p2 = scmp.lt.s32.totalorder %s218_s23, %s218_s23 }
 0x10b   :  { %p16546_p1 = scmp.ne.s32.totalorder %s218_s23, %s16545_s26  ;;  %p16551_p3 = scmp.lt.s32.totalorder %s16545_s26, %s16545_s26 }
 0x10d   :  { %p16552_p4 = por %p16551_p3, %p16550_p2 }
 0x10f   :  { %p16553_p5 = pnand %p16552_p4, %p16546_p1 }
 0x111   :  { %16556 = shalt.err (!%p16553_p5)
}
 0x112   :  { %223 = dma.hbm_to_vmem [thread:$0]  %s16880_s19, 1024, %s218_s23, [#allocation15], %s16736_s18, %s16736_s18, %s16737_s20  }
 0x113   :  { %s16557_s4 = scalar_lea.hbm %s16890_s14, 32 }
 0x114   :  { %p16558_p6 = scmp.ne.s32.totalorder %s16890_s14, %s16557_s4  ;;  %p16561_p7 = scmp.lt.u32.totalorder %s16557_s4, %s16890_s14 }
 0x116   :  { %p16563_p8 = pnand %p16561_p7, %p16558_p6 }
 0x118   :  { %16566 = shalt.err (!%p16563_p8)
}
 0x119   :  { %s16567_s6 = scalar_lea.vmem %s17068_s9, 32  ;;  %p16572_p10 = scmp.lt.s32.totalorder %s17068_s9, %s17068_s9 }
 0x11a   :  { %p16568_p9 = scmp.ne.s32.totalorder %s17068_s9, %s16567_s6  ;;  %p16573_p11 = scmp.lt.s32.totalorder %s16567_s6, %s16567_s6 }
 0x11c   :  { %p16574_p12 = por %p16573_p11, %p16572_p10 }
 0x11e   :  { %p16575_p13 = pnand %p16574_p12, %p16568_p9 }
 0x120   :  { %16578 = shalt.err (!%p16575_p13)
}
 0x121   :  { %s18627_s19 = sld [smem:[#allocation55_spill]]  ;;  %s16740_s28 = smov [#allocation22]  }
 0x122   :  { %247 = dma.hbm_to_vmem [thread:$0]  %s16890_s14, 32, %s17068_s9, [#allocation18], %s16724_s2, %s16724_s2, %s16725_s7  }
 0x123   :  { %s265_s0 = sshll.u32 %s16740_s28, 4  ;;  %s16741_s1 = smov [#allocation25]   ;;  %s266_s0 = int_to_ptr.vmem [resolvable:$true] %s265_s0 }
 0x124   :  { %s291_s13 = sshll.u32 %s16741_s1, 4  ;;  %s17089_s13 = int_to_ptr.vmem [resolvable:$true] %s291_s13 }
 0x127   :  { %s16579_s10 = scalar_lea.hbm %s18627_s19, 1024 }
 0x128   :  { %p16580_p0 = scmp.ne.s32.totalorder %s18627_s19, %s16579_s10  ;;  %p16583_p1 = scmp.lt.u32.totalorder %s16579_s10, %s18627_s19 }
 0x12a   :  { %p16585_p2 = pnand %p16583_p1, %p16580_p0 }
 0x12c   :  { %16588 = shalt.err (!%p16585_p2)
}
 0x12d   :  { %s16589_s8 = scalar_lea.vmem %s266_s0, 1024  ;;  %p16594_p4 = scmp.lt.s32.totalorder %s266_s0, %s266_s0 }
 0x12e   :  { %p16590_p3 = scmp.ne.s32.totalorder %s266_s0, %s16589_s8  ;;  %p16595_p5 = scmp.lt.s32.totalorder %s16589_s8, %s16589_s8 }
 0x130   :  { %p16596_p6 = por %p16595_p5, %p16594_p4 }
 0x132   :  { %p16597_p7 = pnand %p16596_p6, %p16590_p3 }
 0x134   :  { %16600 = shalt.err (!%p16597_p7)
}
 0x135   :  { %s18628_s14 = sld [smem:[#allocation57_spill]] }
 0x136   :  { %271 = dma.hbm_to_vmem [thread:$0]  %s18627_s19, 1024, %s266_s0, [#allocation21], %s16736_s18, %s16736_s18, %s16737_s20  }
 0x13b   :  { %s16601_s11 = scalar_lea.hbm %s18628_s14, 32 }
 0x13c   :  { %p16602_p8 = scmp.ne.s32.totalorder %s18628_s14, %s16601_s11  ;;  %p16605_p9 = scmp.lt.u32.totalorder %s16601_s11, %s18628_s14 }
 0x13e   :  { %p16607_p10 = pnand %p16605_p9, %p16602_p8 }
 0x140   :  { %16610 = shalt.err (!%p16607_p10)
}
 0x141   :  { %s16611_s30 = scalar_lea.vmem %s17089_s13, 32  ;;  %p16616_p12 = scmp.lt.s32.totalorder %s17089_s13, %s17089_s13 }
 0x142   :  { %p16612_p11 = scmp.ne.s32.totalorder %s17089_s13, %s16611_s30  ;;  %p16617_p13 = scmp.lt.s32.totalorder %s16611_s30, %s16611_s30 }
 0x144   :  { %p16618_p0 = por %p16617_p13, %p16616_p12 }
 0x146   :  { %p16619_p1 = pnand %p16618_p0, %p16612_p11 }
 0x148   :  { %16622 = shalt.err (!%p16619_p1)
}
 0x149   :  { %297 = dma.hbm_to_vmem [thread:$0]  %s18628_s14, 32, %s17089_s13, [#allocation24], %s16724_s2, %s16724_s2, %s16725_s7  }
 0x14a   :  { %s16742_s12 = smov [#allocation28]   ;;  %s16623_s15 = scalar_lea.hbm %s16925_s17, 32 }
 0x14b   :  { %s315_s24 = sshll.u32 %s16742_s12, 4  ;;  %p16624_p2 = scmp.ne.s32.totalorder %s16925_s17, %s16623_s15  ;;  %s316_s24 = int_to_ptr.vmem [resolvable:$true] %s315_s24 }
 0x14c   :  { %p16627_p3 = scmp.lt.u32.totalorder %s16623_s15, %s16925_s17 }
 0x14e   :  { %p16629_p4 = pnand %p16627_p3, %p16624_p2 }
 0x150   :  { %16632 = shalt.err (!%p16629_p4)
}
 0x151   :  { %s16633_s27 = scalar_lea.vmem %s316_s24, 32  ;;  %p16638_p6 = scmp.lt.s32.totalorder %s316_s24, %s316_s24 }
 0x152   :  { %p16634_p5 = scmp.ne.s32.totalorder %s316_s24, %s16633_s27  ;;  %p16639_p7 = scmp.lt.s32.totalorder %s16633_s27, %s16633_s27 }
 0x154   :  { %p16640_p8 = por %p16639_p7, %p16638_p6 }
 0x156   :  { %p16641_p9 = pnand %p16640_p8, %p16634_p5 }
 0x158   :  { %16644 = shalt.err (!%p16641_p9)
}
 0x159   :  { %321 = dma.hbm_to_vmem [thread:$0]  %s16925_s17, 32, %s316_s24, [#allocation27], %s16724_s2, %s16724_s2, %s16725_s7  }
 0x15a   :  { %16667 = dma.done.wait [#allocation3], 32  }
 0x15b   :  { %16668 = vsyncadd [#allocation3], 4294967264 }
 0x15c   :  { %16669 = dma.done.wait [#allocation6], 64  }
 0x15d   :  { %16670 = vsyncadd [#allocation6], 4294967232 }
 0x15e   :  { %16671 = dma.done.wait [#allocation9], 64  }
 0x15f   :  { %16672 = vsyncadd [#allocation9], 4294967232 }
 0x160   :  { %16673 = dma.done.wait [#allocation12], 1056  }
 0x161   :  { %16674 = vsyncadd [#allocation12], 4294966240 }
 0x162   :  { %16675 = dma.done.wait [#allocation15], 1056  }
 0x163   :  { %16676 = vsyncadd [#allocation15], 4294966240 }
 0x164   :  { %16677 = dma.done.wait [#allocation18], 64  }
 0x165   :  { %16678 = vsyncadd [#allocation18], 4294967232 }
 0x166   :  { %16679 = dma.done.wait [#allocation21], 1056  }
 0x167   :  { %16680 = vsyncadd [#allocation21], 4294966240 }
 0x168   :  { %16681 = dma.done.wait [#allocation24], 64  }
 0x169   :  { %16682 = vsyncadd [#allocation24], 4294967232 }
 0x16a   :  { %16683 = dma.done.wait [#allocation27], 64  }
 0x16b   :  { %16684 = vsyncadd [#allocation27], 4294967232  ;;  %s18629_s16 = sld [smem:[#allocation43_spill]]  ;;  %s18630_s17 = sld [smem:[#allocation42_spill]]  ;;  %vm399_vm0 = vcmask 261120   ;;  %v16743_v12 = vmov 0.0  }
 0x16c   :  { %s18631_s2 = sld [smem:[#allocation40_spill]]  ;;  %s18632_s7 = sld [smem:[#allocation44_spill]]  ;;  %14843 = vmatprep.subr.mxu1 %v16743_v12  ;;  %vm16744_vm1 = vmmov 0   ;;  %vm484_vm2 = vcmask 64512   ;;  %vm2560_vm3 = vcmask 523264  }
 0x16d   :  { %14845 = vmatprep.mubr.msk.f32.mxu1 %vm16744_vm1, %v16743_v12  ;;  %s16745_s22 = smov 120   ;;  %s16746_s23 = smov 96  }
 0x16e   :  { %s16747_s3 = smov 88   ;;  %s18633_s9 = sld [smem:[#allocation45_spill]] }
 0x16f   :  { %s16748_s25 = smov 56   ;;  %s16749_s26 = smov 64  }
 0x170   :  { %s16750_s4 = smov 80   ;;  %s16751_s6 = smov 112  }
 0x171   :  { %v383_v0 = vld [vmem:[%s18629_s16] sm:$0xff]  ;;  %v384_v1 = vld [vmem:[%s18629_s16 + $0x8] sm:$0xff]  ;;  %v385_v2 = vld [vmem:[%s18629_s16 + $0x10] sm:$0xff]  ;;  %s16752_s19 = smov 72   ;;  %s16753_s28 = smov 104  }
 0x172   :  { %v15771_v3 = vpack.c.bf16 %v384_v1, %v383_v0  ;;  %v386_v4 = vld [vmem:[%s18629_s16 + $0x18] sm:$0xff]  ;;  %v377_v5 = vld [vmem:[%s18630_s17] sm:$0xff]  ;;  %v378_v9 = vld [vmem:[%s18630_s17 + $0x8] sm:$0xff]  ;;  %s16754_s0 = smov 48   ;;  %s16755_s1 = smov 40  }
 0x173   :  { %v379_v6 = vld [vmem:[%s18631_s2] sm:$0xff]  ;;  %v15775_v7 = vpack.c.bf16 %v386_v4, %v385_v2  ;;  %v380_v10 = vld [vmem:[%s18631_s2 + $0x8] sm:$0xff]  ;;  %s18634_s13 = sld [smem:[#allocation46_spill]]  ;;  %s18635_s10 = sld [smem:[#allocation47_spill]] }
 0x174   :  { %v17123_v8 = vadd.f32 %v379_v6, %v377_v5  ;;  %15772 = vmatprep.subr.bf16.mxu0 %v15771_v3  ;;  %v17129_v11 = vadd.f32 %v380_v10, %v378_v9  ;;  %v14117_v13 = vld [vmem:[%s18632_s7] ss:$0 sm:$0xff]  ;;  %v17174_v39 = vld [vmem:[%s18633_s9 + $0x8] sm:$0xff]  ;;  %s18636_s8 = sld [smem:[#allocation48_spill]]  ;;  %s18637_s14 = sld [smem:[#allocation50_spill]] }
 0x175   :  { %15774 = vmatpush3.bf16.msra.mxu0 %v15771_v3  ;;  %v17187_v48 = vld [vmem:[%s18633_s9] sm:$0xff]  ;;  %s18638_s11 = sld [smem:[#allocation49_spill]]  ;;  %s18639_s30 = sld [smem:[#allocation51_spill]] }
 0x176   :  { %14840 = vmatprep.mubr.msk.f32.mxu0 %vm399_vm0, %v17123_v8  ;;  %15776 = vmatprep.subr.bf16.mxu0 %v15775_v7  ;;  %s18640_s12 = sld [smem:[#allocation52_spill]]  ;;  %s18641_s24 = sld [smem:[#allocation53_spill]] }
 0x177   :  { %s18642_s15 = sld [smem:[#allocation41_spill]]  ;;  %s18643_s27 = sld [smem:[#allocation54_spill]] }
 0x179   :  { %15778 = vmatpush3.bf16.msra.mxu0 %v15775_v7 }
 0x17a   :  { %14853 = vmatprep.subr.mxu0 %v16743_v12 }
 0x17c   :  { %14841 = vmatmul.mubr.msk.f32.vlgmr.msra.gmra.mrb[0].mxu0 %vm399_vm0, %v17129_v11 }
 0x17d   :  { %14855 = vmatprep.mubr.msk.f32.mxu0 %vm16744_vm1, %v16743_v12 }
 0x24f   :  { %v14842_v14 = vpop.f32.mrb[0].mxu0 }
 0x250   :  { %v17140_v15 = vadd.f32 %v14842_v14, %v14117_v13  ;;  %v472_v16 = vpop.f32.mrb[1].mxu0  ;;  %v17224_v14 = vld [vmem:[%s18633_s9 + $0x10] sm:$0xff] }
 0x251   :  { %v17142_v17 = vadd.f32 %v14117_v13, %v472_v16 }
 0x253   :  { %647 = vrot.lane.b32.xlu1 %v17142_v17, %s16745_s22  ;;  %482 = vrot.lane.b32.xlu0 %v17142_v17, %s16746_s23 }
 0x257   :  { %649 = vrot.lane.b32.xlu0 %v17142_v17, %s16747_s3 }
 0x2c5   :  { %v483_v18 = vpop.permute.xlu0 %482  ;;  %v648_v20 = vpop.permute.xlu1 %647 }
 0x2c6   :  { %14844 = vmatpush3.xpose.msk.msra.mxu1 %vm484_vm2, %v483_v18 }
 0x2c7   :  { %14848 = vmatprep.subr.mxu1 %v16743_v12 }
 0x2c9   :  { %14846 = vmatmul.mubr.msk.f32.vlgmr.msra.gmra.mrb[0].mxu1 %vm484_vm2, %v17142_v17  ;;  %v650_v19 = vpop.permute.xlu0 %649 }
 0x2ca   :  { %14854 = vmatpush3.xpose.msk.msra.mxu0 %vm484_vm2, %v650_v19  ;;  %14850 = vmatprep.mubr.msk.f32.mxu1 %vm16744_vm1, %v16743_v12 }
 0x2cb   :  { %14863 = vmatprep.subr.mxu0 %v16743_v12 }
 0x2cd   :  { %14856 = vmatmul.mubr.msk.f32.vlgmr.msra.gmra.mrb[2].mxu0 %vm484_vm2, %v648_v20 }
 0x2ce   :  { %14865 = vmatprep.mubr.msk.f32.mxu0 %vm16744_vm1, %v16743_v12  ;;  %14864 = vmatpush3.msra.mxu0 %v17174_v39 }
 0x2cf   :  { %14873 = vmatprep.subr.mxu0 %v16743_v12 }
 0x39c   :  { %v555_v21 = vpop.f32.mrb[0].mxu1 }
 0x39d   :  { %v559_v22 = vmul.f32 0.35355338, %v555_v21  ;;  %v14847_v23 = vpop.f32.mrb[1].mxu1 }
 0x39f   :  { %v560_v24 = vsel %vm484_vm2, %v559_v22, -inf }
 0x3a0   :  { %561 = vmax.xlane.f32.xlu1 %v560_v24  ;;  %v721_v25 = vpop.f32.mrb[2].mxu0 }
 0x3a1   :  { %v725_v26 = vmul.f32 0.35355338, %v721_v25  ;;  %v14857_v27 = vpop.f32.mrb[3].mxu0 }
 0x3a3   :  { %v726_v28 = vsel %vm484_vm2, %v725_v26, -inf }
 0x3a4   :  { %727 = vmax.xlane.f32.xlu0 %v726_v28 }
 0x42d   :  { %v562_v29 = vpop.xlane.xlu1 %561 }
 0x42e   :  { %v563_v30 = vsub.f32 %v559_v22, %v562_v29 }
 0x430   :  { %v564_v31 = vmul.f32 1.442695, %v563_v30 }
 0x431   :  { %v728_v32 = vpop.xlane.xlu0 %727 }
 0x432   :  { %16029 = vpow2.f32 %v564_v31  ;;  %v729_v33 = vsub.f32 %v725_v26, %v728_v32 }
 0x434   :  { %v730_v34 = vmul.f32 1.442695, %v729_v33 }
 0x436   :  { %16031 = vpow2.f32 %v730_v34 }
 0x43c   :  { %v16030_v35 = vpop.eup %16029 }
 0x43d   :  { %v566_v36 = vsel %vm484_vm2, %v16030_v35, 0.0 }
 0x43e   :  { %567 = vadd.xlane.f32.xlu0 %v566_v36 }
 0x440   :  { %v16032_v37 = vpop.eup %16031 }
 0x441   :  { %v732_v38 = vsel %vm484_vm2, %v16032_v37, 0.0 }
 0x442   :  { %733 = vadd.xlane.f32.xlu1 %v732_v38 }
 0x453   :  { %737 = vrot.lane.b32.xlu1 %v17142_v17, %s16748_s25 }
 0x454   :  { %571 = vrot.lane.b32.xlu0 %v17142_v17, %s16749_s26 }
 0x457   :  { %961 = vrot.lane.b32.xlu1 %v17142_v17, %s16750_s4 }
 0x458   :  { %959 = vrot.lane.b32.xlu0 %v17142_v17, %s16751_s6 }
 0x4cb   :  { %v568_v40 = vpop.xlane.xlu0 %567 }
 0x4cc   :  { %16033 = vrcp.f32 %v568_v40 }
 0x4cf   :  { %v734_v41 = vpop.xlane.xlu1 %733  ;;  %v572_v42 = vpop.permute.xlu0 %571 }
 0x4d0   :  { %16035 = vrcp.f32 %v734_v41  ;;  %14849 = vmatpush3.msra.mxu1 %v572_v42 }
 0x4d1   :  { %14858 = vmatprep.subr.mxu1 %v16743_v12 }
 0x4d3   :  { %v738_v45 = vpop.permute.xlu1 %737  ;;  %v960_v54 = vpop.permute.xlu0 %959 }
 0x4d6   :  { %v16034_v43 = vpop.eup %16033 }
 0x4d7   :  { %v570_v44 = vmul.f32 %v16034_v43, %v16030_v35  ;;  %v962_v52 = vpop.permute.xlu1 %961 }
 0x4d9   :  { %14851 = vmatmul.mubr.msk.f32.vlgmr.msra.gmra.mrb[2].mxu1 %vm484_vm2, %v570_v44 }
 0x4da   :  { %v16036_v46 = vpop.eup %16035  ;;  %14859 = vmatpush3.msra.mxu1 %v738_v45  ;;  %14860 = vmatprep.mubr.msk.f32.mxu1 %vm16744_vm1, %v16743_v12 }
 0x4db   :  { %v736_v47 = vmul.f32 %v16036_v46, %v16032_v37  ;;  %14868 = vmatprep.subr.mxu1 %v16743_v12  ;;  %v17258_v37 = vld [vmem:[%s18633_s9 + $0x18] sm:$0xff] }
 0x4dd   :  { %14861 = vmatmul.mubr.msk.f32.vlgmr.msra.gmra.mrb[4].mxu1 %vm484_vm2, %v736_v47 }
 0x4de   :  { %14870 = vmatprep.mubr.msk.f32.mxu1 %vm16744_vm1, %v16743_v12  ;;  %14869 = vmatpush3.msra.mxu1 %v17187_v48 }
 0x4df   :  { %14878 = vmatprep.subr.mxu1 %v16743_v12 }
 0x5ac   :  { %v643_v49 = vpop.f32.mrb[2].mxu1 }
 0x5ad   :  { %v14852_v50 = vpop.f32.mrb[3].mxu1  ;;  %14871 = vmatmul.mubr.msk.f32.vlgmr.msra.gmra.mrb[6].mxu1 %vm484_vm2, %v643_v49 }
 0x5ae   :  { %14880 = vmatprep.mubr.msk.f32.mxu1 %vm16744_vm1, %v16743_v12 }
 0x5b0   :  { %v809_v51 = vpop.f32.mrb[4].mxu1 }
 0x5b1   :  { %v14862_v53 = vpop.f32.mrb[5].mxu1  ;;  %14866 = vmatmul.mubr.msk.f32.vlgmr.msra.gmra.mrb[4].mxu0 %vm484_vm2, %v809_v51 }
 0x5b2   :  { %14874 = vmatpush3.xpose.msk.msra.mxu0 %vm484_vm2, %v962_v52  ;;  %14875 = vmatprep.mubr.msk.f32.mxu0 %vm16744_vm1, %v16743_v12 }
 0x5b3   :  { %14883 = vmatprep.subr.mxu0 %v16743_v12 }
 0x5b5   :  { %14876 = vmatmul.mubr.msk.f32.vlgmr.msra.gmra.mrb[6].mxu0 %vm484_vm2, %v960_v54 }
 0x5b6   :  { %14885 = vmatprep.mubr.msk.f32.mxu0 %vm16744_vm1, %v16743_v12  ;;  %14884 = vmatpush3.msra.mxu0 %v17224_v14 }
 0x5b7   :  { %14893 = vmatprep.subr.mxu0 %v16743_v12 }
 0x680   :  { %v955_v55 = vpop.f32.mrb[6].mxu1 }
 0x681   :  { %v14872_v56 = vpop.f32.mrb[7].mxu1 }
 0x684   :  { %v882_v57 = vpop.f32.mrb[4].mxu0 }
 0x685   :  { %v17202_v58 = vadd.f32 %v955_v55, %v882_v57  ;;  %v14867_v59 = vpop.f32.mrb[5].mxu0 }
 0x688   :  { %v1033_v60 = vpop.f32.mrb[6].mxu0 }
 0x689   :  { %v1037_v61 = vmul.f32 0.35355338, %v1033_v60  ;;  %v14877_v62 = vpop.f32.mrb[7].mxu0 }
 0x68b   :  { %v1038_v63 = vsel %vm484_vm2, %v1037_v61, -inf }
 0x68c   :  { %1039 = vmax.xlane.f32.xlu1 %v1038_v63 }
 0x69d   :  { %1201 = vrot.lane.b32.xlu1 %v17142_v17, %s16752_s19 }
 0x6a1   :  { %1199 = vrot.lane.b32.xlu1 %v17142_v17, %s16753_s28 }
 0x6a5   :  { %1447 = vrot.lane.b32.xlu1 %v17140_v15, %s16746_s23 }
 0x719   :  { %v1040_v0 = vpop.xlane.xlu1 %1039 }
 0x71a   :  { %v1041_v1 = vsub.f32 %v1037_v61, %v1040_v0 }
 0x71c   :  { %v1042_v2 = vmul.f32 1.442695, %v1041_v1 }
 0x71d   :  { %v1202_v9 = vpop.permute.xlu1 %1201 }
 0x71e   :  { %16037 = vpow2.f32 %v1042_v2 }
 0x721   :  { %v1200_v13 = vpop.permute.xlu1 %1199 }
 0x725   :  { %v1448_v31 = vpop.permute.xlu1 %1447 }
 0x728   :  { %v16038_v3 = vpop.eup %16037 }
 0x729   :  { %v1044_v4 = vsel %vm484_vm2, %v16038_v3, 0.0 }
 0x72a   :  { %1045 = vadd.xlane.f32.xlu0 %v1044_v4 }
 0x740   :  { %1049 = vrot.lane.b32.xlu0 %v17142_v17, %s16754_s0 }
 0x7b7   :  { %v1046_v5 = vpop.xlane.xlu0 %1045 }
 0x7b8   :  { %16039 = vrcp.f32 %v1046_v5 }
 0x7bb   :  { %v1050_v6 = vpop.permute.xlu0 %1049 }
 0x7bc   :  { %14879 = vmatpush3.msra.mxu1 %v1050_v6 }
 0x7bd   :  { %14888 = vmatprep.subr.mxu1 %v16743_v12 }
 0x7c2   :  { %v16040_v7 = vpop.eup %16039 }
 0x7c3   :  { %v1048_v10 = vmul.f32 %v16040_v7, %v16038_v3 }
 0x7c5   :  { %14881 = vmatmul.mubr.msk.f32.vlgmr.msra.gmra.mrb[8].mxu1 %vm484_vm2, %v1048_v10 }
 0x7c6   :  { %14889 = vmatpush3.xpose.msk.msra.mxu1 %vm484_vm2, %v1202_v9  ;;  %14890 = vmatprep.mubr.msk.f32.mxu1 %vm16744_vm1, %v16743_v12 }
 0x7c7   :  { %14898 = vmatprep.subr.mxu1 %v16743_v12 }
 0x7c9   :  { %14891 = vmatmul.mubr.msk.f32.vlgmr.msra.gmra.mrb[10].mxu1 %vm484_vm2, %v1200_v13 }
 0x7ca   :  { %14900 = vmatprep.mubr.msk.f32.mxu1 %vm16744_vm1, %v16743_v12  ;;  %14899 = vmatpush3.msra.mxu1 %v17258_v37 }
 0x7cb   :  { %14908 = vmatprep.subr.mxu1 %v16743_v12 }
 0x898   :  { %v1121_v16 = vpop.f32.mrb[8].mxu1 }
 0x899   :  { %v14882_v18 = vpop.f32.mrb[9].mxu1  ;;  %14886 = vmatmul.mubr.msk.f32.vlgmr.msra.gmra.mrb[8].mxu0 %vm484_vm2, %v1121_v16 }
 0x89a   :  { %14895 = vmatprep.mubr.msk.f32.mxu0 %vm16744_vm1, %v16743_v12 }
 0x89c   :  { %v1273_v19 = vpop.f32.mrb[10].mxu1 }
 0x89d   :  { %v1277_v20 = vmul.f32 0.35355338, %v1273_v19  ;;  %v14892_v21 = vpop.f32.mrb[11].mxu1 }
 0x89f   :  { %v1278_v22 = vsel %vm484_vm2, %v1277_v20, -inf }
 0x8a0   :  { %1279 = vmax.xlane.f32.xlu0 %v1278_v22 }
 0x8b6   :  { %1289 = vrot.lane.b32.xlu0 %v17142_v17, %s16755_s1 }
 0x8ba   :  { %1613 = vrot.lane.b32.xlu0 %v17140_v15, %s16747_s3 }
 0x92d   :  { %v1280_v23 = vpop.xlane.xlu0 %1279 }
 0x92e   :  { %v1281_v24 = vsub.f32 %v1277_v20, %v1280_v23 }
 0x930   :  { %v1282_v25 = vmul.f32 1.442695, %v1281_v24 }
 0x931   :  { %v1290_v26 = vpop.permute.xlu0 %1289 }
 0x932   :  { %16041 = vpow2.f32 %v1282_v25  ;;  %14894 = vmatpush3.msra.mxu0 %v1290_v26 }
 0x933   :  { %14903 = vmatprep.subr.mxu0 %v16743_v12 }
 0x935   :  { %v1614_v35 = vpop.permute.xlu0 %1613 }
 0x93c   :  { %v16042_v27 = vpop.eup %16041 }
 0x93d   :  { %v1284_v28 = vsel %vm484_vm2, %v16042_v27, 0.0 }
 0x93e   :  { %1285 = vadd.xlane.f32.xlu1 %v1284_v28 }
 0x94f   :  { %1611 = vrot.lane.b32.xlu1 %v17140_v15, %s16745_s22 }
 0x96c   :  { %v1194_v29 = vpop.f32.mrb[8].mxu0 }
 0x96d   :  { %v1198_v17 = vadd.f32 %v1194_v29, %v17202_v58  ;;  %v14887_v30 = vpop.f32.mrb[9].mxu0 }
 0x9cb   :  { %v1286_v32 = vpop.xlane.xlu1 %1285 }
 0x9cc   :  { %16043 = vrcp.f32 %v1286_v32 }
 0x9cf   :  { %v1612_v36 = vpop.permute.xlu1 %1611 }
 0x9d6   :  { %v16044_v33 = vpop.eup %16043 }
 0x9d7   :  { %v1288_v34 = vmul.f32 %v16044_v33, %v16042_v27 }
 0x9d9   :  { %14896 = vmatmul.mubr.msk.f32.vlgmr.msra.gmra.mrb[10].mxu0 %vm484_vm2, %v1288_v34 }
 0x9da   :  { %14904 = vmatpush3.xpose.msk.msra.mxu0 %vm484_vm2, %v1448_v31  ;;  %14905 = vmatprep.mubr.msk.f32.mxu0 %vm16744_vm1, %v16743_v12 }
 0x9db   :  { %14913 = vmatprep.subr.mxu0 %v16743_v12 }
 0x9dd   :  { %14906 = vmatmul.mubr.msk.f32.vlgmr.msra.gmra.mrb[12].mxu0 %vm484_vm2, %v17140_v15 }
 0x9de   :  { %14914 = vmatpush3.xpose.msk.msra.mxu0 %vm484_vm2, %v1614_v35  ;;  %14915 = vmatprep.mubr.msk.f32.mxu0 %vm16744_vm1, %v16743_v12  ;;  %v14136_v35 = vld [vmem:[%s18634_s13] ss:$0 sm:$0xff] }
 0x9df   :  { %14923 = vmatprep.subr.mxu0 %v16743_v12 }
 0x9e1   :  { %14916 = vmatmul.mubr.msk.f32.vlgmr.msra.gmra.mrb[14].mxu0 %vm484_vm2, %v1612_v36 }
 0x9e2   :  { %14924 = vmatpush3.msra.mxu0 %v17174_v39  ;;  %14925 = vmatprep.mubr.msk.f32.mxu0 %vm16744_vm1, %v16743_v12 }
 0x9e3   :  { %14933 = vmatprep.subr.mxu0 %v16743_v12 }
 0xaac   :  { %v1361_v38 = vpop.f32.mrb[10].mxu0 }
 0xaad   :  { %v14897_v40 = vpop.f32.mrb[11].mxu0  ;;  %14901 = vmatmul.mubr.msk.f32.vlgmr.msra.gmra.mrb[12].mxu1 %vm484_vm2, %v1361_v38 }
 0xaae   :  { %14910 = vmatprep.mubr.msk.f32.mxu1 %vm16744_vm1, %v16743_v12 }
 0xab0   :  { %v1519_v41 = vpop.f32.mrb[12].mxu0 }
 0xab1   :  { %v1523_v39 = vmul.f32 0.35355338, %v1519_v41  ;;  %v14907_v42 = vpop.f32.mrb[13].mxu0 }
 0xab3   :  { %v1524_v43 = vsel %vm484_vm2, %v1523_v39, -inf }
 0xab4   :  { %1525 = vmax.xlane.f32.xlu0 %v1524_v43  ;;  %v1685_v44 = vpop.f32.mrb[14].mxu0 }
 0xab5   :  { %v1689_v45 = vmul.f32 0.35355338, %v1685_v44  ;;  %v14917_v46 = vpop.f32.mrb[15].mxu0 }
 0xab7   :  { %v1690_v47 = vsel %vm484_vm2, %v1689_v45, -inf }
 0xab8   :  { %1691 = vmax.xlane.f32.xlu1 %v1690_v47 }
 0xac9   :  { %1535 = vrot.lane.b32.xlu1 %v17140_v15, %s16749_s26 }
 0xacd   :  { %1925 = vrot.lane.b32.xlu1 %v17140_v15, %s16750_s4 }
 0xad1   :  { %1923 = vrot.lane.b32.xlu1 %v17140_v15, %s16751_s6 }
 0xb41   :  { %v1526_v49 = vpop.xlane.xlu0 %1525 }
 0xb42   :  { %v1527_v50 = vsub.f32 %v1523_v39, %v1526_v49 }
 0xb44   :  { %v1528_v51 = vmul.f32 1.442695, %v1527_v50 }
 0xb45   :  { %v1692_v52 = vpop.xlane.xlu1 %1691 }
 0xb46   :  { %16045 = vpow2.f32 %v1528_v51  ;;  %v1693_v53 = vsub.f32 %v1689_v45, %v1692_v52 }
 0xb48   :  { %v1694_v54 = vmul.f32 1.442695, %v1693_v53 }
 0xb49   :  { %v1536_v55 = vpop.permute.xlu1 %1535 }
 0xb4a   :  { %16047 = vpow2.f32 %v1694_v54  ;;  %14909 = vmatpush3.msra.mxu1 %v1536_v55 }
 0xb4b   :  { %14918 = vmatprep.subr.mxu1 %v16743_v12 }
 0xb4d   :  { %v1926_v9 = vpop.permute.xlu1 %1925 }
 0xb50   :  { %v16046_v56 = vpop.eup %16045 }
 0xb51   :  { %v1530_v57 = vsel %vm484_vm2, %v16046_v56, 0.0 }
 0xb52   :  { %1531 = vadd.xlane.f32.xlu0 %v1530_v57 }
 0xb54   :  { %v16048_v58 = vpop.eup %16047 }
 0xb55   :  { %v1696_v59 = vsel %vm484_vm2, %v16048_v58, 0.0 }
 0xb56   :  { %1697 = vadd.xlane.f32.xlu0 %v1696_v59 }
 0xb6c   :  { %1701 = vrot.lane.b32.xlu0 %v17140_v15, %s16748_s25 }
 0xb80   :  { %v1434_v60 = vpop.f32.mrb[12].mxu1 }
 0xb81   :  { %v17278_v61 = vadd.f32 %v1434_v60, %v1198_v17  ;;  %v14902_v62 = vpop.f32.mrb[13].mxu1 }
 0xb83   :  { %v1445_v40 = vadd.f32 %v14136_v35, %v17278_v61 }
 0xbdf   :  { %v1532_v63 = vpop.xlane.xlu0 %1531 }
 0xbe0   :  { %16049 = vrcp.f32 %v1532_v63 }
 0xbe3   :  { %v1698_v0 = vpop.xlane.xlu0 %1697 }
 0xbe4   :  { %16051 = vrcp.f32 %v1698_v0 }
 0xbe7   :  { %v1702_v3 = vpop.permute.xlu0 %1701 }
 0xbea   :  { %v16050_v1 = vpop.eup %16049 }
 0xbeb   :  { %v1534_v2 = vmul.f32 %v16050_v1, %v16046_v56 }
 0xbed   :  { %14911 = vmatmul.mubr.msk.f32.vlgmr.msra.gmra.mrb[14].mxu1 %vm484_vm2, %v1534_v2 }
 0xbee   :  { %v16052_v4 = vpop.eup %16051  ;;  %14919 = vmatpush3.msra.mxu1 %v1702_v3  ;;  %14920 = vmatprep.mubr.msk.f32.mxu1 %vm16744_vm1, %v16743_v12 }
 0xbef   :  { %v1700_v5 = vmul.f32 %v16052_v4, %v16048_v58  ;;  %14928 = vmatprep.subr.mxu1 %v16743_v12 }
 0xbf1   :  { %14921 = vmatmul.mubr.msk.f32.vlgmr.msra.gmra.mrb[16].mxu1 %vm484_vm2, %v1700_v5 }
 0xbf2   :  { %14929 = vmatpush3.msra.mxu1 %v17187_v48  ;;  %14930 = vmatprep.mubr.msk.f32.mxu1 %vm16744_vm1, %v16743_v12  ;;  %v1924_v48 = vpop.permute.xlu1 %1923 }
 0xbf3   :  { %14938 = vmatprep.subr.mxu1 %v16743_v12 }
 0xcc0   :  { %v1607_v6 = vpop.f32.mrb[14].mxu1 }
 0xcc1   :  { %v14912_v7 = vpop.f32.mrb[15].mxu1  ;;  %14931 = vmatmul.mubr.msk.f32.vlgmr.msra.gmra.mrb[18].mxu1 %vm484_vm2, %v1607_v6 }
 0xcc2   :  { %14940 = vmatprep.mubr.msk.f32.mxu1 %vm16744_vm1, %v16743_v12 }
 0xcc4   :  { %v1773_v10 = vpop.f32.mrb[16].mxu1 }
 0xcc5   :  { %v14922_v13 = vpop.f32.mrb[17].mxu1  ;;  %14926 = vmatmul.mubr.msk.f32.vlgmr.msra.gmra.mrb[16].mxu0 %vm484_vm2, %v1773_v10 }
 0xcc6   :  { %14934 = vmatpush3.xpose.msk.msra.mxu0 %vm484_vm2, %v1926_v9  ;;  %14935 = vmatprep.mubr.msk.f32.mxu0 %vm16744_vm1, %v16743_v12 }
 0xcc7   :  { %14943 = vmatprep.subr.mxu0 %v16743_v12 }
 0xcc9   :  { %14936 = vmatmul.mubr.msk.f32.vlgmr.msra.gmra.mrb[18].mxu0 %vm484_vm2, %v1924_v48 }
 0xcca   :  { %14944 = vmatpush3.msra.mxu0 %v17224_v14  ;;  %14945 = vmatprep.mubr.msk.f32.mxu0 %vm16744_vm1, %v16743_v12 }
 0xccb   :  { %14953 = vmatprep.subr.mxu0 %v16743_v12 }
 0xd94   :  { %v1919_v16 = vpop.f32.mrb[18].mxu1 }
 0xd95   :  { %v14932_v18 = vpop.f32.mrb[19].mxu1 }
 0xd96   :  { %v14153_v18 = vld [vmem:[%s18635_s10] ss:$0 sm:$0xff] }
 0xd98   :  { %v1846_v19 = vpop.f32.mrb[16].mxu0 }
 0xd99   :  { %v1920_v20 = vadd.f32 %v1919_v16, %v1846_v19  ;;  %v14927_v21 = vpop.f32.mrb[17].mxu0 }
 0xd9c   :  { %v1997_v22 = vpop.f32.mrb[18].mxu0 }
 0xd9d   :  { %v2001_v23 = vmul.f32 0.35355338, %v1997_v22  ;;  %v14937_v24 = vpop.f32.mrb[19].mxu0 }
 0xd9e   :  { %v2452_v24 = vld [vmem:[%s18636_s8 + $0x8] sm:$0xff] }
 0xd9f   :  { %v2002_v25 = vsel %vm484_vm2, %v2001_v23, -inf }
 0xda0   :  { %2003 = vmax.xlane.f32.xlu0 %v2002_v25 }
 0xdb6   :  { %2013 = vrot.lane.b32.xlu0 %v17140_v15, %s16754_s0 }
 0xdba   :  { %2163 = vrot.lane.b32.xlu0 %v17140_v15, %s16753_s28 }
 0xe2d   :  { %v2004_v14 = vpop.xlane.xlu0 %2003 }
 0xe2e   :  { %v2005_v26 = vsub.f32 %v2001_v23, %v2004_v14  ;;  %v2451_v23 = vld [vmem:[%s18636_s8] sm:$0xff]  ;;  %v2453_v14 = vld [vmem:[%s18636_s8 + $0x10] sm:$0xff] }
 0xe2f   :  { %v15779_v25 = vpack.c.bf16 %v2452_v24, %v2451_v23  ;;  %v14161_v24 = vld [vmem:[%s18640_s12] ss:$0 sm:$0xff] }
 0xe30   :  { %v2006_v27 = vmul.f32 1.442695, %v2005_v26  ;;  %v2454_v26 = vld [vmem:[%s18636_s8 + $0x18] sm:$0xff] }
 0xe31   :  { %v2014_v28 = vpop.permute.xlu0 %2013 }
 0xe32   :  { %16053 = vpow2.f32 %v2006_v27  ;;  %14939 = vmatpush3.msra.mxu1 %v2014_v28  ;;  %v15783_v27 = vpack.c.bf16 %v2454_v26, %v2453_v14  ;;  %v2545_v28 = vld [vmem:[%s18637_s14] sm:$0xff] }
 0xe33   :  { %14948 = vmatprep.subr.mxu1 %v16743_v12  ;;  %v14162_v14 = vld [vmem:[#allocation5] ss:$0 sm:$0xff] }
 0xe35   :  { %v2164_v34 = vpop.permute.xlu0 %2163 }
 0xe3c   :  { %v16054_v29 = vpop.eup %16053 }
 0xe3d   :  { %v2008_v17 = vsel %vm484_vm2, %v16054_v29, 0.0 }
 0xe3e   :  { %2009 = vadd.xlane.f32.xlu1 %v2008_v17  ;;  %v2547_v17 = vld [vmem:[%s18637_s14 + $0x10] sm:$0xff] }
 0xe4f   :  { %2165 = vrot.lane.b32.xlu1 %v17140_v15, %s16752_s19 }
 0xecb   :  { %v2010_v30 = vpop.xlane.xlu1 %2009 }
 0xecc   :  { %16055 = vrcp.f32 %v2010_v30 }
 0xecf   :  { %v2166_v33 = vpop.permute.xlu1 %2165 }
 0xed6   :  { %v16056_v31 = vpop.eup %16055 }
 0xed7   :  { %v2012_v32 = vmul.f32 %v16056_v31, %v16054_v29  ;;  %v2546_v29 = vld [vmem:[%s18637_s14 + $0x8] sm:$0xff]  ;;  %v2548_v31 = vld [vmem:[%s18637_s14 + $0x18] sm:$0xff] }
 0xed8   :  { %v15787_v30 = vpack.c.bf16 %v2546_v29, %v2545_v28 }
 0xed9   :  { %14941 = vmatmul.mubr.msk.f32.vlgmr.msra.gmra.mrb[20].mxu1 %vm484_vm2, %v2012_v32  ;;  %v15791_v32 = vpack.c.bf16 %v2548_v31, %v2547_v17  ;;  %v14173_v31 = vld [vmem:[%s18632_s7 + $0x1] ss:$0 sm:$0xff] }
 0xeda   :  { %14949 = vmatpush3.xpose.msk.msra.mxu1 %vm484_vm2, %v2166_v33  ;;  %14950 = vmatprep.mubr.msk.f32.mxu1 %vm16744_vm1, %v16743_v12  ;;  %v2549_v33 = vld [vmem:[%s18637_s14 + $0x20] sm:$0xff] }
 0xedb   :  { %14958 = vmatprep.subr.mxu1 %v16743_v12 }
 0xedd   :  { %14951 = vmatmul.mubr.msk.f32.vlgmr.msra.gmra.mrb[22].mxu1 %vm484_vm2, %v2164_v34  ;;  %v2550_v34 = vld [vmem:[%s18637_s14 + $0x28] sm:$0xff] }
 0xede   :  { %14959 = vmatpush3.msra.mxu1 %v17258_v37  ;;  %14960 = vmatprep.mubr.msk.f32.mxu1 %vm16744_vm1, %v16743_v12  ;;  %v2406_v37 = vadd.f32 %v1445_v40, %v17123_v8 }
 0xedf   :  { %15788 = vmatprep.subr.bf16.mxu1 %v15787_v30 }
 0xee0   :  { %v2408_v44 = vsel %vm399_vm0, %v2406_v37, 0.0 }
 0xfac   :  { %v2085_v36 = vpop.f32.mrb[20].mxu1 }
 0xfad   :  { %v14942_v38 = vpop.f32.mrb[21].mxu1  ;;  %14946 = vmatmul.mubr.msk.f32.vlgmr.msra.gmra.mrb[20].mxu0 %vm484_vm2, %v2085_v36 }
 0xfae   :  { %14955 = vmatprep.mubr.msk.f32.mxu0 %vm16744_vm1, %v16743_v12 }
 0xfb0   :  { %v2237_v41 = vpop.f32.mrb[22].mxu1 }
 0xfb1   :  { %v2241_v39 = vmul.f32 0.35355338, %v2237_v41  ;;  %v14952_v42 = vpop.f32.mrb[23].mxu1 }
 0xfb3   :  { %v2242_v43 = vsel %vm484_vm2, %v2241_v39, -inf }
 0xfb4   :  { %2243 = vmax.xlane.f32.xlu1 %v2242_v43 }
 0xfb8   :  { %2409 = vadd.xlane.f32.xlu1 %v2408_v44  ;;  %v2552_v44 = vld [vmem:[%s18637_s14 + $0x38] sm:$0xff] }
0x1041   :  { %v2244_v45 = vpop.xlane.xlu1 %2243 }
0x1042   :  { %v2245_v46 = vsub.f32 %v2241_v39, %v2244_v45 }
0x1044   :  { %v2246_v47 = vmul.f32 1.442695, %v2245_v46  ;;  %v14155_v46 = vld [vmem:[%s18638_s11] ss:$0 sm:$0xff] }
0x1045   :  { %v2410_v59 = vpop.xlane.xlu1 %2409 }
0x1046   :  { %16057 = vpow2.f32 %v2246_v47  ;;  %v2415_v60 = vmul.f32 0.03125, %v2410_v59 }
0x1048   :  { %v2417_v63 = vsub.f32 %v2406_v37, %v2415_v60  ;;  %v2551_v37 = vld [vmem:[%s18637_s14 + $0x30] sm:$0xff] }
0x1049   :  { %v15799_v45 = vpack.c.bf16 %v2552_v44, %v2551_v37 }
0x104a   :  { %v2419_v3 = vmul.f32 %v2417_v63, %v2417_v63 }
0x104c   :  { %v2421_v4 = vsel %vm399_vm0, %v2419_v3, 0.0 }
0x1050   :  { %v16058_v49 = vpop.eup %16057 }
0x1051   :  { %v2248_v50 = vsel %vm484_vm2, %v16058_v49, 0.0 }
0x1052   :  { %2249 = vadd.xlane.f32.xlu0 %v2248_v50 }
0x1068   :  { %2253 = vrot.lane.b32.xlu0 %v17140_v15, %s16755_s1 }
0x1080   :  { %v2158_v51 = vpop.f32.mrb[20].mxu0 }
0x1081   :  { %v2162_v52 = vadd.f32 %v2158_v51, %v1920_v20  ;;  %v14947_v53 = vpop.f32.mrb[21].mxu0  ;;  %v14154_v20 = vld [vmem:[#allocation2] ss:$0 sm:$0xff] }
0x10df   :  { %v2250_v54 = vpop.xlane.xlu0 %2249 }
0x10e0   :  { %16059 = vrcp.f32 %v2250_v54  ;;  %v14158_v54 = vld [vmem:[%s18639_s30] ss:$0 sm:$0xff] }
0x10e3   :  { %v2254_v8 = vpop.permute.xlu0 %2253 }
0x10e4   :  { %14954 = vmatpush3.msra.mxu0 %v2254_v8 }
0x10e5   :  { %15780 = vmatprep.subr.bf16.mxu0 %v15779_v25 }
0x10ea   :  { %v16060_v55 = vpop.eup %16059 }
0x10eb   :  { %v2252_v56 = vmul.f32 %v16060_v55, %v16058_v49 }
0x10ed   :  { %14956 = vmatmul.mubr.msk.f32.vlgmr.msra.gmra.mrb[22].mxu0 %vm484_vm2, %v2252_v56 }
0x10ee   :  { %15782 = vmatpush3.bf16.msra.mxu0 %v15779_v25 }
0x10ef   :  { %15784 = vmatprep.subr.bf16.mxu0 %v15783_v27 }
0x10f2   :  { %15786 = vmatpush3.bf16.msra.mxu0 %v15783_v27 }
0x11c0   :  { %v2325_v57 = vpop.f32.mrb[22].mxu0 }
0x11c1   :  { %v14957_v58 = vpop.f32.mrb[23].mxu0  ;;  %14961 = vmatmul.mubr.msk.f32.vlgmr.msra.gmra.mrb[24].mxu1 %vm484_vm2, %v2325_v57 }
0x11c2   :  { %15790 = vmatpush3.bf16.msra.mxu1 %v15787_v30 }
0x11c3   :  { %15792 = vmatprep.subr.bf16.mxu1 %v15791_v32 }
0x11c6   :  { %15794 = vmatpush3.bf16.msra.mxu1 %v15791_v32 }
0x1294   :  { %v2398_v61 = vpop.f32.mrb[24].mxu1 }
0x1295   :  { %v2402_v62 = vadd.f32 %v2398_v61, %v2162_v52  ;;  %v14962_v15 = vpop.f32.mrb[25].mxu1 }
0x1297   :  { %v2403_v0 = vadd.f32 %v14136_v35, %v2402_v62  ;;  %v15795_v35 = vpack.c.bf16 %v2550_v34, %v2549_v33 }
0x1299   :  { %v2407_v1 = vadd.f32 %v2403_v0, %v17129_v11  ;;  %15796 = vmatprep.subr.bf16.mxu1 %v15795_v35 }
0x129a   :  { %15798 = vmatpush3.bf16.msra.mxu1 %v15795_v35 }
0x129b   :  { %v2411_v2 = vsel %vm399_vm0, %v2407_v1, 0.0  ;;  %15800 = vmatprep.subr.bf16.mxu1 %v15799_v45 }
0x129c   :  { %2412 = vadd.xlane.f32.xlu1 %v2411_v2 }
0x129e   :  { %15802 = vmatpush3.bf16.msra.mxu1 %v15799_v45 }
0x129f   :  { %15009 = vmatprep.subr.mxu1 %v16743_v12 }
0x12a0   :  { %2422 = vadd.xlane.f32.xlu1 %v2421_v4 }
0x1329   :  { %v2413_v5 = vpop.xlane.xlu1 %2412 }
0x132a   :  { %v2416_v6 = vmul.f32 0.03125, %v2413_v5 }
0x132c   :  { %v2418_v7 = vsub.f32 %v2407_v1, %v2416_v6 }
0x132d   :  { %v2423_v9 = vpop.xlane.xlu1 %2422 }
0x132e   :  { %v2427_v10 = vmul.f32 0.03125, %v2423_v9  ;;  %v2420_v13 = vmul.f32 %v2418_v7, %v2418_v7  ;;  %v14164_v9 = vld [vmem:[%s18629_s16 + $0x28] sm:$0xff] }
0x1330   :  { %v2429_v48 = vadd.f32 1e-05, %v2427_v10  ;;  %v2424_v11 = vsel %vm399_vm0, %v2420_v13, 0.0  ;;  %v14165_v10 = vld [vmem:[%s18629_s16 + $0x30] sm:$0xff] }
0x1331   :  { %2425 = vadd.xlane.f32.xlu1 %v2424_v11 }
0x1332   :  { %16061 = vrsqrt.f32 %v2429_v48  ;;  %v14166_v48 = vld [vmem:[%s18629_s16 + $0x38] sm:$0xff] }
0x1333   :  { %v15807_v11 = vpack.c.bf16 %v14166_v48, %v14165_v10 }
0x133c   :  { %v16062_v16 = vpop.eup %16061 }
0x133d   :  { %v2433_v19 = vmul.f32 %v16062_v16, %v2417_v63 }
0x133f   :  { %v2441_v21 = vmul.f32 %v14153_v18, %v2433_v19 }
0x1341   :  { %v2449_v22 = vadd.f32 %v14154_v20, %v2441_v21 }
0x1343   :  { %14971 = vmatprep.mubr.msk.f32.mxu0 %vm399_vm0, %v2449_v22 }
0x13be   :  { %v2426_v36 = vpop.xlane.xlu1 %2425 }
0x13bf   :  { %v2428_v38 = vmul.f32 0.03125, %v2426_v36 }
0x13c1   :  { %v2430_v40 = vadd.f32 1e-05, %v2428_v38 }
0x13c3   :  { %16063 = vrsqrt.f32 %v2430_v40 }
0x13cd   :  { %v16064_v41 = vpop.eup %16063 }
0x13ce   :  { %v2434_v39 = vmul.f32 %v16064_v41, %v2418_v7  ;;  %v14163_v7 = vld [vmem:[%s18629_s16 + $0x20] sm:$0xff]  ;;  %s18644_s16 = sld [smem:[#allocation56_spill]] }
0x13cf   :  { %v15803_v13 = vpack.c.bf16 %v14164_v9, %v14163_v7 }
0x13d0   :  { %v2442_v42 = vmul.f32 %v14153_v18, %v2434_v39 }
0x13d1   :  { %15804 = vmatprep.subr.bf16.mxu0 %v15803_v13 }
0x13d2   :  { %v2450_v43 = vadd.f32 %v14154_v20, %v2442_v42 }
0x13d4   :  { %14972 = vmatmul.mubr.msk.f32.vlgmr.msra.gmra.mrb[24].mxu0 %vm399_vm0, %v2450_v43 }
0x13d5   :  { %15806 = vmatpush3.bf16.msra.mxu0 %v15803_v13 }
0x13d6   :  { %15808 = vmatprep.subr.bf16.mxu0 %v15807_v11 }
0x13d9   :  { %15810 = vmatpush3.bf16.msra.mxu0 %v15807_v11 }
0x13da   :  { %15004 = vmatprep.subr.mxu0 %v16743_v12 }
0x14a7   :  { %v14973_v47 = vpop.f32.mrb[24].mxu0 }
0x14a8   :  { %v2540_v49 = vadd.f32 %v14973_v47, %v14155_v46  ;;  %v2534_v50 = vpop.f32.mrb[25].mxu0 }
0x14a9   :  { %v2535_v51 = vadd.f32 %v14155_v46, %v2534_v50 }
0x14aa   :  { %v2544_v53 = vmax.f32 %v2540_v49, 0.0 }
0x14ab   :  { %v2543_v52 = vmax.f32 %v2535_v51, 0.0 }
0x14ad   :  { %14990 = vmatprep.mubr.msk.f32.mxu1 %vm2560_vm3, %v2543_v52 }
0x14ae   :  { %14991 = vmatmul.mubr.msk.f32.vlgmr.msra.gmra.mrb[26].mxu1 %vm2560_vm3, %v2544_v53 }
0x14af   :  { %15011 = vmatprep.mubr.msk.f32.mxu1 %vm16744_vm1, %v16743_v12 }
0x1581   :  { %v14992_v8 = vpop.f32.mrb[26].mxu1 }
0x1582   :  { %v2633_v55 = vpop.f32.mrb[27].mxu1  ;;  %v2639_v56 = vadd.f32 %v14992_v8, %v14158_v54 }
0x1583   :  { %v2634_v57 = vadd.f32 %v14158_v54, %v2633_v55 }
0x1584   :  { %v2645_v60 = vadd.f32 %v2639_v56, %v2450_v43 }
0x1585   :  { %v2644_v58 = vadd.f32 %v2634_v57, %v2449_v22 }
0x1586   :  { %v2649_v61 = vsel %vm399_vm0, %v2645_v60, 0.0 }
0x1587   :  { %v2646_v59 = vsel %vm399_vm0, %v2644_v58, 0.0 }
0x1588   :  { %2647 = vadd.xlane.f32.xlu1 %v2646_v59 }
0x158c   :  { %2650 = vadd.xlane.f32.xlu1 %v2649_v61 }
0x1615   :  { %v2648_v62 = vpop.xlane.xlu1 %2647 }
0x1616   :  { %v2652_v15 = vmul.f32 0.03125, %v2648_v62 }
0x1618   :  { %v2654_v63 = vsub.f32 %v2644_v58, %v2652_v15  ;;  %v17415_v58 = vld [vmem:[%s18633_s9 + $0x28] sm:$0xff] }
0x1619   :  { %v2651_v0 = vpop.xlane.xlu1 %2650 }
0x161a   :  { %v2653_v1 = vmul.f32 0.03125, %v2651_v0  ;;  %v2656_v2 = vmul.f32 %v2654_v63, %v2654_v63 }
0x161c   :  { %v2655_v3 = vsub.f32 %v2645_v60, %v2653_v1  ;;  %v2658_v4 = vsel %vm399_vm0, %v2656_v2, 0.0  ;;  %v17427_v1 = vld [vmem:[%s18633_s9 + $0x20] sm:$0xff] }
0x161d   :  { %2659 = vadd.xlane.f32.xlu0 %v2658_v4 }
0x161e   :  { %v2657_v5 = vmul.f32 %v2655_v3, %v2655_v3 }
0x1620   :  { %v2661_v6 = vsel %vm399_vm0, %v2657_v5, 0.0 }
0x1621   :  { %2662 = vadd.xlane.f32.xlu1 %v2661_v6 }
0x16aa   :  { %v2660_v16 = vpop.xlane.xlu0 %2659 }
0x16ab   :  { %v2664_v18 = vmul.f32 0.03125, %v2660_v16 }
0x16ad   :  { %v2666_v19 = vadd.f32 1e-05, %v2664_v18 }
0x16ae   :  { %v2663_v20 = vpop.xlane.xlu1 %2662 }
0x16af   :  { %16065 = vrsqrt.f32 %v2666_v19  ;;  %v2665_v21 = vmul.f32 0.03125, %v2663_v20 }
0x16b1   :  { %v2667_v22 = vadd.f32 1e-05, %v2665_v21 }
0x16b3   :  { %16067 = vrsqrt.f32 %v2667_v22 }
0x16b9   :  { %v16066_v23 = vpop.eup %16065 }
0x16ba   :  { %v2670_v25 = vmul.f32 %v16066_v23, %v2654_v63 }
0x16bc   :  { %v2678_v26 = vmul.f32 %v14161_v24, %v2670_v25 }
0x16bd   :  { %v16068_v27 = vpop.eup %16067 }
0x16be   :  { %v2671_v28 = vmul.f32 %v16068_v27, %v2655_v3  ;;  %v17369_v29 = vadd.f32 %v14162_v14, %v2678_v26 }
0x16c0   :  { %v2679_v17 = vmul.f32 %v14161_v24, %v2671_v28  ;;  %15001 = vmatprep.mubr.msk.f32.mxu0 %vm399_vm0, %v17369_v29 }
0x16c2   :  { %v17373_v30 = vadd.f32 %v14162_v14, %v2679_v17 }
0x16c4   :  { %15002 = vmatmul.mubr.msk.f32.vlgmr.msra.gmra.mrb[26].mxu0 %vm399_vm0, %v17373_v30 }
0x16c5   :  { %15006 = vmatprep.mubr.msk.f32.mxu0 %vm16744_vm1, %v16743_v12 }
0x1797   :  { %v15003_v32 = vpop.f32.mrb[26].mxu0 }
0x1798   :  { %v17380_v33 = vadd.f32 %v15003_v32, %v14173_v31  ;;  %v2780_v34 = vpop.f32.mrb[27].mxu0  ;;  %v17460_v32 = vld [vmem:[%s18633_s9 + $0x30] sm:$0xff] }
0x1799   :  { %v17382_v35 = vadd.f32 %v14173_v31, %v2780_v34 }
0x179b   :  { %2790 = vrot.lane.b32.xlu1 %v17382_v35, %s16746_s23 }
0x179f   :  { %2956 = vrot.lane.b32.xlu1 %v17382_v35, %s16747_s3 }
0x17a3   :  { %2954 = vrot.lane.b32.xlu1 %v17382_v35, %s16745_s22 }
0x180d   :  { %v2791_v36 = vpop.permute.xlu1 %2790 }
0x180e   :  { %15005 = vmatpush3.xpose.msk.msra.mxu0 %vm484_vm2, %v2791_v36 }
0x180f   :  { %15014 = vmatprep.subr.mxu0 %v16743_v12 }
0x1811   :  { %15007 = vmatmul.mubr.msk.f32.vlgmr.msra.gmra.mrb[28].mxu0 %vm484_vm2, %v17382_v35  ;;  %v2957_v38 = vpop.permute.xlu1 %2956 }
0x1812   :  { %15015 = vmatpush3.xpose.msk.msra.mxu0 %vm484_vm2, %v2957_v38  ;;  %15016 = vmatprep.mubr.msk.f32.mxu0 %vm16744_vm1, %v16743_v12 }
0x1813   :  { %15024 = vmatprep.subr.mxu0 %v16743_v12 }
0x1815   :  { %v2955_v40 = vpop.permute.xlu1 %2954 }
0x1816   :  { %15017 = vmatmul.mubr.msk.f32.vlgmr.msra.gmra.mrb[30].mxu0 %vm484_vm2, %v2955_v40 }
0x1817   :  { %15026 = vmatprep.mubr.msk.f32.mxu0 %vm16744_vm1, %v16743_v12  ;;  %15025 = vmatpush3.msra.mxu0 %v17415_v58 }
0x1818   :  { %15034 = vmatprep.subr.mxu0 %v16743_v12 }
0x18e4   :  { %v2862_v41 = vpop.f32.mrb[28].mxu0 }
0x18e5   :  { %v2866_v39 = vmul.f32 0.35355338, %v2862_v41  ;;  %v15008_v42 = vpop.f32.mrb[29].mxu0 }
0x18e7   :  { %v2867_v43 = vsel %vm484_vm2, %v2866_v39, -inf }
0x18e8   :  { %2868 = vmax.xlane.f32.xlu0 %v2867_v43 }
0x18e9   :  { %v3028_v37 = vpop.f32.mrb[30].mxu0 }
0x18ea   :  { %v3032_v44 = vmul.f32 0.35355338, %v3028_v37  ;;  %v15018_v45 = vpop.f32.mrb[31].mxu0 }
0x18ec   :  { %v3033_v46 = vsel %vm484_vm2, %v3032_v44, -inf }
0x18ed   :  { %3034 = vmax.xlane.f32.xlu1 %v3033_v46 }
0x18fe   :  { %2878 = vrot.lane.b32.xlu0 %v17382_v35, %s16749_s26  ;;  %3268 = vrot.lane.b32.xlu1 %v17382_v35, %s16750_s4 }
0x1975   :  { %v2869_v47 = vpop.xlane.xlu0 %2868 }
0x1976   :  { %v2870_v49 = vsub.f32 %v2866_v39, %v2869_v47 }
0x1978   :  { %v2871_v50 = vmul.f32 1.442695, %v2870_v49 }
0x1979   :  { %v2879_v51 = vpop.permute.xlu0 %2878 }
0x197a   :  { %16069 = vpow2.f32 %v2871_v50  ;;  %15010 = vmatpush3.msra.mxu1 %v2879_v51  ;;  %v3035_v52 = vpop.xlane.xlu1 %3034 }
0x197b   :  { %v3036_v53 = vsub.f32 %v3032_v44, %v3035_v52  ;;  %15019 = vmatprep.subr.mxu1 %v16743_v12 }
0x197d   :  { %v3037_v54 = vmul.f32 1.442695, %v3036_v53 }
0x197e   :  { %v3269_v5 = vpop.permute.xlu1 %3268 }
0x197f   :  { %16071 = vpow2.f32 %v3037_v54 }
0x1984   :  { %v16070_v8 = vpop.eup %16069 }
0x1985   :  { %v2873_v55 = vsel %vm484_vm2, %v16070_v8, 0.0 }
0x1986   :  { %2874 = vadd.xlane.f32.xlu0 %v2873_v55  ;;  %v17495_v55 = vld [vmem:[%s18633_s9 + $0x38] sm:$0xff] }
0x1989   :  { %v16072_v56 = vpop.eup %16071 }
0x198a   :  { %v3039_v57 = vsel %vm484_vm2, %v16072_v56, 0.0 }
0x198b   :  { %3040 = vadd.xlane.f32.xlu0 %v3039_v57 }
0x19a1   :  { %3044 = vrot.lane.b32.xlu0 %v17382_v35, %s16748_s25 }
0x19a5   :  { %3266 = vrot.lane.b32.xlu0 %v17382_v35, %s16751_s6 }
0x1a13   :  { %v2875_v59 = vpop.xlane.xlu0 %2874 }
0x1a14   :  { %16073 = vrcp.f32 %v2875_v59 }
0x1a18   :  { %v3041_v60 = vpop.xlane.xlu0 %3040 }
0x1a19   :  { %16075 = vrcp.f32 %v3041_v60 }
0x1a1c   :  { %v3045_v15 = vpop.permute.xlu0 %3044 }
0x1a1e   :  { %v16074_v61 = vpop.eup %16073 }
0x1a1f   :  { %v2877_v62 = vmul.f32 %v16074_v61, %v16070_v8 }
0x1a20   :  { %v3267_v7 = vpop.permute.xlu0 %3266 }
0x1a21   :  { %15012 = vmatmul.mubr.msk.f32.vlgmr.msra.gmra.mrb[28].mxu1 %vm484_vm2, %v2877_v62 }
0x1a22   :  { %15020 = vmatpush3.msra.mxu1 %v3045_v15  ;;  %15021 = vmatprep.mubr.msk.f32.mxu1 %vm16744_vm1, %v16743_v12 }
0x1a23   :  { %v16076_v63 = vpop.eup %16075  ;;  %15029 = vmatprep.subr.mxu1 %v16743_v12 }
0x1a24   :  { %v3043_v0 = vmul.f32 %v16076_v63, %v16072_v56 }
0x1a26   :  { %15022 = vmatmul.mubr.msk.f32.vlgmr.msra.gmra.mrb[30].mxu1 %vm484_vm2, %v3043_v0 }
0x1a27   :  { %15031 = vmatprep.mubr.msk.f32.mxu1 %vm16744_vm1, %v16743_v12  ;;  %15030 = vmatpush3.msra.mxu1 %v17427_v1 }
0x1a28   :  { %15039 = vmatprep.subr.mxu1 %v16743_v12 }
0x1af4   :  { %v2950_v2 = vpop.f32.mrb[28].mxu1 }
0x1af5   :  { %v15013_v3 = vpop.f32.mrb[29].mxu1  ;;  %15032 = vmatmul.mubr.msk.f32.vlgmr.msra.gmra.mrb[32].mxu1 %vm484_vm2, %v2950_v2 }
0x1af6   :  { %15041 = vmatprep.mubr.msk.f32.mxu1 %vm16744_vm1, %v16743_v12 }
0x1af9   :  { %v3116_v4 = vpop.f32.mrb[30].mxu1 }
0x1afa   :  { %v15023_v6 = vpop.f32.mrb[31].mxu1  ;;  %15027 = vmatmul.mubr.msk.f32.vlgmr.msra.gmra.mrb[32].mxu0 %vm484_vm2, %v3116_v4 }
0x1afb   :  { %15035 = vmatpush3.xpose.msk.msra.mxu0 %vm484_vm2, %v3269_v5  ;;  %15036 = vmatprep.mubr.msk.f32.mxu0 %vm16744_vm1, %v16743_v12 }
0x1afc   :  { %15044 = vmatprep.subr.mxu0 %v16743_v12 }
0x1afe   :  { %15037 = vmatmul.mubr.msk.f32.vlgmr.msra.gmra.mrb[34].mxu0 %vm484_vm2, %v3267_v7 }
0x1aff   :  { %15046 = vmatprep.mubr.msk.f32.mxu0 %vm16744_vm1, %v16743_v12  ;;  %15045 = vmatpush3.msra.mxu0 %v17460_v32 }
0x1b00   :  { %15054 = vmatprep.subr.mxu0 %v16743_v12 }
0x1bc8   :  { %v3262_v9 = vpop.f32.mrb[32].mxu1 }
0x1bc9   :  { %v15033_v10 = vpop.f32.mrb[33].mxu1 }
0x1bcd   :  { %v3189_v13 = vpop.f32.mrb[32].mxu0 }
0x1bce   :  { %v3263_v48 = vadd.f32 %v3262_v9, %v3189_v13  ;;  %v15028_v11 = vpop.f32.mrb[33].mxu0 }
0x1bd1   :  { %v3340_v16 = vpop.f32.mrb[34].mxu0 }
0x1bd2   :  { %v3344_v18 = vmul.f32 0.35355338, %v3340_v16  ;;  %v15038_v19 = vpop.f32.mrb[35].mxu0 }
0x1bd4   :  { %v3345_v20 = vsel %vm484_vm2, %v3344_v18, -inf }
0x1bd5   :  { %3346 = vmax.xlane.f32.xlu0 %v3345_v20 }
0x1beb   :  { %3356 = vrot.lane.b32.xlu0 %v17382_v35, %s16754_s0 }
0x1bef   :  { %3506 = vrot.lane.b32.xlu0 %v17382_v35, %s16753_s28 }
0x1c62   :  { %v3347_v21 = vpop.xlane.xlu0 %3346 }
0x1c63   :  { %v3348_v22 = vsub.f32 %v3344_v18, %v3347_v21 }
0x1c65   :  { %v3349_v23 = vmul.f32 1.442695, %v3348_v22 }
0x1c66   :  { %v3357_v24 = vpop.permute.xlu0 %3356 }
0x1c67   :  { %16077 = vpow2.f32 %v3349_v23  ;;  %15040 = vmatpush3.msra.mxu1 %v3357_v24 }
0x1c68   :  { %15049 = vmatprep.subr.mxu1 %v16743_v12 }
0x1c6a   :  { %v3507_v31 = vpop.permute.xlu0 %3506 }
0x1c71   :  { %v16078_v25 = vpop.eup %16077 }
0x1c72   :  { %v3351_v14 = vsel %vm484_vm2, %v16078_v25, 0.0 }
0x1c73   :  { %3352 = vadd.xlane.f32.xlu1 %v3351_v14 }
0x1c84   :  { %3508 = vrot.lane.b32.xlu1 %v17382_v35, %s16752_s19 }
0x1d00   :  { %v3353_v26 = vpop.xlane.xlu1 %3352 }
0x1d01   :  { %16079 = vrcp.f32 %v3353_v26 }
0x1d04   :  { %v3509_v17 = vpop.permute.xlu1 %3508 }
0x1d0b   :  { %v16080_v27 = vpop.eup %16079 }
0x1d0c   :  { %v3355_v28 = vmul.f32 %v16080_v27, %v16078_v25 }
0x1d0e   :  { %15042 = vmatmul.mubr.msk.f32.vlgmr.msra.gmra.mrb[34].mxu1 %vm484_vm2, %v3355_v28 }
0x1d0f   :  { %15050 = vmatpush3.xpose.msk.msra.mxu1 %vm484_vm2, %v3509_v17  ;;  %15051 = vmatprep.mubr.msk.f32.mxu1 %vm16744_vm1, %v16743_v12 }
0x1d10   :  { %15059 = vmatprep.subr.mxu1 %v16743_v12 }
0x1d12   :  { %15052 = vmatmul.mubr.msk.f32.vlgmr.msra.gmra.mrb[36].mxu1 %vm484_vm2, %v3507_v31 }
0x1d13   :  { %15061 = vmatprep.mubr.msk.f32.mxu1 %vm16744_vm1, %v16743_v12  ;;  %15060 = vmatpush3.msra.mxu1 %v17495_v55 }
0x1d14   :  { %15069 = vmatprep.subr.mxu1 %v16743_v12 }
0x1de1   :  { %v3428_v34 = vpop.f32.mrb[34].mxu1 }
0x1de2   :  { %v15043_v36 = vpop.f32.mrb[35].mxu1  ;;  %15047 = vmatmul.mubr.msk.f32.vlgmr.msra.gmra.mrb[36].mxu0 %vm484_vm2, %v3428_v34 }
0x1de3   :  { %15056 = vmatprep.mubr.msk.f32.mxu0 %vm16744_vm1, %v16743_v12 }
0x1de5   :  { %v3580_v38 = vpop.f32.mrb[36].mxu1 }
0x1de6   :  { %v3584_v40 = vmul.f32 0.35355338, %v3580_v38  ;;  %v15053_v41 = vpop.f32.mrb[37].mxu1 }
0x1de8   :  { %v3585_v39 = vsel %vm484_vm2, %v3584_v40, -inf }
0x1de9   :  { %3586 = vmax.xlane.f32.xlu0 %v3585_v39 }
0x1dff   :  { %3596 = vrot.lane.b32.xlu0 %v17382_v35, %s16755_s1 }
0x1e03   :  { %3920 = vrot.lane.b32.xlu0 %v17380_v33, %s16747_s3 }
0x1e07   :  { %3918 = vrot.lane.b32.xlu0 %v17380_v33, %s16745_s22 }
0x1e76   :  { %v3587_v42 = vpop.xlane.xlu0 %3586 }
0x1e77   :  { %v3588_v43 = vsub.f32 %v3584_v40, %v3587_v42 }
0x1e79   :  { %v3589_v37 = vmul.f32 1.442695, %v3588_v43 }
0x1e7a   :  { %v3597_v44 = vpop.permute.xlu0 %3596 }
0x1e7b   :  { %16081 = vpow2.f32 %v3589_v37  ;;  %15055 = vmatpush3.msra.mxu0 %v3597_v44 }
0x1e7c   :  { %15064 = vmatprep.subr.mxu0 %v16743_v12 }
0x1e7e   :  { %v3921_v54 = vpop.permute.xlu0 %3920 }
0x1e82   :  { %v3919_v8 = vpop.permute.xlu0 %3918 }
0x1e85   :  { %v16082_v45 = vpop.eup %16081 }
0x1e86   :  { %v3591_v46 = vsel %vm484_vm2, %v16082_v45, 0.0 }
0x1e87   :  { %3592 = vadd.xlane.f32.xlu1 %v3591_v46 }
0x1e98   :  { %3754 = vrot.lane.b32.xlu1 %v17380_v33, %s16746_s23 }
0x1eb5   :  { %v3501_v35 = vpop.f32.mrb[36].mxu0 }
0x1eb6   :  { %v3505_v47 = vadd.f32 %v3501_v35, %v3263_v48  ;;  %v15048_v49 = vpop.f32.mrb[37].mxu0 }
0x1f14   :  { %v3593_v50 = vpop.xlane.xlu1 %3592 }
0x1f15   :  { %16083 = vrcp.f32 %v3593_v50 }
0x1f18   :  { %v3755_v53 = vpop.permute.xlu1 %3754 }
0x1f1f   :  { %v16084_v51 = vpop.eup %16083 }
0x1f20   :  { %v3595_v52 = vmul.f32 %v16084_v51, %v16082_v45 }
0x1f22   :  { %15057 = vmatmul.mubr.msk.f32.vlgmr.msra.gmra.mrb[38].mxu0 %vm484_vm2, %v3595_v52 }
0x1f23   :  { %15065 = vmatpush3.xpose.msk.msra.mxu0 %vm484_vm2, %v3755_v53  ;;  %15066 = vmatprep.mubr.msk.f32.mxu0 %vm16744_vm1, %v16743_v12 }
0x1f24   :  { %15074 = vmatprep.subr.mxu0 %v16743_v12 }
0x1f26   :  { %15067 = vmatmul.mubr.msk.f32.vlgmr.msra.gmra.mrb[40].mxu0 %vm484_vm2, %v17380_v33 }
0x1f27   :  { %15075 = vmatpush3.xpose.msk.msra.mxu0 %vm484_vm2, %v3921_v54  ;;  %15076 = vmatprep.mubr.msk.f32.mxu0 %vm16744_vm1, %v16743_v12  ;;  %v14192_v54 = vld [vmem:[%s18634_s13 + $0x1] ss:$0 sm:$0xff] }
0x1f28   :  { %15084 = vmatprep.subr.mxu0 %v16743_v12 }
0x1f2a   :  { %15077 = vmatmul.mubr.msk.f32.vlgmr.msra.gmra.mrb[42].mxu0 %vm484_vm2, %v3919_v8 }
0x1f2b   :  { %15085 = vmatpush3.msra.mxu0 %v17415_v58  ;;  %15086 = vmatprep.mubr.msk.f32.mxu0 %vm16744_vm1, %v16743_v12 }
0x1f2c   :  { %15094 = vmatprep.subr.mxu0 %v16743_v12 }
0x1ff5   :  { %v3668_v56 = vpop.f32.mrb[38].mxu0 }
0x1ff6   :  { %v15058_v57 = vpop.f32.mrb[39].mxu0  ;;  %15062 = vmatmul.mubr.msk.f32.vlgmr.msra.gmra.mrb[38].mxu1 %vm484_vm2, %v3668_v56 }
0x1ff7   :  { %15071 = vmatprep.mubr.msk.f32.mxu1 %vm16744_vm1, %v16743_v12 }
0x1ff9   :  { %v3826_v59 = vpop.f32.mrb[40].mxu0 }
0x1ffa   :  { %v3830_v58 = vmul.f32 0.35355338, %v3826_v59  ;;  %v15068_v60 = vpop.f32.mrb[41].mxu0 }
0x1ffc   :  { %v3831_v61 = vsel %vm484_vm2, %v3830_v58, -inf }
0x1ffd   :  { %3832 = vmax.xlane.f32.xlu0 %v3831_v61  ;;  %v3992_v62 = vpop.f32.mrb[42].mxu0 }
0x1ffe   :  { %v3996_v15 = vmul.f32 0.35355338, %v3992_v62  ;;  %v15078_v63 = vpop.f32.mrb[43].mxu0 }
0x2000   :  { %v3997_v0 = vsel %vm484_vm2, %v3996_v15, -inf }
0x2001   :  { %3998 = vmax.xlane.f32.xlu1 %v3997_v0 }
0x2012   :  { %3842 = vrot.lane.b32.xlu1 %v17380_v33, %s16749_s26 }
0x2016   :  { %4232 = vrot.lane.b32.xlu1 %v17380_v33, %s16750_s4 }
0x201a   :  { %4230 = vrot.lane.b32.xlu1 %v17380_v33, %s16751_s6 }
0x208a   :  { %v3833_v2 = vpop.xlane.xlu0 %3832 }
0x208b   :  { %v3834_v3 = vsub.f32 %v3830_v58, %v3833_v2 }
0x208d   :  { %v3835_v4 = vmul.f32 1.442695, %v3834_v3 }
0x208e   :  { %v3999_v5 = vpop.xlane.xlu1 %3998 }
0x208f   :  { %16085 = vpow2.f32 %v3835_v4  ;;  %v4000_v6 = vsub.f32 %v3996_v15, %v3999_v5 }
0x2091   :  { %v4001_v7 = vmul.f32 1.442695, %v4000_v6 }
0x2092   :  { %v3843_v9 = vpop.permute.xlu1 %3842 }
0x2093   :  { %16087 = vpow2.f32 %v4001_v7  ;;  %15070 = vmatpush3.msra.mxu1 %v3843_v9 }
0x2094   :  { %15079 = vmatprep.subr.mxu1 %v16743_v12 }
0x2096   :  { %v4233_v28 = vpop.permute.xlu1 %4232 }
0x2099   :  { %v16086_v10 = vpop.eup %16085 }
0x209a   :  { %v3837_v13 = vsel %vm484_vm2, %v16086_v10, 0.0 }
0x209b   :  { %3838 = vadd.xlane.f32.xlu0 %v3837_v13 }
0x209d   :  { %v16088_v48 = vpop.eup %16087 }
0x209e   :  { %v4003_v11 = vsel %vm484_vm2, %v16088_v48, 0.0 }
0x209f   :  { %4004 = vadd.xlane.f32.xlu0 %v4003_v11 }
0x20b5   :  { %4008 = vrot.lane.b32.xlu0 %v17380_v33, %s16748_s25 }
0x20c9   :  { %v3741_v16 = vpop.f32.mrb[38].mxu1 }
0x20ca   :  { %v17515_v18 = vadd.f32 %v3741_v16, %v3505_v47  ;;  %v15063_v19 = vpop.f32.mrb[39].mxu1 }
0x20cc   :  { %v3752_v57 = vadd.f32 %v14192_v54, %v17515_v18 }
0x2128   :  { %v3839_v20 = vpop.xlane.xlu0 %3838 }
0x2129   :  { %16089 = vrcp.f32 %v3839_v20 }
0x212c   :  { %v4005_v21 = vpop.xlane.xlu0 %4004 }
0x212d   :  { %16091 = vrcp.f32 %v4005_v21 }
0x2130   :  { %v4009_v24 = vpop.permute.xlu0 %4008 }
0x2133   :  { %v16090_v22 = vpop.eup %16089 }
0x2134   :  { %v3841_v23 = vmul.f32 %v16090_v22, %v16086_v10 }
0x2136   :  { %15072 = vmatmul.mubr.msk.f32.vlgmr.msra.gmra.mrb[40].mxu1 %vm484_vm2, %v3841_v23 }
0x2137   :  { %v16092_v25 = vpop.eup %16091  ;;  %15080 = vmatpush3.msra.mxu1 %v4009_v24  ;;  %15081 = vmatprep.mubr.msk.f32.mxu1 %vm16744_vm1, %v16743_v12 }
0x2138   :  { %v4007_v14 = vmul.f32 %v16092_v25, %v16088_v48  ;;  %15089 = vmatprep.subr.mxu1 %v16743_v12 }
0x213a   :  { %15082 = vmatmul.mubr.msk.f32.vlgmr.msra.gmra.mrb[42].mxu1 %vm484_vm2, %v4007_v14 }
0x213b   :  { %15090 = vmatpush3.msra.mxu1 %v17427_v1  ;;  %15091 = vmatprep.mubr.msk.f32.mxu1 %vm16744_vm1, %v16743_v12  ;;  %v4231_v1 = vpop.permute.xlu1 %4230 }
0x213c   :  { %15099 = vmatprep.subr.mxu1 %v16743_v12 }
0x2209   :  { %v3914_v26 = vpop.f32.mrb[40].mxu1 }
0x220a   :  { %v15073_v27 = vpop.f32.mrb[41].mxu1  ;;  %15092 = vmatmul.mubr.msk.f32.vlgmr.msra.gmra.mrb[44].mxu1 %vm484_vm2, %v3914_v26 }
0x220b   :  { %15101 = vmatprep.mubr.msk.f32.mxu1 %vm16744_vm1, %v16743_v12 }
0x220d   :  { %v4080_v17 = vpop.f32.mrb[42].mxu1 }
0x220e   :  { %v15083_v31 = vpop.f32.mrb[43].mxu1  ;;  %15087 = vmatmul.mubr.msk.f32.vlgmr.msra.gmra.mrb[44].mxu0 %vm484_vm2, %v4080_v17 }
0x220f   :  { %15095 = vmatpush3.xpose.msk.msra.mxu0 %vm484_vm2, %v4233_v28  ;;  %15096 = vmatprep.mubr.msk.f32.mxu0 %vm16744_vm1, %v16743_v12 }
0x2210   :  { %15104 = vmatprep.subr.mxu0 %v16743_v12 }
0x2212   :  { %15097 = vmatmul.mubr.msk.f32.vlgmr.msra.gmra.mrb[46].mxu0 %vm484_vm2, %v4231_v1 }
0x2213   :  { %15105 = vmatpush3.msra.mxu0 %v17460_v32  ;;  %15106 = vmatprep.mubr.msk.f32.mxu0 %vm16744_vm1, %v16743_v12 }
0x2214   :  { %15114 = vmatprep.subr.mxu0 %v16743_v12 }
0x22dd   :  { %v4226_v34 = vpop.f32.mrb[44].mxu1 }
0x22de   :  { %v15093_v36 = vpop.f32.mrb[45].mxu1 }
0x22df   :  { %v14210_v36 = vld [vmem:[%s18635_s10 + $0x1] ss:$0 sm:$0xff] }
0x22e1   :  { %v4153_v38 = vpop.f32.mrb[44].mxu0 }
0x22e2   :  { %v4227_v40 = vadd.f32 %v4226_v34, %v4153_v38  ;;  %v15088_v41 = vpop.f32.mrb[45].mxu0 }
0x22e5   :  { %v4304_v39 = vpop.f32.mrb[46].mxu0 }
0x22e6   :  { %v4308_v42 = vmul.f32 0.35355338, %v4304_v39  ;;  %v15098_v43 = vpop.f32.mrb[47].mxu0 }
0x22e7   :  { %v14213_v43 = vld [vmem:[%s18636_s8 + $0x28] sm:$0xff] }
0x22e8   :  { %v4309_v37 = vsel %vm484_vm2, %v4308_v42, -inf }
0x22e9   :  { %4310 = vmax.xlane.f32.xlu0 %v4309_v37 }
0x22ff   :  { %4320 = vrot.lane.b32.xlu0 %v17380_v33, %s16754_s0 }
0x2303   :  { %4470 = vrot.lane.b32.xlu0 %v17380_v33, %s16753_s28 }
0x2376   :  { %v4311_v32 = vpop.xlane.xlu0 %4310 }
0x2377   :  { %v4312_v44 = vsub.f32 %v4308_v42, %v4311_v32  ;;  %v14212_v42 = vld [vmem:[%s18636_s8 + $0x20] sm:$0xff]  ;;  %v14214_v32 = vld [vmem:[%s18636_s8 + $0x30] sm:$0xff] }
0x2378   :  { %v15811_v37 = vpack.c.bf16 %v14213_v43, %v14212_v42 }
0x2379   :  { %v4313_v45 = vmul.f32 1.442695, %v4312_v44  ;;  %v14215_v44 = vld [vmem:[%s18636_s8 + $0x38] sm:$0xff] }
0x237a   :  { %v4321_v46 = vpop.permute.xlu0 %4320 }
0x237b   :  { %16093 = vpow2.f32 %v4313_v45  ;;  %15100 = vmatpush3.msra.mxu1 %v4321_v46  ;;  %v15815_v45 = vpack.c.bf16 %v14215_v44, %v14214_v32  ;;  %v5005_v46 = vld [vmem:[%s18641_s24] sm:$0xff] }
0x237c   :  { %15109 = vmatprep.subr.mxu1 %v16743_v12 }
0x237e   :  { %v4471_v53 = vpop.permute.xlu0 %4470 }
0x2385   :  { %v16094_v35 = vpop.eup %16093 }
0x2386   :  { %v4315_v47 = vsel %vm484_vm2, %v16094_v35, 0.0 }
0x2387   :  { %4316 = vadd.xlane.f32.xlu1 %v4315_v47 }
0x2398   :  { %4472 = vrot.lane.b32.xlu1 %v17380_v33, %s16752_s19 }
0x2414   :  { %v4317_v49 = vpop.xlane.xlu1 %4316 }
0x2415   :  { %16095 = vrcp.f32 %v4317_v49  ;;  %v14220_v49 = vld [vmem:[%s18637_s14 + $0x40] sm:$0xff] }
0x2418   :  { %v4473_v52 = vpop.permute.xlu1 %4472 }
0x241f   :  { %v16096_v50 = vpop.eup %16095 }
0x2420   :  { %v4319_v51 = vmul.f32 %v16096_v50, %v16094_v35  ;;  %v5006_v35 = vld [vmem:[%s18641_s24 + $0x8] sm:$0xff] }
0x2421   :  { %v15835_v47 = vpack.c.bf16 %v5006_v35, %v5005_v46  ;;  %v14221_v50 = vld [vmem:[%s18637_s14 + $0x48] sm:$0xff] }
0x2422   :  { %15102 = vmatmul.mubr.msk.f32.vlgmr.msra.gmra.mrb[46].mxu1 %vm484_vm2, %v4319_v51  ;;  %v14222_v51 = vld [vmem:[%s18637_s14 + $0x50] sm:$0xff] }
0x2423   :  { %15110 = vmatpush3.xpose.msk.msra.mxu1 %vm484_vm2, %v4473_v52  ;;  %15111 = vmatprep.mubr.msk.f32.mxu1 %vm16744_vm1, %v16743_v12  ;;  %v15819_v52 = vpack.c.bf16 %v14221_v50, %v14220_v49  ;;  %v17658_v50 = vld [vmem:[%s18643_s27 + $0x8] sm:$0xff] }
0x2424   :  { %15119 = vmatprep.subr.mxu1 %v16743_v12 }
0x2426   :  { %15112 = vmatmul.mubr.msk.f32.vlgmr.msra.gmra.mrb[48].mxu1 %vm484_vm2, %v4471_v53  ;;  %v14223_v53 = vld [vmem:[%s18637_s14 + $0x58] sm:$0xff] }
0x2427   :  { %15120 = vmatpush3.msra.mxu1 %v17495_v55  ;;  %15121 = vmatprep.mubr.msk.f32.mxu1 %vm16744_vm1, %v16743_v12  ;;  %v4715_v55 = vadd.f32 %v3752_v57, %v17369_v29 }
0x2428   :  { %15820 = vmatprep.subr.bf16.mxu1 %v15819_v52 }
0x2429   :  { %v4717_v62 = vsel %vm399_vm0, %v4715_v55, 0.0 }
0x24f5   :  { %v4392_v8 = vpop.f32.mrb[46].mxu1 }
0x24f6   :  { %v15103_v56 = vpop.f32.mrb[47].mxu1  ;;  %15107 = vmatmul.mubr.msk.f32.vlgmr.msra.gmra.mrb[48].mxu0 %vm484_vm2, %v4392_v8  ;;  %v14224_v8 = vld [vmem:[%s18637_s14 + $0x60] sm:$0xff] }
0x24f7   :  { %15116 = vmatprep.mubr.msk.f32.mxu0 %vm16744_vm1, %v16743_v12  ;;  %v14225_v56 = vld [vmem:[%s18637_s14 + $0x68] sm:$0xff] }
0x24f8   :  { %v15827_v57 = vpack.c.bf16 %v14225_v56, %v14224_v8 }
0x24f9   :  { %v4544_v59 = vpop.f32.mrb[48].mxu1 }
0x24fa   :  { %v4548_v58 = vmul.f32 0.35355338, %v4544_v59  ;;  %v15113_v60 = vpop.f32.mrb[49].mxu1 }
0x24fc   :  { %v4549_v61 = vsel %vm484_vm2, %v4548_v58, -inf }
0x24fd   :  { %4550 = vmax.xlane.f32.xlu1 %v4549_v61 }
0x2501   :  { %4718 = vadd.xlane.f32.xlu1 %v4717_v62 }
0x258a   :  { %v4551_v15 = vpop.xlane.xlu1 %4550 }
0x258b   :  { %v4552_v63 = vsub.f32 %v4548_v58, %v4551_v15  ;;  %v5007_v15 = vld [vmem:[%s18641_s24 + $0x10] sm:$0xff] }
0x258d   :  { %v4553_v0 = vmul.f32 1.442695, %v4552_v63  ;;  %v5008_v63 = vld [vmem:[%s18641_s24 + $0x18] sm:$0xff] }
0x258e   :  { %v4719_v11 = vpop.xlane.xlu1 %4718 }
0x258f   :  { %16097 = vpow2.f32 %v4553_v0  ;;  %v4723_v16 = vmul.f32 0.03125, %v4719_v11 }
0x2591   :  { %v4725_v20 = vsub.f32 %v4715_v55, %v4723_v16  ;;  %v5001_v55 = vld [vmem:[%s18642_s15] sm:$0xff] }
0x2593   :  { %v4727_v24 = vmul.f32 %v4725_v20, %v4725_v20 }
0x2595   :  { %v4729_v25 = vsel %vm399_vm0, %v4727_v24, 0.0 }
0x2599   :  { %v16098_v2 = vpop.eup %16097 }
0x259a   :  { %v4555_v3 = vsel %vm484_vm2, %v16098_v2, 0.0 }
0x259b   :  { %4556 = vadd.xlane.f32.xlu0 %v4555_v3 }
0x25b1   :  { %4560 = vrot.lane.b32.xlu0 %v17380_v33, %s16755_s1 }
0x25c9   :  { %v4465_v4 = vpop.f32.mrb[48].mxu0 }
0x25ca   :  { %v4469_v5 = vadd.f32 %v4465_v4, %v4227_v40  ;;  %v15108_v6 = vpop.f32.mrb[49].mxu0  ;;  %v14211_v40 = vld [vmem:[#allocation2 + $0x1] ss:$0 sm:$0xff] }
0x25cb   :  { %v5002_v6 = vld [vmem:[%s18642_s15 + $0x8] sm:$0xff] }
0x2628   :  { %v4557_v7 = vpop.xlane.xlu0 %4556 }
0x2629   :  { %16099 = vrcp.f32 %v4557_v7  ;;  %v16270_v7 = vld [vmem:[%s18630_s17 + $0x8] sm:$0xff] }
0x262c   :  { %v4561_v29 = vpop.permute.xlu0 %4560 }
0x262d   :  { %15115 = vmatpush3.msra.mxu0 %v4561_v29  ;;  %v17605_v29 = vadd.f32 %v16270_v7, %v5002_v6 }
0x262e   :  { %15812 = vmatprep.subr.bf16.mxu0 %v15811_v37 }
0x2633   :  { %v16100_v9 = vpop.eup %16099 }
0x2634   :  { %v4559_v10 = vmul.f32 %v16100_v9, %v16098_v2  ;;  %v16269_v2 = vld [vmem:[%s18630_s17] sm:$0xff]  ;;  %v14226_v9 = vld [vmem:[%s18637_s14 + $0x70] sm:$0xff] }
0x2635   :  { %v17595_v3 = vadd.f32 %v16269_v2, %v5001_v55 }
0x2636   :  { %15117 = vmatmul.mubr.msk.f32.vlgmr.msra.gmra.mrb[50].mxu0 %vm484_vm2, %v4559_v10  ;;  %v14227_v10 = vld [vmem:[%s18637_s14 + $0x78] sm:$0xff] }
0x2637   :  { %15814 = vmatpush3.bf16.msra.mxu0 %v15811_v37 }
0x2638   :  { %15816 = vmatprep.subr.bf16.mxu0 %v15815_v45 }
0x263b   :  { %15818 = vmatpush3.bf16.msra.mxu0 %v15815_v45 }
0x263c   :  { %15836 = vmatprep.subr.bf16.mxu0 %v15835_v47 }
0x2709   :  { %v4632_v13 = vpop.f32.mrb[50].mxu0 }
0x270a   :  { %v15118_v48 = vpop.f32.mrb[51].mxu0  ;;  %15122 = vmatmul.mubr.msk.f32.vlgmr.msra.gmra.mrb[50].mxu1 %vm484_vm2, %v4632_v13  ;;  %v15831_v13 = vpack.c.bf16 %v14227_v10, %v14226_v9 }
0x270b   :  { %15822 = vmatpush3.bf16.msra.mxu1 %v15819_v52  ;;  %v14217_v48 = vld [vmem:[%s18638_s11 + $0x1] ss:$0 sm:$0xff] }
0x27dd   :  { %v4705_v18 = vpop.f32.mrb[50].mxu1 }
0x27de   :  { %v4709_v19 = vadd.f32 %v4705_v18, %v4469_v5  ;;  %v15123_v33 = vpop.f32.mrb[51].mxu1  ;;  %v15839_v5 = vpack.c.bf16 %v5008_v63, %v5007_v15 }
0x27e0   :  { %v4710_v21 = vadd.f32 %v14192_v54, %v4709_v19  ;;  %v15823_v54 = vpack.c.bf16 %v14223_v53, %v14222_v51 }
0x27e2   :  { %v4716_v22 = vadd.f32 %v4710_v21, %v17373_v30  ;;  %15824 = vmatprep.subr.bf16.mxu1 %v15823_v54  ;;  %v14235_v21 = vld [vmem:[#allocation7] ss:$0 sm:$0xff] }
0x27e3   :  { %15826 = vmatpush3.bf16.msra.mxu1 %v15823_v54 }
0x27e4   :  { %v4720_v23 = vsel %vm399_vm0, %v4716_v22, 0.0  ;;  %15828 = vmatprep.subr.bf16.mxu1 %v15827_v57 }
0x27e5   :  { %4721 = vadd.xlane.f32.xlu1 %v4720_v23 }
0x27e7   :  { %15830 = vmatpush3.bf16.msra.mxu1 %v15827_v57 }
0x27e8   :  { %15832 = vmatprep.subr.bf16.mxu1 %v15831_v13 }
0x27e9   :  { %4730 = vadd.xlane.f32.xlu1 %v4729_v25 }
0x27eb   :  { %15834 = vmatpush3.bf16.msra.mxu1 %v15831_v13 }
0x27ec   :  { %15170 = vmatprep.subr.mxu1 %v16743_v12 }
0x2872   :  { %v4722_v14 = vpop.xlane.xlu1 %4721 }
0x2873   :  { %v4724_v26 = vmul.f32 0.03125, %v4722_v14 }
0x2875   :  { %v4726_v27 = vsub.f32 %v4716_v22, %v4724_v26 }
0x2876   :  { %v4731_v28 = vpop.xlane.xlu1 %4730 }
0x2877   :  { %v4735_v17 = vmul.f32 0.03125, %v4731_v28  ;;  %v4728_v31 = vmul.f32 %v4726_v27, %v4726_v27 }
0x2879   :  { %v4737_v1 = vadd.f32 1e-05, %v4735_v17  ;;  %v4732_v30 = vsel %vm399_vm0, %v4728_v31, 0.0 }
0x287a   :  { %4733 = vadd.xlane.f32.xlu1 %v4732_v30 }
0x287b   :  { %16101 = vrsqrt.f32 %v4737_v1 }
0x2885   :  { %v16102_v34 = vpop.eup %16101 }
0x2886   :  { %v4741_v38 = vmul.f32 %v16102_v34, %v4725_v20 }
0x2888   :  { %v4749_v41 = vmul.f32 %v14210_v36, %v4741_v38 }
0x288a   :  { %v17575_v39 = vadd.f32 %v14211_v40, %v4749_v41 }
0x288c   :  { %15132 = vmatprep.mubr.msk.f32.mxu0 %vm399_vm0, %v17575_v39 }
0x2907   :  { %v4734_v59 = vpop.xlane.xlu1 %4733 }
0x2908   :  { %v4736_v58 = vmul.f32 0.03125, %v4734_v59 }
0x290a   :  { %v4738_v60 = vadd.f32 1e-05, %v4736_v58  ;;  %v17671_v58 = vld [vmem:[%s18643_s27] sm:$0xff] }
0x290c   :  { %16103 = vrsqrt.f32 %v4738_v60 }
0x2916   :  { %v16104_v61 = vpop.eup %16103 }
0x2917   :  { %v4742_v62 = vmul.f32 %v16104_v61, %v4726_v27 }
0x2919   :  { %v4750_v0 = vmul.f32 %v14210_v36, %v4742_v62 }
0x291b   :  { %v17597_v4 = vadd.f32 %v14211_v40, %v4750_v0 }
0x291d   :  { %15133 = vmatmul.mubr.msk.f32.vlgmr.msra.gmra.mrb[52].mxu0 %vm399_vm0, %v17597_v4 }
0x291e   :  { %15838 = vmatpush3.bf16.msra.mxu0 %v15835_v47  ;;  %15162 = vmatprep.mubr.msk.f32.mxu0 %vm399_vm0, %v17595_v3 }
0x291f   :  { %15840 = vmatprep.subr.bf16.mxu0 %v15839_v5 }
0x2922   :  { %15842 = vmatpush3.bf16.msra.mxu0 %v15839_v5 }
0x2923   :  { %15165 = vmatprep.subr.mxu0 %v16743_v12 }
0x2925   :  { %15163 = vmatmul.mubr.msk.f32.vlgmr.msra.gmra.mrb[54].mxu0 %vm399_vm0, %v17605_v29 }
0x2926   :  { %15167 = vmatprep.mubr.msk.f32.mxu0 %vm16744_vm1, %v16743_v12 }
0x29f0   :  { %v15134_v11 = vpop.f32.mrb[52].mxu0 }
0x29f1   :  { %v4850_v16 = vadd.f32 %v15134_v11, %v14217_v48  ;;  %v4844_v18 = vpop.f32.mrb[53].mxu0 }
0x29f2   :  { %v4845_v19 = vadd.f32 %v14217_v48, %v4844_v18 }
0x29f3   :  { %v4854_v20 = vmax.f32 %v4850_v16, 0.0 }
0x29f4   :  { %v4853_v33 = vmax.f32 %v4845_v19, 0.0 }
0x29f6   :  { %15151 = vmatprep.mubr.msk.f32.mxu1 %vm2560_vm3, %v4853_v33 }
0x29f7   :  { %15152 = vmatmul.mubr.msk.f32.vlgmr.msra.gmra.mrb[52].mxu1 %vm2560_vm3, %v4854_v20 }
0x29f8   :  { %v15164_v22 = vpop.f32.mrb[54].mxu0  ;;  %15172 = vmatprep.mubr.msk.f32.mxu1 %vm16744_vm1, %v16743_v12 }
0x29f9   :  { %v17620_v23 = vadd.f32 %v15164_v22, %v14235_v21  ;;  %v5093_v24 = vpop.f32.mrb[55].mxu0 }
0x29fa   :  { %v17622_v25 = vadd.f32 %v14235_v21, %v5093_v24 }
0x29fc   :  { %5269 = vrot.lane.b32.xlu0 %v17622_v25, %s16747_s3  ;;  %5103 = vrot.lane.b32.xlu1 %v17622_v25, %s16746_s23 }
0x2a00   :  { %5267 = vrot.lane.b32.xlu0 %v17622_v25, %s16745_s22 }
0x2a6e   :  { %v5104_v14 = vpop.permute.xlu1 %5103  ;;  %v5270_v26 = vpop.permute.xlu0 %5269 }
0x2a6f   :  { %15166 = vmatpush3.xpose.msk.msra.mxu0 %vm484_vm2, %v5104_v14 }
0x2a70   :  { %15175 = vmatprep.subr.mxu0 %v16743_v12 }
0x2a72   :  { %15168 = vmatmul.mubr.msk.f32.vlgmr.msra.gmra.mrb[56].mxu0 %vm484_vm2, %v17622_v25  ;;  %v5268_v27 = vpop.permute.xlu0 %5267 }
0x2a73   :  { %15176 = vmatpush3.xpose.msk.msra.mxu0 %vm484_vm2, %v5270_v26  ;;  %15177 = vmatprep.mubr.msk.f32.mxu0 %vm16744_vm1, %v16743_v12 }
0x2a74   :  { %15185 = vmatprep.subr.mxu0 %v16743_v12 }
0x2a76   :  { %15178 = vmatmul.mubr.msk.f32.vlgmr.msra.gmra.mrb[58].mxu0 %vm484_vm2, %v5268_v27  ;;  %v17706_v27 = vld [vmem:[%s18643_s27 + $0x10] sm:$0xff] }
0x2a77   :  { %15187 = vmatprep.mubr.msk.f32.mxu0 %vm16744_vm1, %v16743_v12  ;;  %15186 = vmatpush3.msra.mxu0 %v17658_v50 }
0x2a78   :  { %15195 = vmatprep.subr.mxu0 %v16743_v12 }
0x2aca   :  { %v17641_v28 = vpop.f32.mrb[52].mxu1 }
0x2acb   :  { %v17643_v17 = vpop.f32.mrb[53].mxu1 }
0x2b45   :  { %v5175_v31 = vpop.f32.mrb[56].mxu0 }
0x2b46   :  { %v5179_v1 = vmul.f32 0.35355338, %v5175_v31  ;;  %v15169_v30 = vpop.f32.mrb[57].mxu0 }
0x2b48   :  { %v5180_v34 = vsel %vm484_vm2, %v5179_v1, -inf }
0x2b49   :  { %5181 = vmax.xlane.f32.xlu0 %v5180_v34  ;;  %v5341_v36 = vpop.f32.mrb[58].mxu0 }
0x2b4a   :  { %v5345_v38 = vmul.f32 0.35355338, %v5341_v36  ;;  %v15179_v40 = vpop.f32.mrb[59].mxu0 }
0x2b4c   :  { %v5346_v41 = vsel %vm484_vm2, %v5345_v38, -inf }
0x2b4d   :  { %5347 = vmax.xlane.f32.xlu1 %v5346_v41 }
0x2b5e   :  { %5357 = vrot.lane.b32.xlu1 %v17622_v25, %s16748_s25 }
0x2b62   :  { %5581 = vrot.lane.b32.xlu1 %v17622_v25, %s16750_s4 }
0x2bd6   :  { %v5182_v42 = vpop.xlane.xlu0 %5181 }
0x2bd7   :  { %v5183_v43 = vsub.f32 %v5179_v1, %v5182_v42 }
0x2bd9   :  { %v5184_v37 = vmul.f32 1.442695, %v5183_v43 }
0x2bda   :  { %v5348_v32 = vpop.xlane.xlu1 %5347 }
0x2bdb   :  { %16105 = vpow2.f32 %v5184_v37  ;;  %v5349_v44 = vsub.f32 %v5345_v38, %v5348_v32 }
0x2bdd   :  { %v5350_v45 = vmul.f32 1.442695, %v5349_v44 }
0x2bde   :  { %v5358_v56 = vpop.permute.xlu1 %5357 }
0x2bdf   :  { %16107 = vpow2.f32 %v5350_v45 }
0x2be2   :  { %v5582_v62 = vpop.permute.xlu1 %5581 }
0x2be5   :  { %v16106_v46 = vpop.eup %16105 }
0x2be6   :  { %v5186_v35 = vsel %vm484_vm2, %v16106_v46, 0.0 }
0x2be7   :  { %5187 = vadd.xlane.f32.xlu0 %v5186_v35 }
0x2be9   :  { %v16108_v47 = vpop.eup %16107 }
0x2bea   :  { %v5352_v49 = vsel %vm484_vm2, %v16108_v47, 0.0 }
0x2beb   :  { %5353 = vadd.xlane.f32.xlu0 %v5352_v49 }
0x2c01   :  { %5191 = vrot.lane.b32.xlu0 %v17622_v25, %s16749_s26 }
0x2c05   :  { %5579 = vrot.lane.b32.xlu0 %v17622_v25, %s16751_s6 }
0x2c74   :  { %v5188_v51 = vpop.xlane.xlu0 %5187 }
0x2c75   :  { %16109 = vrcp.f32 %v5188_v51 }
0x2c78   :  { %v5354_v52 = vpop.xlane.xlu0 %5353 }
0x2c79   :  { %16111 = vrcp.f32 %v5354_v52 }
0x2c7c   :  { %v5192_v53 = vpop.permute.xlu0 %5191 }
0x2c7d   :  { %15171 = vmatpush3.msra.mxu1 %v5192_v53  ;;  %v17739_v53 = vld [vmem:[%s18643_s27 + $0x18] sm:$0xff] }
0x2c7e   :  { %15180 = vmatprep.subr.mxu1 %v16743_v12 }
0x2c7f   :  { %v16110_v54 = vpop.eup %16109 }
0x2c80   :  { %v5190_v8 = vmul.f32 %v16110_v54, %v16106_v46  ;;  %v5580_v63 = vpop.permute.xlu0 %5579 }
0x2c82   :  { %15173 = vmatmul.mubr.msk.f32.vlgmr.msra.gmra.mrb[54].mxu1 %vm484_vm2, %v5190_v8 }
0x2c83   :  { %v16112_v57 = vpop.eup %16111  ;;  %15181 = vmatpush3.msra.mxu1 %v5358_v56  ;;  %15182 = vmatprep.mubr.msk.f32.mxu1 %vm16744_vm1, %v16743_v12 }
0x2c84   :  { %v5356_v59 = vmul.f32 %v16112_v57, %v16108_v47  ;;  %15190 = vmatprep.subr.mxu1 %v16743_v12 }
0x2c86   :  { %15183 = vmatmul.mubr.msk.f32.vlgmr.msra.gmra.mrb[56].mxu1 %vm484_vm2, %v5356_v59 }
0x2c87   :  { %15192 = vmatprep.mubr.msk.f32.mxu1 %vm16744_vm1, %v16743_v12  ;;  %15191 = vmatpush3.msra.mxu1 %v17671_v58 }
0x2c88   :  { %15200 = vmatprep.subr.mxu1 %v16743_v12 }
0x2d55   :  { %v5263_v60 = vpop.f32.mrb[54].mxu1 }
0x2d56   :  { %v15174_v61 = vpop.f32.mrb[55].mxu1  ;;  %15193 = vmatmul.mubr.msk.f32.vlgmr.msra.gmra.mrb[58].mxu1 %vm484_vm2, %v5263_v60 }
0x2d57   :  { %15202 = vmatprep.mubr.msk.f32.mxu1 %vm16744_vm1, %v16743_v12 }
0x2d59   :  { %v5429_v55 = vpop.f32.mrb[56].mxu1 }
0x2d5a   :  { %v15184_v15 = vpop.f32.mrb[57].mxu1  ;;  %15188 = vmatmul.mubr.msk.f32.vlgmr.msra.gmra.mrb[60].mxu0 %vm484_vm2, %v5429_v55 }
0x2d5b   :  { %15196 = vmatpush3.xpose.msk.msra.mxu0 %vm484_vm2, %v5582_v62  ;;  %15197 = vmatprep.mubr.msk.f32.mxu0 %vm16744_vm1, %v16743_v12 }
0x2d5c   :  { %15205 = vmatprep.subr.mxu0 %v16743_v12 }
0x2d5e   :  { %15198 = vmatmul.mubr.msk.f32.vlgmr.msra.gmra.mrb[62].mxu0 %vm484_vm2, %v5580_v63 }
0x2d5f   :  { %15207 = vmatprep.mubr.msk.f32.mxu0 %vm16744_vm1, %v16743_v12  ;;  %15206 = vmatpush3.msra.mxu0 %v17706_v27 }
0x2d60   :  { %15215 = vmatprep.subr.mxu0 %v16743_v12 }
0x2e29   :  { %v5575_v0 = vpop.f32.mrb[58].mxu1 }
0x2e2a   :  { %v15194_v2 = vpop.f32.mrb[59].mxu1 }
0x2e2d   :  { %v5502_v5 = vpop.f32.mrb[60].mxu0 }
0x2e2e   :  { %v5576_v6 = vadd.f32 %v5575_v0, %v5502_v5  ;;  %v15189_v7 = vpop.f32.mrb[61].mxu0 }
0x2e31   :  { %v5653_v9 = vpop.f32.mrb[62].mxu0 }
0x2e32   :  { %v5657_v10 = vmul.f32 0.35355338, %v5653_v9  ;;  %v15199_v13 = vpop.f32.mrb[63].mxu0 }
0x2e34   :  { %v5658_v48 = vsel %vm484_vm2, %v5657_v10, -inf }
0x2e35   :  { %5659 = vmax.xlane.f32.xlu1 %v5658_v48 }
0x2e46   :  { %5821 = vrot.lane.b32.xlu1 %v17622_v25, %s16752_s19 }
0x2e4a   :  { %5819 = vrot.lane.b32.xlu1 %v17622_v25, %s16753_s28 }
0x2e4e   :  { %6067 = vrot.lane.b32.xlu1 %v17620_v23, %s16746_s23 }
0x2ec2   :  { %v5660_v11 = vpop.xlane.xlu1 %5659 }
0x2ec3   :  { %v5661_v16 = vsub.f32 %v5657_v10, %v5660_v11 }
0x2ec5   :  { %v5662_v18 = vmul.f32 1.442695, %v5661_v16 }
0x2ec6   :  { %v5822_v24 = vpop.permute.xlu1 %5821 }
0x2ec7   :  { %16113 = vpow2.f32 %v5662_v18 }
0x2eca   :  { %v5820_v26 = vpop.permute.xlu1 %5819 }
0x2ece   :  { %v6068_v46 = vpop.permute.xlu1 %6067 }
0x2ed1   :  { %v16114_v19 = vpop.eup %16113 }
0x2ed2   :  { %v5664_v33 = vsel %vm484_vm2, %v16114_v19, 0.0 }
0x2ed3   :  { %5665 = vadd.xlane.f32.xlu0 %v5664_v33 }
0x2ee9   :  { %5669 = vrot.lane.b32.xlu0 %v17622_v25, %s16754_s0 }
0x2f60   :  { %v5666_v20 = vpop.xlane.xlu0 %5665 }
0x2f61   :  { %16115 = vrcp.f32 %v5666_v20 }
0x2f64   :  { %v5670_v21 = vpop.permute.xlu0 %5669 }
0x2f65   :  { %15201 = vmatpush3.msra.mxu1 %v5670_v21 }
0x2f66   :  { %15210 = vmatprep.subr.mxu1 %v16743_v12 }
0x2f6b   :  { %v16116_v22 = vpop.eup %16115 }
0x2f6c   :  { %v5668_v14 = vmul.f32 %v16116_v22, %v16114_v19 }
0x2f6e   :  { %15203 = vmatmul.mubr.msk.f32.vlgmr.msra.gmra.mrb[60].mxu1 %vm484_vm2, %v5668_v14 }
0x2f6f   :  { %15211 = vmatpush3.xpose.msk.msra.mxu1 %vm484_vm2, %v5822_v24  ;;  %15212 = vmatprep.mubr.msk.f32.mxu1 %vm16744_vm1, %v16743_v12 }
0x2f70   :  { %15220 = vmatprep.subr.mxu1 %v16743_v12 }
0x2f72   :  { %15213 = vmatmul.mubr.msk.f32.vlgmr.msra.gmra.mrb[62].mxu1 %vm484_vm2, %v5820_v26 }
0x2f73   :  { %15222 = vmatprep.mubr.msk.f32.mxu1 %vm16744_vm1, %v16743_v12  ;;  %15221 = vmatpush3.msra.mxu1 %v17739_v53 }
0x2f74   :  { %15230 = vmatprep.subr.mxu1 %v16743_v12 }
0x3041   :  { %v5741_v31 = vpop.f32.mrb[60].mxu1 }
0x3042   :  { %v15204_v1 = vpop.f32.mrb[61].mxu1  ;;  %15208 = vmatmul.mubr.msk.f32.vlgmr.msra.gmra.mrb[64].mxu0 %vm484_vm2, %v5741_v31 }
0x3043   :  { %15217 = vmatprep.mubr.msk.f32.mxu0 %vm16744_vm1, %v16743_v12 }
0x3045   :  { %v5893_v30 = vpop.f32.mrb[62].mxu1 }
0x3046   :  { %v5897_v34 = vmul.f32 0.35355338, %v5893_v30  ;;  %v15214_v36 = vpop.f32.mrb[63].mxu1 }
0x3048   :  { %v5898_v38 = vsel %vm484_vm2, %v5897_v34, -inf }
0x3049   :  { %5899 = vmax.xlane.f32.xlu0 %v5898_v38 }
0x305f   :  { %5909 = vrot.lane.b32.xlu0 %v17622_v25, %s16755_s1 }
0x3063   :  { %6233 = vrot.lane.b32.xlu0 %v17620_v23, %s16747_s3 }
0x30d6   :  { %v5900_v40 = vpop.xlane.xlu0 %5899 }
0x30d7   :  { %v5901_v41 = vsub.f32 %v5897_v34, %v5900_v40 }
0x30d9   :  { %v5902_v42 = vmul.f32 1.442695, %v5901_v41 }
0x30da   :  { %v5910_v43 = vpop.permute.xlu0 %5909 }
0x30db   :  { %16117 = vpow2.f32 %v5902_v42  ;;  %15216 = vmatpush3.msra.mxu0 %v5910_v43 }
0x30dc   :  { %15225 = vmatprep.subr.mxu0 %v16743_v12 }
0x30de   :  { %v6234_v51 = vpop.permute.xlu0 %6233 }
0x30e5   :  { %v16118_v37 = vpop.eup %16117 }
0x30e6   :  { %v5904_v32 = vsel %vm484_vm2, %v16118_v37, 0.0 }
0x30e7   :  { %5905 = vadd.xlane.f32.xlu1 %v5904_v32 }
0x30f8   :  { %6231 = vrot.lane.b32.xlu1 %v17620_v23, %s16745_s22 }
0x3115   :  { %v5814_v44 = vpop.f32.mrb[64].mxu0 }
0x3116   :  { %v5818_v25 = vadd.f32 %v5814_v44, %v5576_v6  ;;  %v15209_v45 = vpop.f32.mrb[65].mxu0 }
0x3174   :  { %v5906_v35 = vpop.xlane.xlu1 %5905 }
0x3175   :  { %16119 = vrcp.f32 %v5906_v35 }
0x3178   :  { %v6232_v52 = vpop.permute.xlu1 %6231 }
0x317f   :  { %v16120_v47 = vpop.eup %16119 }
0x3180   :  { %v5908_v49 = vmul.f32 %v16120_v47, %v16118_v37 }
0x3182   :  { %15218 = vmatmul.mubr.msk.f32.vlgmr.msra.gmra.mrb[66].mxu0 %vm484_vm2, %v5908_v49 }
0x3183   :  { %15226 = vmatpush3.xpose.msk.msra.mxu0 %vm484_vm2, %v6068_v46  ;;  %15227 = vmatprep.mubr.msk.f32.mxu0 %vm16744_vm1, %v16743_v12 }
0x3184   :  { %15235 = vmatprep.subr.mxu0 %v16743_v12 }
0x3186   :  { %15228 = vmatmul.mubr.msk.f32.vlgmr.msra.gmra.mrb[68].mxu0 %vm484_vm2, %v17620_v23 }
0x3187   :  { %15236 = vmatpush3.xpose.msk.msra.mxu0 %vm484_vm2, %v6234_v51  ;;  %15237 = vmatprep.mubr.msk.f32.mxu0 %vm16744_vm1, %v16743_v12 }
0x3188   :  { %15245 = vmatprep.subr.mxu0 %v16743_v12 }
0x318a   :  { %15238 = vmatmul.mubr.msk.f32.vlgmr.msra.gmra.mrb[70].mxu0 %vm484_vm2, %v6232_v52 }
0x318b   :  { %15246 = vmatpush3.msra.mxu0 %v17658_v50  ;;  %15247 = vmatprep.mubr.msk.f32.mxu0 %vm16744_vm1, %v16743_v12 }
0x318c   :  { %15255 = vmatprep.subr.mxu0 %v16743_v12 }
0x3255   :  { %v5981_v54 = vpop.f32.mrb[66].mxu0 }
0x3256   :  { %v15219_v8 = vpop.f32.mrb[67].mxu0  ;;  %15223 = vmatmul.mubr.msk.f32.vlgmr.msra.gmra.mrb[64].mxu1 %vm484_vm2, %v5981_v54 }
0x3257   :  { %15232 = vmatprep.mubr.msk.f32.mxu1 %vm16744_vm1, %v16743_v12 }
0x3259   :  { %v6139_v56 = vpop.f32.mrb[68].mxu0 }
0x325a   :  { %v6143_v50 = vmul.f32 0.35355338, %v6139_v56  ;;  %v15229_v57 = vpop.f32.mrb[69].mxu0  ;;  %v14229_v56 = vld [vmem:[%s18639_s30 + $0x1] ss:$0 sm:$0xff] }
0x325c   :  { %v6144_v59 = vsel %vm484_vm2, %v6143_v50, -inf }
0x325d   :  { %6145 = vmax.xlane.f32.xlu0 %v6144_v59  ;;  %v6305_v60 = vpop.f32.mrb[70].mxu0  ;;  %v4945_v59 = vadd.f32 %v14229_v56, %v17643_v17 }
0x325e   :  { %v6309_v61 = vmul.f32 0.35355338, %v6305_v60  ;;  %v15239_v55 = vpop.f32.mrb[71].mxu0 }
0x3260   :  { %v6310_v62 = vsel %vm484_vm2, %v6309_v61, -inf }
0x3261   :  { %6311 = vmax.xlane.f32.xlu1 %v6310_v62  ;;  %v4950_v62 = vadd.f32 %v17641_v28, %v14229_v56 }
0x3272   :  { %6155 = vrot.lane.b32.xlu1 %v17620_v23, %s16749_s26 }
0x3276   :  { %6545 = vrot.lane.b32.xlu1 %v17620_v23, %s16750_s4 }
0x327a   :  { %6543 = vrot.lane.b32.xlu1 %v17620_v23, %s16751_s6 }
0x32ea   :  { %v6146_v15 = vpop.xlane.xlu0 %6145 }
0x32eb   :  { %v6147_v63 = vsub.f32 %v6143_v50, %v6146_v15 }
0x32ed   :  { %v6148_v0 = vmul.f32 1.442695, %v6147_v63  ;;  %v4958_v63 = vadd.f32 %v4950_v62, %v17597_v4 }
0x32ee   :  { %v6312_v2 = vpop.xlane.xlu1 %6311 }
0x32ef   :  { %16121 = vpow2.f32 %v6148_v0  ;;  %v6313_v5 = vsub.f32 %v6309_v61, %v6312_v2  ;;  %v4962_v2 = vsel %vm399_vm0, %v4958_v63, 0.0 }
0x32f1   :  { %v6314_v6 = vmul.f32 1.442695, %v6313_v5 }
0x32f2   :  { %v6156_v7 = vpop.permute.xlu1 %6155 }
0x32f3   :  { %16123 = vpow2.f32 %v6314_v6  ;;  %15231 = vmatpush3.msra.mxu1 %v6156_v7 }
0x32f4   :  { %15240 = vmatprep.subr.mxu1 %v16743_v12 }
0x32f6   :  { %v6546_v1 = vpop.permute.xlu1 %6545 }
0x32f9   :  { %v16122_v9 = vpop.eup %16121 }
0x32fa   :  { %v6150_v10 = vsel %vm484_vm2, %v16122_v9, 0.0 }
0x32fb   :  { %6151 = vadd.xlane.f32.xlu0 %v6150_v10 }
0x32fd   :  { %v16124_v13 = vpop.eup %16123 }
0x32fe   :  { %v6316_v48 = vsel %vm484_vm2, %v16124_v13, 0.0 }
0x32ff   :  { %6317 = vadd.xlane.f32.xlu0 %v6316_v48 }
0x3315   :  { %6321 = vrot.lane.b32.xlu0 %v17620_v23, %s16748_s25 }
0x3329   :  { %v6054_v11 = vpop.f32.mrb[64].mxu1 }
0x332a   :  { %v17759_v16 = vadd.f32 %v6054_v11, %v5818_v25  ;;  %v15224_v18 = vpop.f32.mrb[65].mxu1 }
0x3388   :  { %v6152_v19 = vpop.xlane.xlu0 %6151 }
0x3389   :  { %16125 = vrcp.f32 %v6152_v19 }
0x338c   :  { %v6318_v33 = vpop.xlane.xlu0 %6317 }
0x338d   :  { %16127 = vrcp.f32 %v6318_v33 }
0x3390   :  { %v6322_v22 = vpop.permute.xlu0 %6321 }
0x3393   :  { %v16126_v20 = vpop.eup %16125 }
0x3394   :  { %v6154_v21 = vmul.f32 %v16126_v20, %v16122_v9  ;;  %v17817_v20 = vld [vmem:[#allocation13] sm:$0xff] }
0x3396   :  { %15233 = vmatmul.mubr.msk.f32.vlgmr.msra.gmra.mrb[66].mxu1 %vm484_vm2, %v6154_v21  ;;  %v17819_v21 = vld [vmem:[#allocation13 + $0x8] sm:$0xff] }
0x3397   :  { %v16128_v24 = vpop.eup %16127  ;;  %15241 = vmatpush3.msra.mxu1 %v6322_v22  ;;  %15242 = vmatprep.mubr.msk.f32.mxu1 %vm16744_vm1, %v16743_v12  ;;  %v16009_v22 = vpack.i.bf16 %v17819_v21, %v17817_v20 }
0x3398   :  { %v6320_v14 = vmul.f32 %v16128_v24, %v16124_v13  ;;  %15250 = vmatprep.subr.mxu1 %v16743_v12  ;;  %v7072_v24 = vld [vmem:[#allocation13 + $0x10] sm:$0xff] }
0x339a   :  { %15243 = vmatmul.mubr.msk.f32.vlgmr.msra.gmra.mrb[68].mxu1 %vm484_vm2, %v6320_v14  ;;  %v7073_v14 = vld [vmem:[#allocation13 + $0x18] sm:$0xff] }
0x339b   :  { %15251 = vmatpush3.msra.mxu1 %v17671_v58  ;;  %15252 = vmatprep.mubr.msk.f32.mxu1 %vm16744_vm1, %v16743_v12  ;;  %v6544_v58 = vpop.permute.xlu1 %6543 }
0x339c   :  { %15260 = vmatprep.subr.mxu1 %v16743_v12 }
0x3469   :  { %v6227_v26 = vpop.f32.mrb[66].mxu1 }
0x346a   :  { %v15234_v31 = vpop.f32.mrb[67].mxu1  ;;  %15253 = vmatmul.mubr.msk.f32.vlgmr.msra.gmra.mrb[70].mxu1 %vm484_vm2, %v6227_v26  ;;  %v16014_v26 = vpack.i.bf16 %v7073_v14, %v7072_v24 }
0x346b   :  { %15262 = vmatprep.mubr.msk.f32.mxu1 %vm16744_vm1, %v16743_v12  ;;  %v17825_v31 = vld [vmem:[#allocation8] ss:$0 sm:$0xff] }
0x346d   :  { %v6393_v30 = vpop.f32.mrb[68].mxu1 }
0x346e   :  { %v15244_v34 = vpop.f32.mrb[69].mxu1  ;;  %15248 = vmatmul.mubr.msk.f32.vlgmr.msra.gmra.mrb[72].mxu0 %vm484_vm2, %v6393_v30 }
0x346f   :  { %15256 = vmatpush3.xpose.msk.msra.mxu0 %vm484_vm2, %v6546_v1  ;;  %15257 = vmatprep.mubr.msk.f32.mxu0 %vm16744_vm1, %v16743_v12  ;;  %v6065_v1 = vadd.f32 %v17825_v31, %v17759_v16 }
0x3470   :  { %15265 = vmatprep.subr.mxu0 %v16743_v12 }
0x3472   :  { %15258 = vmatmul.mubr.msk.f32.vlgmr.msra.gmra.mrb[74].mxu0 %vm484_vm2, %v6544_v58 }
0x3473   :  { %15266 = vmatpush3.msra.mxu0 %v17706_v27  ;;  %15267 = vmatprep.mubr.msk.f32.mxu0 %vm16744_vm1, %v16743_v12 }
0x3474   :  { %15275 = vmatprep.subr.mxu0 %v16743_v12 }
0x353d   :  { %v6539_v36 = vpop.f32.mrb[70].mxu1 }
0x353e   :  { %v15254_v38 = vpop.f32.mrb[71].mxu1 }
0x3541   :  { %v6466_v40 = vpop.f32.mrb[72].mxu0 }
0x3542   :  { %v17783_v41 = vadd.f32 %v6539_v36, %v6466_v40  ;;  %v15249_v42 = vpop.f32.mrb[73].mxu0  ;;  %v17833_v36 = vadd.f32 %v6065_v1, %v17595_v3 }
0x3544   :  { %v7028_v38 = vsel %vm399_vm0, %v17833_v36, 0.0 }
0x3545   :  { %v6617_v43 = vpop.f32.mrb[74].mxu0 }
0x3546   :  { %v6621_v37 = vmul.f32 0.35355338, %v6617_v43  ;;  %v15259_v32 = vpop.f32.mrb[75].mxu0 }
0x3548   :  { %v6622_v44 = vsel %vm484_vm2, %v6621_v37, -inf }
0x3549   :  { %6623 = vmax.xlane.f32.xlu0 %v6622_v44 }
0x355f   :  { %6633 = vrot.lane.b32.xlu0 %v17620_v23, %s16754_s0 }
0x3563   :  { %6783 = vrot.lane.b32.xlu0 %v17620_v23, %s16753_s28 }
0x35d6   :  { %v6624_v27 = vpop.xlane.xlu0 %6623 }
0x35d7   :  { %v6625_v25 = vsub.f32 %v6621_v37, %v6624_v27  ;;  %v14233_v27 = vld [vmem:[%s18640_s12 + $0x1] ss:$0 sm:$0xff] }
0x35d9   :  { %v6626_v45 = vmul.f32 1.442695, %v6625_v25 }
0x35da   :  { %v6634_v46 = vpop.permute.xlu0 %6633 }
0x35db   :  { %16129 = vpow2.f32 %v6626_v45  ;;  %15261 = vmatpush3.msra.mxu1 %v6634_v46 }
0x35dc   :  { %15270 = vmatprep.subr.mxu1 %v16743_v12 }
0x35de   :  { %v6784_v8 = vpop.permute.xlu0 %6783 }
0x35e5   :  { %v16130_v35 = vpop.eup %16129 }
0x35e6   :  { %v6628_v47 = vsel %vm484_vm2, %v16130_v35, 0.0 }
0x35e7   :  { %6629 = vadd.xlane.f32.xlu1 %v6628_v47  ;;  %v14234_v47 = vld [vmem:[#allocation5 + $0x1] ss:$0 sm:$0xff] }
0x35f8   :  { %6785 = vrot.lane.b32.xlu1 %v17620_v23, %s16752_s19 }
0x3674   :  { %v6630_v49 = vpop.xlane.xlu1 %6629 }
0x3675   :  { %16131 = vrcp.f32 %v6630_v49 }
0x3678   :  { %v6786_v54 = vpop.permute.xlu1 %6785 }
0x367f   :  { %v16132_v51 = vpop.eup %16131 }
0x3680   :  { %v6632_v52 = vmul.f32 %v16132_v51, %v16130_v35  ;;  %v15847_v35 = vpack.c.bf16 %v7073_v14, %v7072_v24 }
0x3682   :  { %15263 = vmatmul.mubr.msk.f32.vlgmr.msra.gmra.mrb[72].mxu1 %vm484_vm2, %v6632_v52 }
0x3683   :  { %15271 = vmatpush3.xpose.msk.msra.mxu1 %vm484_vm2, %v6786_v54  ;;  %15272 = vmatprep.mubr.msk.f32.mxu1 %vm16744_vm1, %v16743_v12 }
0x3684   :  { %15280 = vmatprep.subr.mxu1 %v16743_v12 }
0x3686   :  { %15273 = vmatmul.mubr.msk.f32.vlgmr.msra.gmra.mrb[74].mxu1 %vm484_vm2, %v6784_v8 }
0x3687   :  { %15281 = vmatpush3.msra.mxu1 %v17739_v53  ;;  %15282 = vmatprep.mubr.msk.f32.mxu1 %vm16744_vm1, %v16743_v12  ;;  %v4957_v53 = vadd.f32 %v4945_v59, %v17575_v39  ;;  %v17853_v59 = vld [vmem:[#allocation14] ss:$0 sm:$0xff] }
0x3689   :  { %v4959_v0 = vsel %vm399_vm0, %v4957_v53, 0.0 }
0x3755   :  { %v6705_v50 = vpop.f32.mrb[72].mxu1 }
0x3756   :  { %v15264_v57 = vpop.f32.mrb[73].mxu1  ;;  %15268 = vmatmul.mubr.msk.f32.vlgmr.msra.gmra.mrb[76].mxu0 %vm484_vm2, %v6705_v50 }
0x3757   :  { %15277 = vmatprep.mubr.msk.f32.mxu0 %vm16744_vm1, %v16743_v12 }
0x3759   :  { %v6857_v60 = vpop.f32.mrb[74].mxu1 }
0x375a   :  { %v6861_v61 = vmul.f32 0.35355338, %v6857_v60  ;;  %v15274_v55 = vpop.f32.mrb[75].mxu1 }
0x375c   :  { %v6862_v15 = vsel %vm484_vm2, %v6861_v61, -inf }
0x375d   :  { %6863 = vmax.xlane.f32.xlu1 %v6862_v15 }
0x3761   :  { %4960 = vadd.xlane.f32.xlu1 %v4959_v0 }
0x3765   :  { %4963 = vadd.xlane.f32.xlu1 %v4962_v2 }
0x37ea   :  { %v6864_v5 = vpop.xlane.xlu1 %6863 }
0x37eb   :  { %v6865_v17 = vsub.f32 %v6861_v61, %v6864_v5 }
0x37ed   :  { %v6866_v6 = vmul.f32 1.442695, %v6865_v17 }
0x37ee   :  { %v4961_v7 = vpop.xlane.xlu1 %4960 }
0x37ef   :  { %16133 = vpow2.f32 %v6866_v6  ;;  %v4965_v9 = vmul.f32 0.03125, %v4961_v7 }
0x37f1   :  { %v4967_v28 = vsub.f32 %v4957_v53, %v4965_v9 }
0x37f2   :  { %v4964_v10 = vpop.xlane.xlu1 %4963 }
0x37f3   :  { %v4966_v39 = vmul.f32 0.03125, %v4964_v10  ;;  %v4969_v13 = vmul.f32 %v4967_v28, %v4967_v28 }
0x37f5   :  { %v4968_v48 = vsub.f32 %v4958_v63, %v4966_v39  ;;  %v4971_v11 = vsel %vm399_vm0, %v4969_v13, 0.0 }
0x37f6   :  { %4972 = vadd.xlane.f32.xlu1 %v4971_v11 }
0x37f7   :  { %v4970_v4 = vmul.f32 %v4968_v48, %v4968_v48 }
0x37f9   :  { %v16134_v18 = vpop.eup %16133  ;;  %v4974_v19 = vsel %vm399_vm0, %v4970_v4, 0.0 }
0x37fa   :  { %4975 = vadd.xlane.f32.xlu1 %v4974_v19  ;;  %v6868_v33 = vsel %vm484_vm2, %v16134_v18, 0.0 }
0x37fb   :  { %6869 = vadd.xlane.f32.xlu0 %v6868_v33 }
0x3811   :  { %6873 = vrot.lane.b32.xlu0 %v17620_v23, %s16755_s1 }
0x3829   :  { %v6778_v30 = vpop.f32.mrb[76].mxu0 }
0x382a   :  { %v17830_v34 = vadd.f32 %v6778_v30, %v17783_v41  ;;  %v15269_v58 = vpop.f32.mrb[77].mxu0  ;;  %v15843_v41 = vpack.c.bf16 %v17819_v21, %v17817_v20 }
0x382b   :  { %v14271_v58 = vld [vmem:[#allocation10] ss:$0 sm:$0xff] }
0x3830   :  { %7029 = vadd.xlane.f32.xlu0 %v7028_v38  ;;  %v14272_v38 = vld [vmem:[#allocation11] ss:$0 sm:$0xff] }
0x3883   :  { %v4973_v23 = vpop.xlane.xlu1 %4972 }
0x3884   :  { %v4977_v40 = vmul.f32 0.03125, %v4973_v23 }
0x3886   :  { %v4979_v42 = vadd.f32 1e-05, %v4977_v40 }
0x3887   :  { %v4976_v43 = vpop.xlane.xlu1 %4975 }
0x3888   :  { %16135 = vrsqrt.f32 %v4979_v42  ;;  %v4978_v37 = vmul.f32 0.03125, %v4976_v43  ;;  %v6870_v16 = vpop.xlane.xlu0 %6869 }
0x3889   :  { %16137 = vrcp.f32 %v6870_v16 }
0x388a   :  { %v4980_v32 = vadd.f32 1e-05, %v4978_v37 }
0x388c   :  { %16139 = vrsqrt.f32 %v4980_v32  ;;  %v6874_v3 = vpop.permute.xlu0 %6873 }
0x388d   :  { %15276 = vmatpush3.msra.mxu0 %v6874_v3 }
0x388e   :  { %15844 = vmatprep.subr.bf16.mxu0 %v15843_v41 }
0x3892   :  { %v16136_v44 = vpop.eup %16135 }
0x3893   :  { %v16138_v25 = vpop.eup %16137  ;;  %v4983_v45 = vmul.f32 %v16136_v44, %v4967_v28 }
0x3894   :  { %v6872_v46 = vmul.f32 %v16138_v25, %v16134_v18 }
0x3895   :  { %v4991_v49 = vmul.f32 %v14233_v27, %v4983_v45 }
0x3896   :  { %v16140_v51 = vpop.eup %16139  ;;  %15278 = vmatmul.mubr.msk.f32.vlgmr.msra.gmra.mrb[78].mxu0 %vm484_vm2, %v6872_v46 }
0x3897   :  { %15846 = vmatpush3.bf16.msra.mxu0 %v15843_v41  ;;  %v4984_v52 = vmul.f32 %v16140_v51, %v4968_v48  ;;  %v17841_v54 = vadd.f32 %v14234_v47, %v4991_v49 }
0x3898   :  { %15848 = vmatprep.subr.bf16.mxu0 %v15847_v35 }
0x3899   :  { %v4992_v8 = vmul.f32 %v14233_v27, %v4984_v52  ;;  %15293 = vmatprep.mubr.msk.f32.mxu0 %vm399_vm0, %v17841_v54 }
0x389b   :  { %v17845_v56 = vadd.f32 %v14234_v47, %v4992_v8  ;;  %15850 = vmatpush3.bf16.msra.mxu0 %v15847_v35 }
0x389c   :  { %15307 = vmatprep.subr.mxu0 %v16743_v12 }
0x389e   :  { %15294 = vmatmul.mubr.msk.f32.vlgmr.msra.gmra.mrb[80].mxu0 %vm399_vm0, %v17845_v56 }
0x389f   :  { %15309 = vmatprep.mubr.msk.f32.mxu0 %vm16744_vm1, %v16743_v12 }
0x38bd   :  { %v7030_v62 = vpop.xlane.xlu0 %7029 }
0x38be   :  { %v7034_v0 = vmul.f32 0.03125, %v7030_v62 }
0x38c0   :  { %v7036_v6 = vsub.f32 %v17833_v36, %v7034_v0 }
0x38c2   :  { %v7038_v10 = vmul.f32 %v7036_v6, %v7036_v6 }
0x38c4   :  { %v7040_v39 = vsel %vm399_vm0, %v7038_v10, 0.0 }
0x3969   :  { %v6945_v50 = vpop.f32.mrb[78].mxu0 }
0x396a   :  { %v15279_v57 = vpop.f32.mrb[79].mxu0  ;;  %15283 = vmatmul.mubr.msk.f32.vlgmr.msra.gmra.mrb[76].mxu1 %vm484_vm2, %v6945_v50 }
0x3971   :  { %v17855_v60 = vpop.f32.mrb[80].mxu0 }
0x3972   :  { %v7158_v61 = vpop.f32.mrb[81].mxu0 }
0x3973   :  { %v17858_v55 = vadd.f32 %v17853_v59, %v7158_v61 }
0x3975   :  { %7431 = vrot.lane.b32.xlu0 %v17858_v55, %s16747_s3  ;;  %7268 = vrot.lane.b32.xlu1 %v17858_v55, %s16746_s23 }
0x3979   :  { %7429 = vrot.lane.b32.xlu0 %v17858_v55, %s16745_s22 }
0x397d   :  { %16015 = vrot.lane.b32.xlu0 %v16014_v26, %s16749_s26 }
0x39e7   :  { %v7269_v53 = vpop.permute.xlu1 %7268  ;;  %v7432_v15 = vpop.permute.xlu0 %7431 }
0x39e8   :  { %15308 = vmatpush3.xpose.msk.msra.mxu0 %vm484_vm2, %v7269_v53 }
0x39e9   :  { %15317 = vmatprep.subr.mxu0 %v16743_v12 }
0x39eb   :  { %15310 = vmatmul.mubr.msk.f32.vlgmr.msra.gmra.mrb[82].mxu0 %vm484_vm2, %v17858_v55  ;;  %v7430_v63 = vpop.permute.xlu0 %7429 }
0x39ec   :  { %15318 = vmatpush3.xpose.msk.msra.mxu0 %vm484_vm2, %v7432_v15  ;;  %15319 = vmatprep.mubr.msk.f32.mxu0 %vm16744_vm1, %v16743_v12 }
0x39ed   :  { %15327 = vmatprep.subr.mxu0 %v16743_v12 }
0x39ef   :  { %15320 = vmatmul.mubr.msk.f32.vlgmr.msra.gmra.mrb[84].mxu0 %vm484_vm2, %v7430_v63  ;;  %v16016_v37 = vpop.permute.xlu0 %16015 }
0x39f0   :  { %15329 = vmatprep.mubr.msk.f32.mxu0 %vm16744_vm1, %v16743_v12  ;;  %v16018_v20 = vunpack.i.h.bf16 %v16016_v37  ;;  %v16017_v21 = vunpack.i.l.bf16 %v16016_v37 }
0x39f2   :  { %v15855_v49 = vpack.c.bf16 %v16018_v20, %v16017_v21 }
0x3a3d   :  { %v7018_v2 = vpop.f32.mrb[76].mxu1 }
0x3a3e   :  { %v7022_v5 = vadd.f32 %v7018_v2, %v17830_v34  ;;  %v15284_v17 = vpop.f32.mrb[77].mxu1 }
0x3a40   :  { %v7023_v7 = vadd.f32 %v17825_v31, %v7022_v5 }
0x3a42   :  { %v7027_v9 = vadd.f32 %v7023_v7, %v17605_v29 }
0x3a44   :  { %v7031_v28 = vsel %vm399_vm0, %v7027_v9, 0.0 }
0x3a45   :  { %7032 = vadd.xlane.f32.xlu1 %v7031_v28 }
0x3a49   :  { %7041 = vadd.xlane.f32.xlu1 %v7040_v39 }
0x3abe   :  { %v7340_v13 = vpop.f32.mrb[82].mxu0 }
0x3abf   :  { %v7344_v48 = vmul.f32 0.35355338, %v7340_v13  ;;  %v15311_v11 = vpop.f32.mrb[83].mxu0 }
0x3ac1   :  { %v7345_v4 = vsel %vm484_vm2, %v7344_v48, -inf }
0x3ac2   :  { %7346 = vmax.xlane.f32.xlu0 %v7345_v4  ;;  %v7503_v18 = vpop.f32.mrb[84].mxu0 }
0x3ac3   :  { %v15321_v19 = vpop.f32.mrb[85].mxu0  ;;  %v7507_v42 = vmul.f32 0.35355338, %v7503_v18 }
0x3ac5   :  { %v7508_v43 = vsel %vm484_vm2, %v7507_v42, -inf }
0x3ad2   :  { %v7033_v33 = vpop.xlane.xlu1 %7032 }
0x3ad3   :  { %v7035_v24 = vmul.f32 0.03125, %v7033_v33 }
0x3ad5   :  { %v7037_v14 = vsub.f32 %v7027_v9, %v7035_v24  ;;  %v17924_v9 = vld [vmem:[#allocation16 + $0x8] sm:$0xff] }
0x3ad6   :  { %v7042_v26 = vpop.xlane.xlu1 %7041  ;;  %15328 = vmatpush3.msra.mxu0 %v17924_v9 }
0x3ad7   :  { %v7046_v29 = vmul.f32 0.03125, %v7042_v26  ;;  %v7039_v31 = vmul.f32 %v7037_v14, %v7037_v14  ;;  %15337 = vmatprep.subr.mxu0 %v16743_v12 }
0x3ad8   :  { %7183 = vrot.lane.b32.xlu0 %v17853_v59, %s16749_s26 }
0x3ad9   :  { %v7048_v1 = vadd.f32 1e-05, %v7046_v29  ;;  %v7043_v30 = vsel %vm399_vm0, %v7039_v31, 0.0 }
0x3ada   :  { %7044 = vadd.xlane.f32.xlu1 %v7043_v30 }
0x3adb   :  { %16141 = vrsqrt.f32 %v7048_v1 }
0x3ae5   :  { %v16142_v34 = vpop.eup %16141 }
0x3ae6   :  { %v7052_v36 = vmul.f32 %v16142_v34, %v7036_v6 }
0x3ae8   :  { %v7060_v23 = vmul.f32 %v14271_v58, %v7052_v36 }
0x3aea   :  { %v17888_v40 = vadd.f32 %v14272_v38, %v7060_v23 }
0x3aeb   :  { %16010 = vrot.lane.b32.xlu1 %v16009_v22, %s16749_s26 }
0x3aec   :  { %15304 = vmatprep.mubr.msk.f32.mxu1 %vm399_vm0, %v17888_v40 }
0x3b0f   :  { %7509 = vmax.xlane.f32.xlu1 %v7508_v43 }
0x3b4f   :  { %v7347_v16 = vpop.xlane.xlu0 %7346 }
0x3b50   :  { %v7348_v32 = vsub.f32 %v7344_v48, %v7347_v16  ;;  %v17928_v48 = vld [vmem:[#allocation16] sm:$0xff] }
0x3b52   :  { %v7349_v41 = vmul.f32 1.442695, %v7348_v32 }
0x3b53   :  { %v17908_v0 = vpop.permute.xlu0 %7183 }
0x3b54   :  { %16143 = vpow2.f32 %v7349_v41 }
0x3b5e   :  { %v16144_v3 = vpop.eup %16143 }
0x3b5f   :  { %v7351_v44 = vsel %vm484_vm2, %v16144_v3, 0.0 }
0x3b60   :  { %7352 = vadd.xlane.f32.xlu1 %v7351_v44 }
0x3b67   :  { %v7045_v27 = vpop.xlane.xlu1 %7044 }
0x3b68   :  { %v7047_v25 = vmul.f32 0.03125, %v7045_v27 }
0x3b6a   :  { %v7049_v22 = vadd.f32 1e-05, %v7047_v25 }
0x3b6b   :  { %v16011_v45 = vpop.permute.xlu1 %16010 }
0x3b6c   :  { %16145 = vrsqrt.f32 %v7049_v22  ;;  %v16013_v46 = vunpack.i.h.bf16 %v16011_v45  ;;  %v16012_v35 = vunpack.i.l.bf16 %v16011_v45 }
0x3b6e   :  { %v15851_v47 = vpack.c.bf16 %v16013_v46, %v16012_v35  ;;  %v17978_v35 = vadd.f32 %v17855_v60, %v17853_v59  ;;  %v17988_v59 = vld [vmem:[#allocation16 + $0x18] sm:$0xff] }
0x3b70   :  { %15852 = vmatprep.subr.bf16.mxu1 %v15851_v47 }
0x3b71   :  { %15854 = vmatpush3.bf16.msra.mxu1 %v15851_v47 }
0x3b72   :  { %15856 = vmatprep.subr.bf16.mxu1 %v15855_v49 }
0x3b75   :  { %15858 = vmatpush3.bf16.msra.mxu1 %v15855_v49 }
0x3b76   :  { %v16146_v51 = vpop.eup %16145  ;;  %15312 = vmatprep.subr.mxu1 %v16743_v12 }
0x3b77   :  { %v7053_v52 = vmul.f32 %v16146_v51, %v7037_v14 }
0x3b79   :  { %v7061_v8 = vmul.f32 %v14271_v58, %v7053_v52 }
0x3b7b   :  { %v17899_v50 = vadd.f32 %v14272_v38, %v7061_v8 }
0x3b7d   :  { %15305 = vmatmul.mubr.msk.f32.vlgmr.msra.gmra.mrb[78].mxu1 %vm399_vm0, %v17899_v50 }
0x3b7e   :  { %15314 = vmatprep.mubr.msk.f32.mxu1 %vm16744_vm1, %v16743_v12 }
0x3b9c   :  { %v7510_v57 = vpop.xlane.xlu1 %7509 }
0x3b9d   :  { %v7511_v61 = vsub.f32 %v7507_v42, %v7510_v57 }
0x3b9f   :  { %v7512_v62 = vmul.f32 1.442695, %v7511_v61 }
0x3ba1   :  { %16147 = vpow2.f32 %v7512_v62 }
0x3bab   :  { %v16148_v53 = vpop.eup %16147 }
0x3bac   :  { %v7514_v15 = vsel %vm484_vm2, %v16148_v53, 0.0 }
0x3bad   :  { %7515 = vadd.xlane.f32.xlu1 %v7514_v15 }
0x3bbe   :  { %7744 = vrot.lane.b32.xlu1 %v17858_v55, %s16750_s4 }
0x3bed   :  { %v7353_v63 = vpop.xlane.xlu1 %7352 }
0x3bee   :  { %16149 = vrcp.f32 %v7353_v63 }
0x3bf8   :  { %v16150_v2 = vpop.eup %16149 }
0x3bf9   :  { %v7355_v7 = vmul.f32 %v16150_v2, %v16144_v3 }
0x3c3a   :  { %v7516_v28 = vpop.xlane.xlu1 %7515 }
0x3c3b   :  { %16151 = vrcp.f32 %v7516_v28 }
0x3c3e   :  { %v7745_v19 = vpop.permute.xlu1 %7744 }
0x3c45   :  { %v16152_v10 = vpop.eup %16151 }
0x3c46   :  { %v7518_v13 = vmul.f32 %v16152_v10, %v16148_v53 }
0x3c50   :  { %v17910_v5 = vpop.f32.mrb[78].mxu1 }
0x3c51   :  { %v7258_v17 = vpop.f32.mrb[79].mxu1 }
0x3c52   :  { %v17913_v6 = vadd.f32 %v7258_v17, %v17908_v0 }
0x3c54   :  { %7520 = vrot.lane.b32.xlu0 %v17913_v6, %s16745_s22  ;;  %15313 = vmatpush3.msra.mxu1 %v17913_v6 }
0x3c55   :  { %15315 = vmatmul.mubr.msk.f32.vlgmr.msra.gmra.mrb[80].mxu1 %vm484_vm2, %v7355_v7  ;;  %15322 = vmatprep.subr.mxu1 %v16743_v12  ;;  %v18011_v7 = vadd.f32 %v17910_v5, %v17908_v0 }
0x3c56   :  { %15324 = vmatprep.mubr.msk.f32.mxu1 %vm16744_vm1, %v16743_v12 }
0x3c58   :  { %7742 = vrot.lane.b32.xlu0 %v17858_v55, %s16751_s6 }
0x3cc6   :  { %v7521_v39 = vpop.permute.xlu0 %7520 }
0x3cc7   :  { %15323 = vmatpush3.msra.mxu1 %v7521_v39 }
0x3cc8   :  { %15325 = vmatmul.mubr.msk.f32.vlgmr.msra.gmra.mrb[82].mxu1 %vm484_vm2, %v7518_v13  ;;  %15332 = vmatprep.subr.mxu1 %v16743_v12 }
0x3cc9   :  { %15333 = vmatpush3.msra.mxu1 %v17928_v48  ;;  %15334 = vmatprep.mubr.msk.f32.mxu1 %vm16744_vm1, %v16743_v12 }
0x3cca   :  { %15342 = vmatprep.subr.mxu1 %v16743_v12  ;;  %v7743_v24 = vpop.permute.xlu0 %7742 }
0x3d28   :  { %v7425_v11 = vpop.f32.mrb[80].mxu1 }
0x3d29   :  { %v15316_v4 = vpop.f32.mrb[81].mxu1  ;;  %15335 = vmatmul.mubr.msk.f32.vlgmr.msra.gmra.mrb[84].mxu1 %vm484_vm2, %v7425_v11 }
0x3d2a   :  { %15344 = vmatprep.mubr.msk.f32.mxu1 %vm16744_vm1, %v16743_v12 }
0x3d9b   :  { %v7592_v18 = vpop.f32.mrb[82].mxu1 }
0x3d9c   :  { %v15326_v33 = vpop.f32.mrb[83].mxu1  ;;  %15330 = vmatmul.mubr.msk.f32.vlgmr.msra.gmra.mrb[86].mxu0 %vm484_vm2, %v7592_v18 }
0x3d9d   :  { %15338 = vmatpush3.xpose.msk.msra.mxu0 %vm484_vm2, %v7745_v19  ;;  %15339 = vmatprep.mubr.msk.f32.mxu0 %vm16744_vm1, %v16743_v12 }
0x3d9e   :  { %15347 = vmatprep.subr.mxu0 %v16743_v12 }
0x3da0   :  { %15340 = vmatmul.mubr.msk.f32.vlgmr.msra.gmra.mrb[88].mxu0 %vm484_vm2, %v7743_v24 }
0x3da1   :  { %15349 = vmatprep.mubr.msk.f32.mxu0 %vm16744_vm1, %v16743_v12 }
0x3dfc   :  { %v7738_v14 = vpop.f32.mrb[84].mxu1 }
0x3dfd   :  { %v15336_v26 = vpop.f32.mrb[85].mxu1 }
0x3e6f   :  { %v7665_v29 = vpop.f32.mrb[86].mxu0 }
0x3e70   :  { %v17947_v31 = vadd.f32 %v7738_v14, %v7665_v29  ;;  %v15331_v1 = vpop.f32.mrb[87].mxu0 }
0x3e73   :  { %v7816_v30 = vpop.f32.mrb[88].mxu0 }
0x3e74   :  { %v7820_v34 = vmul.f32 0.35355338, %v7816_v30  ;;  %v15341_v58 = vpop.f32.mrb[89].mxu0 }
0x3e76   :  { %v7821_v36 = vsel %vm484_vm2, %v7820_v34, -inf }
0x3e77   :  { %7822 = vmax.xlane.f32.xlu0 %v7821_v36 }
0x3e8d   :  { %7832 = vrot.lane.b32.xlu0 %v17913_v6, %s16751_s6 }
0x3e91   :  { %7982 = vrot.lane.b32.xlu0 %v17858_v55, %s16753_s28 }
0x3f04   :  { %v7823_v38 = vpop.xlane.xlu0 %7822 }
0x3f05   :  { %v7824_v23 = vsub.f32 %v7820_v34, %v7823_v38 }
0x3f07   :  { %v7825_v42 = vmul.f32 1.442695, %v7824_v23 }
0x3f08   :  { %v7833_v43 = vpop.permute.xlu0 %7832 }
0x3f09   :  { %16153 = vpow2.f32 %v7825_v42  ;;  %15343 = vmatpush3.msra.mxu1 %v7833_v43 }
0x3f0a   :  { %15352 = vmatprep.subr.mxu1 %v16743_v12 }
0x3f0c   :  { %v7983_v27 = vpop.permute.xlu0 %7982 }
0x3f13   :  { %v16154_v37 = vpop.eup %16153 }
0x3f14   :  { %v7827_v16 = vsel %vm484_vm2, %v16154_v37, 0.0 }
0x3f15   :  { %7828 = vadd.xlane.f32.xlu1 %v7827_v16 }
0x3f26   :  { %7984 = vrot.lane.b32.xlu1 %v17858_v55, %s16752_s19  ;;  %v17966_v55 = vld [vmem:[#allocation16 + $0x10] sm:$0xff] }
0x3f27   :  { %15348 = vmatpush3.msra.mxu0 %v17966_v55 }
0x3f28   :  { %15357 = vmatprep.subr.mxu0 %v16743_v12 }
0x3fa2   :  { %v7829_v32 = vpop.xlane.xlu1 %7828 }
0x3fa3   :  { %16155 = vrcp.f32 %v7829_v32 }
0x3fa6   :  { %v7985_v44 = vpop.permute.xlu1 %7984 }
0x3fad   :  { %v16156_v41 = vpop.eup %16155 }
0x3fae   :  { %v7831_v3 = vmul.f32 %v16156_v41, %v16154_v37 }
0x3fb0   :  { %15345 = vmatmul.mubr.msk.f32.vlgmr.msra.gmra.mrb[86].mxu1 %vm484_vm2, %v7831_v3 }
0x3fb1   :  { %15353 = vmatpush3.xpose.msk.msra.mxu1 %vm484_vm2, %v7985_v44  ;;  %15354 = vmatprep.mubr.msk.f32.mxu1 %vm16744_vm1, %v16743_v12 }
0x3fb2   :  { %15362 = vmatprep.subr.mxu1 %v16743_v12 }
0x3fb4   :  { %15355 = vmatmul.mubr.msk.f32.vlgmr.msra.gmra.mrb[88].mxu1 %vm484_vm2, %v7983_v27 }
0x3fb5   :  { %15364 = vmatprep.mubr.msk.f32.mxu1 %vm16744_vm1, %v16743_v12  ;;  %15363 = vmatpush3.msra.mxu1 %v17988_v59 }
0x3fb6   :  { %15372 = vmatprep.subr.mxu1 %v16743_v12 }
0x4083   :  { %v7904_v25 = vpop.f32.mrb[86].mxu1 }
0x4084   :  { %v15346_v20 = vpop.f32.mrb[87].mxu1  ;;  %15350 = vmatmul.mubr.msk.f32.vlgmr.msra.gmra.mrb[90].mxu0 %vm484_vm2, %v7904_v25 }
0x4085   :  { %15359 = vmatprep.mubr.msk.f32.mxu0 %vm16744_vm1, %v16743_v12 }
0x4087   :  { %v8056_v21 = vpop.f32.mrb[88].mxu1 }
0x4088   :  { %v8060_v22 = vmul.f32 0.35355338, %v8056_v21  ;;  %v15356_v45 = vpop.f32.mrb[89].mxu1 }
0x408a   :  { %v8061_v46 = vsel %vm484_vm2, %v8060_v22, -inf }
0x408b   :  { %8062 = vmax.xlane.f32.xlu0 %v8061_v46 }
0x40a1   :  { %8072 = vrot.lane.b32.xlu0 %v17913_v6, %s16753_s28 }
0x40a5   :  { %8393 = vrot.lane.b32.xlu0 %v17978_v35, %s16747_s3 }
0x40a9   :  { %8391 = vrot.lane.b32.xlu0 %v17978_v35, %s16745_s22 }
0x4118   :  { %v8063_v47 = vpop.xlane.xlu0 %8062 }
0x4119   :  { %v8064_v49 = vsub.f32 %v8060_v22, %v8063_v47 }
0x411b   :  { %v8065_v51 = vmul.f32 1.442695, %v8064_v49 }
0x411c   :  { %v8073_v52 = vpop.permute.xlu0 %8072 }
0x411d   :  { %16157 = vpow2.f32 %v8065_v51  ;;  %15358 = vmatpush3.msra.mxu0 %v8073_v52 }
0x411e   :  { %15367 = vmatprep.subr.mxu0 %v16743_v12 }
0x4120   :  { %v8394_v17 = vpop.permute.xlu0 %8393 }
0x4124   :  { %v8392_v6 = vpop.permute.xlu0 %8391 }
0x4127   :  { %v16158_v8 = vpop.eup %16157 }
0x4128   :  { %v8067_v57 = vsel %vm484_vm2, %v16158_v8, 0.0 }
0x4129   :  { %8068 = vadd.xlane.f32.xlu1 %v8067_v57 }
0x413a   :  { %8230 = vrot.lane.b32.xlu1 %v17978_v35, %s16746_s23 }
0x4157   :  { %v7977_v60 = vpop.f32.mrb[90].mxu0 }
0x4158   :  { %v7981_v61 = vadd.f32 %v7977_v60, %v17947_v31  ;;  %v15351_v62 = vpop.f32.mrb[91].mxu0 }
0x41b6   :  { %v8069_v53 = vpop.xlane.xlu1 %8068 }
0x41b7   :  { %16159 = vrcp.f32 %v8069_v53 }
0x41ba   :  { %v8231_v2 = vpop.permute.xlu1 %8230 }
0x41c1   :  { %v16160_v15 = vpop.eup %16159 }
0x41c2   :  { %v8071_v63 = vmul.f32 %v16160_v15, %v16158_v8 }
0x41c4   :  { %15360 = vmatmul.mubr.msk.f32.vlgmr.msra.gmra.mrb[92].mxu0 %vm484_vm2, %v8071_v63 }
0x41c5   :  { %15368 = vmatpush3.xpose.msk.msra.mxu0 %vm484_vm2, %v8231_v2  ;;  %15369 = vmatprep.mubr.msk.f32.mxu0 %vm16744_vm1, %v16743_v12 }
0x41c6   :  { %15377 = vmatprep.subr.mxu0 %v16743_v12 }
0x41c8   :  { %15370 = vmatmul.mubr.msk.f32.vlgmr.msra.gmra.mrb[94].mxu0 %vm484_vm2, %v17978_v35 }
0x41c9   :  { %15378 = vmatpush3.xpose.msk.msra.mxu0 %vm484_vm2, %v8394_v17  ;;  %15379 = vmatprep.mubr.msk.f32.mxu0 %vm16744_vm1, %v16743_v12 }
0x41ca   :  { %15387 = vmatprep.subr.mxu0 %v16743_v12 }
0x41cc   :  { %15380 = vmatmul.mubr.msk.f32.vlgmr.msra.gmra.mrb[96].mxu0 %vm484_vm2, %v8392_v6 }
0x41cd   :  { %15388 = vmatpush3.msra.mxu0 %v17924_v9  ;;  %15389 = vmatprep.mubr.msk.f32.mxu0 %vm16744_vm1, %v16743_v12 }
0x41ce   :  { %15397 = vmatprep.subr.mxu0 %v16743_v12 }
0x4297   :  { %v8144_v28 = vpop.f32.mrb[92].mxu0 }
0x4298   :  { %v15361_v10 = vpop.f32.mrb[93].mxu0  ;;  %15365 = vmatmul.mubr.msk.f32.vlgmr.msra.gmra.mrb[90].mxu1 %vm484_vm2, %v8144_v28 }
0x4299   :  { %15373 = vmatpush3.msra.mxu1 %v18011_v7  ;;  %15374 = vmatprep.mubr.msk.f32.mxu1 %vm16744_vm1, %v16743_v12 }
0x429a   :  { %15382 = vmatprep.subr.mxu1 %v16743_v12 }
0x429b   :  { %v8302_v9 = vpop.f32.mrb[94].mxu0 }
0x429c   :  { %v8306_v39 = vmul.f32 0.35355338, %v8302_v9  ;;  %v15371_v13 = vpop.f32.mrb[95].mxu0 }
0x429e   :  { %v8307_v11 = vsel %vm484_vm2, %v8306_v39, -inf }
0x429f   :  { %8308 = vmax.xlane.f32.xlu0 %v8307_v11  ;;  %v8465_v4 = vpop.f32.mrb[96].mxu0 }
0x42a0   :  { %v8469_v0 = vmul.f32 0.35355338, %v8465_v4  ;;  %v15381_v5 = vpop.f32.mrb[97].mxu0 }
0x42a1   :  { %v14294_v5 = vld [vmem:[#allocation17] ss:$0 sm:$0xff] }
0x42a2   :  { %v8470_v18 = vsel %vm484_vm2, %v8469_v0, -inf }
0x42a3   :  { %8471 = vmax.xlane.f32.xlu1 %v8470_v18 }
0x42b4   :  { %8482 = vrot.lane.b32.xlu1 %v18011_v7, %s16745_s22 }
0x42b8   :  { %8704 = vrot.lane.b32.xlu1 %v17978_v35, %s16751_s6 }
0x432c   :  { %v8309_v19 = vpop.xlane.xlu0 %8308 }
0x432d   :  { %v8310_v33 = vsub.f32 %v8306_v39, %v8309_v19 }
0x432f   :  { %v8311_v24 = vmul.f32 1.442695, %v8310_v33 }
0x4330   :  { %v8472_v14 = vpop.xlane.xlu1 %8471 }
0x4331   :  { %16161 = vpow2.f32 %v8311_v24  ;;  %v8473_v26 = vsub.f32 %v8469_v0, %v8472_v14 }
0x4333   :  { %v8474_v29 = vmul.f32 1.442695, %v8473_v26 }
0x4334   :  { %v8483_v16 = vpop.permute.xlu1 %8482 }
0x4335   :  { %16163 = vpow2.f32 %v8474_v29 }
0x433b   :  { %v16162_v31 = vpop.eup %16161 }
0x433c   :  { %v8313_v1 = vsel %vm484_vm2, %v16162_v31, 0.0 }
0x433d   :  { %8314 = vadd.xlane.f32.xlu0 %v8313_v1 }
0x433f   :  { %v16164_v30 = vpop.eup %16163 }
0x4340   :  { %v8476_v34 = vsel %vm484_vm2, %v16164_v30, 0.0 }
0x4341   :  { %8477 = vadd.xlane.f32.xlu0 %v8476_v34 }
0x4357   :  { %8706 = vrot.lane.b32.xlu0 %v17978_v35, %s16750_s4 }
0x436b   :  { %v8217_v58 = vpop.f32.mrb[90].mxu1 }
0x436c   :  { %v18028_v36 = vadd.f32 %v8217_v58, %v7981_v61  ;;  %v15366_v38 = vpop.f32.mrb[91].mxu1 }
0x436e   :  { %v8228_v18 = vadd.f32 %v14294_v5, %v18028_v36 }
0x4370   :  { %v9187_v24 = vadd.f32 %v8228_v18, %v17888_v40  ;;  %v9332_v18 = vld [vmem:[%s18644_s16 + $0x38] sm:$0xff] }
0x4372   :  { %v9189_v14 = vsel %vm399_vm0, %v9187_v24, 0.0 }
0x43ca   :  { %v8315_v23 = vpop.xlane.xlu0 %8314 }
0x43cb   :  { %16165 = vrcp.f32 %v8315_v23 }
0x43ce   :  { %v8478_v42 = vpop.xlane.xlu0 %8477 }
0x43cf   :  { %16167 = vrcp.f32 %v8478_v42 }
0x43d2   :  { %v8707_v25 = vpop.permute.xlu0 %8706 }
0x43d5   :  { %v16166_v43 = vpop.eup %16165 }
0x43d6   :  { %v8317_v37 = vmul.f32 %v16166_v43, %v16162_v31 }
0x43d8   :  { %15375 = vmatmul.mubr.msk.f32.vlgmr.msra.gmra.mrb[92].mxu1 %vm484_vm2, %v8317_v37 }
0x43d9   :  { %v16168_v32 = vpop.eup %16167  ;;  %15383 = vmatpush3.msra.mxu1 %v8483_v16  ;;  %15384 = vmatprep.mubr.msk.f32.mxu1 %vm16744_vm1, %v16743_v12 }
0x43da   :  { %v8480_v41 = vmul.f32 %v16168_v32, %v16164_v30  ;;  %15392 = vmatprep.subr.mxu1 %v16743_v12 }
0x43dc   :  { %15385 = vmatmul.mubr.msk.f32.vlgmr.msra.gmra.mrb[94].mxu1 %vm484_vm2, %v8480_v41 }
0x43dd   :  { %15393 = vmatpush3.msra.mxu1 %v17928_v48  ;;  %15394 = vmatprep.mubr.msk.f32.mxu1 %vm16744_vm1, %v16743_v12  ;;  %v8705_v48 = vpop.permute.xlu1 %8704 }
0x43de   :  { %15402 = vmatprep.subr.mxu1 %v16743_v12 }
0x44ab   :  { %v8387_v3 = vpop.f32.mrb[92].mxu1 }
0x44ac   :  { %v15376_v44 = vpop.f32.mrb[93].mxu1  ;;  %15395 = vmatmul.mubr.msk.f32.vlgmr.msra.gmra.mrb[96].mxu1 %vm484_vm2, %v8387_v3 }
0x44ad   :  { %15404 = vmatprep.mubr.msk.f32.mxu1 %vm16744_vm1, %v16743_v12 }
0x44af   :  { %v8554_v27 = vpop.f32.mrb[94].mxu1 }
0x44b0   :  { %v15386_v20 = vpop.f32.mrb[95].mxu1  ;;  %15390 = vmatmul.mubr.msk.f32.vlgmr.msra.gmra.mrb[98].mxu0 %vm484_vm2, %v8554_v27 }
0x44b1   :  { %15398 = vmatpush3.xpose.msk.msra.mxu0 %vm484_vm2, %v8707_v25  ;;  %15399 = vmatprep.mubr.msk.f32.mxu0 %vm16744_vm1, %v16743_v12 }
0x44b2   :  { %15407 = vmatprep.subr.mxu0 %v16743_v12 }
0x44b4   :  { %15400 = vmatmul.mubr.msk.f32.vlgmr.msra.gmra.mrb[100].mxu0 %vm484_vm2, %v8705_v48 }
0x44b5   :  { %15408 = vmatpush3.msra.mxu0 %v17966_v55  ;;  %15409 = vmatprep.mubr.msk.f32.mxu0 %vm16744_vm1, %v16743_v12 }
0x44b6   :  { %15417 = vmatprep.subr.mxu0 %v16743_v12 }
0x457f   :  { %v8700_v21 = vpop.f32.mrb[96].mxu1 }
0x4580   :  { %v15396_v22 = vpop.f32.mrb[97].mxu1 }
0x4583   :  { %v8627_v45 = vpop.f32.mrb[98].mxu0 }
0x4584   :  { %v8701_v46 = vadd.f32 %v8700_v21, %v8627_v45  ;;  %v15391_v47 = vpop.f32.mrb[99].mxu0 }
0x4587   :  { %v8778_v49 = vpop.f32.mrb[100].mxu0 }
0x4588   :  { %v8782_v51 = vmul.f32 0.35355338, %v8778_v49  ;;  %v15401_v52 = vpop.f32.mrb[101].mxu0  ;;  %v14312_v49 = vld [vmem:[#allocation20] ss:$0 sm:$0xff] }
0x458a   :  { %v8783_v8 = vsel %vm484_vm2, %v8782_v51, -inf }
0x458b   :  { %8784 = vmax.xlane.f32.xlu1 %v8783_v8  ;;  %v9231_v8 = vld [vmem:[#allocation22] sm:$0xff] }
0x459c   :  { %8946 = vrot.lane.b32.xlu1 %v17978_v35, %s16752_s19 }
0x45a0   :  { %8944 = vrot.lane.b32.xlu1 %v17978_v35, %s16753_s28 }
0x4618   :  { %v8785_v55 = vpop.xlane.xlu1 %8784 }
0x4619   :  { %v8786_v57 = vsub.f32 %v8782_v51, %v8785_v55  ;;  %v9232_v55 = vld [vmem:[#allocation22 + $0x8] sm:$0xff] }
0x461b   :  { %v8787_v60 = vmul.f32 1.442695, %v8786_v57  ;;  %v15859_v57 = vpack.c.bf16 %v9232_v55, %v9231_v8 }
0x461c   :  { %v8947_v2 = vpop.permute.xlu1 %8946 }
0x461d   :  { %16169 = vpow2.f32 %v8787_v60  ;;  %v9233_v60 = vld [vmem:[#allocation22 + $0x10] sm:$0xff] }
0x4620   :  { %v8945_v17 = vpop.permute.xlu1 %8944 }
0x4627   :  { %v16170_v61 = vpop.eup %16169 }
0x4628   :  { %v8789_v62 = vsel %vm484_vm2, %v16170_v61, 0.0 }
0x4629   :  { %8790 = vadd.xlane.f32.xlu0 %v8789_v62 }
0x463f   :  { %8794 = vrot.lane.b32.xlu0 %v18011_v7, %s16751_s6 }
0x46b6   :  { %v8791_v53 = vpop.xlane.xlu0 %8790 }
0x46b7   :  { %16171 = vrcp.f32 %v8791_v53  ;;  %v9325_v53 = vld [vmem:[%s18644_s16] sm:$0xff] }
0x46ba   :  { %v8795_v15 = vpop.permute.xlu0 %8794 }
0x46bb   :  { %15403 = vmatpush3.msra.mxu1 %v8795_v15  ;;  %v9326_v15 = vld [vmem:[%s18644_s16 + $0x8] sm:$0xff] }
0x46bc   :  { %15412 = vmatprep.subr.mxu1 %v16743_v12 }
0x46c1   :  { %v16172_v63 = vpop.eup %16171 }
0x46c2   :  { %v8793_v35 = vmul.f32 %v16172_v63, %v16170_v61  ;;  %v9234_v61 = vld [vmem:[#allocation22 + $0x18] sm:$0xff] }
0x46c3   :  { %v15863_v62 = vpack.c.bf16 %v9234_v61, %v9233_v60  ;;  %v9327_v63 = vld [vmem:[%s18644_s16 + $0x10] sm:$0xff]  ;;  %v14319_v60 = vld [vmem:[#allocation26] ss:$0 sm:$0xff] }
0x46c4   :  { %15405 = vmatmul.mubr.msk.f32.vlgmr.msra.gmra.mrb[98].mxu1 %vm484_vm2, %v8793_v35  ;;  %v9328_v35 = vld [vmem:[%s18644_s16 + $0x18] sm:$0xff] }
0x46c5   :  { %15413 = vmatpush3.xpose.msk.msra.mxu1 %vm484_vm2, %v8947_v2  ;;  %15414 = vmatprep.mubr.msk.f32.mxu1 %vm16744_vm1, %v16743_v12  ;;  %v15867_v2 = vpack.c.bf16 %v9326_v15, %v9325_v53 }
0x46c6   :  { %15422 = vmatprep.subr.mxu1 %v16743_v12 }
0x46c8   :  { %15415 = vmatmul.mubr.msk.f32.vlgmr.msra.gmra.mrb[100].mxu1 %vm484_vm2, %v8945_v17  ;;  %v15871_v17 = vpack.c.bf16 %v9328_v35, %v9327_v63 }
0x46c9   :  { %15423 = vmatpush3.msra.mxu1 %v17988_v59  ;;  %15424 = vmatprep.mubr.msk.f32.mxu1 %vm16744_vm1, %v16743_v12 }
0x46ca   :  { %15868 = vmatprep.subr.bf16.mxu1 %v15867_v2 }
0x4797   :  { %v8866_v6 = vpop.f32.mrb[98].mxu1 }
0x4798   :  { %v15406_v28 = vpop.f32.mrb[99].mxu1  ;;  %15410 = vmatmul.mubr.msk.f32.vlgmr.msra.gmra.mrb[102].mxu0 %vm484_vm2, %v8866_v6  ;;  %v9329_v6 = vld [vmem:[%s18644_s16 + $0x20] sm:$0xff] }
0x4799   :  { %15419 = vmatprep.mubr.msk.f32.mxu0 %vm16744_vm1, %v16743_v12  ;;  %v9330_v28 = vld [vmem:[%s18644_s16 + $0x28] sm:$0xff] }
0x479b   :  { %v9018_v10 = vpop.f32.mrb[100].mxu1 }
0x479c   :  { %v9022_v9 = vmul.f32 0.35355338, %v9018_v10  ;;  %v15416_v39 = vpop.f32.mrb[101].mxu1  ;;  %v15875_v10 = vpack.c.bf16 %v9330_v28, %v9329_v6  ;;  %v14329_v6 = vld [vmem:[#allocation7 + $0x1] ss:$0 sm:$0xff] }
0x479e   :  { %v9023_v13 = vsel %vm484_vm2, %v9022_v9, -inf }
0x479f   :  { %9024 = vmax.xlane.f32.xlu0 %v9023_v13 }
0x47b5   :  { %9034 = vrot.lane.b32.xlu0 %v18011_v7, %s16753_s28 }
0x482c   :  { %v9025_v59 = vpop.xlane.xlu0 %9024 }
0x482d   :  { %v9026_v11 = vsub.f32 %v9022_v9, %v9025_v59 }
0x482f   :  { %v9027_v4 = vmul.f32 1.442695, %v9026_v11 }
0x4830   :  { %v9035_v0 = vpop.permute.xlu0 %9034 }
0x4831   :  { %16173 = vpow2.f32 %v9027_v4  ;;  %15418 = vmatpush3.msra.mxu0 %v9035_v0 }
0x4832   :  { %15860 = vmatprep.subr.bf16.mxu0 %v15859_v57 }
0x483b   :  { %v16174_v19 = vpop.eup %16173 }
0x483c   :  { %v9029_v33 = vsel %vm484_vm2, %v16174_v19, 0.0 }
0x483d   :  { %9030 = vadd.xlane.f32.xlu1 %v9029_v33  ;;  %v14313_v33 = vld [vmem:[#allocation23] ss:$0 sm:$0xff] }
0x4841   :  { %9190 = vadd.xlane.f32.xlu1 %v9189_v14 }
0x486b   :  { %v8939_v26 = vpop.f32.mrb[102].mxu0 }
0x486c   :  { %v8943_v7 = vadd.f32 %v8939_v26, %v8701_v46  ;;  %v15411_v29 = vpop.f32.mrb[103].mxu0 }
0x48ca   :  { %v9031_v31 = vpop.xlane.xlu1 %9030 }
0x48cb   :  { %16175 = vrcp.f32 %v9031_v31 }
0x48ce   :  { %v9191_v36 = vpop.xlane.xlu1 %9190 }
0x48cf   :  { %v9195_v38 = vmul.f32 0.03125, %v9191_v36 }
0x48d1   :  { %v9197_v43 = vsub.f32 %v9187_v24, %v9195_v38 }
0x48d3   :  { %v9199_v41 = vmul.f32 %v9197_v43, %v9197_v43 }
0x48d5   :  { %v16176_v1 = vpop.eup %16175  ;;  %v9201_v3 = vsel %vm399_vm0, %v9199_v41, 0.0 }
0x48d6   :  { %v9033_v30 = vmul.f32 %v16176_v1, %v16174_v19  ;;  %v14316_v1 = vld [vmem:[#allocation25] ss:$0 sm:$0xff] }
0x48d8   :  { %15420 = vmatmul.mubr.msk.f32.vlgmr.msra.gmra.mrb[104].mxu0 %vm484_vm2, %v9033_v30 }
0x48d9   :  { %15862 = vmatpush3.bf16.msra.mxu0 %v15859_v57 }
0x48da   :  { %15864 = vmatprep.subr.bf16.mxu0 %v15863_v62 }
0x48dd   :  { %15866 = vmatpush3.bf16.msra.mxu0 %v15863_v62  ;;  %v14320_v62 = vld [vmem:[#allocation28] ss:$0 sm:$0xff] }
0x49ab   :  { %v9106_v34 = vpop.f32.mrb[104].mxu0 }
0x49ac   :  { %v15421_v58 = vpop.f32.mrb[105].mxu0  ;;  %15425 = vmatmul.mubr.msk.f32.vlgmr.msra.gmra.mrb[102].mxu1 %vm484_vm2, %v9106_v34 }
0x49ad   :  { %15870 = vmatpush3.bf16.msra.mxu1 %v15867_v2 }
0x49ae   :  { %15872 = vmatprep.subr.bf16.mxu1 %v15871_v17 }
0x49b1   :  { %15874 = vmatpush3.bf16.msra.mxu1 %v15871_v17 }
0x49b2   :  { %15876 = vmatprep.subr.bf16.mxu1 %v15875_v10 }
0x49b5   :  { %15878 = vmatpush3.bf16.msra.mxu1 %v15875_v10 }
0x4a7f   :  { %v9179_v40 = vpop.f32.mrb[102].mxu1 }
0x4a80   :  { %v9183_v23 = vadd.f32 %v9179_v40, %v8943_v7  ;;  %v15426_v42 = vpop.f32.mrb[103].mxu1 }
0x4a82   :  { %v9184_v37 = vadd.f32 %v14294_v5, %v9183_v23  ;;  %v9331_v5 = vld [vmem:[%s18644_s16 + $0x30] sm:$0xff] }
0x4a83   :  { %v15879_v19 = vpack.c.bf16 %v9332_v18, %v9331_v5 }
0x4a84   :  { %v9188_v16 = vadd.f32 %v9184_v37, %v17899_v50  ;;  %v14311_v50 = vld [vmem:[#allocation19] ss:$0 sm:$0xff] }
0x4a85   :  { %15880 = vmatprep.subr.bf16.mxu1 %v15879_v19 }
0x4a86   :  { %v9192_v32 = vsel %vm399_vm0, %v9188_v16, 0.0  ;;  %15882 = vmatpush3.bf16.msra.mxu1 %v15879_v19 }
0x4a87   :  { %9193 = vadd.xlane.f32.xlu1 %v9192_v32  ;;  %15473 = vmatprep.subr.mxu1 %v16743_v12 }
0x4a8b   :  { %9202 = vadd.xlane.f32.xlu1 %v9201_v3 }
0x4b14   :  { %v9194_v44 = vpop.xlane.xlu1 %9193 }
0x4b15   :  { %v9196_v27 = vmul.f32 0.03125, %v9194_v44 }
0x4b17   :  { %v9198_v25 = vsub.f32 %v9188_v16, %v9196_v27 }
0x4b18   :  { %v9203_v20 = vpop.xlane.xlu1 %9202 }
0x4b19   :  { %v9207_v48 = vmul.f32 0.03125, %v9203_v20  ;;  %v9200_v21 = vmul.f32 %v9198_v25, %v9198_v25 }
0x4b1b   :  { %v9209_v22 = vadd.f32 1e-05, %v9207_v48  ;;  %v9204_v45 = vsel %vm399_vm0, %v9200_v21, 0.0  ;;  %v14321_v48 = vld [vmem:[%s18641_s24 + $0x20] sm:$0xff]  ;;  %v14322_v21 = vld [vmem:[%s18641_s24 + $0x28] sm:$0xff] }
0x4b1c   :  { %9205 = vadd.xlane.f32.xlu1 %v9204_v45  ;;  %v15883_v45 = vpack.c.bf16 %v14322_v21, %v14321_v48 }
0x4b1d   :  { %16177 = vrsqrt.f32 %v9209_v22  ;;  %v14323_v22 = vld [vmem:[%s18641_s24 + $0x30] sm:$0xff] }
0x4b1e   :  { %15884 = vmatprep.subr.bf16.mxu0 %v15883_v45 }
0x4b27   :  { %v16178_v46 = vpop.eup %16177 }
0x4b28   :  { %v9213_v47 = vmul.f32 %v16178_v46, %v9197_v43  ;;  %v14324_v46 = vld [vmem:[%s18641_s24 + $0x38] sm:$0xff] }
0x4b2a   :  { %v9221_v51 = vmul.f32 %v14311_v50, %v9213_v47 }
0x4b2c   :  { %v9229_v52 = vadd.f32 %v14312_v49, %v9221_v51 }
0x4b2e   :  { %15435 = vmatprep.mubr.msk.f32.mxu0 %vm399_vm0, %v9229_v52 }
0x4ba9   :  { %v9206_v9 = vpop.xlane.xlu1 %9205 }
0x4baa   :  { %v9208_v39 = vmul.f32 0.03125, %v9206_v9 }
0x4bac   :  { %v9210_v13 = vadd.f32 1e-05, %v9208_v39 }
0x4bae   :  { %16179 = vrsqrt.f32 %v9210_v13 }
0x4bb8   :  { %v16180_v59 = vpop.eup %16179 }
0x4bb9   :  { %v9214_v11 = vmul.f32 %v16180_v59, %v9198_v25 }
0x4bbb   :  { %v9222_v4 = vmul.f32 %v14311_v50, %v9214_v11  ;;  %v15887_v50 = vpack.c.bf16 %v14324_v46, %v14323_v22 }
0x4bbd   :  { %v9230_v0 = vadd.f32 %v14312_v49, %v9222_v4 }
0x4bbf   :  { %15436 = vmatmul.mubr.msk.f32.vlgmr.msra.gmra.mrb[106].mxu0 %vm399_vm0, %v9230_v0 }
0x4bc0   :  { %15886 = vmatpush3.bf16.msra.mxu0 %v15883_v45 }
0x4bc1   :  { %15888 = vmatprep.subr.bf16.mxu0 %v15887_v50 }
0x4bc4   :  { %15890 = vmatpush3.bf16.msra.mxu0 %v15887_v50 }
0x4bc5   :  { %15468 = vmatprep.subr.mxu0 %v16743_v12 }
0x4c92   :  { %v15437_v24 = vpop.f32.mrb[106].mxu0 }
0x4c93   :  { %v9320_v14 = vadd.f32 %v15437_v24, %v14313_v33  ;;  %v9314_v26 = vpop.f32.mrb[107].mxu0 }
0x4c94   :  { %v9315_v7 = vadd.f32 %v14313_v33, %v9314_v26 }
0x4c95   :  { %v9324_v31 = vmax.f32 %v9320_v14, 0.0 }
0x4c96   :  { %v9323_v29 = vmax.f32 %v9315_v7, 0.0 }
0x4c98   :  { %15454 = vmatprep.mubr.msk.f32.mxu1 %vm2560_vm3, %v9323_v29 }
0x4c99   :  { %15455 = vmatmul.mubr.msk.f32.vlgmr.msra.gmra.mrb[104].mxu1 %vm2560_vm3, %v9324_v31 }
0x4c9a   :  { %15475 = vmatprep.mubr.msk.f32.mxu1 %vm16744_vm1, %v16743_v12 }
0x4d6c   :  { %v15456_v30 = vpop.f32.mrb[104].mxu1 }
0x4d6d   :  { %v9418_v34 = vadd.f32 %v15456_v30, %v14316_v1  ;;  %v9412_v58 = vpop.f32.mrb[105].mxu1 }
0x4d6e   :  { %v9413_v36 = vadd.f32 %v14316_v1, %v9412_v58 }
0x4d6f   :  { %v9424_v38 = vadd.f32 %v9418_v34, %v9230_v0 }
0x4d70   :  { %v9423_v40 = vadd.f32 %v9413_v36, %v9229_v52 }
0x4d71   :  { %v9428_v23 = vsel %vm399_vm0, %v9424_v38, 0.0 }
0x4d72   :  { %9429 = vadd.xlane.f32.xlu0 %v9428_v23  ;;  %v9425_v42 = vsel %vm399_vm0, %v9423_v40, 0.0 }
0x4d73   :  { %9426 = vadd.xlane.f32.xlu1 %v9425_v42 }
0x4dff   :  { %v9430_v43 = vpop.xlane.xlu0 %9429 }
0x4e00   :  { %v9432_v37 = vmul.f32 0.03125, %v9430_v43  ;;  %v9427_v16 = vpop.xlane.xlu1 %9426 }
0x4e01   :  { %v9431_v32 = vmul.f32 0.03125, %v9427_v16 }
0x4e02   :  { %v9434_v41 = vsub.f32 %v9424_v38, %v9432_v37 }
0x4e03   :  { %v9433_v3 = vsub.f32 %v9423_v40, %v9431_v32  ;;  %v18154_v40 = vld [vmem:[%s18643_s27 + $0x28] sm:$0xff] }
0x4e04   :  { %v9436_v25 = vmul.f32 %v9434_v41, %v9434_v41 }
0x4e05   :  { %v9435_v44 = vmul.f32 %v9433_v3, %v9433_v3 }
0x4e06   :  { %v9440_v20 = vsel %vm399_vm0, %v9436_v25, 0.0 }
0x4e07   :  { %v9437_v27 = vsel %vm399_vm0, %v9435_v44, 0.0  ;;  %v18167_v44 = vld [vmem:[%s18643_s27 + $0x20] sm:$0xff] }
0x4e08   :  { %9438 = vadd.xlane.f32.xlu1 %v9437_v27 }
0x4e0c   :  { %9441 = vadd.xlane.f32.xlu1 %v9440_v20 }
0x4e95   :  { %v9439_v47 = vpop.xlane.xlu1 %9438 }
0x4e96   :  { %v9443_v49 = vmul.f32 0.03125, %v9439_v47 }
0x4e98   :  { %v9445_v51 = vadd.f32 1e-05, %v9443_v49 }
0x4e99   :  { %v9442_v52 = vpop.xlane.xlu1 %9441 }
0x4e9a   :  { %16181 = vrsqrt.f32 %v9445_v51  ;;  %v9444_v8 = vmul.f32 0.03125, %v9442_v52 }
0x4e9c   :  { %v9446_v55 = vadd.f32 1e-05, %v9444_v8 }
0x4e9e   :  { %16183 = vrsqrt.f32 %v9446_v55 }
0x4ea4   :  { %v16182_v57 = vpop.eup %16181 }
0x4ea5   :  { %v9449_v61 = vmul.f32 %v16182_v57, %v9433_v3 }
0x4ea7   :  { %v9457_v53 = vmul.f32 %v14319_v60, %v9449_v61 }
0x4ea8   :  { %v16184_v15 = vpop.eup %16183 }
0x4ea9   :  { %v9450_v63 = vmul.f32 %v16184_v15, %v9434_v41  ;;  %v18110_v2 = vadd.f32 %v14320_v62, %v9457_v53 }
0x4eab   :  { %v9458_v35 = vmul.f32 %v14319_v60, %v9450_v63  ;;  %15465 = vmatprep.mubr.msk.f32.mxu0 %vm399_vm0, %v18110_v2 }
0x4ead   :  { %v18114_v17 = vadd.f32 %v14320_v62, %v9458_v35 }
0x4eaf   :  { %15466 = vmatmul.mubr.msk.f32.vlgmr.msra.gmra.mrb[108].mxu0 %vm399_vm0, %v18114_v17 }
0x4eb0   :  { %15470 = vmatprep.mubr.msk.f32.mxu0 %vm16744_vm1, %v16743_v12 }
0x4f82   :  { %v15467_v28 = vpop.f32.mrb[108].mxu0 }
0x4f83   :  { %v18120_v10 = vadd.f32 %v15467_v28, %v14329_v6  ;;  %v9559_v9 = vpop.f32.mrb[109].mxu0 }
0x4f84   :  { %v18122_v39 = vadd.f32 %v14329_v6, %v9559_v9 }
0x4f86   :  { %9733 = vrot.lane.b32.xlu0 %v18122_v39, %s16745_s22  ;;  %9569 = vrot.lane.b32.xlu1 %v18122_v39, %s16746_s23 }
0x4f8a   :  { %9735 = vrot.lane.b32.xlu1 %v18122_v39, %s16747_s3 }
0x4ff8   :  { %v9570_v13 = vpop.permute.xlu1 %9569  ;;  %v9734_v11 = vpop.permute.xlu0 %9733 }
0x4ff9   :  { %15469 = vmatpush3.xpose.msk.msra.mxu0 %vm484_vm2, %v9570_v13  ;;  %v18200_v13 = vld [vmem:[%s18643_s27 + $0x30] sm:$0xff] }
0x4ffa   :  { %15478 = vmatprep.subr.mxu0 %v16743_v12 }
0x4ffc   :  { %15471 = vmatmul.mubr.msk.f32.vlgmr.msra.gmra.mrb[110].mxu0 %vm484_vm2, %v18122_v39  ;;  %v9736_v59 = vpop.permute.xlu1 %9735 }
0x4ffd   :  { %15479 = vmatpush3.xpose.msk.msra.mxu0 %vm484_vm2, %v9736_v59  ;;  %15480 = vmatprep.mubr.msk.f32.mxu0 %vm16744_vm1, %v16743_v12 }
0x4ffe   :  { %15488 = vmatprep.subr.mxu0 %v16743_v12 }
0x5000   :  { %15481 = vmatmul.mubr.msk.f32.vlgmr.msra.gmra.mrb[112].mxu0 %vm484_vm2, %v9734_v11 }
0x5001   :  { %15490 = vmatprep.mubr.msk.f32.mxu0 %vm16744_vm1, %v16743_v12  ;;  %15489 = vmatpush3.msra.mxu0 %v18154_v40 }
0x5002   :  { %15498 = vmatprep.subr.mxu0 %v16743_v12 }
0x50cf   :  { %v9641_v4 = vpop.f32.mrb[110].mxu0 }
0x50d0   :  { %v9645_v0 = vmul.f32 0.35355338, %v9641_v4  ;;  %v15472_v5 = vpop.f32.mrb[111].mxu0 }
0x50d2   :  { %v9646_v18 = vsel %vm484_vm2, %v9645_v0, -inf }
0x50d3   :  { %9647 = vmax.xlane.f32.xlu1 %v9646_v18  ;;  %v9807_v19 = vpop.f32.mrb[112].mxu0 }
0x50d4   :  { %v9811_v33 = vmul.f32 0.35355338, %v9807_v19  ;;  %v15482_v24 = vpop.f32.mrb[113].mxu0 }
0x50d6   :  { %v9812_v14 = vsel %vm484_vm2, %v9811_v33, -inf }
0x50d7   :  { %9813 = vmax.xlane.f32.xlu0 %v9812_v14 }
0x50ed   :  { %9823 = vrot.lane.b32.xlu0 %v18122_v39, %s16748_s25 }
0x5160   :  { %v9648_v26 = vpop.xlane.xlu1 %9647 }
0x5161   :  { %v9649_v7 = vsub.f32 %v9645_v0, %v9648_v26 }
0x5163   :  { %v9650_v29 = vmul.f32 1.442695, %v9649_v7 }
0x5164   :  { %v9814_v31 = vpop.xlane.xlu0 %9813 }
0x5165   :  { %16185 = vpow2.f32 %v9650_v29  ;;  %v9815_v1 = vsub.f32 %v9811_v33, %v9814_v31 }
0x5167   :  { %v9816_v30 = vmul.f32 1.442695, %v9815_v1 }
0x5168   :  { %v9824_v32 = vpop.permute.xlu0 %9823 }
0x5169   :  { %16187 = vpow2.f32 %v9816_v30 }
0x516f   :  { %v16186_v34 = vpop.eup %16185 }
0x5170   :  { %v9652_v58 = vsel %vm484_vm2, %v16186_v34, 0.0 }
0x5171   :  { %9653 = vadd.xlane.f32.xlu1 %v9652_v58 }
0x5173   :  { %v16188_v36 = vpop.eup %16187 }
0x5174   :  { %v9818_v38 = vsel %vm484_vm2, %v16188_v36, 0.0 }
0x5175   :  { %9819 = vadd.xlane.f32.xlu1 %v9818_v38 }
0x5186   :  { %9657 = vrot.lane.b32.xlu1 %v18122_v39, %s16749_s26 }
0x518a   :  { %10047 = vrot.lane.b32.xlu1 %v18122_v39, %s16750_s4 }
0x518e   :  { %10045 = vrot.lane.b32.xlu1 %v18122_v39, %s16751_s6 }
0x51fe   :  { %v9654_v23 = vpop.xlane.xlu1 %9653 }
0x51ff   :  { %16189 = vrcp.f32 %v9654_v23  ;;  %v18237_v23 = vld [vmem:[%s18643_s27 + $0x38] sm:$0xff] }
0x5202   :  { %v9820_v42 = vpop.xlane.xlu1 %9819 }
0x5203   :  { %16191 = vrcp.f32 %v9820_v42 }
0x5206   :  { %v9658_v43 = vpop.permute.xlu1 %9657 }
0x5207   :  { %15474 = vmatpush3.msra.mxu1 %v9658_v43 }
0x5208   :  { %15483 = vmatprep.subr.mxu1 %v16743_v12 }
0x5209   :  { %v16190_v37 = vpop.eup %16189 }
0x520a   :  { %v9656_v16 = vmul.f32 %v16190_v37, %v16186_v34  ;;  %v10048_v20 = vpop.permute.xlu1 %10047 }
0x520c   :  { %15476 = vmatmul.mubr.msk.f32.vlgmr.msra.gmra.mrb[106].mxu1 %vm484_vm2, %v9656_v16 }
0x520d   :  { %v16192_v41 = vpop.eup %16191  ;;  %15484 = vmatpush3.msra.mxu1 %v9824_v32  ;;  %15485 = vmatprep.mubr.msk.f32.mxu1 %vm16744_vm1, %v16743_v12 }
0x520e   :  { %v9822_v3 = vmul.f32 %v16192_v41, %v16188_v36  ;;  %15493 = vmatprep.subr.mxu1 %v16743_v12  ;;  %v10046_v22 = vpop.permute.xlu1 %10045 }
0x5210   :  { %15486 = vmatmul.mubr.msk.f32.vlgmr.msra.gmra.mrb[108].mxu1 %vm484_vm2, %v9822_v3 }
0x5211   :  { %15495 = vmatprep.mubr.msk.f32.mxu1 %vm16744_vm1, %v16743_v12  ;;  %15494 = vmatpush3.msra.mxu1 %v18167_v44 }
0x5212   :  { %15503 = vmatprep.subr.mxu1 %v16743_v12 }
0x52df   :  { %v9729_v27 = vpop.f32.mrb[106].mxu1 }
0x52e0   :  { %v15477_v25 = vpop.f32.mrb[107].mxu1  ;;  %15496 = vmatmul.mubr.msk.f32.vlgmr.msra.gmra.mrb[110].mxu1 %vm484_vm2, %v9729_v27 }
0x52e1   :  { %15505 = vmatprep.mubr.msk.f32.mxu1 %vm16744_vm1, %v16743_v12 }
0x52e3   :  { %v9895_v48 = vpop.f32.mrb[108].mxu1 }
0x52e4   :  { %v15487_v21 = vpop.f32.mrb[109].mxu1  ;;  %15491 = vmatmul.mubr.msk.f32.vlgmr.msra.gmra.mrb[114].mxu0 %vm484_vm2, %v9895_v48 }
0x52e5   :  { %15499 = vmatpush3.xpose.msk.msra.mxu0 %vm484_vm2, %v10048_v20  ;;  %15500 = vmatprep.mubr.msk.f32.mxu0 %vm16744_vm1, %v16743_v12 }
0x52e6   :  { %15508 = vmatprep.subr.mxu0 %v16743_v12 }
0x52e8   :  { %15501 = vmatmul.mubr.msk.f32.vlgmr.msra.gmra.mrb[116].mxu0 %vm484_vm2, %v10046_v22 }
0x52e9   :  { %15510 = vmatprep.mubr.msk.f32.mxu0 %vm16744_vm1, %v16743_v12  ;;  %15509 = vmatpush3.msra.mxu0 %v18200_v13 }
0x52ea   :  { %15518 = vmatprep.subr.mxu0 %v16743_v12 }
0x53b3   :  { %v10041_v45 = vpop.f32.mrb[110].mxu1 }
0x53b4   :  { %v15497_v46 = vpop.f32.mrb[111].mxu1 }
0x53b7   :  { %v9968_v50 = vpop.f32.mrb[114].mxu0 }
0x53b8   :  { %v10042_v47 = vadd.f32 %v10041_v45, %v9968_v50  ;;  %v15492_v49 = vpop.f32.mrb[115].mxu0 }
0x53bb   :  { %v10119_v51 = vpop.f32.mrb[116].mxu0 }
0x53bc   :  { %v10123_v52 = vmul.f32 0.35355338, %v10119_v51  ;;  %v15502_v8 = vpop.f32.mrb[117].mxu0 }
0x53be   :  { %v10124_v55 = vsel %vm484_vm2, %v10123_v52, -inf }
0x53bf   :  { %10125 = vmax.xlane.f32.xlu1 %v10124_v55 }
0x53d0   :  { %10287 = vrot.lane.b32.xlu1 %v18122_v39, %s16752_s19 }
0x53d4   :  { %10285 = vrot.lane.b32.xlu1 %v18122_v39, %s16753_s28 }
0x544c   :  { %v10126_v57 = vpop.xlane.xlu1 %10125 }
0x544d   :  { %v10127_v60 = vsub.f32 %v10123_v52, %v10126_v57 }
0x544f   :  { %v10128_v61 = vmul.f32 1.442695, %v10127_v60 }
0x5450   :  { %v10288_v6 = vpop.permute.xlu1 %10287 }
0x5451   :  { %16193 = vpow2.f32 %v10128_v61 }
0x5454   :  { %v10286_v9 = vpop.permute.xlu1 %10285 }
0x545b   :  { %v16194_v62 = vpop.eup %16193 }
0x545c   :  { %v10130_v53 = vsel %vm484_vm2, %v16194_v62, 0.0 }
0x545d   :  { %10131 = vadd.xlane.f32.xlu0 %v10130_v53 }
0x5473   :  { %10135 = vrot.lane.b32.xlu0 %v18122_v39, %s16754_s0 }
0x54ea   :  { %v10132_v15 = vpop.xlane.xlu0 %10131 }
0x54eb   :  { %16195 = vrcp.f32 %v10132_v15 }
0x54ee   :  { %v10136_v63 = vpop.permute.xlu0 %10135 }
0x54ef   :  { %15504 = vmatpush3.msra.mxu1 %v10136_v63 }
0x54f0   :  { %15513 = vmatprep.subr.mxu1 %v16743_v12 }
0x54f5   :  { %v16196_v35 = vpop.eup %16195 }
0x54f6   :  { %v10134_v28 = vmul.f32 %v16196_v35, %v16194_v62 }
0x54f8   :  { %15506 = vmatmul.mubr.msk.f32.vlgmr.msra.gmra.mrb[112].mxu1 %vm484_vm2, %v10134_v28 }
0x54f9   :  { %15514 = vmatpush3.xpose.msk.msra.mxu1 %vm484_vm2, %v10288_v6  ;;  %15515 = vmatprep.mubr.msk.f32.mxu1 %vm16744_vm1, %v16743_v12 }
0x54fa   :  { %15523 = vmatprep.subr.mxu1 %v16743_v12 }
0x54fc   :  { %15516 = vmatmul.mubr.msk.f32.vlgmr.msra.gmra.mrb[114].mxu1 %vm484_vm2, %v10286_v9 }
0x54fd   :  { %15525 = vmatprep.mubr.msk.f32.mxu1 %vm16744_vm1, %v16743_v12  ;;  %15524 = vmatpush3.msra.mxu1 %v18237_v23 }
0x54fe   :  { %15533 = vmatprep.subr.mxu1 %v16743_v12 }
0x55cb   :  { %v10207_v59 = vpop.f32.mrb[112].mxu1 }
0x55cc   :  { %v15507_v11 = vpop.f32.mrb[113].mxu1  ;;  %15511 = vmatmul.mubr.msk.f32.vlgmr.msra.gmra.mrb[118].mxu0 %vm484_vm2, %v10207_v59 }
0x55cd   :  { %15520 = vmatprep.mubr.msk.f32.mxu0 %vm16744_vm1, %v16743_v12 }
0x55cf   :  { %v10359_v4 = vpop.f32.mrb[114].mxu1 }
0x55d0   :  { %v10363_v0 = vmul.f32 0.35355338, %v10359_v4  ;;  %v15517_v5 = vpop.f32.mrb[115].mxu1 }
0x55d2   :  { %v10364_v18 = vsel %vm484_vm2, %v10363_v0, -inf }
0x55d3   :  { %10365 = vmax.xlane.f32.xlu1 %v10364_v18 }
0x55e4   :  { %10533 = vrot.lane.b32.xlu1 %v18120_v10, %s16746_s23 }
0x55e8   :  { %10699 = vrot.lane.b32.xlu1 %v18120_v10, %s16747_s3 }
0x5660   :  { %v10366_v19 = vpop.xlane.xlu1 %10365 }
0x5661   :  { %v10367_v33 = vsub.f32 %v10363_v0, %v10366_v19 }
0x5663   :  { %v10368_v24 = vmul.f32 1.442695, %v10367_v33 }
0x5664   :  { %v10534_v58 = vpop.permute.xlu1 %10533 }
0x5665   :  { %16197 = vpow2.f32 %v10368_v24 }
0x566f   :  { %v16198_v14 = vpop.eup %16197 }
0x5670   :  { %v10370_v26 = vsel %vm484_vm2, %v16198_v14, 0.0 }
0x5671   :  { %10371 = vadd.xlane.f32.xlu0 %v10370_v26 }
0x5687   :  { %10375 = vrot.lane.b32.xlu0 %v18122_v39, %s16755_s1  ;;  %v10700_v39 = vpop.permute.xlu1 %10699 }
0x568b   :  { %10697 = vrot.lane.b32.xlu0 %v18120_v10, %s16745_s22 }
0x569f   :  { %v10280_v7 = vpop.f32.mrb[118].mxu0 }
0x56a0   :  { %v18217_v29 = vadd.f32 %v10280_v7, %v10042_v47  ;;  %v15512_v31 = vpop.f32.mrb[119].mxu0 }
0x56fe   :  { %v10372_v1 = vpop.xlane.xlu0 %10371 }
0x56ff   :  { %16199 = vrcp.f32 %v10372_v1 }
0x5702   :  { %v10376_v30 = vpop.permute.xlu0 %10375 }
0x5703   :  { %15519 = vmatpush3.msra.mxu0 %v10376_v30 }
0x5704   :  { %15528 = vmatprep.subr.mxu0 %v16743_v12 }
0x5706   :  { %v10698_v38 = vpop.permute.xlu0 %10697 }
0x5709   :  { %v16200_v34 = vpop.eup %16199 }
0x570a   :  { %v10374_v36 = vmul.f32 %v16200_v34, %v16198_v14 }
0x570c   :  { %15521 = vmatmul.mubr.msk.f32.vlgmr.msra.gmra.mrb[120].mxu0 %vm484_vm2, %v10374_v36 }
0x570d   :  { %15529 = vmatpush3.xpose.msk.msra.mxu0 %vm484_vm2, %v10534_v58  ;;  %15530 = vmatprep.mubr.msk.f32.mxu0 %vm16744_vm1, %v16743_v12 }
0x570e   :  { %15538 = vmatprep.subr.mxu0 %v16743_v12 }
0x5710   :  { %15531 = vmatmul.mubr.msk.f32.vlgmr.msra.gmra.mrb[122].mxu0 %vm484_vm2, %v18120_v10 }
0x5711   :  { %15539 = vmatpush3.xpose.msk.msra.mxu0 %vm484_vm2, %v10700_v39  ;;  %15540 = vmatprep.mubr.msk.f32.mxu0 %vm16744_vm1, %v16743_v12 }
0x5712   :  { %15548 = vmatprep.subr.mxu0 %v16743_v12 }
0x5714   :  { %15541 = vmatmul.mubr.msk.f32.vlgmr.msra.gmra.mrb[124].mxu0 %vm484_vm2, %v10698_v38 }
0x5715   :  { %15549 = vmatpush3.msra.mxu0 %v18154_v40  ;;  %15550 = vmatprep.mubr.msk.f32.mxu0 %vm16744_vm1, %v16743_v12 }
0x5716   :  { %15558 = vmatprep.subr.mxu0 %v16743_v12 }
0x57df   :  { %v10447_v42 = vpop.f32.mrb[120].mxu0 }
0x57e0   :  { %v15522_v43 = vpop.f32.mrb[121].mxu0  ;;  %15526 = vmatmul.mubr.msk.f32.vlgmr.msra.gmra.mrb[116].mxu1 %vm484_vm2, %v10447_v42 }
0x57e1   :  { %15535 = vmatprep.mubr.msk.f32.mxu1 %vm16744_vm1, %v16743_v12 }
0x57e3   :  { %v10605_v37 = vpop.f32.mrb[122].mxu0 }
0x57e4   :  { %v10609_v40 = vmul.f32 0.35355338, %v10605_v37  ;;  %v15532_v16 = vpop.f32.mrb[123].mxu0 }
0x57e6   :  { %v10610_v32 = vsel %vm484_vm2, %v10609_v40, -inf }
0x57e7   :  { %10611 = vmax.xlane.f32.xlu1 %v10610_v32  ;;  %v10771_v41 = vpop.f32.mrb[124].mxu0 }
0x57e8   :  { %v10775_v3 = vmul.f32 0.35355338, %v10771_v41  ;;  %v15542_v27 = vpop.f32.mrb[125].mxu0 }
0x57ea   :  { %v10776_v25 = vsel %vm484_vm2, %v10775_v3, -inf }
0x57eb   :  { %10777 = vmax.xlane.f32.xlu0 %v10776_v25 }
0x57f8   :  { %10621 = vrot.lane.b32.xlu1 %v18120_v10, %s16749_s26 }
0x57fc   :  { %11011 = vrot.lane.b32.xlu1 %v18120_v10, %s16750_s4 }
0x5800   :  { %11009 = vrot.lane.b32.xlu1 %v18120_v10, %s16751_s6 }
0x5874   :  { %v10612_v20 = vpop.xlane.xlu1 %10611 }
0x5875   :  { %v10613_v48 = vsub.f32 %v10609_v40, %v10612_v20 }
0x5877   :  { %v10614_v21 = vmul.f32 1.442695, %v10613_v48  ;;  %v18307_v48 = vld [vmem:[#allocation13 + $0x20] sm:$0xff] }
0x5878   :  { %v10622_v22 = vpop.permute.xlu1 %10621  ;;  %v10778_v45 = vpop.xlane.xlu0 %10777 }
0x5879   :  { %16201 = vpow2.f32 %v10614_v21  ;;  %v10779_v46 = vsub.f32 %v10775_v3, %v10778_v45  ;;  %15534 = vmatpush3.msra.mxu1 %v10622_v22  ;;  %v18309_v21 = vld [vmem:[#allocation13 + $0x28] sm:$0xff]  ;;  %v11541_v45 = vld [vmem:[#allocation13 + $0x30] sm:$0xff] }
0x587a   :  { %15543 = vmatprep.subr.mxu1 %v16743_v12  ;;  %v16019_v22 = vpack.i.bf16 %v18309_v21, %v18307_v48 }
0x587b   :  { %v10780_v50 = vmul.f32 1.442695, %v10779_v46  ;;  %v11542_v46 = vld [vmem:[#allocation13 + $0x38] sm:$0xff] }
0x587c   :  { %v11012_v9 = vpop.permute.xlu1 %11011 }
0x587d   :  { %16203 = vpow2.f32 %v10780_v50  ;;  %v16024_v50 = vpack.i.bf16 %v11542_v46, %v11541_v45 }
0x5883   :  { %v16202_v47 = vpop.eup %16201 }
0x5884   :  { %v10616_v49 = vsel %vm484_vm2, %v16202_v47, 0.0 }
0x5885   :  { %10617 = vadd.xlane.f32.xlu0 %v10616_v49 }
0x5887   :  { %v16204_v51 = vpop.eup %16203 }
0x5888   :  { %v10782_v52 = vsel %vm484_vm2, %v16204_v51, 0.0 }
0x5889   :  { %10783 = vadd.xlane.f32.xlu0 %v10782_v52 }
0x589f   :  { %10787 = vrot.lane.b32.xlu0 %v18120_v10, %s16748_s25 }
0x58b3   :  { %v10520_v8 = vpop.f32.mrb[116].mxu1 }
0x58b4   :  { %v18258_v55 = vadd.f32 %v10520_v8, %v18217_v29  ;;  %v15527_v57 = vpop.f32.mrb[117].mxu1 }
0x5912   :  { %v10618_v60 = vpop.xlane.xlu0 %10617 }
0x5913   :  { %16205 = vrcp.f32 %v10618_v60  ;;  %v15895_v60 = vpack.c.bf16 %v11542_v46, %v11541_v45 }
0x5916   :  { %v10784_v61 = vpop.xlane.xlu0 %10783 }
0x5917   :  { %16207 = vrcp.f32 %v10784_v61 }
0x591a   :  { %v10788_v15 = vpop.permute.xlu0 %10787 }
0x591d   :  { %v16206_v62 = vpop.eup %16205 }
0x591e   :  { %v10620_v53 = vmul.f32 %v16206_v62, %v16202_v47 }
0x5920   :  { %15536 = vmatmul.mubr.msk.f32.vlgmr.msra.gmra.mrb[118].mxu1 %vm484_vm2, %v10620_v53  ;;  %v18324_v53 = vld [vmem:[#allocation14 + $0x1] ss:$0 sm:$0xff] }
0x5921   :  { %v16208_v63 = vpop.eup %16207  ;;  %15544 = vmatpush3.msra.mxu1 %v10788_v15  ;;  %15545 = vmatprep.mubr.msk.f32.mxu1 %vm16744_vm1, %v16743_v12 }
0x5922   :  { %v10786_v35 = vmul.f32 %v16208_v63, %v16204_v51  ;;  %15553 = vmatprep.subr.mxu1 %v16743_v12 }
0x5924   :  { %15546 = vmatmul.mubr.msk.f32.vlgmr.msra.gmra.mrb[120].mxu1 %vm484_vm2, %v10786_v35 }
0x5925   :  { %15554 = vmatpush3.msra.mxu1 %v18167_v44  ;;  %15555 = vmatprep.mubr.msk.f32.mxu1 %vm16744_vm1, %v16743_v12  ;;  %v11010_v44 = vpop.permute.xlu1 %11009 }
0x5926   :  { %15563 = vmatprep.subr.mxu1 %v16743_v12 }
0x59f3   :  { %v10693_v6 = vpop.f32.mrb[118].mxu1 }
0x59f4   :  { %v15537_v28 = vpop.f32.mrb[119].mxu1  ;;  %15556 = vmatmul.mubr.msk.f32.vlgmr.msra.gmra.mrb[122].mxu1 %vm484_vm2, %v10693_v6 }
0x59f5   :  { %15565 = vmatprep.mubr.msk.f32.mxu1 %vm16744_vm1, %v16743_v12 }
0x59f7   :  { %v10859_v59 = vpop.f32.mrb[120].mxu1 }
0x59f8   :  { %v15547_v11 = vpop.f32.mrb[121].mxu1  ;;  %15551 = vmatmul.mubr.msk.f32.vlgmr.msra.gmra.mrb[126].mxu0 %vm484_vm2, %v10859_v59 }
0x59f9   :  { %15559 = vmatpush3.xpose.msk.msra.mxu0 %vm484_vm2, %v11012_v9  ;;  %15560 = vmatprep.mubr.msk.f32.mxu0 %vm16744_vm1, %v16743_v12 }
0x59fa   :  { %15568 = vmatprep.subr.mxu0 %v16743_v12 }
0x59fc   :  { %15561 = vmatmul.mubr.msk.f32.vlgmr.msra.gmra.mrb[128].mxu0 %vm484_vm2, %v11010_v44 }
0x59fd   :  { %15569 = vmatpush3.msra.mxu0 %v18200_v13  ;;  %15570 = vmatprep.mubr.msk.f32.mxu0 %vm16744_vm1, %v16743_v12 }
0x59fe   :  { %15578 = vmatprep.subr.mxu0 %v16743_v12 }
0x5ac7   :  { %v11005_v4 = vpop.f32.mrb[122].mxu1 }
0x5ac8   :  { %v15557_v0 = vpop.f32.mrb[123].mxu1 }
0x5acb   :  { %v10932_v5 = vpop.f32.mrb[126].mxu0 }
0x5acc   :  { %v11006_v18 = vadd.f32 %v11005_v4, %v10932_v5  ;;  %v15552_v19 = vpop.f32.mrb[127].mxu0 }
0x5acf   :  { %v11083_v33 = vpop.f32.mrb[128].mxu0 }
0x5ad0   :  { %v11087_v24 = vmul.f32 0.35355338, %v11083_v33  ;;  %v15562_v14 = vpop.f32.mrb[129].mxu0 }
0x5ad2   :  { %v11088_v26 = vsel %vm484_vm2, %v11087_v24, -inf }
0x5ad3   :  { %11089 = vmax.xlane.f32.xlu1 %v11088_v26 }
0x5ae4   :  { %11251 = vrot.lane.b32.xlu1 %v18120_v10, %s16752_s19 }
0x5ae8   :  { %11249 = vrot.lane.b32.xlu1 %v18120_v10, %s16753_s28 }
0x5b60   :  { %v11090_v13 = vpop.xlane.xlu1 %11089 }
0x5b61   :  { %v11091_v7 = vsub.f32 %v11087_v24, %v11090_v13 }
0x5b63   :  { %v11092_v29 = vmul.f32 1.442695, %v11091_v7 }
0x5b64   :  { %v11252_v36 = vpop.permute.xlu1 %11251 }
0x5b65   :  { %16209 = vpow2.f32 %v11092_v29 }
0x5b68   :  { %v11250_v38 = vpop.permute.xlu1 %11249 }
0x5b6f   :  { %v16210_v31 = vpop.eup %16209 }
0x5b70   :  { %v11094_v1 = vsel %vm484_vm2, %v16210_v31, 0.0 }
0x5b71   :  { %11095 = vadd.xlane.f32.xlu0 %v11094_v1 }
0x5b87   :  { %11099 = vrot.lane.b32.xlu0 %v18120_v10, %s16754_s0 }
0x5bfe   :  { %v11096_v30 = vpop.xlane.xlu0 %11095 }
0x5bff   :  { %16211 = vrcp.f32 %v11096_v30 }
0x5c02   :  { %v11100_v34 = vpop.permute.xlu0 %11099 }
0x5c03   :  { %15564 = vmatpush3.msra.mxu1 %v11100_v34 }
0x5c04   :  { %15573 = vmatprep.subr.mxu1 %v16743_v12 }
0x5c09   :  { %v16212_v58 = vpop.eup %16211 }
0x5c0a   :  { %v11098_v39 = vmul.f32 %v16212_v58, %v16210_v31  ;;  %v14366_v58 = vld [vmem:[#allocation11 + $0x1] ss:$0 sm:$0xff] }
0x5c0c   :  { %15566 = vmatmul.mubr.msk.f32.vlgmr.msra.gmra.mrb[124].mxu1 %vm484_vm2, %v11098_v39 }
0x5c0d   :  { %15574 = vmatpush3.xpose.msk.msra.mxu1 %vm484_vm2, %v11252_v36  ;;  %15575 = vmatprep.mubr.msk.f32.mxu1 %vm16744_vm1, %v16743_v12 }
0x5c0e   :  { %15583 = vmatprep.subr.mxu1 %v16743_v12 }
0x5c10   :  { %15576 = vmatmul.mubr.msk.f32.vlgmr.msra.gmra.mrb[126].mxu1 %vm484_vm2, %v11250_v38 }
0x5c11   :  { %15584 = vmatpush3.msra.mxu1 %v18237_v23  ;;  %15585 = vmatprep.mubr.msk.f32.mxu1 %vm16744_vm1, %v16743_v12 }
0x5cdf   :  { %v11171_v42 = vpop.f32.mrb[124].mxu1 }
0x5ce0   :  { %v15567_v43 = vpop.f32.mrb[125].mxu1  ;;  %15571 = vmatmul.mubr.msk.f32.vlgmr.msra.gmra.mrb[130].mxu0 %vm484_vm2, %v11171_v42 }
0x5ce1   :  { %15580 = vmatprep.mubr.msk.f32.mxu0 %vm16744_vm1, %v16743_v12 }
0x5ce3   :  { %v11323_v37 = vpop.f32.mrb[126].mxu1 }
0x5ce4   :  { %v11327_v40 = vmul.f32 0.35355338, %v11323_v37  ;;  %v15577_v16 = vpop.f32.mrb[127].mxu1 }
0x5ce6   :  { %v11328_v32 = vsel %vm484_vm2, %v11327_v40, -inf }
0x5ce7   :  { %11329 = vmax.xlane.f32.xlu0 %v11328_v32 }
0x5cfd   :  { %11339 = vrot.lane.b32.xlu0 %v18120_v10, %s16755_s1  ;;  %v15891_v10 = vpack.c.bf16 %v18309_v21, %v18307_v48 }
0x5d74   :  { %v11330_v23 = vpop.xlane.xlu0 %11329 }
0x5d75   :  { %v11331_v41 = vsub.f32 %v11327_v40, %v11330_v23 }
0x5d77   :  { %v11332_v3 = vmul.f32 1.442695, %v11331_v41 }
0x5d78   :  { %v11340_v27 = vpop.permute.xlu0 %11339 }
0x5d79   :  { %16213 = vpow2.f32 %v11332_v3  ;;  %15579 = vmatpush3.msra.mxu0 %v11340_v27 }
0x5d7a   :  { %15892 = vmatprep.subr.bf16.mxu0 %v15891_v10 }
0x5d83   :  { %v16214_v25 = vpop.eup %16213 }
0x5d84   :  { %v11334_v20 = vsel %vm484_vm2, %v16214_v25, 0.0 }
0x5d85   :  { %11335 = vadd.xlane.f32.xlu1 %v11334_v20 }
0x5db3   :  { %v11244_v47 = vpop.f32.mrb[130].mxu0 }
0x5db4   :  { %v11248_v49 = vadd.f32 %v11244_v47, %v11006_v18  ;;  %v15572_v51 = vpop.f32.mrb[131].mxu0 }
0x5e12   :  { %v11336_v52 = vpop.xlane.xlu1 %11335 }
0x5e13   :  { %16215 = vrcp.f32 %v11336_v52 }
0x5e1d   :  { %v16216_v8 = vpop.eup %16215 }
0x5e1e   :  { %v11338_v57 = vmul.f32 %v16216_v8, %v16214_v25 }
0x5e20   :  { %15581 = vmatmul.mubr.msk.f32.vlgmr.msra.gmra.mrb[132].mxu0 %vm484_vm2, %v11338_v57 }
0x5e21   :  { %15894 = vmatpush3.bf16.msra.mxu0 %v15891_v10  ;;  %15596 = vmatprep.mubr.msk.f32.mxu0 %vm399_vm0, %v17841_v54 }
0x5e22   :  { %15896 = vmatprep.subr.bf16.mxu0 %v15895_v60 }
0x5e25   :  { %15898 = vmatpush3.bf16.msra.mxu0 %v15895_v60 }
0x5e26   :  { %15610 = vmatprep.subr.mxu0 %v16743_v12 }
0x5e28   :  { %15597 = vmatmul.mubr.msk.f32.vlgmr.msra.gmra.mrb[134].mxu0 %vm399_vm0, %v17845_v56  ;;  %v14348_v56 = vld [vmem:[#allocation8 + $0x1] ss:$0 sm:$0xff] }
0x5e29   :  { %15612 = vmatprep.mubr.msk.f32.mxu0 %vm16744_vm1, %v16743_v12  ;;  %v10531_v35 = vadd.f32 %v14348_v56, %v18258_v55 }
0x5e2b   :  { %v11494_v6 = vadd.f32 %v10531_v35, %v18110_v2 }
0x5e2d   :  { %v11496_v28 = vsel %vm399_vm0, %v11494_v6, 0.0 }
0x5ef3   :  { %v11411_v61 = vpop.f32.mrb[132].mxu0 }
0x5ef4   :  { %v15582_v62 = vpop.f32.mrb[133].mxu0  ;;  %15586 = vmatmul.mubr.msk.f32.vlgmr.msra.gmra.mrb[128].mxu1 %vm484_vm2, %v11411_v61 }
0x5efb   :  { %v18326_v15 = vpop.f32.mrb[134].mxu0 }
0x5efc   :  { %v11624_v63 = vpop.f32.mrb[135].mxu0 }
0x5efd   :  { %v18329_v54 = vadd.f32 %v18324_v53, %v11624_v63 }
0x5eff   :  { %11897 = vrot.lane.b32.xlu0 %v18329_v54, %s16747_s3  ;;  %11734 = vrot.lane.b32.xlu1 %v18329_v54, %s16746_s23 }
0x5f23   :  { %11497 = vadd.xlane.f32.xlu1 %v11496_v28 }
0x5f71   :  { %v11735_v9 = vpop.permute.xlu1 %11734  ;;  %v11898_v59 = vpop.permute.xlu0 %11897 }
0x5f72   :  { %15611 = vmatpush3.xpose.msk.msra.mxu0 %vm484_vm2, %v11735_v9 }
0x5f73   :  { %15620 = vmatprep.subr.mxu0 %v16743_v12 }
0x5f75   :  { %15613 = vmatmul.mubr.msk.f32.vlgmr.msra.gmra.mrb[136].mxu0 %vm484_vm2, %v18329_v54 }
0x5f76   :  { %15621 = vmatpush3.xpose.msk.msra.mxu0 %vm484_vm2, %v11898_v59  ;;  %15622 = vmatprep.mubr.msk.f32.mxu0 %vm16744_vm1, %v16743_v12 }
0x5f77   :  { %15630 = vmatprep.subr.mxu0 %v16743_v12 }
0x5fb0   :  { %v11498_v2 = vpop.xlane.xlu1 %11497 }
0x5fb1   :  { %v11502_v55 = vmul.f32 0.03125, %v11498_v2 }
0x5fb3   :  { %v11504_v11 = vsub.f32 %v11494_v6, %v11502_v55 }
0x5fb5   :  { %v11506_v44 = vmul.f32 %v11504_v11, %v11504_v11 }
0x5fb7   :  { %v11508_v4 = vsel %vm399_vm0, %v11506_v44, 0.0 }
0x5fb8   :  { %11509 = vadd.xlane.f32.xlu1 %v11508_v4 }
0x5fc7   :  { %v11484_v0 = vpop.f32.mrb[128].mxu1 }
0x5fc8   :  { %v11488_v5 = vadd.f32 %v11484_v0, %v11248_v49  ;;  %v15587_v18 = vpop.f32.mrb[129].mxu1 }
0x5fca   :  { %v11489_v19 = vadd.f32 %v14348_v56, %v11488_v5  ;;  %v18395_v5 = vld [vmem:[#allocation16 + $0x28] sm:$0xff] }
0x5fcc   :  { %v11495_v33 = vadd.f32 %v11489_v19, %v18114_v17  ;;  %v14365_v17 = vld [vmem:[#allocation10 + $0x1] ss:$0 sm:$0xff] }
0x5fce   :  { %v11499_v24 = vsel %vm399_vm0, %v11495_v33, 0.0 }
0x5fcf   :  { %11500 = vadd.xlane.f32.xlu0 %v11499_v24 }
0x5fe5   :  { %11895 = vrot.lane.b32.xlu0 %v18329_v54, %s16745_s22 }
0x5fe9   :  { %16025 = vrot.lane.b32.xlu0 %v16024_v50, %s16749_s26 }
0x6045   :  { %v11510_v14 = vpop.xlane.xlu1 %11509 }
0x6046   :  { %v11514_v26 = vmul.f32 0.03125, %v11510_v14  ;;  %v18400_v14 = vld [vmem:[#allocation16 + $0x20] sm:$0xff] }
0x6048   :  { %v11516_v13 = vadd.f32 1e-05, %v11514_v26  ;;  %v11806_v7 = vpop.f32.mrb[136].mxu0 }
0x6049   :  { %v11810_v29 = vmul.f32 0.35355338, %v11806_v7  ;;  %v15614_v31 = vpop.f32.mrb[137].mxu0 }
0x604a   :  { %16217 = vrsqrt.f32 %v11516_v13 }
0x604b   :  { %v11811_v1 = vsel %vm484_vm2, %v11810_v29, -inf }
0x604c   :  { %11812 = vmax.xlane.f32.xlu0 %v11811_v1 }
0x6054   :  { %v16218_v30 = vpop.eup %16217 }
0x6055   :  { %v11520_v34 = vmul.f32 %v16218_v30, %v11504_v11 }
0x6057   :  { %v11528_v36 = vmul.f32 %v14365_v17, %v11520_v34 }
0x6059   :  { %v18353_v39 = vadd.f32 %v14366_v58, %v11528_v36 }
0x605b   :  { %15607 = vmatprep.mubr.msk.f32.mxu1 %vm399_vm0, %v18353_v39 }
0x605c   :  { %v11501_v38 = vpop.xlane.xlu0 %11500 }
0x605d   :  { %v11503_v42 = vmul.f32 0.03125, %v11501_v38 }
0x605f   :  { %v11505_v43 = vsub.f32 %v11495_v33, %v11503_v42 }
0x6060   :  { %v11896_v37 = vpop.permute.xlu0 %11895 }
0x6061   :  { %15623 = vmatmul.mubr.msk.f32.vlgmr.msra.gmra.mrb[138].mxu0 %vm484_vm2, %v11896_v37  ;;  %v11507_v40 = vmul.f32 %v11505_v43, %v11505_v43 }
0x6062   :  { %11649 = vrot.lane.b32.xlu0 %v18324_v53, %s16749_s26  ;;  %15632 = vmatprep.mubr.msk.f32.mxu0 %vm16744_vm1, %v16743_v12 }
0x6063   :  { %v11511_v16 = vsel %vm399_vm0, %v11507_v40, 0.0  ;;  %15631 = vmatpush3.msra.mxu0 %v18395_v5 }
0x6064   :  { %11512 = vadd.xlane.f32.xlu1 %v11511_v16  ;;  %v16026_v41 = vpop.permute.xlu0 %16025  ;;  %15640 = vmatprep.subr.mxu0 %v16743_v12 }
0x6065   :  { %v16028_v3 = vunpack.i.h.bf16 %v16026_v41  ;;  %v16027_v27 = vunpack.i.l.bf16 %v16026_v41 }
0x6066   :  { %12210 = vrot.lane.b32.xlu0 %v18329_v54, %s16750_s4 }
0x6067   :  { %v15903_v46 = vpack.c.bf16 %v16028_v3, %v16027_v27 }
0x606a   :  { %12208 = vrot.lane.b32.xlu0 %v18329_v54, %s16751_s6 }
0x6075   :  { %16020 = vrot.lane.b32.xlu1 %v16019_v22, %s16749_s26 }
0x60d9   :  { %v11813_v49 = vpop.xlane.xlu0 %11812 }
0x60da   :  { %v11814_v51 = vsub.f32 %v11810_v29, %v11813_v49 }
0x60dc   :  { %v11815_v52 = vmul.f32 1.442695, %v11814_v51  ;;  %v18445_v51 = vadd.f32 %v18326_v15, %v18324_v53  ;;  %v18456_v53 = vld [vmem:[#allocation16 + $0x38] sm:$0xff] }
0x60dd   :  { %v18383_v11 = vpop.permute.xlu0 %11649 }
0x60e1   :  { %v12211_v7 = vpop.permute.xlu0 %12210 }
0x60e5   :  { %v12209_v1 = vpop.permute.xlu0 %12208 }
0x60f1   :  { %v11513_v32 = vpop.xlane.xlu1 %11512 }
0x60f2   :  { %v11515_v23 = vmul.f32 0.03125, %v11513_v32 }
0x60f4   :  { %v11517_v25 = vadd.f32 1e-05, %v11515_v23 }
0x60f5   :  { %v16021_v20 = vpop.permute.xlu1 %16020 }
0x60f6   :  { %16219 = vrsqrt.f32 %v11517_v25  ;;  %v16023_v10 = vunpack.i.h.bf16 %v16021_v20  ;;  %v16022_v45 = vunpack.i.l.bf16 %v16021_v20 }
0x60f7   :  { %16221 = vpow2.f32 %v11815_v52 }
0x60f8   :  { %v15899_v50 = vpack.c.bf16 %v16023_v10, %v16022_v45 }
0x60fa   :  { %15900 = vmatprep.subr.bf16.mxu1 %v15899_v50 }
0x60fb   :  { %15902 = vmatpush3.bf16.msra.mxu1 %v15899_v50 }
0x60fc   :  { %15904 = vmatprep.subr.bf16.mxu1 %v15903_v46 }
0x60ff   :  { %15906 = vmatpush3.bf16.msra.mxu1 %v15903_v46 }
0x6100   :  { %v16220_v47 = vpop.eup %16219  ;;  %15615 = vmatprep.subr.mxu1 %v16743_v12 }
0x6101   :  { %v11521_v48 = vmul.f32 %v16220_v47, %v11505_v43  ;;  %v16222_v62 = vpop.eup %16221 }
0x6102   :  { %v11817_v63 = vsel %vm484_vm2, %v16222_v62, 0.0 }
0x6103   :  { %v11529_v21 = vmul.f32 %v14365_v17, %v11521_v48 }
0x6105   :  { %v18372_v22 = vadd.f32 %v14366_v58, %v11529_v21 }
0x6107   :  { %15608 = vmatmul.mubr.msk.f32.vlgmr.msra.gmra.mrb[130].mxu1 %vm399_vm0, %v18372_v22 }
0x6108   :  { %15617 = vmatprep.mubr.msk.f32.mxu1 %vm16744_vm1, %v16743_v12 }
0x6134   :  { %v11969_v8 = vpop.f32.mrb[138].mxu0 }
0x6135   :  { %v11973_v57 = vmul.f32 0.35355338, %v11969_v8  ;;  %v15624_v60 = vpop.f32.mrb[139].mxu0 }
0x6137   :  { %v11974_v61 = vsel %vm484_vm2, %v11973_v57, -inf }
0x6138   :  { %11975 = vmax.xlane.f32.xlu1 %v11974_v61 }
0x613c   :  { %11818 = vadd.xlane.f32.xlu1 %v11817_v63 }
0x61c5   :  { %v11976_v56 = vpop.xlane.xlu1 %11975 }
0x61c6   :  { %v11977_v35 = vsub.f32 %v11973_v57, %v11976_v56 }
0x61c8   :  { %v11978_v6 = vmul.f32 1.442695, %v11977_v35 }
0x61c9   :  { %v11819_v28 = vpop.xlane.xlu1 %11818 }
0x61ca   :  { %16223 = vpow2.f32 %v11978_v6 }
0x61cb   :  { %16225 = vrcp.f32 %v11819_v28 }
0x61d4   :  { %v16224_v9 = vpop.eup %16223 }
0x61d5   :  { %v11980_v59 = vsel %vm484_vm2, %v16224_v9, 0.0  ;;  %v16226_v2 = vpop.eup %16225 }
0x61d6   :  { %11981 = vadd.xlane.f32.xlu1 %v11980_v59  ;;  %v11821_v0 = vmul.f32 %v16226_v2, %v16222_v62 }
0x61da   :  { %v18381_v55 = vpop.f32.mrb[130].mxu1 }
0x61db   :  { %v11724_v44 = vpop.f32.mrb[131].mxu1 }
0x61dc   :  { %v18386_v4 = vadd.f32 %v11724_v44, %v18383_v11  ;;  %v18479_v44 = vadd.f32 %v18381_v55, %v18383_v11 }
0x61de   :  { %15616 = vmatpush3.msra.mxu1 %v18386_v4 }
0x61df   :  { %15618 = vmatmul.mubr.msk.f32.vlgmr.msra.gmra.mrb[132].mxu1 %vm484_vm2, %v11821_v0  ;;  %15625 = vmatprep.subr.mxu1 %v16743_v12 }
0x61e0   :  { %15627 = vmatprep.mubr.msk.f32.mxu1 %vm16744_vm1, %v16743_v12 }
0x61e7   :  { %11986 = vrot.lane.b32.xlu1 %v18386_v4, %s16745_s22 }
0x6263   :  { %v11982_v18 = vpop.xlane.xlu1 %11981 }
0x6264   :  { %16227 = vrcp.f32 %v11982_v18 }
0x6267   :  { %v11987_v19 = vpop.permute.xlu1 %11986 }
0x6268   :  { %15626 = vmatpush3.msra.mxu1 %v11987_v19 }
0x6269   :  { %15635 = vmatprep.subr.mxu1 %v16743_v12 }
0x626e   :  { %v16228_v33 = vpop.eup %16227 }
0x626f   :  { %v11984_v24 = vmul.f32 %v16228_v33, %v16224_v9 }
0x6271   :  { %15628 = vmatmul.mubr.msk.f32.vlgmr.msra.gmra.mrb[134].mxu1 %vm484_vm2, %v11984_v24 }
0x6272   :  { %15636 = vmatpush3.msra.mxu1 %v18400_v14  ;;  %15637 = vmatprep.mubr.msk.f32.mxu1 %vm16744_vm1, %v16743_v12 }
0x6273   :  { %15645 = vmatprep.subr.mxu1 %v16743_v12 }
0x62b2   :  { %v11891_v26 = vpop.f32.mrb[132].mxu1 }
0x62b3   :  { %v15619_v13 = vpop.f32.mrb[133].mxu1  ;;  %15638 = vmatmul.mubr.msk.f32.vlgmr.msra.gmra.mrb[136].mxu1 %vm484_vm2, %v11891_v26 }
0x62b4   :  { %15647 = vmatprep.mubr.msk.f32.mxu1 %vm16744_vm1, %v16743_v12 }
0x6344   :  { %v12058_v29 = vpop.f32.mrb[134].mxu1 }
0x6345   :  { %v15629_v31 = vpop.f32.mrb[135].mxu1  ;;  %15633 = vmatmul.mubr.msk.f32.vlgmr.msra.gmra.mrb[140].mxu0 %vm484_vm2, %v12058_v29 }
0x6346   :  { %15641 = vmatpush3.xpose.msk.msra.mxu0 %vm484_vm2, %v12211_v7  ;;  %15642 = vmatprep.mubr.msk.f32.mxu0 %vm16744_vm1, %v16743_v12 }
0x6347   :  { %15650 = vmatprep.subr.mxu0 %v16743_v12 }
0x6349   :  { %15643 = vmatmul.mubr.msk.f32.vlgmr.msra.gmra.mrb[142].mxu0 %vm484_vm2, %v12209_v1 }
0x634a   :  { %15652 = vmatprep.mubr.msk.f32.mxu0 %vm16744_vm1, %v16743_v12 }
0x6386   :  { %v12204_v30 = vpop.f32.mrb[136].mxu1 }
0x6387   :  { %v15639_v17 = vpop.f32.mrb[137].mxu1 }
0x6418   :  { %v12131_v34 = vpop.f32.mrb[140].mxu0 }
0x6419   :  { %v12205_v58 = vadd.f32 %v12204_v30, %v12131_v34  ;;  %v15634_v36 = vpop.f32.mrb[141].mxu0 }
0x641c   :  { %v12282_v38 = vpop.f32.mrb[142].mxu0 }
0x641d   :  { %v12286_v42 = vmul.f32 0.35355338, %v12282_v38  ;;  %v15644_v43 = vpop.f32.mrb[143].mxu0 }
0x641f   :  { %v12287_v37 = vsel %vm484_vm2, %v12286_v42, -inf }
0x6420   :  { %12288 = vmax.xlane.f32.xlu0 %v12287_v37 }
0x6436   :  { %12298 = vrot.lane.b32.xlu0 %v18386_v4, %s16751_s6 }
0x643a   :  { %12448 = vrot.lane.b32.xlu0 %v18329_v54, %s16753_s28 }
0x64ad   :  { %v12289_v40 = vpop.xlane.xlu0 %12288 }
0x64ae   :  { %v12290_v16 = vsub.f32 %v12286_v42, %v12289_v40 }
0x64b0   :  { %v12291_v32 = vmul.f32 1.442695, %v12290_v16 }
0x64b1   :  { %v12299_v23 = vpop.permute.xlu0 %12298 }
0x64b2   :  { %16229 = vpow2.f32 %v12291_v32  ;;  %15646 = vmatpush3.msra.mxu1 %v12299_v23 }
0x64b3   :  { %15655 = vmatprep.subr.mxu1 %v16743_v12 }
0x64b5   :  { %v12449_v45 = vpop.permute.xlu0 %12448 }
0x64bc   :  { %v16230_v41 = vpop.eup %16229 }
0x64bd   :  { %v12293_v3 = vsel %vm484_vm2, %v16230_v41, 0.0 }
0x64be   :  { %12294 = vadd.xlane.f32.xlu1 %v12293_v3 }
0x64cf   :  { %12450 = vrot.lane.b32.xlu1 %v18329_v54, %s16752_s19  ;;  %v18435_v54 = vld [vmem:[#allocation16 + $0x30] sm:$0xff] }
0x64d0   :  { %15651 = vmatpush3.msra.mxu0 %v18435_v54 }
0x64d1   :  { %15660 = vmatprep.subr.mxu0 %v16743_v12 }
0x654b   :  { %v12295_v27 = vpop.xlane.xlu1 %12294 }
0x654c   :  { %16231 = vrcp.f32 %v12295_v27 }
0x654f   :  { %v12451_v10 = vpop.permute.xlu1 %12450 }
0x6556   :  { %v16232_v25 = vpop.eup %16231 }
0x6557   :  { %v12297_v20 = vmul.f32 %v16232_v25, %v16230_v41 }
0x6559   :  { %15648 = vmatmul.mubr.msk.f32.vlgmr.msra.gmra.mrb[138].mxu1 %vm484_vm2, %v12297_v20 }
0x655a   :  { %15656 = vmatpush3.xpose.msk.msra.mxu1 %vm484_vm2, %v12451_v10  ;;  %15657 = vmatprep.mubr.msk.f32.mxu1 %vm16744_vm1, %v16743_v12 }
0x655b   :  { %15665 = vmatprep.subr.mxu1 %v16743_v12 }
0x655d   :  { %15658 = vmatmul.mubr.msk.f32.vlgmr.msra.gmra.mrb[140].mxu1 %vm484_vm2, %v12449_v45 }
0x655e   :  { %15667 = vmatprep.mubr.msk.f32.mxu1 %vm16744_vm1, %v16743_v12  ;;  %15666 = vmatpush3.msra.mxu1 %v18456_v53 }
0x655f   :  { %15675 = vmatprep.subr.mxu1 %v16743_v12 }
0x662c   :  { %v12370_v46 = vpop.f32.mrb[138].mxu1 }
0x662d   :  { %v15649_v50 = vpop.f32.mrb[139].mxu1  ;;  %15653 = vmatmul.mubr.msk.f32.vlgmr.msra.gmra.mrb[144].mxu0 %vm484_vm2, %v12370_v46 }
0x662e   :  { %15662 = vmatprep.mubr.msk.f32.mxu0 %vm16744_vm1, %v16743_v12 }
0x6630   :  { %v12522_v47 = vpop.f32.mrb[140].mxu1 }
0x6631   :  { %v12526_v48 = vmul.f32 0.35355338, %v12522_v47  ;;  %v15659_v21 = vpop.f32.mrb[141].mxu1 }
0x6633   :  { %v12527_v49 = vsel %vm484_vm2, %v12526_v48, -inf }
0x6634   :  { %12528 = vmax.xlane.f32.xlu1 %v12527_v49 }
0x6645   :  { %12696 = vrot.lane.b32.xlu1 %v18445_v51, %s16746_s23 }
0x6649   :  { %12859 = vrot.lane.b32.xlu1 %v18445_v51, %s16747_s3 }
0x66c1   :  { %v12529_v52 = vpop.xlane.xlu1 %12528 }
0x66c2   :  { %v12530_v8 = vsub.f32 %v12526_v48, %v12529_v52 }
0x66c4   :  { %v12531_v57 = vmul.f32 1.442695, %v12530_v8 }
0x66c5   :  { %v12697_v28 = vpop.permute.xlu1 %12696 }
0x66c6   :  { %16233 = vpow2.f32 %v12531_v57 }
0x66c9   :  { %v12860_v59 = vpop.permute.xlu1 %12859 }
0x66d0   :  { %v16234_v60 = vpop.eup %16233 }
0x66d1   :  { %v12533_v61 = vsel %vm484_vm2, %v16234_v60, 0.0 }
0x66d2   :  { %12534 = vadd.xlane.f32.xlu0 %v12533_v61 }
0x66e8   :  { %12538 = vrot.lane.b32.xlu0 %v18386_v4, %s16753_s28 }
0x66ec   :  { %12857 = vrot.lane.b32.xlu0 %v18445_v51, %s16745_s22 }
0x6700   :  { %v12443_v15 = vpop.f32.mrb[144].mxu0 }
0x6701   :  { %v12447_v62 = vadd.f32 %v12443_v15, %v12205_v58  ;;  %v15654_v63 = vpop.f32.mrb[145].mxu0 }
0x675f   :  { %v12535_v56 = vpop.xlane.xlu0 %12534 }
0x6760   :  { %16235 = vrcp.f32 %v12535_v56 }
0x6763   :  { %v12539_v35 = vpop.permute.xlu0 %12538 }
0x6764   :  { %15661 = vmatpush3.msra.mxu0 %v12539_v35 }
0x6765   :  { %15670 = vmatprep.subr.mxu0 %v16743_v12 }
0x6767   :  { %v12858_v2 = vpop.permute.xlu0 %12857 }
0x676a   :  { %v16236_v6 = vpop.eup %16235 }
0x676b   :  { %v12537_v9 = vmul.f32 %v16236_v6, %v16234_v60 }
0x676d   :  { %15663 = vmatmul.mubr.msk.f32.vlgmr.msra.gmra.mrb[146].mxu0 %vm484_vm2, %v12537_v9  ;;  %v14388_v9 = vld [vmem:[#allocation17 + $0x1] ss:$0 sm:$0xff] }
0x676e   :  { %15671 = vmatpush3.xpose.msk.msra.mxu0 %vm484_vm2, %v12697_v28  ;;  %15672 = vmatprep.mubr.msk.f32.mxu0 %vm16744_vm1, %v16743_v12 }
0x676f   :  { %15680 = vmatprep.subr.mxu0 %v16743_v12 }
0x6771   :  { %15673 = vmatmul.mubr.msk.f32.vlgmr.msra.gmra.mrb[148].mxu0 %vm484_vm2, %v18445_v51 }
0x6772   :  { %15681 = vmatpush3.xpose.msk.msra.mxu0 %vm484_vm2, %v12860_v59  ;;  %15682 = vmatprep.mubr.msk.f32.mxu0 %vm16744_vm1, %v16743_v12 }
0x6773   :  { %15690 = vmatprep.subr.mxu0 %v16743_v12 }
0x6775   :  { %15683 = vmatmul.mubr.msk.f32.vlgmr.msra.gmra.mrb[150].mxu0 %vm484_vm2, %v12858_v2 }
0x6776   :  { %15691 = vmatpush3.msra.mxu0 %v18395_v5  ;;  %15692 = vmatprep.mubr.msk.f32.mxu0 %vm16744_vm1, %v16743_v12 }
0x6777   :  { %15700 = vmatprep.subr.mxu0 %v16743_v12 }
0x6840   :  { %v12610_v4 = vpop.f32.mrb[146].mxu0 }
0x6841   :  { %v15664_v0 = vpop.f32.mrb[147].mxu0  ;;  %15668 = vmatmul.mubr.msk.f32.vlgmr.msra.gmra.mrb[142].mxu1 %vm484_vm2, %v12610_v4 }
0x6842   :  { %15676 = vmatpush3.msra.mxu1 %v18479_v44  ;;  %15677 = vmatprep.mubr.msk.f32.mxu1 %vm16744_vm1, %v16743_v12 }
0x6843   :  { %15685 = vmatprep.subr.mxu1 %v16743_v12 }
0x6844   :  { %v12768_v5 = vpop.f32.mrb[148].mxu0 }
0x6845   :  { %v12772_v18 = vmul.f32 0.35355338, %v12768_v5  ;;  %v15674_v19 = vpop.f32.mrb[149].mxu0 }
0x6847   :  { %v12773_v33 = vsel %vm484_vm2, %v12772_v18, -inf }
0x6848   :  { %12774 = vmax.xlane.f32.xlu1 %v12773_v33  ;;  %v12931_v24 = vpop.f32.mrb[150].mxu0 }
0x6849   :  { %v12935_v55 = vmul.f32 0.35355338, %v12931_v24  ;;  %v15684_v11 = vpop.f32.mrb[151].mxu0 }
0x684b   :  { %v12936_v26 = vsel %vm484_vm2, %v12935_v55, -inf }
0x684c   :  { %12937 = vmax.xlane.f32.xlu0 %v12936_v26 }
0x6859   :  { %12948 = vrot.lane.b32.xlu1 %v18479_v44, %s16745_s22 }
0x685d   :  { %13170 = vrot.lane.b32.xlu1 %v18445_v51, %s16751_s6 }
0x68d5   :  { %v12775_v13 = vpop.xlane.xlu1 %12774 }
0x68d6   :  { %v12776_v7 = vsub.f32 %v12772_v18, %v12775_v13 }
0x68d8   :  { %v12777_v29 = vmul.f32 1.442695, %v12776_v7 }
0x68d9   :  { %v12938_v31 = vpop.xlane.xlu0 %12937  ;;  %v12949_v23 = vpop.permute.xlu1 %12948 }
0x68da   :  { %16237 = vpow2.f32 %v12777_v29  ;;  %v12939_v1 = vsub.f32 %v12935_v55, %v12938_v31 }
0x68dc   :  { %v12940_v30 = vmul.f32 1.442695, %v12939_v1 }
0x68de   :  { %16239 = vpow2.f32 %v12940_v30 }
0x68e4   :  { %v16238_v17 = vpop.eup %16237 }
0x68e5   :  { %v12779_v34 = vsel %vm484_vm2, %v16238_v17, 0.0 }
0x68e6   :  { %12780 = vadd.xlane.f32.xlu0 %v12779_v34 }
0x68e8   :  { %v16240_v58 = vpop.eup %16239 }
0x68e9   :  { %v12942_v36 = vsel %vm484_vm2, %v16240_v58, 0.0 }
0x68ea   :  { %12943 = vadd.xlane.f32.xlu0 %v12942_v36 }
0x6900   :  { %13172 = vrot.lane.b32.xlu0 %v18445_v51, %s16750_s4 }
0x6914   :  { %v12683_v38 = vpop.f32.mrb[142].mxu1 }
0x6915   :  { %v18496_v42 = vadd.f32 %v12683_v38, %v12447_v62  ;;  %v15669_v43 = vpop.f32.mrb[143].mxu1 }
0x6917   :  { %v12694_v4 = vadd.f32 %v14388_v9, %v18496_v42 }
0x6973   :  { %v12781_v37 = vpop.xlane.xlu0 %12780 }
0x6974   :  { %16241 = vrcp.f32 %v12781_v37 }
0x6977   :  { %v12944_v40 = vpop.xlane.xlu0 %12943 }
0x6978   :  { %16243 = vrcp.f32 %v12944_v40 }
0x697b   :  { %v13173_v10 = vpop.permute.xlu0 %13172 }
0x697e   :  { %v16242_v16 = vpop.eup %16241 }
0x697f   :  { %v12783_v32 = vmul.f32 %v16242_v16, %v16238_v17 }
0x6981   :  { %15678 = vmatmul.mubr.msk.f32.vlgmr.msra.gmra.mrb[144].mxu1 %vm484_vm2, %v12783_v32 }
0x6982   :  { %v16244_v41 = vpop.eup %16243  ;;  %15686 = vmatpush3.msra.mxu1 %v12949_v23  ;;  %15687 = vmatprep.mubr.msk.f32.mxu1 %vm16744_vm1, %v16743_v12 }
0x6983   :  { %v12946_v3 = vmul.f32 %v16244_v41, %v16240_v58  ;;  %15695 = vmatprep.subr.mxu1 %v16743_v12 }
0x6985   :  { %15688 = vmatmul.mubr.msk.f32.vlgmr.msra.gmra.mrb[146].mxu1 %vm484_vm2, %v12946_v3 }
0x6986   :  { %15696 = vmatpush3.msra.mxu1 %v18400_v14  ;;  %15697 = vmatprep.mubr.msk.f32.mxu1 %vm16744_vm1, %v16743_v12  ;;  %v13171_v14 = vpop.permute.xlu1 %13170 }
0x6987   :  { %15705 = vmatprep.subr.mxu1 %v16743_v12 }
0x6a54   :  { %v12853_v27 = vpop.f32.mrb[144].mxu1 }
0x6a55   :  { %v15679_v25 = vpop.f32.mrb[145].mxu1  ;;  %15698 = vmatmul.mubr.msk.f32.vlgmr.msra.gmra.mrb[148].mxu1 %vm484_vm2, %v12853_v27 }
0x6a56   :  { %15707 = vmatprep.mubr.msk.f32.mxu1 %vm16744_vm1, %v16743_v12 }
0x6a58   :  { %v13020_v20 = vpop.f32.mrb[146].mxu1 }
0x6a59   :  { %v15689_v45 = vpop.f32.mrb[147].mxu1  ;;  %15693 = vmatmul.mubr.msk.f32.vlgmr.msra.gmra.mrb[152].mxu0 %vm484_vm2, %v13020_v20 }
0x6a5a   :  { %15701 = vmatpush3.xpose.msk.msra.mxu0 %vm484_vm2, %v13173_v10  ;;  %15702 = vmatprep.mubr.msk.f32.mxu0 %vm16744_vm1, %v16743_v12 }
0x6a5b   :  { %15710 = vmatprep.subr.mxu0 %v16743_v12 }
0x6a5d   :  { %15703 = vmatmul.mubr.msk.f32.vlgmr.msra.gmra.mrb[154].mxu0 %vm484_vm2, %v13171_v14 }
0x6a5e   :  { %15711 = vmatpush3.msra.mxu0 %v18435_v54  ;;  %15712 = vmatprep.mubr.msk.f32.mxu0 %vm16744_vm1, %v16743_v12 }
0x6a5f   :  { %15720 = vmatprep.subr.mxu0 %v16743_v12 }
0x6b28   :  { %v13166_v46 = vpop.f32.mrb[148].mxu1 }
0x6b29   :  { %v15699_v50 = vpop.f32.mrb[149].mxu1 }
0x6b2c   :  { %v13093_v47 = vpop.f32.mrb[152].mxu0 }
0x6b2d   :  { %v13167_v48 = vadd.f32 %v13166_v46, %v13093_v47  ;;  %v15694_v21 = vpop.f32.mrb[153].mxu0  ;;  %v14406_v47 = vld [vmem:[#allocation20 + $0x1] ss:$0 sm:$0xff] }
0x6b30   :  { %v13244_v49 = vpop.f32.mrb[154].mxu0 }
0x6b31   :  { %v13248_v52 = vmul.f32 0.35355338, %v13244_v49  ;;  %v15704_v8 = vpop.f32.mrb[155].mxu0  ;;  %v13700_v49 = vld [vmem:[#allocation22 + $0x20] sm:$0xff] }
0x6b33   :  { %v13249_v57 = vsel %vm484_vm2, %v13248_v52, -inf }
0x6b34   :  { %13250 = vmax.xlane.f32.xlu1 %v13249_v57  ;;  %v13702_v57 = vld [vmem:[#allocation22 + $0x30] sm:$0xff] }
0x6b45   :  { %13412 = vrot.lane.b32.xlu1 %v18445_v51, %s16752_s19 }
0x6b49   :  { %13410 = vrot.lane.b32.xlu1 %v18445_v51, %s16753_s28 }
0x6bc1   :  { %v13251_v54 = vpop.xlane.xlu1 %13250 }
0x6bc2   :  { %v13252_v60 = vsub.f32 %v13248_v52, %v13251_v54  ;;  %v13701_v52 = vld [vmem:[#allocation22 + $0x28] sm:$0xff]  ;;  %v13703_v54 = vld [vmem:[#allocation22 + $0x38] sm:$0xff] }
0x6bc3   :  { %v15907_v8 = vpack.c.bf16 %v13701_v52, %v13700_v49  ;;  %v14421_v49 = vld [vmem:[#allocation26 + $0x1] ss:$0 sm:$0xff] }
0x6bc4   :  { %v13253_v61 = vmul.f32 1.442695, %v13252_v60  ;;  %v15911_v60 = vpack.c.bf16 %v13703_v54, %v13702_v57 }
0x6bc5   :  { %v13413_v6 = vpop.permute.xlu1 %13412 }
0x6bc6   :  { %16245 = vpow2.f32 %v13253_v61  ;;  %v14410_v61 = vld [vmem:[%s18644_s16 + $0x40] sm:$0xff] }
0x6bc9   :  { %v13411_v28 = vpop.permute.xlu1 %13410 }
0x6bd0   :  { %v16246_v15 = vpop.eup %16245 }
0x6bd1   :  { %v13255_v62 = vsel %vm484_vm2, %v16246_v15, 0.0 }
0x6bd2   :  { %13256 = vadd.xlane.f32.xlu0 %v13255_v62  ;;  %v14412_v62 = vld [vmem:[%s18644_s16 + $0x50] sm:$0xff] }
0x6be8   :  { %13260 = vrot.lane.b32.xlu0 %v18479_v44, %s16751_s6 }
0x6c5f   :  { %v13257_v63 = vpop.xlane.xlu0 %13256 }
0x6c60   :  { %16247 = vrcp.f32 %v13257_v63 }
0x6c63   :  { %v13261_v56 = vpop.permute.xlu0 %13260 }
0x6c64   :  { %15706 = vmatpush3.msra.mxu1 %v13261_v56  ;;  %v14413_v56 = vld [vmem:[%s18644_s16 + $0x58] sm:$0xff] }
0x6c65   :  { %15715 = vmatprep.subr.mxu1 %v16743_v12 }
0x6c6a   :  { %v16248_v35 = vpop.eup %16247 }
0x6c6b   :  { %v13259_v51 = vmul.f32 %v16248_v35, %v16246_v15  ;;  %v14411_v15 = vld [vmem:[%s18644_s16 + $0x48] sm:$0xff]  ;;  %v15919_v35 = vpack.c.bf16 %v14413_v56, %v14412_v62 }
0x6c6c   :  { %v15915_v63 = vpack.c.bf16 %v14411_v15, %v14410_v61 }
0x6c6d   :  { %15708 = vmatmul.mubr.msk.f32.vlgmr.msra.gmra.mrb[150].mxu1 %vm484_vm2, %v13259_v51  ;;  %v14415_v51 = vld [vmem:[%s18644_s16 + $0x68] sm:$0xff] }
0x6c6e   :  { %15716 = vmatpush3.xpose.msk.msra.mxu1 %vm484_vm2, %v13413_v6  ;;  %15717 = vmatprep.mubr.msk.f32.mxu1 %vm16744_vm1, %v16743_v12  ;;  %v14414_v6 = vld [vmem:[%s18644_s16 + $0x60] sm:$0xff] }
0x6c6f   :  { %15725 = vmatprep.subr.mxu1 %v16743_v12 }
0x6c71   :  { %15718 = vmatmul.mubr.msk.f32.vlgmr.msra.gmra.mrb[152].mxu1 %vm484_vm2, %v13411_v28  ;;  %v15923_v28 = vpack.c.bf16 %v14415_v51, %v14414_v6 }
0x6c72   :  { %15726 = vmatpush3.msra.mxu1 %v18456_v53  ;;  %15727 = vmatprep.mubr.msk.f32.mxu1 %vm16744_vm1, %v16743_v12  ;;  %v13655_v53 = vadd.f32 %v12694_v4, %v18353_v39 }
0x6c73   :  { %15916 = vmatprep.subr.bf16.mxu1 %v15915_v63 }
0x6c74   :  { %v13657_v33 = vsel %vm399_vm0, %v13655_v53, 0.0 }
0x6d40   :  { %v13332_v59 = vpop.f32.mrb[150].mxu1 }
0x6d41   :  { %v15709_v2 = vpop.f32.mrb[151].mxu1  ;;  %15713 = vmatmul.mubr.msk.f32.vlgmr.msra.gmra.mrb[156].mxu0 %vm484_vm2, %v13332_v59 }
0x6d42   :  { %15722 = vmatprep.mubr.msk.f32.mxu0 %vm16744_vm1, %v16743_v12 }
0x6d44   :  { %v13484_v0 = vpop.f32.mrb[152].mxu1 }
0x6d45   :  { %v13488_v5 = vmul.f32 0.35355338, %v13484_v0  ;;  %v15719_v18 = vpop.f32.mrb[153].mxu1 }
0x6d47   :  { %v13489_v19 = vsel %vm484_vm2, %v13488_v5, -inf }
0x6d48   :  { %13490 = vmax.xlane.f32.xlu1 %v13489_v19  ;;  %v14416_v19 = vld [vmem:[%s18644_s16 + $0x70] sm:$0xff] }
0x6d4c   :  { %13658 = vadd.xlane.f32.xlu1 %v13657_v33 }
0x6dd5   :  { %v13491_v24 = vpop.xlane.xlu1 %13490 }
0x6dd6   :  { %v13492_v55 = vsub.f32 %v13488_v5, %v13491_v24  ;;  %v14407_v24 = vld [vmem:[#allocation23 + $0x1] ss:$0 sm:$0xff] }
0x6dd8   :  { %v13493_v11 = vmul.f32 1.442695, %v13492_v55 }
0x6dd9   :  { %v13659_v58 = vpop.xlane.xlu1 %13658 }
0x6dda   :  { %16249 = vpow2.f32 %v13493_v11  ;;  %v13663_v36 = vmul.f32 0.03125, %v13659_v58 }
0x6ddc   :  { %v13665_v43 = vsub.f32 %v13655_v53, %v13663_v36  ;;  %v14417_v53 = vld [vmem:[%s18644_s16 + $0x78] sm:$0xff] }
0x6ddd   :  { %v15927_v33 = vpack.c.bf16 %v14417_v53, %v14416_v19 }
0x6dde   :  { %v13667_v32 = vmul.f32 %v13665_v43, %v13665_v43 }
0x6de0   :  { %v13669_v23 = vsel %vm399_vm0, %v13667_v32, 0.0 }
0x6de4   :  { %v16250_v26 = vpop.eup %16249 }
0x6de5   :  { %v13495_v12 = vsel %vm484_vm2, %v16250_v26, 0.0 }
0x6de6   :  { %13496 = vadd.xlane.f32.xlu0 %v13495_v12 }
0x6dfc   :  { %13500 = vrot.lane.b32.xlu0 %v18479_v44, %s16753_s28 }
0x6e14   :  { %v13405_v13 = vpop.f32.mrb[156].mxu0 }
0x6e15   :  { %v13409_v7 = vadd.f32 %v13405_v13, %v13167_v48  ;;  %v15714_v29 = vpop.f32.mrb[157].mxu0 }
0x6e16   :  { %v14418_v29 = vld [vmem:[#allocation25 + $0x1] ss:$0 sm:$0xff] }
0x6e73   :  { %v13497_v31 = vpop.xlane.xlu0 %13496 }
0x6e74   :  { %16251 = vrcp.f32 %v13497_v31 }
0x6e77   :  { %v13501_v39 = vpop.permute.xlu0 %13500 }
0x6e78   :  { %15721 = vmatpush3.msra.mxu0 %v13501_v39 }
0x6e79   :  { %15908 = vmatprep.subr.bf16.mxu0 %v15907_v8 }
0x6e7e   :  { %v16252_v1 = vpop.eup %16251 }
0x6e7f   :  { %v13499_v30 = vmul.f32 %v16252_v1, %v16250_v26 }
0x6e81   :  { %15723 = vmatmul.mubr.msk.f32.vlgmr.msra.gmra.mrb[158].mxu0 %vm484_vm2, %v13499_v30 }
0x6e82   :  { %15910 = vmatpush3.bf16.msra.mxu0 %v15907_v8  ;;  %v14422_v8 = vld [vmem:[#allocation28 + $0x1] ss:$0 sm:$0xff] }
0x6e83   :  { %15912 = vmatprep.subr.bf16.mxu0 %v15911_v60 }
0x6e86   :  { %15914 = vmatpush3.bf16.msra.mxu0 %v15911_v60 }
0x6f54   :  { %v13572_v17 = vpop.f32.mrb[158].mxu0 }
0x6f55   :  { %v15724_v34 = vpop.f32.mrb[159].mxu0  ;;  %15728 = vmatmul.mubr.msk.f32.vlgmr.msra.gmra.mrb[154].mxu1 %vm484_vm2, %v13572_v17 }
0x6f56   :  { %15918 = vmatpush3.bf16.msra.mxu1 %v15915_v63  ;;  %v14423_v63 = vld [vmem:[%s16935_s5] ss:$0 sm:$0xff]  ;;  %s16756_s5 = smov [#allocation29]  }
0x6f57   :  { %15920 = vmatprep.subr.bf16.mxu1 %v15919_v35 }
0x6f5a   :  { %15922 = vmatpush3.bf16.msra.mxu1 %v15919_v35 }
0x6f5b   :  { %15924 = vmatprep.subr.bf16.mxu1 %v15923_v28 }
0x6f5e   :  { %15926 = vmatpush3.bf16.msra.mxu1 %v15923_v28 }
0x6f5f   :  { %15928 = vmatprep.subr.bf16.mxu1 %v15927_v33 }
0x6f62   :  { %15930 = vmatpush3.bf16.msra.mxu1 %v15927_v33 }
0x7028   :  { %v13645_v38 = vpop.f32.mrb[154].mxu1 }
0x7029   :  { %v13649_v42 = vadd.f32 %v13645_v38, %v13409_v7  ;;  %v15729_v44 = vpop.f32.mrb[155].mxu1 }
0x702b   :  { %v13650_v37 = vadd.f32 %v14388_v9, %v13649_v42 }
0x702d   :  { %v13656_v40 = vadd.f32 %v13650_v37, %v18372_v22  ;;  %v14405_v22 = vld [vmem:[#allocation19 + $0x1] ss:$0 sm:$0xff] }
0x702f   :  { %v13660_v16 = vsel %vm399_vm0, %v13656_v40, 0.0 }
0x7030   :  { %13661 = vadd.xlane.f32.xlu1 %v13660_v16 }
0x7034   :  { %13670 = vadd.xlane.f32.xlu1 %v13669_v23 }
0x70bd   :  { %v13662_v41 = vpop.xlane.xlu1 %13661 }
0x70be   :  { %v13664_v3 = vmul.f32 0.03125, %v13662_v41 }
0x70c0   :  { %v13666_v27 = vsub.f32 %v13656_v40, %v13664_v3  ;;  %v13941_v3 = vld [vmem:[%s16930_s21] sm:$0xff] }
0x70c1   :  { %v13671_v25 = vpop.xlane.xlu1 %13670 }
0x70c2   :  { %v13675_v20 = vmul.f32 0.03125, %v13671_v25  ;;  %v13668_v10 = vmul.f32 %v13666_v27, %v13666_v27 }
0x70c4   :  { %v13677_v45 = vadd.f32 1e-05, %v13675_v20  ;;  %v13672_v14 = vsel %vm399_vm0, %v13668_v10, 0.0  ;;  %v13943_v20 = vld [vmem:[%s16930_s21 + $0x10] sm:$0xff]  ;;  %v13944_v10 = vld [vmem:[%s16930_s21 + $0x18] sm:$0xff] }
0x70c5   :  { %13673 = vadd.xlane.f32.xlu1 %v13672_v14 }
0x70c6   :  { %16253 = vrsqrt.f32 %v13677_v45  ;;  %v15935_v45 = vpack.c.bf16 %v13944_v10, %v13943_v20 }
0x70d0   :  { %v16254_v46 = vpop.eup %16253 }
0x70d1   :  { %v13681_v50 = vmul.f32 %v16254_v46, %v13665_v43 }
0x70d3   :  { %v13689_v48 = vmul.f32 %v14405_v22, %v13681_v50 }
0x70d5   :  { %v13697_v21 = vadd.f32 %v14406_v47, %v13689_v48 }
0x70d7   :  { %15738 = vmatprep.mubr.msk.f32.mxu0 %vm399_vm0, %v13697_v21 }
0x7152   :  { %v13674_v9 = vpop.xlane.xlu1 %13673 }
0x7153   :  { %v13676_v59 = vmul.f32 0.03125, %v13674_v9 }
0x7155   :  { %v13678_v2 = vadd.f32 1e-05, %v13676_v59 }
0x7157   :  { %16255 = vrsqrt.f32 %v13678_v2 }
0x7161   :  { %v16256_v4 = vpop.eup %16255 }
0x7162   :  { %v13682_v0 = vmul.f32 %v16256_v4, %v13666_v27  ;;  %v13942_v27 = vld [vmem:[%s16930_s21 + $0x8] sm:$0xff]  ;;  %s14062_s21 = sshll.u32 %s16756_s5, 4  ;;  %s14063_s21 = int_to_ptr.vmem [resolvable:$true] %s14062_s21 }
0x7163   :  { %v15931_v25 = vpack.c.bf16 %v13942_v27, %v13941_v3  ;;  %s16645_s17 = scalar_lea.vmem %s14063_s21, 256  ;;  %p16650_p11 = scmp.lt.s32.totalorder %s14063_s21, %s14063_s21 }
0x7164   :  { %v13690_v5 = vmul.f32 %v14405_v22, %v13682_v0  ;;  %p16646_p10 = scmp.ne.s32.totalorder %s14063_s21, %s16645_s17  ;;  %p16651_p12 = scmp.lt.s32.totalorder %s16645_s17, %s16645_s17 }
0x7165   :  { %15932 = vmatprep.subr.bf16.mxu0 %v15931_v25 }
0x7166   :  { %v13698_v18 = vadd.f32 %v14406_v47, %v13690_v5  ;;  %p16652_p13 = por %p16651_p12, %p16650_p11 }
0x7168   :  { %15739 = vmatmul.mubr.msk.f32.vlgmr.msra.gmra.mrb[160].mxu0 %vm399_vm0, %v13698_v18  ;;  %p16653_p0 = pnand %p16652_p13, %p16646_p10 }
0x7169   :  { %15934 = vmatpush3.bf16.msra.mxu0 %v15931_v25 }
0x716a   :  { %15936 = vmatprep.subr.bf16.mxu0 %v15935_v45 }
0x716d   :  { %15938 = vmatpush3.bf16.msra.mxu0 %v15935_v45 }
0x723b   :  { %v15740_v55 = vpop.f32.mrb[160].mxu0 }
0x723c   :  { %v13790_v11 = vadd.f32 %v15740_v55, %v14407_v24  ;;  %v13784_v26 = vpop.f32.mrb[161].mxu0 }
0x723d   :  { %v13785_v12 = vadd.f32 %v14407_v24, %v13784_v26 }
0x723e   :  { %v13794_v7 = vmax.f32 %v13790_v11, 0.0 }
0x723f   :  { %v13793_v13 = vmax.f32 %v13785_v12, 0.0 }
0x7241   :  { %15757 = vmatprep.mubr.msk.f32.mxu1 %vm2560_vm3, %v13793_v13 }
0x7242   :  { %15758 = vmatmul.mubr.msk.f32.vlgmr.msra.gmra.mrb[156].mxu1 %vm2560_vm3, %v13794_v7 }
0x7315   :  { %v15759_v31 = vpop.f32.mrb[156].mxu1 }
0x7316   :  { %v13890_v39 = vadd.f32 %v15759_v31, %v14418_v29  ;;  %v13884_v1 = vpop.f32.mrb[157].mxu1 }
0x7317   :  { %v13885_v30 = vadd.f32 %v14418_v29, %v13884_v1 }
0x7318   :  { %v13898_v17 = vadd.f32 %v13890_v39, %v13698_v18 }
0x7319   :  { %v13897_v34 = vadd.f32 %v13885_v30, %v13697_v21 }
0x731a   :  { %v13902_v58 = vsel %vm399_vm0, %v13898_v17, 0.0 }
0x731b   :  { %13903 = vadd.xlane.f32.xlu0 %v13902_v58  ;;  %v13899_v36 = vsel %vm399_vm0, %v13897_v34, 0.0 }
0x731c   :  { %13900 = vadd.xlane.f32.xlu1 %v13899_v36 }
0x73a8   :  { %v13904_v38 = vpop.xlane.xlu0 %13903 }
0x73a9   :  { %v13906_v42 = vmul.f32 0.03125, %v13904_v38  ;;  %v13901_v44 = vpop.xlane.xlu1 %13900 }
0x73aa   :  { %v13905_v43 = vmul.f32 0.03125, %v13901_v44 }
0x73ab   :  { %v13908_v37 = vsub.f32 %v13898_v17, %v13906_v42 }
0x73ac   :  { %v13907_v40 = vsub.f32 %v13897_v34, %v13905_v43 }
0x73ad   :  { %v13910_v23 = vmul.f32 %v13908_v37, %v13908_v37 }
0x73ae   :  { %v13909_v16 = vmul.f32 %v13907_v40, %v13907_v40 }
0x73af   :  { %v13914_v41 = vsel %vm399_vm0, %v13910_v23, 0.0 }
0x73b0   :  { %v13911_v32 = vsel %vm399_vm0, %v13909_v16, 0.0 }
0x73b1   :  { %13912 = vadd.xlane.f32.xlu1 %v13911_v32 }
0x73b5   :  { %13915 = vadd.xlane.f32.xlu1 %v13914_v41 }
0x743e   :  { %v13913_v14 = vpop.xlane.xlu1 %13912 }
0x743f   :  { %v13917_v46 = vmul.f32 0.03125, %v13913_v14 }
0x7441   :  { %v13919_v22 = vadd.f32 1e-05, %v13917_v46 }
0x7442   :  { %v13916_v50 = vpop.xlane.xlu1 %13915 }
0x7443   :  { %16257 = vrsqrt.f32 %v13919_v22  ;;  %v13918_v47 = vmul.f32 0.03125, %v13916_v50 }
0x7445   :  { %v13920_v48 = vadd.f32 1e-05, %v13918_v47 }
0x7447   :  { %16259 = vrsqrt.f32 %v13920_v48 }
0x744d   :  { %v16258_v21 = vpop.eup %16257 }
0x744e   :  { %v13923_v52 = vmul.f32 %v16258_v21, %v13907_v40 }
0x7450   :  { %v13931_v57 = vmul.f32 %v14421_v49, %v13923_v52 }
0x7451   :  { %v16260_v54 = vpop.eup %16259 }
0x7452   :  { %v13924_v60 = vmul.f32 %v16260_v54, %v13908_v37  ;;  %v13939_v61 = vadd.f32 %v14422_v8, %v13931_v57 }
0x7454   :  { %v13932_v15 = vmul.f32 %v14421_v49, %v13924_v60  ;;  %15768 = vmatprep.mubr.msk.f32.mxu0 %vm399_vm0, %v13939_v61 }
0x7456   :  { %v13940_v62 = vadd.f32 %v14422_v8, %v13932_v15 }
0x7458   :  { %15769 = vmatmul.mubr.msk.f32.vlgmr.msra.gmra.mrb[162].mxu0 %vm399_vm0, %v13940_v62 }
0x752b   :  { %v15770_v56 = vpop.f32.mrb[162].mxu0 }
0x752c   :  { %v14024_v35 = vpop.f32.mrb[163].mxu0  ;;  %v14030_v51 = vadd.f32 %v15770_v56, %v14423_v63 }
0x752d   :  { %v14025_v6 = vadd.f32 %v14423_v63, %v14024_v35 }
0x752e   :  { %v14036_v9 = vsel %vm399_vm0, %v14030_v51, -inf }
0x752f   :  { %v14033_v28 = vsel %vm399_vm0, %v14025_v6, -inf }
0x7530   :  { %14034 = vmax.xlane.f32.xlu1 %v14033_v28 }
0x7534   :  { %14037 = vmax.xlane.f32.xlu1 %v14036_v9 }
0x75bd   :  { %v14035_v59 = vpop.xlane.xlu1 %14034 }
0x75be   :  { %v14039_v2 = vsub.f32 %v14025_v6, %v14035_v59 }
0x75c0   :  { %v14041_v4 = vmul.f32 1.442695, %v14039_v2 }
0x75c1   :  { %v14038_v0 = vpop.xlane.xlu1 %14037 }
0x75c2   :  { %16261 = vpow2.f32 %v14041_v4  ;;  %v14040_v5 = vsub.f32 %v14030_v51, %v14038_v0 }
0x75c4   :  { %v14043_v18 = vmul.f32 1.442695, %v14040_v5 }
0x75c6   :  { %16263 = vpow2.f32 %v14043_v18 }
0x75cc   :  { %v16262_v19 = vpop.eup %16261 }
0x75cd   :  { %v14045_v53 = vsel %vm399_vm0, %v16262_v19, 0.0 }
0x75ce   :  { %14046 = vadd.xlane.f32.xlu1 %v14045_v53 }
0x75d0   :  { %v16264_v33 = vpop.eup %16263 }
0x75d1   :  { %v14048_v24 = vsel %vm399_vm0, %v16264_v33, 0.0 }
0x75d2   :  { %14049 = vadd.xlane.f32.xlu1 %v14048_v24 }
0x765b   :  { %v14047_v55 = vpop.xlane.xlu1 %14046 }
0x765c   :  { %16265 = vrcp.f32 %v14047_v55 }
0x765f   :  { %v14050_v11 = vpop.xlane.xlu1 %14049 }
0x7660   :  { %16267 = vrcp.f32 %v14050_v11 }
0x7666   :  { %v16266_v26 = vpop.eup %16265 }
0x7667   :  { %v14052_v12 = vmul.f32 %v16266_v26, %v16262_v19 }
0x7669   :  { %14055 = vst.msk [vmem:[#allocation29] sm:$0xff] %vm399_vm0, %v14052_v12 }
0x766a   :  { %v16268_v13 = vpop.eup %16267 }
0x766b   :  { %v14054_v7 = vmul.f32 %v16268_v13, %v16264_v33 }
0x766d   :  { %14056 = vst.msk [vmem:[#allocation29 + $0x8] sm:$0xff] %vm399_vm0, %v14054_v7 }
0x766e   :  { %16656 = shalt.err (!%p16653_p0)
}
0x766f   :  { %s16657_s2 = scalar_lea.hbm %s16940_s29, 256 }
0x7670   :  { %p16658_p1 = scmp.ne.s32.totalorder %s16940_s29, %s16657_s2  ;;  %p16661_p2 = scmp.lt.u32.totalorder %s16657_s2, %s16940_s29 }
0x7672   :  { %p16663_p3 = pnand %p16661_p2, %p16658_p1 }
0x7674   :  { %16666 = shalt.err (!%p16663_p3)
}
0x7675   :  { %14068 = dma.vmem_to_hbm [thread:$0]  %s14063_s21, 256, %s16940_s29, [#allocation4], %s16736_s18, %s16736_s18, %s16737_s20  }
0x7676   :  { %16685 = dma.done.wait [#allocation4], 256  }
0x7677   :  { %16686 = vsyncadd [#allocation4], 4294967040 }
0x7678   :  { %14072 = vsyncpa [#allocation3], 1 }
0x7679   :  { %14073 = vsyncpa [#allocation6], 1 }
0x767a   :  { %14074 = vsyncpa [#allocation9], 1 }
0x767b   :  { %14075 = vsyncpa [#allocation12], 1 }
0x767c   :  { %14076 = vsyncpa [#allocation15], 1 }
0x767d   :  { %14077 = vsyncpa [#allocation18], 1 }
0x767e   :  { %14078 = vsyncpa [#allocation21], 1 }
0x767f   :  { %14079 = vsyncpa [#allocation24], 1 }
0x7680   :  { %14080 = vsyncpa [#allocation27], 1 }
0x7681   :  { %14081 = vsyncpa [#allocation4], 1 }

</bundles_post_ra>
